<compile_context>
chip_gen: v5e
topology: v5e:2x2
jax: 0.10.0
libtpu: 0.0.40
codegen_flags: <defaults>
</compile_context>

<pallas_src>
import jax
import jax.numpy as jnp
from jax.experimental import pallas as pl
from jax.experimental.pallas import tpu as pltpu

NEG_SLOPE = 0.01      # torch.nn.LeakyReLU default
EPS = 1e-12
HIDDEN = 256


def _round_up(n, m):
    return ((n + m - 1) // m) * m


def _leaky_relu(h):
    # max(x, 0.01*x) == LeakyReLU(x) for slope < 1; 2 VPU ops vs 3 for where().
    return jnp.maximum(h, NEG_SLOPE * h)


def simple_mlp_kernel(xt_ref, st_ref,
                      w1_ref, w2_ref, b2_ref, w3_ref, b3_ref,
                      w4_ref, b4_ref, w5_ref, b5_ref, wh_ref, bh_ref,
                      out_ref, feat_ref):
    """One batch tile. All tensors are feature-major: (features, TB)."""
    TB = xt_ref.shape[1]
    xt = xt_ref[...]                                     # (4, TB): qx,qy,qz,qw rows
    qx, qy, qz, qw = xt[0:1, :], xt[1:2, :], xt[2:3, :], xt[3:4, :]

    # lietorch.SO3(x).matrix()[:, :3, :3]: unit quaternion -> rotation matrix,
    # written row-major into the (16, TB) feature scratch.
    feat_ref[0:1, :] = 1.0 - 2.0 * (qy * qy + qz * qz)        # r00
    feat_ref[1:2, :] = 2.0 * (qx * qy - qz * qw)              # r01
    feat_ref[2:3, :] = 2.0 * (qx * qz + qy * qw)              # r02
    feat_ref[3:4, :] = 2.0 * (qx * qy + qz * qw)              # r10
    feat_ref[4:5, :] = 1.0 - 2.0 * (qx * qx + qz * qz)        # r11
    feat_ref[5:6, :] = 2.0 * (qy * qz - qx * qw)              # r12
    feat_ref[6:7, :] = 2.0 * (qx * qz - qy * qw)              # r20
    feat_ref[7:8, :] = 2.0 * (qy * qz + qx * qw)              # r21
    feat_ref[8:9, :] = 1.0 - 2.0 * (qx * qx + qy * qy)        # r22
    feat_ref[9:10, :] = st_ref[...]                           # s
    # Row 10 = 1.0 (b1 rides along as w1 column 10); rows 11..15 must be finite
    # (garbage * 0 weight would still give NaN in the MXU accumulate).  Written
    # every step: a write-once pl.when(program_id==0) guard is unsafe when the
    # batch grid axis is megacore-parallel (TC1 never sees program_id 0).
    feat_ref[10:11, :] = jnp.ones((1, TB), jnp.float32)
    feat_ref[11:16, :] = jnp.zeros((5, TB), jnp.float32)

    # MLP hot path: 5 x (Linear -> LeakyReLU), bf16 MXU / f32 acc, bf16 epilogue.
    h = jnp.dot(w1_ref[...], feat_ref[...].astype(jnp.bfloat16),
                preferred_element_type=jnp.float32)           # b1 already fused
    h = _leaky_relu(h.astype(jnp.bfloat16))
    for w_ref, b_ref in ((w2_ref, b2_ref), (w3_ref, b3_ref),
                         (w4_ref, b4_ref), (w5_ref, b5_ref)):
        h = jnp.dot(w_ref[...], h, preferred_element_type=jnp.float32)
        h = _leaky_relu(h.astype(jnp.bfloat16) + b_ref[...])

    # Fused head (f32): rows 0..5 = layer_mu(h), row 6 = layer_scale(layer_mu(h))
    # pre-softplus, row 7 = pad.
    head = jnp.dot(wh_ref[...], h.astype(jnp.float32),
                   preferred_element_type=jnp.float32) + bh_ref[...]

    ax, ay, az = head[0:1, :], head[1:2, :], head[2:3, :]
    bx, by, bz = head[3:4, :], head[4:5, :], head[5:6, :]
    sc_pre = head[6:7, :]

    # Gram-Schmidt (6D rotation rep -> orthonormal frame), rsqrt + eps guard.
    inv_na = jax.lax.rsqrt(ax * ax + ay * ay + az * az + EPS)
    r1x, r1y, r1z = ax * inv_na, ay * inv_na, az * inv_na
    cx = r1y * bz - r1z * by
    cy = r1z * bx - r1x * bz
    cz = r1x * by - r1y * bx
    inv_nc = jax.lax.rsqrt(cx * cx + cy * cy + cz * cz + EPS)
    r3x, r3y, r3z = cx * inv_nc, cy * inv_nc, cz * inv_nc
    r2x = r3y * r1z - r3z * r1y
    r2y = r3z * r1x - r3x * r1z
    r2z = r3x * r1y - r3y * r1x

    # rotation_matrix = stack([R1, R2, R3], dim=-1): columns are R1, R2, R3.
    m00, m01, m02 = r1x, r2x, r3x
    m10, m11, m12 = r1y, r2y, r3y
    m20, m21, m22 = r1z, r2z, r3z

    # Rotation matrix -> quaternion (x, y, z, w): branchless Shepperd 4-case,
    # divisions replaced by one rsqrt per branch.
    # TODO(synk): lietorch may return the opposite-sign quaternion (double cover).
    tr = m00 + m11 + m22
    t0 = jnp.maximum(tr + 1.0, EPS)
    t1 = jnp.maximum(1.0 + m00 - m11 - m22, EPS)
    t2 = jnp.maximum(1.0 + m11 - m00 - m22, EPS)
    t3 = jnp.maximum(1.0 + m22 - m00 - m11, EPS)
    i0 = 0.5 * jax.lax.rsqrt(t0)
    i1 = 0.5 * jax.lax.rsqrt(t1)
    i2 = 0.5 * jax.lax.rsqrt(t2)
    i3 = 0.5 * jax.lax.rsqrt(t3)
    # (w, x, y, z) per branch
    q0 = (t0 * i0, (m21 - m12) * i0, (m02 - m20) * i0, (m10 - m01) * i0)
    q1 = ((m21 - m12) * i1, t1 * i1, (m01 + m10) * i1, (m02 + m20) * i1)
    q2 = ((m02 - m20) * i2, (m01 + m10) * i2, t2 * i2, (m12 + m21) * i2)
    q3 = ((m10 - m01) * i3, (m02 + m20) * i3, (m12 + m21) * i3, t3 * i3)

    c_tr = tr > 0.0
    c_m00 = (m00 > m11) & (m00 > m22)
    c_m11 = m11 > m22

    def sel(k):
        return jnp.where(c_tr, q0[k],
                         jnp.where(c_m00, q1[k],
                                   jnp.where(c_m11, q2[k], q3[k])))

    qw_o, qx_o, qy_o, qz_o = sel(0), sel(1), sel(2), sel(3)

    # scale = softplus(layer_scale(mu)) + 1e-4   (torch softplus, threshold=20)
    scale = jnp.where(sc_pre > 20.0, sc_pre, jnp.log1p(jnp.exp(sc_pre)))
    scale = scale + 1.0e-4

    out_ref[0:1, :] = qx_o
    out_ref[1:2, :] = qy_o
    out_ref[2:3, :] = qz_o
    out_ref[3:4, :] = qw_o
    out_ref[4:5, :] = scale


def prepare_params(params):
    """Convert (in, out)-layout Linear params (i.e. torch `weight.T`) into the
    kernel operand layout: transposed bf16 hidden weights with b1 fused into
    column 10 of the padded first layer, bf16 column biases for the hidden
    layers, and a fused layer_mu + layer_scale head (f32, 8 rows)."""
    (W1, b1, W2, b2, W3, b3, W4, b4, W5, b5, Wmu, bmu, Wsc, bsc) = params

    def col(b, dt=jnp.float32):
        return jnp.asarray(b, jnp.float32).reshape(-1, 1).astype(dt)

    # First layer: (256, 16) = [W1^T | b1 | 0...0]; feat row 10 is a ones row.
    w1_t = jnp.concatenate(
        [jnp.asarray(W1, jnp.float32).T, col(b1),
         jnp.zeros((HIDDEN, 5), jnp.float32)],
        axis=1).astype(jnp.bfloat16)                              # (256, 16)
    hidden_w = [jnp.asarray(W, jnp.float32).T.astype(jnp.bfloat16)  # (256, 256)
                for W in (W2, W3, W4, W5)]
    hidden_b = [col(b, jnp.bfloat16) for b in (b2, b3, b4, b5)]     # (256, 1) bf16

    # Fused head: scale = layer_scale(layer_mu(h)) is linear in h (the torch
    # model applies layer_scale to the raw, un-normalized mu).
    wmu_t = jnp.asarray(Wmu, jnp.float32).T                       # (6, 256)
    wsc = jnp.asarray(Wsc, jnp.float32)                           # (6, 1)
    bmu_c = col(bmu)                                              # (6, 1)
    wsc_row = wsc.T @ wmu_t                                       # (1, 256)
    bsc_row = wsc.T @ bmu_c + jnp.asarray(bsc, jnp.float32).reshape(1, 1)
    w_head = jnp.concatenate(
        [wmu_t, wsc_row, jnp.zeros((1, HIDDEN), jnp.float32)], axis=0)  # (8, 256)
    b_head = jnp.concatenate(
        [bmu_c, bsc_row, jnp.zeros((1, 1), jnp.float32)], axis=0)       # (8, 1)

    return (w1_t,
            hidden_w[0], hidden_b[0], hidden_w[1], hidden_b[1],
            hidden_w[2], hidden_b[2], hidden_w[3], hidden_b[3],
            w_head, b_head)


def simple_mlp_forward(x, s, params, *, block_rows=8192, vmem_limit_mb=56):
    """Returns (quat (B,4) in lietorch (x,y,z,w) order, scale (B,1))."""
    assert block_rows % 128 == 0, "batch tile must be lane-aligned"
    kparams = prepare_params(params)

    B = x.shape[0]
    # block_rows=8192 keeps peak VMEM well inside v7x's 64 MiB per-TC budget;
    # raise to 16384 (and vmem_limit_mb ~96) on v5e/v6e for fewer grid steps.
    if B >= block_rows:
        TB = block_rows
    else:
        TB = max(256, _round_up(B, 128))     # keep lane-dense for small batches
    Bp = _round_up(B, TB)
    grid = (Bp // TB,)

    # Batch-along-lanes layout: (features, batch), batch zero-padded to Bp.
    # TODO(synk): the pad/transpose here and the final .T are extra XLA HBM
    # passes; a feature-major caller could feed/consume the slabs directly.
    x_t = jnp.pad(jnp.asarray(x, jnp.float32), ((0, Bp - B), (0, 0))).T   # (4, Bp)
    s_t = jnp.pad(jnp.asarray(s, jnp.float32), ((0, Bp - B), (0, 0))).T   # (1, Bp)

    def batch_spec(rows):
        return pl.BlockSpec((rows, TB), lambda i: (0, i))

    def resident_spec(p):                      # weights: same block every step
        return pl.BlockSpec(p.shape, lambda i: (0, 0))

    out_t = pl.pallas_call(
        simple_mlp_kernel,
        out_shape=jax.ShapeDtypeStruct((5, Bp), jnp.float32),
        grid=grid,
        in_specs=[batch_spec(4), batch_spec(1)]
                 + [resident_spec(p) for p in kparams],
        out_specs=pl.BlockSpec((5, TB), lambda i: (0, i)),
        scratch_shapes=[pltpu.VMEM((16, TB), jnp.float32)],
        compiler_params=pltpu.CompilerParams(
            dimension_semantics=("parallel",),      # 2 TCs on v7x; no-op elsewhere
            vmem_limit_bytes=vmem_limit_mb * 1024 * 1024),
    )(x_t, s_t, *kparams)

    out = out_t.T[:B]                  # (B, 5): quat in cols 0..3, scale in col 4
    return out[:, 0:4], out[:, 4:5]


def init_params(key, input_size=10):
    """Deterministic synthetic init mimicking nn.Linear's U(-1/sqrt(fan_in), ...).
    Weights are stored (in, out) == torch weight.T (see prepare_params)."""
    sizes = [(input_size, 256), (256, 256), (256, 256), (256, 256), (256, 256),
             (256, 6), (6, 1)]
    params = []
    for fi, fo in sizes:
        key, kw, kb = jax.random.split(key, 3)
        bound = 1.0 / (fi ** 0.5)
        W = jax.random.uniform(kw, (fi, fo), jnp.float32, -bound, bound)
        b = jax.random.uniform(kb, (1, fo), jnp.float32, -bound, bound)
        params += [W, b]
    return tuple(params)


if __name__ == "__main__":
    key = jax.random.PRNGKey(0)
    kq, ks, kp = jax.random.split(key, 3)

    B = 8
    # x: unit quaternions (x, y, z, w) per row (lietorch SO3 data layout)
    q_in = jax.random.normal(kq, (B, 4), jnp.float32)
    q_in = q_in / jnp.sqrt(jnp.sum(q_in * q_in, axis=-1, keepdims=True))
    s_in = jax.random.normal(ks, (B, 1), jnp.float32)

    params = init_params(kp, input_size=10)

    quat, scale = simple_mlp_forward(q_in, s_in, params)
    jax.block_until_ready((quat, scale))

    assert quat.shape == (B, 4) and scale.shape == (B, 1)
    # output quaternions should be (near-)unit norm after the in-kernel
    # Gram-Schmidt + rotmat->quat round trip
    qn = jnp.sqrt(jnp.sum(quat * quat, axis=-1))
    assert bool(jnp.all(jnp.isfinite(quat)))
    assert bool(jnp.all(jnp.abs(qn - 1.0) < 1e-2))
    assert bool(jnp.all(jnp.isfinite(scale))) and bool(jnp.all(scale > 0.0))
    print("KERNEL_OK")
</pallas_src>

<mosaic_0001>
module attributes {stable_mosaic.version = 11 : i64} {
  func.func @simple_mlp_kernel(%arg0: i32, %arg1: memref<4x256xf32, #tpu.memory_space<vmem>>, %arg2: memref<1x256xf32, #tpu.memory_space<vmem>>, %arg3: memref<256x16xbf16, #tpu.memory_space<vmem>>, %arg4: memref<256x256xbf16, #tpu.memory_space<vmem>>, %arg5: memref<256x1xbf16, #tpu.memory_space<vmem>>, %arg6: memref<256x256xbf16, #tpu.memory_space<vmem>>, %arg7: memref<256x1xbf16, #tpu.memory_space<vmem>>, %arg8: memref<256x256xbf16, #tpu.memory_space<vmem>>, %arg9: memref<256x1xbf16, #tpu.memory_space<vmem>>, %arg10: memref<256x256xbf16, #tpu.memory_space<vmem>>, %arg11: memref<256x1xbf16, #tpu.memory_space<vmem>>, %arg12: memref<8x256xf32, #tpu.memory_space<vmem>>, %arg13: memref<8x1xf32, #tpu.memory_space<vmem>>, %arg14: memref<5x256xf32, #tpu.memory_space<vmem>>, %arg15: memref<16x256xf32, #tpu.memory_space<vmem>>) attributes {dimension_semantics = [#tpu.dimension_semantics<parallel>], iteration_bounds = array<i64: 1>, scalar_prefetch = 0 : i64, scratch_operands = 1 : i64, tpu.core_type = #tpu.core_type<tc>, window_params = [{transform_indices = @transform_0, window_bounds = array<i64: 4, 256>}, {transform_indices = @transform_1, window_bounds = array<i64: 1, 256>}, {pipeline_mode = #tpu.pipeline_mode<synchronous>, transform_indices = @transform_2, window_bounds = array<i64: 256, 16>}, {pipeline_mode = #tpu.pipeline_mode<synchronous>, transform_indices = @transform_3, window_bounds = array<i64: 256, 256>}, {pipeline_mode = #tpu.pipeline_mode<synchronous>, transform_indices = @transform_4, window_bounds = array<i64: 256, 1>}, {pipeline_mode = #tpu.pipeline_mode<synchronous>, transform_indices = @transform_5, window_bounds = array<i64: 256, 256>}, {pipeline_mode = #tpu.pipeline_mode<synchronous>, transform_indices = @transform_6, window_bounds = array<i64: 256, 1>}, {pipeline_mode = #tpu.pipeline_mode<synchronous>, transform_indices = @transform_7, window_bounds = array<i64: 256, 256>}, {pipeline_mode = #tpu.pipeline_mode<synchronous>, transform_indices = @transform_8, window_bounds = array<i64: 256, 1>}, {pipeline_mode = #tpu.pipeline_mode<synchronous>, transform_indices = @transform_9, window_bounds = array<i64: 256, 256>}, {pipeline_mode = #tpu.pipeline_mode<synchronous>, transform_indices = @transform_10, window_bounds = array<i64: 256, 1>}, {pipeline_mode = #tpu.pipeline_mode<synchronous>, transform_indices = @transform_11, window_bounds = array<i64: 8, 256>}, {pipeline_mode = #tpu.pipeline_mode<synchronous>, transform_indices = @transform_12, window_bounds = array<i64: 8, 1>}, {transform_indices = @transform_13, window_bounds = array<i64: 5, 256>}]} {
    %c0 = arith.constant 0 : index
    %c0_0 = arith.constant 0 : index
    %0 = vector.load %arg1[%c0, %c0_0] : memref<4x256xf32, #tpu.memory_space<vmem>>, vector<4x256xf32>
    %1 = vector.extract_strided_slice %0 {offsets = [0, 0], sizes = [1, 256], strides = [1, 1]} : vector<4x256xf32> to vector<1x256xf32>
    %2 = vector.extract_strided_slice %0 {offsets = [1, 0], sizes = [1, 256], strides = [1, 1]} : vector<4x256xf32> to vector<1x256xf32>
    %3 = vector.extract_strided_slice %0 {offsets = [2, 0], sizes = [1, 256], strides = [1, 1]} : vector<4x256xf32> to vector<1x256xf32>
    %4 = vector.extract_strided_slice %0 {offsets = [3, 0], sizes = [1, 256], strides = [1, 1]} : vector<4x256xf32> to vector<1x256xf32>
    %5 = arith.mulf %2, %2 : vector<1x256xf32>
    %6 = arith.mulf %3, %3 : vector<1x256xf32>
    %7 = arith.addf %5, %6 : vector<1x256xf32>
    %cst = arith.constant 2.000000e+00 : f32
    %8 = vector.broadcast %cst : f32 to vector<1x256xf32>
    %9 = arith.mulf %8, %7 : vector<1x256xf32>
    %cst_1 = arith.constant 1.000000e+00 : f32
    %10 = vector.broadcast %cst_1 : f32 to vector<1x256xf32>
    %11 = arith.subf %10, %9 : vector<1x256xf32>
    %c0_2 = arith.constant 0 : index
    %c0_3 = arith.constant 0 : index
    %12 = vector.load %arg15[%c0_2, %c0_3] : memref<16x256xf32, #tpu.memory_space<vmem>>, vector<1x256xf32>
    tpu.vector_store %arg15[%c0_2, %c0_3], %11 {strides = array<i32>} : memref<16x256xf32, #tpu.memory_space<vmem>>, vector<1x256xf32>,
    %13 = arith.mulf %1, %2 : vector<1x256xf32>
    %14 = arith.mulf %3, %4 : vector<1x256xf32>
    %15 = arith.subf %13, %14 : vector<1x256xf32>
    %cst_4 = arith.constant 2.000000e+00 : f32
    %16 = vector.broadcast %cst_4 : f32 to vector<1x256xf32>
    %17 = arith.mulf %16, %15 : vector<1x256xf32>
    %c1 = arith.constant 1 : index
    %c0_5 = arith.constant 0 : index
    %18 = vector.load %arg15[%c1, %c0_5] : memref<16x256xf32, #tpu.memory_space<vmem>>, vector<1x256xf32>
    tpu.vector_store %arg15[%c1, %c0_5], %17 {strides = array<i32>} : memref<16x256xf32, #tpu.memory_space<vmem>>, vector<1x256xf32>,
    %19 = arith.mulf %1, %3 : vector<1x256xf32>
    %20 = arith.mulf %2, %4 : vector<1x256xf32>
    %21 = arith.addf %19, %20 : vector<1x256xf32>
    %cst_6 = arith.constant 2.000000e+00 : f32
    %22 = vector.broadcast %cst_6 : f32 to vector<1x256xf32>
    %23 = arith.mulf %22, %21 : vector<1x256xf32>
    %c2 = arith.constant 2 : index
    %c0_7 = arith.constant 0 : index
    %24 = vector.load %arg15[%c2, %c0_7] : memref<16x256xf32, #tpu.memory_space<vmem>>, vector<1x256xf32>
    tpu.vector_store %arg15[%c2, %c0_7], %23 {strides = array<i32>} : memref<16x256xf32, #tpu.memory_space<vmem>>, vector<1x256xf32>,
    %25 = arith.mulf %1, %2 : vector<1x256xf32>
    %26 = arith.mulf %3, %4 : vector<1x256xf32>
    %27 = arith.addf %25, %26 : vector<1x256xf32>
    %cst_8 = arith.constant 2.000000e+00 : f32
    %28 = vector.broadcast %cst_8 : f32 to vector<1x256xf32>
    %29 = arith.mulf %28, %27 : vector<1x256xf32>
    %c3 = arith.constant 3 : index
    %c0_9 = arith.constant 0 : index
    %30 = vector.load %arg15[%c3, %c0_9] : memref<16x256xf32, #tpu.memory_space<vmem>>, vector<1x256xf32>
    tpu.vector_store %arg15[%c3, %c0_9], %29 {strides = array<i32>} : memref<16x256xf32, #tpu.memory_space<vmem>>, vector<1x256xf32>,
    %31 = arith.mulf %1, %1 : vector<1x256xf32>
    %32 = arith.mulf %3, %3 : vector<1x256xf32>
    %33 = arith.addf %31, %32 : vector<1x256xf32>
    %cst_10 = arith.constant 2.000000e+00 : f32
    %34 = vector.broadcast %cst_10 : f32 to vector<1x256xf32>
    %35 = arith.mulf %34, %33 : vector<1x256xf32>
    %cst_11 = arith.constant 1.000000e+00 : f32
    %36 = vector.broadcast %cst_11 : f32 to vector<1x256xf32>
    %37 = arith.subf %36, %35 : vector<1x256xf32>
    %c4 = arith.constant 4 : index
    %c0_12 = arith.constant 0 : index
    %38 = vector.load %arg15[%c4, %c0_12] : memref<16x256xf32, #tpu.memory_space<vmem>>, vector<1x256xf32>
    tpu.vector_store %arg15[%c4, %c0_12], %37 {strides = array<i32>} : memref<16x256xf32, #tpu.memory_space<vmem>>, vector<1x256xf32>,
    %39 = arith.mulf %2, %3 : vector<1x256xf32>
    %40 = arith.mulf %1, %4 : vector<1x256xf32>
    %41 = arith.subf %39, %40 : vector<1x256xf32>
    %cst_13 = arith.constant 2.000000e+00 : f32
    %42 = vector.broadcast %cst_13 : f32 to vector<1x256xf32>
    %43 = arith.mulf %42, %41 : vector<1x256xf32>
    %c5 = arith.constant 5 : index
    %c0_14 = arith.constant 0 : index
    %44 = vector.load %arg15[%c5, %c0_14] : memref<16x256xf32, #tpu.memory_space<vmem>>, vector<1x256xf32>
    tpu.vector_store %arg15[%c5, %c0_14], %43 {strides = array<i32>} : memref<16x256xf32, #tpu.memory_space<vmem>>, vector<1x256xf32>,
    %45 = arith.mulf %1, %3 : vector<1x256xf32>
    %46 = arith.mulf %2, %4 : vector<1x256xf32>
    %47 = arith.subf %45, %46 : vector<1x256xf32>
    %cst_15 = arith.constant 2.000000e+00 : f32
    %48 = vector.broadcast %cst_15 : f32 to vector<1x256xf32>
    %49 = arith.mulf %48, %47 : vector<1x256xf32>
    %c6 = arith.constant 6 : index
    %c0_16 = arith.constant 0 : index
    %50 = vector.load %arg15[%c6, %c0_16] : memref<16x256xf32, #tpu.memory_space<vmem>>, vector<1x256xf32>
    tpu.vector_store %arg15[%c6, %c0_16], %49 {strides = array<i32>} : memref<16x256xf32, #tpu.memory_space<vmem>>, vector<1x256xf32>,
    %51 = arith.mulf %2, %3 : vector<1x256xf32>
    %52 = arith.mulf %1, %4 : vector<1x256xf32>
    %53 = arith.addf %51, %52 : vector<1x256xf32>
    %cst_17 = arith.constant 2.000000e+00 : f32
    %54 = vector.broadcast %cst_17 : f32 to vector<1x256xf32>
    %55 = arith.mulf %54, %53 : vector<1x256xf32>
    %c7 = arith.constant 7 : index
    %c0_18 = arith.constant 0 : index
    %56 = vector.load %arg15[%c7, %c0_18] : memref<16x256xf32, #tpu.memory_space<vmem>>, vector<1x256xf32>
    tpu.vector_store %arg15[%c7, %c0_18], %55 {strides = array<i32>} : memref<16x256xf32, #tpu.memory_space<vmem>>, vector<1x256xf32>,
    %57 = arith.mulf %1, %1 : vector<1x256xf32>
    %58 = arith.mulf %2, %2 : vector<1x256xf32>
    %59 = arith.addf %57, %58 : vector<1x256xf32>
    %cst_19 = arith.constant 2.000000e+00 : f32
    %60 = vector.broadcast %cst_19 : f32 to vector<1x256xf32>
    %61 = arith.mulf %60, %59 : vector<1x256xf32>
    %cst_20 = arith.constant 1.000000e+00 : f32
    %62 = vector.broadcast %cst_20 : f32 to vector<1x256xf32>
    %63 = arith.subf %62, %61 : vector<1x256xf32>
    %c8 = arith.constant 8 : index
    %c0_21 = arith.constant 0 : index
    %64 = vector.load %arg15[%c8, %c0_21] : memref<16x256xf32, #tpu.memory_space<vmem>>, vector<1x256xf32>
    tpu.vector_store %arg15[%c8, %c0_21], %63 {strides = array<i32>} : memref<16x256xf32, #tpu.memory_space<vmem>>, vector<1x256xf32>,
    %c0_22 = arith.constant 0 : index
    %c0_23 = arith.constant 0 : index
    %65 = vector.load %arg2[%c0_22, %c0_23] : memref<1x256xf32, #tpu.memory_space<vmem>>, vector<1x256xf32>
    %c9 = arith.constant 9 : index
    %c0_24 = arith.constant 0 : index
    %66 = vector.load %arg15[%c9, %c0_24] : memref<16x256xf32, #tpu.memory_space<vmem>>, vector<1x256xf32>
    tpu.vector_store %arg15[%c9, %c0_24], %65 {strides = array<i32>} : memref<16x256xf32, #tpu.memory_space<vmem>>, vector<1x256xf32>,
    %cst_25 = arith.constant 1.000000e+00 : f32
    %67 = vector.broadcast %cst_25 : f32 to vector<1x256xf32>
    %c10 = arith.constant 10 : index
    %c0_26 = arith.constant 0 : index
    %68 = vector.load %arg15[%c10, %c0_26] : memref<16x256xf32, #tpu.memory_space<vmem>>, vector<1x256xf32>
    tpu.vector_store %arg15[%c10, %c0_26], %67 {strides = array<i32>} : memref<16x256xf32, #tpu.memory_space<vmem>>, vector<1x256xf32>,
    %cst_27 = arith.constant 0.000000e+00 : f32
    %69 = vector.broadcast %cst_27 : f32 to vector<5x256xf32>
    %c11 = arith.constant 11 : index
    %c0_28 = arith.constant 0 : index
    %70 = vector.load %arg15[%c11, %c0_28] : memref<16x256xf32, #tpu.memory_space<vmem>>, vector<5x256xf32>
    tpu.vector_store %arg15[%c11, %c0_28], %69 {strides = array<i32>} : memref<16x256xf32, #tpu.memory_space<vmem>>, vector<5x256xf32>,
    %c0_29 = arith.constant 0 : index
    %c0_30 = arith.constant 0 : index
    %71 = vector.load %arg3[%c0_29, %c0_30] : memref<256x16xbf16, #tpu.memory_space<vmem>>, vector<256x16xbf16>
    %c0_31 = arith.constant 0 : index
    %c0_32 = arith.constant 0 : index
    %72 = vector.load %arg15[%c0_31, %c0_32] : memref<16x256xf32, #tpu.memory_space<vmem>>, vector<16x256xf32>
    %73 = arith.truncf %72 : vector<16x256xf32> to vector<16x256xbf16>
    %cst_33 = arith.constant dense<0.000000e+00> : vector<256x256xf32>
    %74 = tpu.matmul %71, %73, %cst_33 {dimension_numbers = #tpu.dot_dimension_numbers<[1], [0], [0], [1], [0, 0, 1, 1], [], []>} : vector<256x16xbf16>, vector<16x256xbf16>, vector<256x256xf32> -> vector<256x256xf32>
    %75 = arith.truncf %74 : vector<256x256xf32> to vector<256x256xbf16>
    %cst_34 = arith.constant 1.000980e-02 : bf16
    %76 = vector.broadcast %cst_34 : bf16 to vector<256x256xbf16>
    %77 = arith.mulf %76, %75 : vector<256x256xbf16>
    %78 = arith.maximumf %75, %77 : vector<256x256xbf16>
    %c0_35 = arith.constant 0 : index
    %c0_36 = arith.constant 0 : index
    %79 = vector.load %arg4[%c0_35, %c0_36] : memref<256x256xbf16, #tpu.memory_space<vmem>>, vector<256x256xbf16>
    %cst_37 = arith.constant dense<0.000000e+00> : vector<256x256xf32>
    %80 = tpu.matmul %79, %78, %cst_37 {dimension_numbers = #tpu.dot_dimension_numbers<[1], [0], [0], [1], [0, 0, 1, 1], [], []>} : vector<256x256xbf16>, vector<256x256xbf16>, vector<256x256xf32> -> vector<256x256xf32>
    %81 = arith.truncf %80 : vector<256x256xf32> to vector<256x256xbf16>
    %c0_38 = arith.constant 0 : index
    %c0_39 = arith.constant 0 : index
    %82 = vector.load %arg5[%c0_38, %c0_39] : memref<256x1xbf16, #tpu.memory_space<vmem>>, vector<256x1xbf16>
    %83 = vector.broadcast %82 : vector<256x1xbf16> to vector<256x256xbf16>
    %84 = arith.addf %81, %83 : vector<256x256xbf16>
    %cst_40 = arith.constant 1.000980e-02 : bf16
    %85 = vector.broadcast %cst_40 : bf16 to vector<256x256xbf16>
    %86 = arith.mulf %85, %84 : vector<256x256xbf16>
    %87 = arith.maximumf %84, %86 : vector<256x256xbf16>
    %c0_41 = arith.constant 0 : index
    %c0_42 = arith.constant 0 : index
    %88 = vector.load %arg6[%c0_41, %c0_42] : memref<256x256xbf16, #tpu.memory_space<vmem>>, vector<256x256xbf16>
    %cst_43 = arith.constant dense<0.000000e+00> : vector<256x256xf32>
    %89 = tpu.matmul %88, %87, %cst_43 {dimension_numbers = #tpu.dot_dimension_numbers<[1], [0], [0], [1], [0, 0, 1, 1], [], []>} : vector<256x256xbf16>, vector<256x256xbf16>, vector<256x256xf32> -> vector<256x256xf32>
    %90 = arith.truncf %89 : vector<256x256xf32> to vector<256x256xbf16>
    %c0_44 = arith.constant 0 : index
    %c0_45 = arith.constant 0 : index
    %91 = vector.load %arg7[%c0_44, %c0_45] : memref<256x1xbf16, #tpu.memory_space<vmem>>, vector<256x1xbf16>
    %92 = vector.broadcast %91 : vector<256x1xbf16> to vector<256x256xbf16>
    %93 = arith.addf %90, %92 : vector<256x256xbf16>
    %cst_46 = arith.constant 1.000980e-02 : bf16
    %94 = vector.broadcast %cst_46 : bf16 to vector<256x256xbf16>
    %95 = arith.mulf %94, %93 : vector<256x256xbf16>
    %96 = arith.maximumf %93, %95 : vector<256x256xbf16>
    %c0_47 = arith.constant 0 : index
    %c0_48 = arith.constant 0 : index
    %97 = vector.load %arg8[%c0_47, %c0_48] : memref<256x256xbf16, #tpu.memory_space<vmem>>, vector<256x256xbf16>
    %cst_49 = arith.constant dense<0.000000e+00> : vector<256x256xf32>
    %98 = tpu.matmul %97, %96, %cst_49 {dimension_numbers = #tpu.dot_dimension_numbers<[1], [0], [0], [1], [0, 0, 1, 1], [], []>} : vector<256x256xbf16>, vector<256x256xbf16>, vector<256x256xf32> -> vector<256x256xf32>
    %99 = arith.truncf %98 : vector<256x256xf32> to vector<256x256xbf16>
    %c0_50 = arith.constant 0 : index
    %c0_51 = arith.constant 0 : index
    %100 = vector.load %arg9[%c0_50, %c0_51] : memref<256x1xbf16, #tpu.memory_space<vmem>>, vector<256x1xbf16>
    %101 = vector.broadcast %100 : vector<256x1xbf16> to vector<256x256xbf16>
    %102 = arith.addf %99, %101 : vector<256x256xbf16>
    %cst_52 = arith.constant 1.000980e-02 : bf16
    %103 = vector.broadcast %cst_52 : bf16 to vector<256x256xbf16>
    %104 = arith.mulf %103, %102 : vector<256x256xbf16>
    %105 = arith.maximumf %102, %104 : vector<256x256xbf16>
    %c0_53 = arith.constant 0 : index
    %c0_54 = arith.constant 0 : index
    %106 = vector.load %arg10[%c0_53, %c0_54] : memref<256x256xbf16, #tpu.memory_space<vmem>>, vector<256x256xbf16>
    %cst_55 = arith.constant dense<0.000000e+00> : vector<256x256xf32>
    %107 = tpu.matmul %106, %105, %cst_55 {dimension_numbers = #tpu.dot_dimension_numbers<[1], [0], [0], [1], [0, 0, 1, 1], [], []>} : vector<256x256xbf16>, vector<256x256xbf16>, vector<256x256xf32> -> vector<256x256xf32>
    %108 = arith.truncf %107 : vector<256x256xf32> to vector<256x256xbf16>
    %c0_56 = arith.constant 0 : index
    %c0_57 = arith.constant 0 : index
    %109 = vector.load %arg11[%c0_56, %c0_57] : memref<256x1xbf16, #tpu.memory_space<vmem>>, vector<256x1xbf16>
    %110 = vector.broadcast %109 : vector<256x1xbf16> to vector<256x256xbf16>
    %111 = arith.addf %108, %110 : vector<256x256xbf16>
    %cst_58 = arith.constant 1.000980e-02 : bf16
    %112 = vector.broadcast %cst_58 : bf16 to vector<256x256xbf16>
    %113 = arith.mulf %112, %111 : vector<256x256xbf16>
    %114 = arith.maximumf %111, %113 : vector<256x256xbf16>
    %c0_59 = arith.constant 0 : index
    %c0_60 = arith.constant 0 : index
    %115 = vector.load %arg12[%c0_59, %c0_60] : memref<8x256xf32, #tpu.memory_space<vmem>>, vector<8x256xf32>
    %116 = arith.extf %114 : vector<256x256xbf16> to vector<256x256xf32>
    %cst_61 = arith.constant dense<0.000000e+00> : vector<8x256xf32>
    %117 = tpu.matmul %115, %116, %cst_61 {dimension_numbers = #tpu.dot_dimension_numbers<[1], [0], [0], [1], [0, 0, 1, 1], [], []>} : vector<8x256xf32>, vector<256x256xf32>, vector<8x256xf32> -> vector<8x256xf32>
    %c0_62 = arith.constant 0 : index
    %c0_63 = arith.constant 0 : index
    %118 = vector.load %arg13[%c0_62, %c0_63] : memref<8x1xf32, #tpu.memory_space<vmem>>, vector<8x1xf32>
    %119 = vector.broadcast %118 : vector<8x1xf32> to vector<8x256xf32>
    %120 = arith.addf %117, %119 : vector<8x256xf32>
    %121 = vector.extract_strided_slice %120 {offsets = [0, 0], sizes = [1, 256], strides = [1, 1]} : vector<8x256xf32> to vector<1x256xf32>
    %122 = vector.extract_strided_slice %120 {offsets = [1, 0], sizes = [1, 256], strides = [1, 1]} : vector<8x256xf32> to vector<1x256xf32>
    %123 = vector.extract_strided_slice %120 {offsets = [2, 0], sizes = [1, 256], strides = [1, 1]} : vector<8x256xf32> to vector<1x256xf32>
    %124 = vector.extract_strided_slice %120 {offsets = [3, 0], sizes = [1, 256], strides = [1, 1]} : vector<8x256xf32> to vector<1x256xf32>
    %125 = vector.extract_strided_slice %120 {offsets = [4, 0], sizes = [1, 256], strides = [1, 1]} : vector<8x256xf32> to vector<1x256xf32>
    %126 = vector.extract_strided_slice %120 {offsets = [5, 0], sizes = [1, 256], strides = [1, 1]} : vector<8x256xf32> to vector<1x256xf32>
    %127 = vector.extract_strided_slice %120 {offsets = [6, 0], sizes = [1, 256], strides = [1, 1]} : vector<8x256xf32> to vector<1x256xf32>
    %128 = arith.mulf %121, %121 : vector<1x256xf32>
    %129 = arith.mulf %122, %122 : vector<1x256xf32>
    %130 = arith.addf %128, %129 : vector<1x256xf32>
    %131 = arith.mulf %123, %123 : vector<1x256xf32>
    %132 = arith.addf %130, %131 : vector<1x256xf32>
    %cst_64 = arith.constant 9.99999996E-13 : f32
    %133 = vector.broadcast %cst_64 : f32 to vector<1x256xf32>
    %134 = arith.addf %132, %133 : vector<1x256xf32>
    %135 = math.rsqrt %134 : vector<1x256xf32>
    %136 = arith.mulf %121, %135 : vector<1x256xf32>
    %137 = arith.mulf %122, %135 : vector<1x256xf32>
    %138 = arith.mulf %123, %135 : vector<1x256xf32>
    %139 = arith.mulf %137, %126 : vector<1x256xf32>
    %140 = arith.mulf %138, %125 : vector<1x256xf32>
    %141 = arith.subf %139, %140 : vector<1x256xf32>
    %142 = arith.mulf %138, %124 : vector<1x256xf32>
    %143 = arith.mulf %136, %126 : vector<1x256xf32>
    %144 = arith.subf %142, %143 : vector<1x256xf32>
    %145 = arith.mulf %136, %125 : vector<1x256xf32>
    %146 = arith.mulf %137, %124 : vector<1x256xf32>
    %147 = arith.subf %145, %146 : vector<1x256xf32>
    %148 = arith.mulf %141, %141 : vector<1x256xf32>
    %149 = arith.mulf %144, %144 : vector<1x256xf32>
    %150 = arith.addf %148, %149 : vector<1x256xf32>
    %151 = arith.mulf %147, %147 : vector<1x256xf32>
    %152 = arith.addf %150, %151 : vector<1x256xf32>
    %cst_65 = arith.constant 9.99999996E-13 : f32
    %153 = vector.broadcast %cst_65 : f32 to vector<1x256xf32>
    %154 = arith.addf %152, %153 : vector<1x256xf32>
    %155 = math.rsqrt %154 : vector<1x256xf32>
    %156 = arith.mulf %141, %155 : vector<1x256xf32>
    %157 = arith.mulf %144, %155 : vector<1x256xf32>
    %158 = arith.mulf %147, %155 : vector<1x256xf32>
    %159 = arith.mulf %157, %138 : vector<1x256xf32>
    %160 = arith.mulf %158, %137 : vector<1x256xf32>
    %161 = arith.subf %159, %160 : vector<1x256xf32>
    %162 = arith.mulf %158, %136 : vector<1x256xf32>
    %163 = arith.mulf %156, %138 : vector<1x256xf32>
    %164 = arith.subf %162, %163 : vector<1x256xf32>
    %165 = arith.mulf %156, %137 : vector<1x256xf32>
    %166 = arith.mulf %157, %136 : vector<1x256xf32>
    %167 = arith.subf %165, %166 : vector<1x256xf32>
    %168 = arith.addf %136, %164 : vector<1x256xf32>
    %169 = arith.addf %168, %158 : vector<1x256xf32>
    %cst_66 = arith.constant 1.000000e+00 : f32
    %170 = vector.broadcast %cst_66 : f32 to vector<1x256xf32>
    %171 = arith.addf %169, %170 : vector<1x256xf32>
    %cst_67 = arith.constant 9.99999996E-13 : f32
    %172 = vector.broadcast %cst_67 : f32 to vector<1x256xf32>
    %173 = arith.maximumf %171, %172 : vector<1x256xf32>
    %cst_68 = arith.constant 1.000000e+00 : f32
    %174 = vector.broadcast %cst_68 : f32 to vector<1x256xf32>
    %175 = arith.addf %174, %136 : vector<1x256xf32>
    %176 = arith.subf %175, %164 : vector<1x256xf32>
    %177 = arith.subf %176, %158 : vector<1x256xf32>
    %cst_69 = arith.constant 9.99999996E-13 : f32
    %178 = vector.broadcast %cst_69 : f32 to vector<1x256xf32>
    %179 = arith.maximumf %177, %178 : vector<1x256xf32>
    %cst_70 = arith.constant 1.000000e+00 : f32
    %180 = vector.broadcast %cst_70 : f32 to vector<1x256xf32>
    %181 = arith.addf %180, %164 : vector<1x256xf32>
    %182 = arith.subf %181, %136 : vector<1x256xf32>
    %183 = arith.subf %182, %158 : vector<1x256xf32>
    %cst_71 = arith.constant 9.99999996E-13 : f32
    %184 = vector.broadcast %cst_71 : f32 to vector<1x256xf32>
    %185 = arith.maximumf %183, %184 : vector<1x256xf32>
    %cst_72 = arith.constant 1.000000e+00 : f32
    %186 = vector.broadcast %cst_72 : f32 to vector<1x256xf32>
    %187 = arith.addf %186, %158 : vector<1x256xf32>
    %188 = arith.subf %187, %136 : vector<1x256xf32>
    %189 = arith.subf %188, %164 : vector<1x256xf32>
    %cst_73 = arith.constant 9.99999996E-13 : f32
    %190 = vector.broadcast %cst_73 : f32 to vector<1x256xf32>
    %191 = arith.maximumf %189, %190 : vector<1x256xf32>
    %192 = math.rsqrt %173 : vector<1x256xf32>
    %cst_74 = arith.constant 5.000000e-01 : f32
    %193 = vector.broadcast %cst_74 : f32 to vector<1x256xf32>
    %194 = arith.mulf %193, %192 : vector<1x256xf32>
    %195 = math.rsqrt %179 : vector<1x256xf32>
    %cst_75 = arith.constant 5.000000e-01 : f32
    %196 = vector.broadcast %cst_75 : f32 to vector<1x256xf32>
    %197 = arith.mulf %196, %195 : vector<1x256xf32>
    %198 = math.rsqrt %185 : vector<1x256xf32>
    %cst_76 = arith.constant 5.000000e-01 : f32
    %199 = vector.broadcast %cst_76 : f32 to vector<1x256xf32>
    %200 = arith.mulf %199, %198 : vector<1x256xf32>
    %201 = math.rsqrt %191 : vector<1x256xf32>
    %cst_77 = arith.constant 5.000000e-01 : f32
    %202 = vector.broadcast %cst_77 : f32 to vector<1x256xf32>
    %203 = arith.mulf %202, %201 : vector<1x256xf32>
    %204 = arith.mulf %173, %194 : vector<1x256xf32>
    %205 = arith.subf %167, %157 : vector<1x256xf32>
    %206 = arith.mulf %205, %194 : vector<1x256xf32>
    %207 = arith.subf %156, %138 : vector<1x256xf32>
    %208 = arith.mulf %207, %194 : vector<1x256xf32>
    %209 = arith.subf %137, %161 : vector<1x256xf32>
    %210 = arith.mulf %209, %194 : vector<1x256xf32>
    %211 = arith.subf %167, %157 : vector<1x256xf32>
    %212 = arith.mulf %211, %197 : vector<1x256xf32>
    %213 = arith.mulf %179, %197 : vector<1x256xf32>
    %214 = arith.addf %161, %137 : vector<1x256xf32>
    %215 = arith.mulf %214, %197 : vector<1x256xf32>
    %216 = arith.addf %156, %138 : vector<1x256xf32>
    %217 = arith.mulf %216, %197 : vector<1x256xf32>
    %218 = arith.subf %156, %138 : vector<1x256xf32>
    %219 = arith.mulf %218, %200 : vector<1x256xf32>
    %220 = arith.addf %161, %137 : vector<1x256xf32>
    %221 = arith.mulf %220, %200 : vector<1x256xf32>
    %222 = arith.mulf %185, %200 : vector<1x256xf32>
    %223 = arith.addf %157, %167 : vector<1x256xf32>
    %224 = arith.mulf %223, %200 : vector<1x256xf32>
    %225 = arith.subf %137, %161 : vector<1x256xf32>
    %226 = arith.mulf %225, %203 : vector<1x256xf32>
    %227 = arith.addf %156, %138 : vector<1x256xf32>
    %228 = arith.mulf %227, %203 : vector<1x256xf32>
    %229 = arith.addf %157, %167 : vector<1x256xf32>
    %230 = arith.mulf %229, %203 : vector<1x256xf32>
    %231 = arith.mulf %191, %203 : vector<1x256xf32>
    %cst_78 = arith.constant 0.000000e+00 : f32
    %232 = vector.broadcast %cst_78 : f32 to vector<1x256xf32>
    %233 = arith.cmpf ogt, %169, %232 : vector<1x256xf32>
    %234 = arith.cmpf ogt, %136, %164 : vector<1x256xf32>
    %235 = arith.cmpf ogt, %136, %158 : vector<1x256xf32>
    %236 = arith.andi %234, %235 : vector<1x256xi1>
    %237 = arith.cmpf ogt, %164, %158 : vector<1x256xf32>
    %238 = arith.select %237, %219, %226 : vector<1x256xi1>, vector<1x256xf32>
    %239 = arith.select %236, %212, %238 : vector<1x256xi1>, vector<1x256xf32>
    %240 = arith.select %233, %204, %239 : vector<1x256xi1>, vector<1x256xf32>
    %241 = arith.select %237, %221, %228 : vector<1x256xi1>, vector<1x256xf32>
    %242 = arith.select %236, %213, %241 : vector<1x256xi1>, vector<1x256xf32>
    %243 = arith.select %233, %206, %242 : vector<1x256xi1>, vector<1x256xf32>
    %244 = arith.select %237, %222, %230 : vector<1x256xi1>, vector<1x256xf32>
    %245 = arith.select %236, %215, %244 : vector<1x256xi1>, vector<1x256xf32>
    %246 = arith.select %233, %208, %245 : vector<1x256xi1>, vector<1x256xf32>
    %247 = arith.select %237, %224, %231 : vector<1x256xi1>, vector<1x256xf32>
    %248 = arith.select %236, %217, %247 : vector<1x256xi1>, vector<1x256xf32>
    %249 = arith.select %233, %210, %248 : vector<1x256xi1>, vector<1x256xf32>
    %cst_79 = arith.constant 2.000000e+01 : f32
    %250 = vector.broadcast %cst_79 : f32 to vector<1x256xf32>
    %251 = arith.cmpf ogt, %127, %250 : vector<1x256xf32>
    %252 = math.exp %127 : vector<1x256xf32>
    %253 = math.log1p %252 : vector<1x256xf32>
    %254 = arith.select %251, %127, %253 : vector<1x256xi1>, vector<1x256xf32>
    %cst_80 = arith.constant 9.99999974E-5 : f32
    %255 = vector.broadcast %cst_80 : f32 to vector<1x256xf32>
    %256 = arith.addf %254, %255 : vector<1x256xf32>
    %c0_81 = arith.constant 0 : index
    %c0_82 = arith.constant 0 : index
    %257 = vector.load %arg14[%c0_81, %c0_82] : memref<5x256xf32, #tpu.memory_space<vmem>>, vector<1x256xf32>
    tpu.vector_store %arg14[%c0_81, %c0_82], %243 {strides = array<i32>} : memref<5x256xf32, #tpu.memory_space<vmem>>, vector<1x256xf32>,
    %c1_83 = arith.constant 1 : index
    %c0_84 = arith.constant 0 : index
    %258 = vector.load %arg14[%c1_83, %c0_84] : memref<5x256xf32, #tpu.memory_space<vmem>>, vector<1x256xf32>
    tpu.vector_store %arg14[%c1_83, %c0_84], %246 {strides = array<i32>} : memref<5x256xf32, #tpu.memory_space<vmem>>, vector<1x256xf32>,
    %c2_85 = arith.constant 2 : index
    %c0_86 = arith.constant 0 : index
    %259 = vector.load %arg14[%c2_85, %c0_86] : memref<5x256xf32, #tpu.memory_space<vmem>>, vector<1x256xf32>
    tpu.vector_store %arg14[%c2_85, %c0_86], %249 {strides = array<i32>} : memref<5x256xf32, #tpu.memory_space<vmem>>, vector<1x256xf32>,
    %c3_87 = arith.constant 3 : index
    %c0_88 = arith.constant 0 : index
    %260 = vector.load %arg14[%c3_87, %c0_88] : memref<5x256xf32, #tpu.memory_space<vmem>>, vector<1x256xf32>
    tpu.vector_store %arg14[%c3_87, %c0_88], %240 {strides = array<i32>} : memref<5x256xf32, #tpu.memory_space<vmem>>, vector<1x256xf32>,
    %c4_89 = arith.constant 4 : index
    %c0_90 = arith.constant 0 : index
    %261 = vector.load %arg14[%c4_89, %c0_90] : memref<5x256xf32, #tpu.memory_space<vmem>>, vector<1x256xf32>
    tpu.vector_store %arg14[%c4_89, %c0_90], %256 {strides = array<i32>} : memref<5x256xf32, #tpu.memory_space<vmem>>, vector<1x256xf32>,
    return
  }
  func.func @transform_0(%arg0: i32) -> (i32, i32) {
    %c0_i32 = arith.constant 0 : i32
    %c0_i32_0 = arith.constant 0 : i32
    return %c0_i32, %arg0 : i32, i32
  }
  func.func @transform_1(%arg0: i32) -> (i32, i32) {
    %c0_i32 = arith.constant 0 : i32
    %c0_i32_0 = arith.constant 0 : i32
    return %c0_i32, %arg0 : i32, i32
  }
  func.func @transform_2(%arg0: i32) -> (i32, i32) {
    %c0_i32 = arith.constant 0 : i32
    %c0_i32_0 = arith.constant 0 : i32
    %c0_i32_1 = arith.constant 0 : i32
    return %c0_i32, %c0_i32_0 : i32, i32
  }
  func.func @transform_3(%arg0: i32) -> (i32, i32) {
    %c0_i32 = arith.constant 0 : i32
    %c0_i32_0 = arith.constant 0 : i32
    %c0_i32_1 = arith.constant 0 : i32
    return %c0_i32, %c0_i32_0 : i32, i32
  }
  func.func @transform_4(%arg0: i32) -> (i32, i32) {
    %c0_i32 = arith.constant 0 : i32
    %c0_i32_0 = arith.constant 0 : i32
    %c0_i32_1 = arith.constant 0 : i32
    return %c0_i32, %c0_i32_0 : i32, i32
  }
  func.func @transform_5(%arg0: i32) -> (i32, i32) {
    %c0_i32 = arith.constant 0 : i32
    %c0_i32_0 = arith.constant 0 : i32
    %c0_i32_1 = arith.constant 0 : i32
    return %c0_i32, %c0_i32_0 : i32, i32
  }
  func.func @transform_6(%arg0: i32) -> (i32, i32) {
    %c0_i32 = arith.constant 0 : i32
    %c0_i32_0 = arith.constant 0 : i32
    %c0_i32_1 = arith.constant 0 : i32
    return %c0_i32, %c0_i32_0 : i32, i32
  }
  func.func @transform_7(%arg0: i32) -> (i32, i32) {
    %c0_i32 = arith.constant 0 : i32
    %c0_i32_0 = arith.constant 0 : i32
    %c0_i32_1 = arith.constant 0 : i32
    return %c0_i32, %c0_i32_0 : i32, i32
  }
  func.func @transform_8(%arg0: i32) -> (i32, i32) {
    %c0_i32 = arith.constant 0 : i32
    %c0_i32_0 = arith.constant 0 : i32
    %c0_i32_1 = arith.constant 0 : i32
    return %c0_i32, %c0_i32_0 : i32, i32
  }
  func.func @transform_9(%arg0: i32) -> (i32, i32) {
    %c0_i32 = arith.constant 0 : i32
    %c0_i32_0 = arith.constant 0 : i32
    %c0_i32_1 = arith.constant 0 : i32
    return %c0_i32, %c0_i32_0 : i32, i32
  }
  func.func @transform_10(%arg0: i32) -> (i32, i32) {
    %c0_i32 = arith.constant 0 : i32
    %c0_i32_0 = arith.constant 0 : i32
    %c0_i32_1 = arith.constant 0 : i32
    return %c0_i32, %c0_i32_0 : i32, i32
  }
  func.func @transform_11(%arg0: i32) -> (i32, i32) {
    %c0_i32 = arith.constant 0 : i32
    %c0_i32_0 = arith.constant 0 : i32
    %c0_i32_1 = arith.constant 0 : i32
    return %c0_i32, %c0_i32_0 : i32, i32
  }
  func.func @transform_12(%arg0: i32) -> (i32, i32) {
    %c0_i32 = arith.constant 0 : i32
    %c0_i32_0 = arith.constant 0 : i32
    %c0_i32_1 = arith.constant 0 : i32
    return %c0_i32, %c0_i32_0 : i32, i32
  }
  func.func @transform_13(%arg0: i32) -> (i32, i32) {
    %c0_i32 = arith.constant 0 : i32
    %c0_i32_0 = arith.constant 0 : i32
    return %c0_i32, %arg0 : i32, i32
  }
}

</mosaic_0001>

<bundles_post_ra>
// kernel: tpu_custom_call.1
= control target key start
LH: loop header
LB: loop body
LE: loop exit
PB: predicated region body
PF: predicated region fallthrough
CT: control target
= control target key end

     0   :  { %18 = vsyncpa [#allocation4], 0  ;;  %s11436_s0 = inlined_call_operand.vmem [shape: f32[4,256], index: 0, kind: input, shape index: {}]   ;;  %s11437_s1 = inlined_call_operand.vmem [shape: f32[1,256], index: 1, kind: input, shape index: {}]   ;;  %s11438_s2 = inlined_call_operand.vmem [shape: bf16[256,16], index: 2, kind: input, shape index: {}]   ;;  %s11439_s3 = inlined_call_operand.vmem [shape: bf16[256,256], index: 3, kind: input, shape index: {}]   ;;  %s11440_s4 = inlined_call_operand.vmem [shape: bf16[256,1], index: 4, kind: input, shape index: {}]   ;;  %s11441_s5 = inlined_call_operand.vmem [shape: bf16[256,256], index: 5, kind: input, shape index: {}]   ;;  %s11442_s6 = inlined_call_operand.vmem [shape: bf16[256,1], index: 6, kind: input, shape index: {}]   ;;  %s11443_s7 = inlined_call_operand.hbm [shape: bf16[256,256], index: 7, kind: input, shape index: {}]   ;;  %s11444_s8 = inlined_call_operand.vmem [shape: bf16[256,1], index: 8, kind: input, shape index: {}]   ;;  %s11445_s9 = inlined_call_operand.hbm [shape: bf16[256,256], index: 9, kind: input, shape index: {}]   ;;  %s11446_s10 = inlined_call_operand.vmem [shape: bf16[256,1], index: 10, kind: input, shape index: {}]   ;;  %s11447_s11 = inlined_call_operand.vmem [shape: f32[8,256], index: 11, kind: input, shape index: {}]   ;;  %s11448_s12 = inlined_call_operand.vmem [shape: f32[8,1], index: 12, kind: input, shape index: {}]   ;;  %s11449_s13 = inlined_call_operand.hbm [shape: f32[5,256], index: 13, kind: output, shape index: {}]  }
   0x1   :  { %19 = vsyncpa [#allocation7], 0 }
   0x2   :  { %20 = vsyncpa [#allocation5], 0  ;;  %s39_s27 = sshll.u32 %s11443_s7, 4  ;;  %s8222_s28 = smov [#allocation3]   ;;  %s40_s27 = int_to_ptr.hbm [resolvable:$true] %s39_s27 }
   0x3   :  { %s41_s29 = sshll.u32 %s8222_s28, 4  ;;  %s54_s15 = sshll.u32 %s11445_s9, 4  ;;  %s42_s29 = int_to_ptr.vmem [resolvable:$true] %s41_s29  ;;  %s55_s15 = int_to_ptr.hbm [resolvable:$true] %s54_s15 }
   0x4   :  { %s8223_s16 = smov 128   ;;  %s8224_s17 = smov 8  }
   0x5   :  { %47 = dma.hbm_to_vmem [thread:$0]  %s40_s27, 4096, %s42_s29, [#allocation4], %s8223_s16, %s8223_s16, %s8224_s17  }
   0x6   :  { %s8225_s18 = smov [#allocation6]  }
   0x7   :  { %s56_s19 = sshll.u32 %s8225_s18, 4  ;;  %s57_s19 = int_to_ptr.vmem [resolvable:$true] %s56_s19 }
   0x8   :  { %62 = dma.hbm_to_vmem [thread:$0]  %s55_s15, 4096, %s57_s19, [#allocation7], %s8223_s16, %s8223_s16, %s8224_s17  }
   0x9   :  { %8216 = dma.done.wait [#allocation4], 4096  }
   0xa   :  { %8217 = vsyncadd [#allocation4], 4294963200 }
   0xb   :  { %8218 = dma.done.wait [#allocation7], 4096  }
   0xc   :  { %8219 = vsyncadd [#allocation7], 4294963200  ;;  %v92_v0 = vlaneseq  ;;  %v78_v1 = vld [vmem:[%s11436_s0] sm:$0xff]  ;;  %v11461_v6 = vmov 0  ;;  %v8226_v17 = vmov 1.0   ;;  %v8227_v22 = vmov 0.0  }
   0xd   :  { %v79_v2 = vmul.f32 %v78_v1, %v78_v1  ;;  %v7342_v3 = vrot.slane %v78_v1, 9  ;;  %v7343_v4 = vrot.slane %v78_v1, 10  ;;  %v7345_v5 = vrot.slane %v78_v1, 11  ;;  %v198_v12 = vld [vmem:[%s11437_s1] sm:$0x3]  ;;  %v7964_v60 = vld [vmem:[%s11438_s2 + $0x50] sm:$0xff] }
   0xe   :  { %vm8310_vm0 = vcmp.lt.s32.totalorder %v92_v0, 256  ;;  %205 = vst [vmem:[#allocation2 + $0x10] sm:$0xf8] %v8227_v22  ;;  %vm111_vm1 = vcmask 1040384   ;;  %v7954_v59 = vld [vmem:[%s11438_s2] sm:$0xff]  ;;  %vm325_vm2 = vcmask 130048  }
   0xf   :  { %v11462_v6 = vsel %vm8310_vm0, 4294967295, %v11461_v6  ;;  %v7341_v7 = vrot.slane %v79_v2, 9  ;;  %v102_v8 = vmul.f32 %v7342_v3, %v78_v1  ;;  %v120_v9 = vmul.f32 %v7343_v4, %v78_v1  ;;  %200 = vst.msk [vmem:[#allocation2 + $0x11] ss:$8 sm:$0x3] %vm8310_vm0, %v198_v12  ;;  %v7955_v61 = vld [vmem:[%s11438_s2 + $0x8] sm:$0xff] }
  0x10   :  { %11463 = vst [vmem:[#allocation12_spill] sm:$0xff] %v11462_v6  ;;  %v7344_v10 = vrot.slane %v79_v2, 10  ;;  %v159_v11 = vmul.f32 %v7345_v5, %v78_v1  ;;  %v7965_v62 = vld [vmem:[%s11438_s2 + $0x58] sm:$0xff]  ;;  %v7956_v63 = vld [vmem:[%s11438_s2 + $0x10] sm:$0xff]  ;;  %v7966_v0 = vld [vmem:[%s11438_s2 + $0x60] sm:$0xff]  ;;  %s7330_s14 = sshll.u32 %s11449_s13, 4  ;;  %s7331_s14 = int_to_ptr.hbm [resolvable:$true] %s7330_s14 }
  0x11   :  { %v84_v13 = vadd.f32 %v7341_v7, %v79_v2  ;;  %v104_v14 = vrot.slane %v102_v8, 6  ;;  %v122_v15 = vrot.slane %v120_v9, 5  ;;  %203 = vst.msk [vmem:[#allocation2 + $0x12] ss:$8 sm:$0x3] %vm8310_vm0, %v8226_v17  ;;  %v7957_v1 = vld [vmem:[%s11438_s2 + $0x18] sm:$0xff] }
  0x12   :  { %v146_v16 = vadd.f32 %v7344_v10, %v79_v2  ;;  %v161_v23 = vrot.slane %v159_v11, 7  ;;  %206 = vst [vmem:[#allocation2 + $0x18] sm:$0xf8] %v8227_v22  ;;  %v7967_v2 = vld [vmem:[%s11438_s2 + $0x68] sm:$0xff]  ;;  %v7958_v3 = vld [vmem:[%s11438_s2 + $0x20] sm:$0xff]  ;;  %v7968_v4 = vld [vmem:[%s11438_s2 + $0x70] sm:$0xff] }
  0x13   :  { %v85_v18 = vmul.f32 2.0, %v84_v13  ;;  %v105_v19 = vrot.slane %v104_v14, 4  ;;  %v123_v20 = vrot.slane %v122_v15, 4  ;;  %v7959_v5 = vld [vmem:[%s11438_s2 + $0x28] sm:$0xff]  ;;  %v7969_v7 = vld [vmem:[%s11438_s2 + $0x78] sm:$0xff]  ;;  %v7962_v10 = vld [vmem:[%s11438_s2 + $0x40] sm:$0xff] }
  0x14   :  { %v147_v21 = vmul.f32 2.0, %v146_v16  ;;  %v163_v35 = vsub.f32 %v102_v8, %v161_v23  ;;  %v182_v49 = vadd.f32 %v161_v23, %v102_v8 }
  0x15   :  { %v86_v24 = vsub.f32 1.0, %v85_v18  ;;  %v107_v25 = vsub.f32 %v102_v8, %v105_v19  ;;  %v125_v26 = vadd.f32 %v123_v20, %v120_v9  ;;  %v134_v27 = vadd.f32 %v105_v19, %v102_v8  ;;  %v7960_v8 = vld [vmem:[%s11438_s2 + $0x30] sm:$0xff] }
  0x16   :  { %v148_v28 = vsub.f32 1.0, %v147_v21  ;;  %v173_v29 = vsub.f32 %v120_v9, %v123_v20  ;;  %v164_v46 = vmul.f32 2.0, %v163_v35  ;;  %v183_v50 = vmul.f32 2.0, %v182_v49  ;;  %v7961_v9 = vld [vmem:[%s11438_s2 + $0x38] sm:$0xff]  ;;  %v7963_v21 = vld [vmem:[%s11438_s2 + $0x48] sm:$0xff] }
  0x17   :  { %88 = vst [vmem:[#allocation1] sm:$0xff] %v86_v24  ;;  %v108_v30 = vmul.f32 2.0, %v107_v25  ;;  %v126_v31 = vmul.f32 2.0, %v125_v26  ;;  %v135_v32 = vmul.f32 2.0, %v134_v27  ;;  %v192_v33 = vrot.slane %v86_v24, 3 }
  0x18   :  { %v150_v34 = vrot.slane %v148_v28, 3  ;;  %v174_v36 = vmul.f32 2.0, %v173_v29  ;;  %v1514_v25 = vld [vmem:[%s11440_s4 + $0x78] sm:$0xf] }
  0x19   :  { %v110_v37 = vrot.slane %v108_v30, 3  ;;  %v128_v38 = vrot.slane %v126_v31, 3  ;;  %v137_v39 = vrot.slane %v135_v32, 3  ;;  %v193_v40 = vsel %vm111_vm1, %v86_v24, %v192_v33  ;;  %v1498_v26 = vld [vmem:[%s11440_s4 + $0x38] sm:$0xf] }
  0x1a   :  { %v151_v41 = vsel %vm111_vm1, %v148_v28, %v150_v34  ;;  %v176_v42 = vrot.slane %v174_v36, 3  ;;  %196 = vst.msk [vmem:[#allocation2 + $0x10] ss:$8 sm:$0x3] %vm8310_vm0, %v193_v40  ;;  %v8228_v24 = vmov 0  }
  0x1b   :  { %v112_v43 = vsel %vm111_vm1, %v108_v30, %v110_v37  ;;  %v129_v44 = vsel %vm111_vm1, %v126_v31, %v128_v38  ;;  %v138_v45 = vsel %vm111_vm1, %v135_v32, %v137_v39  ;;  %154 = vst.msk [vmem:[#allocation2 + $0x4] ss:$8 sm:$0x3] %vm8310_vm0, %v151_v41  ;;  %8110 = vset.pattern.permute.xlu1 %v8228_v24  ;;  %v1515_v33 = vld [vmem:[%s11440_s4 + $0x7c] sm:$0xf] }
  0x1c   :  { %115 = vst.msk [vmem:[#allocation2 + $0x1] ss:$8 sm:$0x3] %vm8310_vm0, %v112_v43  ;;  %v177_v48 = vsel %vm111_vm1, %v174_v36, %v176_v42  ;;  %8109 = vset.pattern.permute.xlu0 %v8228_v24  ;;  %1788 = vperm.xlu1 %8110, %v1514_v25   ;;  %v1499_v34 = vld [vmem:[%s11440_s4 + $0x3c] sm:$0xf] }
  0x1d   :  { %132 = vst.msk [vmem:[#allocation2 + $0x2] ss:$8 sm:$0x3] %vm8310_vm0, %v129_v44  ;;  %1644 = vperm.xlu0 %8109, %v1498_v26   ;;  %8111 = vset.pattern.permute.xlu2 %v8228_v24  ;;  %v1513_v39 = vld [vmem:[%s11440_s4 + $0x74] sm:$0xf] }
  0x1e   :  { %v90_v47 = vld [vmem:[#allocation1 + $0x1] ss:$4 sm:$0xff]  ;;  %141 = vst.msk [vmem:[#allocation2 + $0x3] ss:$8 sm:$0x3] %vm8310_vm0, %v138_v45 }
  0x1f   :  { %96 = vst.msk [vmem:[#allocation2] ss:$8 sm:$0x3] %vm8310_vm0, %v90_v47  ;;  %v1512_v40 = vld [vmem:[%s11440_s4 + $0x70] sm:$0xf] }
  0x20   :  { %166 = vst [vmem:[#allocation1] sm:$0xff] %v164_v46  ;;  %v1510_v47 = vld [vmem:[%s11440_s4 + $0x68] sm:$0xf]  ;;  %v1508_v26 = vld [vmem:[%s11440_s4 + $0x60] sm:$0xf] }
  0x21   :  { %180 = vst.msk [vmem:[#allocation2 + $0x6] ss:$8 sm:$0x3] %vm8310_vm0, %v177_v48  ;;  %v241_v53 = vld [vmem:[#allocation2 + $0x10] sm:$0xff]  ;;  %v242_v54 = vld [vmem:[#allocation2 + $0x18] sm:$0xff] }
  0x22   :  { %v1495_v48 = vld [vmem:[%s11440_s4 + $0x2c] sm:$0xf] }
  0x24   :  { %1797 = vperm.xlu1 %8110, %v1515_v33  }
  0x25   :  { %1653 = vperm.xlu0 %8109, %v1499_v34  }
  0x27   :  { %v168_v51 = vld [vmem:[#allocation1 + $0x1] ss:$4 sm:$0xff] }
  0x28   :  { %171 = vst.msk [vmem:[#allocation2 + $0x5] ss:$8 sm:$0x3] %vm8310_vm0, %v168_v51 }
  0x29   :  { %185 = vst [vmem:[#allocation1] sm:$0xff] %v183_v50 }
  0x2c   :  { %1779 = vperm.xlu1 %8110, %v1513_v39  }
  0x2d   :  { %1770 = vperm.xlu0 %8109, %v1512_v40  }
  0x30   :  { %v187_v52 = vld [vmem:[#allocation1 + $0x1] ss:$4 sm:$0xff] }
  0x31   :  { %190 = vst.msk [vmem:[#allocation2 + $0x7] ss:$8 sm:$0x3] %vm8310_vm0, %v187_v52 }
  0x34   :  { %1752 = vperm.xlu1 %8110, %v1510_v47   ;;  %v1484_v47 = vld [vmem:[%s11440_s4] sm:$0xf] }
  0x35   :  { %1617 = vperm.xlu0 %8109, %v1495_v48  }
  0x38   :  { %v239_v55 = vld [vmem:[#allocation2] sm:$0xff]  ;;  %v240_v56 = vld [vmem:[#allocation2 + $0x8] sm:$0xff] }
  0x39   :  { %v243_v57 = vpack.c.bf16 %v241_v53, %v239_v55  ;;  %v244_v58 = vpack.c.bf16 %v242_v54, %v240_v56  ;;  %v1496_v53 = vld [vmem:[%s11440_s4 + $0x30] sm:$0xf]  ;;  %v1493_v54 = vld [vmem:[%s11440_s4 + $0x24] sm:$0xf]  ;;  %v1492_v55 = vld [vmem:[%s11440_s4 + $0x20] sm:$0xf] }
  0x3a   :  { %1626 = vperm.xlu2 %8111, %v1496_v53  }
  0x3b   :  { %381 = vmatpush.bf16.msra.mxu0 %v243_v57  ;;  %8098 = vmatpush.bf16.msra.mxu2 %v243_v57 }
  0x3c   :  { %470 = vmatpush.bf16.msra.mxu1 %v244_v58  ;;  %8099 = vmatpush.bf16.msra.mxu3 %v244_v58 }
  0x3d   :  { %1599 = vperm.xlu1 %8110, %v1493_v54   ;;  %1590 = vperm.xlu0 %8109, %v1492_v55  }
  0x3e   :  { %7410 = vmatmul.msk.bf16.vlgmr.msra.gmra.mxu0 %vm325_vm2, %v7954_v59  ;;  %7420 = vmatmul.msk.bf16.vlgmr.msra.gmra.mxu2 %vm325_vm2, %v7964_v60 }
  0x3f   :  { %7426 = vmatmul.msk.bf16.vlgmr.msra.gmra.mxu1 %vm325_vm2, %v7954_v59  ;;  %7436 = vmatmul.msk.bf16.vlgmr.msra.gmra.mxu3 %vm325_vm2, %v7964_v60 }
  0x4e   :  { %7411 = vmatmul.msk.bf16.gmra.mxu0 %vm325_vm2, %v7955_v61  ;;  %7421 = vmatmul.msk.bf16.gmra.mxu2 %vm325_vm2, %v7965_v62 }
  0x4f   :  { %7427 = vmatmul.msk.bf16.gmra.mxu1 %vm325_vm2, %v7955_v61  ;;  %7437 = vmatmul.msk.bf16.gmra.mxu3 %vm325_vm2, %v7965_v62  ;;  %v1497_v61 = vld [vmem:[%s11440_s4 + $0x34] sm:$0xf]  ;;  %v1509_v62 = vld [vmem:[%s11440_s4 + $0x64] sm:$0xf] }
  0x50   :  { %1635 = vperm.xlu2 %8111, %v1497_v61   ;;  %1743 = vperm.xlu0 %8109, %v1509_v62  }
  0x5e   :  { %7412 = vmatmul.msk.bf16.gmra.mxu0 %vm325_vm2, %v7956_v63  ;;  %7422 = vmatmul.msk.bf16.gmra.mxu2 %vm325_vm2, %v7966_v0 }
  0x5f   :  { %7428 = vmatmul.msk.bf16.gmra.mxu1 %vm325_vm2, %v7956_v63  ;;  %7438 = vmatmul.msk.bf16.gmra.mxu3 %vm325_vm2, %v7966_v0  ;;  %v1490_v63 = vld [vmem:[%s11440_s4 + $0x18] sm:$0xf] }
  0x60   :  { %1572 = vperm.xlu1 %8110, %v1490_v63  }
  0x6e   :  { %7413 = vmatmul.msk.bf16.gmra.mxu0 %vm325_vm2, %v7957_v1  ;;  %7423 = vmatmul.msk.bf16.gmra.mxu2 %vm325_vm2, %v7967_v2 }
  0x6f   :  { %7429 = vmatmul.msk.bf16.gmra.mxu1 %vm325_vm2, %v7957_v1  ;;  %7439 = vmatmul.msk.bf16.gmra.mxu3 %vm325_vm2, %v7967_v2 }
  0x7e   :  { %7414 = vmatmul.msk.bf16.gmra.mxu0 %vm325_vm2, %v7958_v3  ;;  %7424 = vmatmul.msk.bf16.gmra.mxu2 %vm325_vm2, %v7968_v4 }
  0x7f   :  { %7430 = vmatmul.msk.bf16.gmra.mxu1 %vm325_vm2, %v7958_v3  ;;  %7440 = vmatmul.msk.bf16.gmra.mxu3 %vm325_vm2, %v7968_v4  ;;  %v1494_v4 = vld [vmem:[%s11440_s4 + $0x28] sm:$0xf] }
  0x80   :  { %1608 = vperm.xlu2 %8111, %v1494_v4  }
  0x8e   :  { %7415 = vmatmul.msk.bf16.gmra.mxu0 %vm325_vm2, %v7959_v5  ;;  %7425 = vmatmul.msk.bf16.gmra.mxu2 %vm325_vm2, %v7969_v7 }
  0x8f   :  { %7431 = vmatmul.msk.bf16.gmra.mxu1 %vm325_vm2, %v7959_v5  ;;  %7441 = vmatmul.msk.bf16.gmra.mxu3 %vm325_vm2, %v7969_v7  ;;  %v1506_v5 = vld [vmem:[%s11440_s4 + $0x58] sm:$0xf]  ;;  %v1507_v7 = vld [vmem:[%s11440_s4 + $0x5c] sm:$0xf] }
  0x90   :  { %1725 = vperm.xlu1 %8110, %v1507_v7   ;;  %1716 = vperm.xlu0 %8109, %v1506_v5  }
  0x9e   :  { %7416 = vmatmul.msk.bf16.gmra.mxu0 %vm325_vm2, %v7960_v8 }
  0x9f   :  { %7432 = vmatmul.msk.bf16.gmra.mxu1 %vm325_vm2, %v7960_v8 }
  0xae   :  { %7417 = vmatmul.msk.bf16.gmra.mxu0 %vm325_vm2, %v7961_v9 }
  0xaf   :  { %7433 = vmatmul.msk.bf16.gmra.mxu1 %vm325_vm2, %v7961_v9 }
  0xbb   :  { %v383_v11 = vpop.f32.mrf.mxu0 }
  0xbc   :  { %v472_v12 = vpop.f32.mrf.mxu1 }
  0xbd   :  { %v8418_v13 = vpack.c.bf16 %v472_v12, %v383_v11 }
  0xbe   :  { %7418 = vmatmul.msk.bf16.gmra.mxu0 %vm325_vm2, %v7962_v10 }
  0xbf   :  { %7434 = vmatmul.msk.bf16.gmra.mxu1 %vm325_vm2, %v7962_v10 }
  0xc1   :  { %v433_v14 = vpop.f32.mrf.mxu2 }
  0xc2   :  { %v522_v15 = vpop.f32.mrf.mxu3 }
  0xc3   :  { %v8422_v16 = vpack.c.bf16 %v522_v15, %v433_v14  ;;  %v8424_v17 = vpop.f32.mrf.mxu0  ;;  %v1511_v14 = vld [vmem:[%s11440_s4 + $0x6c] sm:$0xf]  ;;  %v1504_v15 = vld [vmem:[%s11440_s4 + $0x50] sm:$0xf] }
  0xc4   :  { %v8426_v18 = vpop.f32.mrf.mxu1  ;;  %1761 = vperm.xlu2 %8111, %v1511_v14   ;;  %1698 = vperm.xlu1 %8110, %v1504_v15  }
  0xc9   :  { %v8428_v19 = vpop.f32.mrf.mxu2 }
  0xca   :  { %v8430_v20 = vpop.f32.mrf.mxu3 }
  0xcb   :  { %v388_v22 = vpop.f32.mrf.mxu0 }
  0xcc   :  { %v477_v23 = vpop.f32.mrf.mxu1  ;;  %1734 = vperm.xlu2 %8111, %v1508_v26  }
  0xcd   :  { %v8441_v27 = vpack.c.bf16 %v477_v23, %v388_v22 }
  0xce   :  { %7419 = vmatmul.msk.bf16.gmra.mxu0 %vm325_vm2, %v7963_v21 }
  0xcf   :  { %7435 = vmatmul.msk.bf16.gmra.mxu1 %vm325_vm2, %v7963_v21  ;;  %v1489_v21 = vld [vmem:[%s11440_s4 + $0x14] sm:$0xf] }
  0xd0   :  { %1563 = vperm.xlu0 %8109, %v1489_v21  }
  0xd1   :  { %v438_v28 = vpop.f32.mrf.mxu2 }
  0xd2   :  { %v527_v29 = vpop.f32.mrf.mxu3 }
  0xd3   :  { %v8445_v30 = vpack.c.bf16 %v527_v29, %v438_v28  ;;  %v8447_v31 = vpop.f32.mrf.mxu0  ;;  %v1487_v28 = vld [vmem:[%s11440_s4 + $0xc] sm:$0xf]  ;;  %v1486_v29 = vld [vmem:[%s11440_s4 + $0x8] sm:$0xf] }
  0xd4   :  { %v8449_v32 = vpop.f32.mrf.mxu1  ;;  %1545 = vperm.xlu1 %8110, %v1487_v28  }
  0xd8   :  { %1536 = vperm.xlu0 %8109, %v1486_v29  }
  0xd9   :  { %v8457_v35 = vpop.f32.mrf.mxu2 }
  0xda   :  { %v8459_v36 = vpop.f32.mrf.mxu3 }
  0xdb   :  { %v393_v37 = vpop.f32.mrf.mxu0  ;;  %v8567_v15 = vpack.c.bf16 %v8459_v36, %v8457_v35 }
  0xdc   :  { %v482_v38 = vpop.f32.mrf.mxu1  ;;  %1518 = vperm.xlu1 %8110, %v1484_v47  }
  0xdd   :  { %v8467_v41 = vpack.c.bf16 %v482_v38, %v393_v37 }
  0xe1   :  { %v443_v42 = vpop.f32.mrf.mxu2 }
  0xe2   :  { %v532_v43 = vpop.f32.mrf.mxu3 }
  0xe3   :  { %v8469_v44 = vpack.c.bf16 %v532_v43, %v443_v42  ;;  %v8471_v45 = vpop.f32.mrf.mxu0  ;;  %v1491_v42 = vld [vmem:[%s11440_s4 + $0x1c] sm:$0xf]  ;;  %v1503_v43 = vld [vmem:[%s11440_s4 + $0x4c] sm:$0xf] }
  0xe4   :  { %v8473_v46 = vpop.f32.mrf.mxu1  ;;  %1581 = vperm.xlu2 %8111, %v1491_v42   ;;  %1689 = vperm.xlu0 %8109, %v1503_v43  }
  0xe5   :  { %v633_v42 = vunpack.c.h.bf16 %v8469_v44 }
  0xe9   :  { %v8481_v49 = vpop.f32.mrf.mxu2 }
  0xea   :  { %v8483_v50 = vpop.f32.mrf.mxu3 }
  0xeb   :  { %v398_v51 = vpop.f32.mrf.mxu0  ;;  %v8571_v21 = vpack.c.bf16 %v8483_v50, %v8481_v49 }
  0xec   :  { %v487_v52 = vpop.f32.mrf.mxu1 }
  0xed   :  { %v8494_v56 = vpack.c.bf16 %v487_v52, %v398_v51 }
  0xf1   :  { %v448_v57 = vpop.f32.mrf.mxu2 }
  0xf2   :  { %v537_v58 = vpop.f32.mrf.mxu3 }
  0xf3   :  { %v8496_v59 = vpop.f32.mrf.mxu0  ;;  %v8559_v63 = vpack.c.bf16 %v537_v58, %v448_v57  ;;  %v1488_v58 = vld [vmem:[%s11440_s4 + $0x10] sm:$0xf] }
  0xf4   :  { %v8498_v60 = vpop.f32.mrf.mxu1  ;;  %1554 = vperm.xlu2 %8111, %v1488_v58   ;;  %v635_v58 = vunpack.c.h.bf16 %v8571_v21 }
  0xf5   :  { %v636_v49 = vunpack.c.l.bf16 %v8559_v63  ;;  %v637_v50 = vunpack.c.h.bf16 %v8559_v63  ;;  %v634_v63 = vunpack.c.l.bf16 %v8571_v21 }
  0xf9   :  { %v450_v0 = vpop.f32.mrf.mxu2 }
  0xfa   :  { %v539_v1 = vpop.f32.mrf.mxu3 }
  0xfb   :  { %v403_v2 = vpop.f32.mrf.mxu0 }
  0xfc   :  { %v492_v3 = vpop.f32.mrf.mxu1 }
  0xfd   :  { %v8518_v8 = vpack.c.bf16 %v492_v3, %v403_v2  ;;  %v8561_v2 = vpack.c.bf16 %v539_v1, %v450_v0  ;;  %v1500_v0 = vld [vmem:[%s11440_s4 + $0x40] sm:$0xf]  ;;  %v1501_v1 = vld [vmem:[%s11440_s4 + $0x44] sm:$0xf] }
  0xfe   :  { %1671 = vperm.xlu1 %8110, %v1501_v1   ;;  %1662 = vperm.xlu0 %8109, %v1500_v0   ;;  %v701_v0 = vmul.f32 0.010009766, %v637_v50 }
  0xff   :  { %v638_v26 = vunpack.c.l.bf16 %v8561_v2  ;;  %v639_v28 = vunpack.c.h.bf16 %v8561_v2  ;;  %v700_v2 = vmul.f32 0.010009766, %v636_v49 }
 0x101   :  { %v453_v9 = vpop.f32.mrf.mxu2 }
 0x102   :  { %v542_v10 = vpop.f32.mrf.mxu3 }
 0x103   :  { %v8520_v11 = vpop.f32.mrf.mxu0  ;;  %v580_v34 = vpack.c.bf16 %v542_v10, %v453_v9 }
 0x104   :  { %v8522_v12 = vpop.f32.mrf.mxu1 }
 0x105   :  { %v640_v51 = vunpack.c.l.bf16 %v580_v34  ;;  %v641_v52 = vunpack.c.h.bf16 %v580_v34 }
 0x107   :  { %v704_v3 = vmul.f32 0.010009766, %v640_v51  ;;  %v705_v5 = vmul.f32 0.010009766, %v641_v52 }
 0x109   :  { %v455_v22 = vpop.f32.mrf.mxu2  ;;  %v864_v43 = vmax.f32 %v640_v51, %v704_v3  ;;  %v865_v47 = vmax.f32 %v641_v52, %v705_v5  ;;  %v628_v51 = vunpack.c.l.bf16 %v8445_v30  ;;  %v629_v52 = vunpack.c.h.bf16 %v8445_v30  ;;  %v2911_v3 = vld [vmem:[%s11442_s6 + $0x3c] sm:$0xf]  ;;  %v2926_v5 = vld [vmem:[%s11442_s6 + $0x78] sm:$0xf] }
 0x10a   :  { %v544_v23 = vpop.f32.mrf.mxu3  ;;  %3065 = vperm.xlu0 %8109, %v2911_v3   ;;  %3200 = vperm.xlu1 %8110, %v2926_v5  }
 0x10b   :  { %v8533_v24 = vpop.f32.mrf.mxu0  ;;  %v581_v48 = vpack.c.bf16 %v544_v23, %v455_v22 }
 0x10c   :  { %v8535_v25 = vpop.f32.mrf.mxu1 }
 0x10d   :  { %v642_v55 = vunpack.c.l.bf16 %v581_v48  ;;  %v643_v61 = vunpack.c.h.bf16 %v581_v48 }
 0x10f   :  { %v706_v22 = vmul.f32 0.010009766, %v642_v55  ;;  %v707_v23 = vmul.f32 0.010009766, %v643_v61 }
 0x111   :  { %v458_v33 = vpop.f32.mrf.mxu2 }
 0x112   :  { %v547_v37 = vpop.f32.mrf.mxu3 }
 0x113   :  { %v582_v38 = vpack.c.bf16 %v547_v37, %v458_v33  ;;  %v8546_v39 = vpop.f32.mrf.mxu0 }
 0x114   :  { %v8548_v40 = vpop.f32.mrf.mxu1 }
 0x115   :  { %v644_v53 = vunpack.c.l.bf16 %v582_v38  ;;  %v645_v54 = vunpack.c.h.bf16 %v582_v38  ;;  %v632_v38 = vunpack.c.l.bf16 %v8469_v44  ;;  %v8596_v44 = vpack.c.bf16 %v8430_v20, %v8428_v19 }
 0x116   :  { %v630_v19 = vunpack.c.l.bf16 %v8567_v15  ;;  %v631_v20 = vunpack.c.h.bf16 %v8567_v15 }
 0x117   :  { %v708_v7 = vmul.f32 0.010009766, %v644_v53  ;;  %v709_v9 = vmul.f32 0.010009766, %v645_v54  ;;  %v626_v15 = vunpack.c.l.bf16 %v8596_v44 }
 0x119   :  { %v460_v62 = vpop.f32.mrf.mxu2  ;;  %v868_v33 = vmax.f32 %v644_v53, %v708_v7  ;;  %v869_v37 = vmax.f32 %v645_v54, %v709_v9  ;;  %v702_v7 = vmul.f32 0.010009766, %v638_v26  ;;  %v703_v9 = vmul.f32 0.010009766, %v639_v28 }
 0x11a   :  { %v549_v4 = vpop.f32.mrf.mxu3 }
 0x11b   :  { %v583_v10 = vpack.c.bf16 %v549_v4, %v460_v62  ;;  %v8563_v14 = vpop.f32.mrf.mxu0  ;;  %v866_v4 = vmax.f32 %v642_v55, %v706_v22  ;;  %v698_v22 = vmul.f32 0.010009766, %v634_v63 }
 0x11c   :  { %v8573_v57 = vpop.f32.mrf.mxu1 }
 0x11d   :  { %v646_v35 = vunpack.c.l.bf16 %v583_v10  ;;  %v647_v36 = vunpack.c.h.bf16 %v583_v10  ;;  %v867_v10 = vmax.f32 %v643_v61, %v707_v23  ;;  %v1505_v61 = vld [vmem:[%s11440_s4 + $0x54] sm:$0xf]  ;;  %v900_v30 = vpack.c.bf16 %v866_v4, %v864_v43 }
 0x11e   :  { %v699_v23 = vmul.f32 0.010009766, %v635_v58  ;;  %1707 = vperm.xlu2 %8111, %v1505_v61   ;;  %v627_v43 = vunpack.c.h.bf16 %v8596_v44  ;;  %v693_v4 = vmul.f32 0.010009766, %v629_v52  ;;  %v690_v61 = vmul.f32 0.010009766, %v626_v15  ;;  %v1502_v44 = vld [vmem:[%s11440_s4 + $0x48] sm:$0xf] }
 0x11f   :  { %v710_v29 = vmul.f32 0.010009766, %v646_v35  ;;  %v711_v34 = vmul.f32 0.010009766, %v647_v36  ;;  %v901_v21 = vpack.c.bf16 %v867_v10, %v865_v47  ;;  %v692_v47 = vmul.f32 0.010009766, %v628_v51 }
 0x120   :  { %v853_v3 = vmax.f32 %v629_v52, %v693_v4  ;;  %v691_v5 = vmul.f32 0.010009766, %v627_v43 }
 0x121   :  { %v870_v48 = vmax.f32 %v646_v35, %v710_v29  ;;  %v871_v62 = vmax.f32 %v647_v36, %v711_v34  ;;  %v696_v35 = vmul.f32 0.010009766, %v632_v38  ;;  %v697_v36 = vmul.f32 0.010009766, %v633_v42 }
 0x122   :  { %v860_v29 = vmax.f32 %v636_v49, %v700_v2  ;;  %v861_v34 = vmax.f32 %v637_v50, %v701_v0  ;;  %v695_v49 = vmul.f32 0.010009766, %v631_v20  ;;  %v858_v2 = vmax.f32 %v634_v63, %v698_v22 }
 0x123   :  { %v8592_v1 = vpop.f32.mrf.mxu0  ;;  %v902_v53 = vpack.c.bf16 %v870_v48, %v868_v33  ;;  %v903_v54 = vpack.c.bf16 %v871_v62, %v869_v37  ;;  %v862_v33 = vmax.f32 %v638_v26, %v702_v7  ;;  %v863_v37 = vmax.f32 %v639_v28, %v703_v9 }
 0x124   :  { %v504_v55 = vpop.f32.mrf.mxu1  ;;  %v624_v48 = vunpack.c.l.bf16 %v8422_v16  ;;  %v625_v62 = vunpack.c.h.bf16 %v8422_v16  ;;  %v856_v10 = vmax.f32 %v632_v38, %v696_v35  ;;  %v859_v0 = vmax.f32 %v635_v58, %v699_v23  ;;  %v2908_v38 = vld [vmem:[%s11442_s6 + $0x30] sm:$0xf] }
 0x125   :  { %1185 = vmatpush.bf16.msrb.mxu3 %v902_v53  ;;  %1363 = vmatpush.bf16.msrb.mxu1 %v903_v54  ;;  %v857_v53 = vmax.f32 %v633_v42, %v697_v36  ;;  %v694_v54 = vmul.f32 0.010009766, %v630_v19  ;;  %v898_v50 = vpack.c.bf16 %v862_v33, %v860_v29  ;;  %v899_v28 = vpack.c.bf16 %v863_v37, %v861_v34  ;;  %v2909_v42 = vld [vmem:[%s11442_s6 + $0x34] sm:$0xf] }
 0x126   :  { %v688_v7 = vmul.f32 0.010009766, %v624_v48  ;;  %v689_v9 = vmul.f32 0.010009766, %v625_v62  ;;  %v852_v63 = vmax.f32 %v628_v51, %v692_v47  ;;  %1680 = vperm.xlu2 %8111, %v1502_v44   ;;  %3038 = vperm.xlu0 %8109, %v2908_v38   ;;  %v855_v36 = vmax.f32 %v631_v20, %v695_v49 }
 0x127   :  { %v854_v58 = vmax.f32 %v630_v19, %v694_v54  ;;  %v897_v35 = vpack.c.bf16 %v859_v0, %v857_v53  ;;  %3047 = vperm.xlu1 %8110, %v2909_v42   ;;  %v8625_v22 = vpack.c.bf16 %v504_v55, %v8592_v1  ;;  %v850_v29 = vmax.f32 %v626_v15, %v690_v61 }
 0x128   :  { %v848_v23 = vmax.f32 %v624_v48, %v688_v7  ;;  %v8629_v51 = vpack.c.bf16 %v8573_v57, %v8563_v14  ;;  %v849_v52 = vmax.f32 %v625_v62, %v689_v9  ;;  %v851_v19 = vmax.f32 %v627_v43, %v691_v5  ;;  %v2925_v57 = vld [vmem:[%s11442_s6 + $0x74] sm:$0xf]  ;;  %v1485_v62 = vld [vmem:[%s11440_s4 + $0x4] sm:$0xf] }
 0x129   :  { %1186 = vmatpush.bf16.msrb.mxu3 %v900_v30  ;;  %1364 = vmatpush.bf16.msrb.mxu1 %v901_v21  ;;  %v896_v21 = vpack.c.bf16 %v858_v2, %v856_v10  ;;  %v894_v47 = vpack.c.bf16 %v854_v58, %v852_v63  ;;  %v895_v4 = vpack.c.bf16 %v855_v36, %v853_v3  ;;  %v610_v55 = vunpack.c.l.bf16 %v8625_v22  ;;  %v2922_v58 = vld [vmem:[%s11442_s6 + $0x68] sm:$0xf]  ;;  %v2910_v3 = vld [vmem:[%s11442_s6 + $0x38] sm:$0xf] }
 0x12a   :  { %v8633_v20 = vpack.c.bf16 %v8548_v40, %v8546_v39  ;;  %v611_v48 = vunpack.c.h.bf16 %v8625_v22  ;;  %v892_v14 = vpack.c.bf16 %v850_v29, %v848_v23  ;;  %v2906_v39 = vld [vmem:[%s11442_s6 + $0x28] sm:$0xf]  ;;  %v8648_v40 = vpack.c.bf16 %v8535_v25, %v8533_v24 }
 0x12b   :  { %v418_v26 = vpop.f32.mrf.mxu0  ;;  %v608_v43 = vunpack.c.l.bf16 %v8629_v51  ;;  %v609_v10 = vunpack.c.h.bf16 %v8629_v51  ;;  %v893_v53 = vpack.c.bf16 %v851_v19, %v849_v52  ;;  %v8658_v24 = vpack.c.bf16 %v8522_v12, %v8520_v11  ;;  %v2923_v52 = vld [vmem:[%s11442_s6 + $0x6c] sm:$0xf] }
 0x12c   :  { %v507_v16 = vpop.f32.mrf.mxu1  ;;  %v606_v25 = vunpack.c.l.bf16 %v8633_v20  ;;  %v607_v2 = vunpack.c.h.bf16 %v8633_v20  ;;  %v674_v9 = vmul.f32 0.010009766, %v610_v55  ;;  %v604_v61 = vunpack.c.l.bf16 %v8648_v40 }
 0x12d   :  { %1187 = vmatpush.bf16.msrb.mxu3 %v898_v50  ;;  %1365 = vmatpush.bf16.msrb.mxu1 %v899_v28  ;;  %v566_v30 = vpack.c.bf16 %v507_v16, %v418_v26  ;;  %v8654_v28 = vpack.c.bf16 %v8498_v60, %v8496_v59  ;;  %v675_v16 = vmul.f32 0.010009766, %v611_v48  ;;  %v605_v44 = vunpack.c.h.bf16 %v8648_v40 }
 0x12e   :  { %3191 = vperm.xlu0 %8109, %v2925_v57   ;;  %1527 = vperm.xlu2 %8111, %v1485_v62   ;;  %v672_v59 = vmul.f32 0.010009766, %v608_v43  ;;  %v673_v60 = vmul.f32 0.010009766, %v609_v10  ;;  %v602_v5 = vunpack.c.l.bf16 %v8658_v24  ;;  %v671_v36 = vmul.f32 0.010009766, %v607_v2 }
 0x12f   :  { %v612_v33 = vunpack.c.l.bf16 %v566_v30  ;;  %v613_v34 = vunpack.c.h.bf16 %v566_v30  ;;  %3020 = vperm.xlu1 %8110, %v2906_v39   ;;  %v603_v30 = vunpack.c.h.bf16 %v8658_v24  ;;  %v834_v29 = vmax.f32 %v610_v55, %v674_v9 }
 0x130   :  { %v835_v51 = vmax.f32 %v611_v48, %v675_v16  ;;  %v8681_v19 = vpack.c.bf16 %v8473_v46, %v8471_v45  ;;  %v833_v20 = vmax.f32 %v609_v10, %v673_v60  ;;  %v599_v55 = vunpack.c.h.bf16 %v8654_v28 }
 0x131   :  { %1188 = vmatpush.bf16.msrb.mxu3 %v896_v21  ;;  %1366 = vmatpush.bf16.msrb.mxu1 %v897_v35  ;;  %v676_v54 = vmul.f32 0.010009766, %v612_v33  ;;  %v677_v49 = vmul.f32 0.010009766, %v613_v34  ;;  %v670_v35 = vmul.f32 0.010009766, %v606_v25  ;;  %v666_v48 = vmul.f32 0.010009766, %v602_v5 }
 0x132   :  { %v885_v46 = vpack.c.bf16 %v835_v51, %v833_v20  ;;  %v831_v57 = vmax.f32 %v607_v2, %v671_v36  ;;  %v596_v62 = vunpack.c.l.bf16 %v8494_v56  ;;  %v597_v39 = vunpack.c.h.bf16 %v8494_v56 }
 0x133   :  { %v420_v37 = vpop.f32.mrf.mxu0  ;;  %v836_v11 = vmax.f32 %v612_v33, %v676_v54  ;;  %v837_v42 = vmax.f32 %v613_v34, %v677_v49  ;;  %v600_v33 = vunpack.c.l.bf16 %v8518_v8  ;;  %v601_v34 = vunpack.c.h.bf16 %v8518_v8  ;;  %v2905_v49 = vld [vmem:[%s11442_s6 + $0x24] sm:$0xf] }
 0x134   :  { %v509_v1 = vpop.f32.mrf.mxu1  ;;  %v8689_v8 = vpack.c.bf16 %v8449_v32, %v8447_v31  ;;  %v2927_v31 = vld [vmem:[%s11442_s6 + $0x7c] sm:$0xf]  ;;  %v594_v32 = vunpack.c.l.bf16 %v8681_v19  ;;  %v595_v56 = vunpack.c.h.bf16 %v8681_v19  ;;  %v826_v2 = vmax.f32 %v602_v5, %v666_v48  ;;  %v2924_v19 = vld [vmem:[%s11442_s6 + $0x70] sm:$0xf] }
 0x135   :  { %v567_v15 = vpack.c.bf16 %v509_v1, %v420_v37  ;;  %1189 = vmatpush.bf16.msrb.mxu3 %v894_v47  ;;  %1367 = vmatpush.bf16.msrb.mxu1 %v895_v4  ;;  %v668_v37 = vmul.f32 0.010009766, %v604_v61  ;;  %v669_v47 = vmul.f32 0.010009766, %v605_v44  ;;  %v832_v4 = vmax.f32 %v608_v43, %v672_v59  ;;  %v2903_v48 = vld [vmem:[%s11442_s6 + $0x1c] sm:$0xf] }
 0x136   :  { %3164 = vperm.xlu0 %8109, %v2922_v58   ;;  %3056 = vperm.xlu2 %8111, %v2910_v3   ;;  %v598_v1 = vunpack.c.l.bf16 %v8654_v28  ;;  %v664_v40 = vmul.f32 0.010009766, %v600_v33  ;;  %v665_v43 = vmul.f32 0.010009766, %v601_v34  ;;  %v663_v28 = vmul.f32 0.010009766, %v599_v55 }
 0x137   :  { %v614_v26 = vunpack.c.l.bf16 %v567_v15  ;;  %v615_v50 = vunpack.c.h.bf16 %v567_v15  ;;  %v667_v15 = vmul.f32 0.010009766, %v603_v30  ;;  %3173 = vperm.xlu1 %8110, %v2923_v52   ;;  %v884_v45 = vpack.c.bf16 %v834_v29, %v832_v4  ;;  %v2902_v52 = vld [vmem:[%s11442_s6 + $0x18] sm:$0xf] }
 0x138   :  { %v829_v54 = vmax.f32 %v605_v44, %v669_v47  ;;  %v8710_v9 = vpack.c.bf16 %v8426_v18, %v8424_v17  ;;  %v592_v16 = vunpack.c.l.bf16 %v8467_v41  ;;  %v660_v44 = vmul.f32 0.010009766, %v596_v62 }
 0x139   :  { %1190 = vmatpush.bf16.msrb.mxu3 %v892_v14  ;;  %1368 = vmatpush.bf16.msrb.mxu1 %v893_v53  ;;  %v678_v0 = vmul.f32 0.010009766, %v614_v26  ;;  %v679_v7 = vmul.f32 0.010009766, %v615_v50  ;;  %v830_v14 = vmax.f32 %v606_v25, %v670_v35  ;;  %v828_v53 = vmax.f32 %v604_v61, %v668_v37 }
 0x13a   :  { %v883_v25 = vpack.c.bf16 %v831_v57, %v829_v54  ;;  %v593_v61 = vunpack.c.h.bf16 %v8467_v41  ;;  %v661_v59 = vmul.f32 0.010009766, %v597_v39  ;;  %v824_v60 = vmax.f32 %v600_v33, %v664_v40 }
 0x13b   :  { %v8664_v38 = vpop.f32.mrf.mxu0  ;;  %v838_v12 = vmax.f32 %v614_v26, %v678_v0  ;;  %v839_v63 = vmax.f32 %v615_v50, %v679_v7  ;;  %v662_v50 = vmul.f32 0.010009766, %v598_v1  ;;  %v882_v24 = vpack.c.bf16 %v830_v14, %v828_v53  ;;  %v2920_v7 = vld [vmem:[%s11442_s6 + $0x60] sm:$0xf] }
 0x13c   :  { %v8674_v21 = vpop.f32.mrf.mxu1  ;;  %v827_v0 = vmax.f32 %v603_v30, %v667_v15  ;;  %v659_v58 = vmul.f32 0.010009766, %v595_v56  ;;  %v880_v17 = vpack.c.bf16 %v826_v2, %v824_v60  ;;  %v823_v5 = vmax.f32 %v599_v55, %v663_v28 }
 0x13d   :  { %v886_v22 = vpack.c.bf16 %v838_v12, %v836_v11  ;;  %v887_v23 = vpack.c.bf16 %v839_v63, %v837_v42  ;;  %v825_v11 = vmax.f32 %v601_v34, %v665_v43  ;;  %v590_v12 = vunpack.c.l.bf16 %v8689_v8 }
 0x13e   :  { %3011 = vperm.xlu0 %8109, %v2905_v49   ;;  %3209 = vperm.xlu2 %8111, %v2927_v31   ;;  %v591_v42 = vunpack.c.h.bf16 %v8689_v8  ;;  %v658_v63 = vmul.f32 0.010009766, %v594_v32  ;;  %v822_v3 = vmax.f32 %v598_v1, %v662_v50  ;;  %v584_v41 = vunpack.c.l.bf16 %v8418_v13 }
 0x13f   :  { %1096 = vmatpush.bf16.msrb.mxu2 %v886_v22  ;;  %1274 = vmatpush.bf16.msrb.mxu0 %v887_v23  ;;  %v881_v18 = vpack.c.bf16 %v827_v0, %v825_v11  ;;  %v588_v30 = vunpack.c.l.bf16 %v8441_v27  ;;  %v589_v35 = vunpack.c.h.bf16 %v8441_v27  ;;  %v656_v36 = vmul.f32 0.010009766, %v592_v16 }
 0x140   :  { %3146 = vperm.xlu1 %8110, %v2920_v7   ;;  %v657_v22 = vmul.f32 0.010009766, %v593_v61  ;;  %v820_v29 = vmax.f32 %v596_v62, %v660_v44  ;;  %v821_v51 = vmax.f32 %v597_v39, %v661_v59  ;;  %v586_v33 = vunpack.c.l.bf16 %v8710_v9  ;;  %v2900_v59 = vld [vmem:[%s11442_s6 + $0x10] sm:$0xf] }
 0x141   :  { %v587_v34 = vunpack.c.h.bf16 %v8710_v9  ;;  %v654_v37 = vmul.f32 0.010009766, %v590_v12  ;;  %v655_v47 = vmul.f32 0.010009766, %v591_v42  ;;  %v818_v1 = vmax.f32 %v594_v32, %v658_v63 }
 0x142   :  { %v878_v4 = vpack.c.bf16 %v822_v3, %v820_v29  ;;  %v879_v20 = vpack.c.bf16 %v823_v5, %v821_v51  ;;  %v819_v55 = vmax.f32 %v595_v56, %v659_v58  ;;  %v585_v15 = vunpack.c.h.bf16 %v8418_v13  ;;  %v7444_v3 = vld [vmem:[%s11439_s3] sm:$0xf]  ;;  %v7971_v5 = vld [vmem:[%s11439_s3 + $0x4] sm:$0xf0] }
 0x143   :  { %1097 = vmatpush.bf16.msrb.mxu2 %v884_v45  ;;  %1275 = vmatpush.bf16.msrb.mxu0 %v885_v46  ;;  %v8693_v10 = vpop.f32.mrf.mxu0  ;;  %v652_v45 = vmul.f32 0.010009766, %v588_v30  ;;  %v653_v14 = vmul.f32 0.010009766, %v589_v35  ;;  %v816_v57 = vmax.f32 %v592_v16, %v656_v36  ;;  %v817_v8 = vmax.f32 %v593_v61, %v657_v22 }
 0x144   :  { %v8703_v26 = vpop.f32.mrf.mxu1  ;;  %v648_v62 = vmul.f32 0.010009766, %v584_v41  ;;  %v814_v39 = vmax.f32 %v590_v12, %v654_v37  ;;  %v650_v40 = vmul.f32 0.010009766, %v586_v33  ;;  %v651_v43 = vmul.f32 0.010009766, %v587_v34 }
 0x145   :  { %v569_v53 = vpack.c.bf16 %v8703_v26, %v8693_v10  ;;  %v876_v54 = vpack.c.bf16 %v818_v1, %v816_v57  ;;  %v877_v49 = vpack.c.bf16 %v819_v55, %v817_v8  ;;  %v815_v31 = vmax.f32 %v591_v42, %v655_v47  ;;  %v2919_v10 = vld [vmem:[%s11442_s6 + $0x5c] sm:$0xf]  ;;  %v2907_v26 = vld [vmem:[%s11442_s6 + $0x2c] sm:$0xf]  ;;  %v2904_v1 = vld [vmem:[%s11442_s6 + $0x20] sm:$0xf] }
 0x146   :  { %2984 = vperm.xlu0 %8109, %v2902_v52   ;;  %3182 = vperm.xlu2 %8111, %v2924_v19   ;;  %v649_v32 = vmul.f32 0.010009766, %v585_v15  ;;  %v568_v56 = vpack.c.bf16 %v8674_v21, %v8664_v38  ;;  %v812_v28 = vmax.f32 %v588_v30, %v652_v45  ;;  %v813_v2 = vmax.f32 %v589_v35, %v653_v14  ;;  %v2917_v55 = vld [vmem:[%s11442_s6 + $0x54] sm:$0xf]  ;;  %v7970_v45 = vld [vmem:[%s11439_s3 + $0x4] sm:$0xf] }
 0x147   :  { %1098 = vmatpush.bf16.msrb.mxu2 %v882_v24  ;;  %1276 = vmatpush.bf16.msrb.mxu0 %v883_v25  ;;  %v810_v38 = vmax.f32 %v586_v33, %v650_v40  ;;  %v811_v21 = vmax.f32 %v587_v34, %v651_v43  ;;  %v618_v9 = vunpack.c.l.bf16 %v569_v53  ;;  %v619_v16 = vunpack.c.h.bf16 %v569_v53  ;;  %v2914_v40 = vld [vmem:[%s11442_s6 + $0x48] sm:$0xf]  ;;  %v7452_v43 = vld [vmem:[%s11439_s3 + $0x10] sm:$0xf]  ;;  %v7973_v53 = vld [vmem:[%s11439_s3 + $0x14] sm:$0xf0] }
 0x148   :  { %2993 = vperm.xlu1 %8110, %v2903_v48   ;;  %v874_v7 = vpack.c.bf16 %v814_v39, %v812_v28  ;;  %v875_v44 = vpack.c.bf16 %v815_v31, %v813_v2  ;;  %v616_v60 = vunpack.c.l.bf16 %v568_v56  ;;  %v808_v12 = vmax.f32 %v584_v41, %v648_v62  ;;  %v2899_v62 = vld [vmem:[%s11442_s6 + $0xc] sm:$0xf]  ;;  %v2921_v39 = vld [vmem:[%s11442_s6 + $0x64] sm:$0xf]  ;;  %v2918_v31 = vld [vmem:[%s11442_s6 + $0x58] sm:$0xf] }
 0x149   :  { %v809_v42 = vmax.f32 %v585_v15, %v649_v32  ;;  %v617_v63 = vunpack.c.h.bf16 %v568_v56  ;;  %v682_v36 = vmul.f32 0.010009766, %v618_v9  ;;  %v683_v22 = vmul.f32 0.010009766, %v619_v16  ;;  %v2897_v32 = vld [vmem:[%s11442_s6 + $0x4] sm:$0xf]  ;;  %v7972_v56 = vld [vmem:[%s11439_s3 + $0x14] sm:$0xf] }
 0x14a   :  { %v872_v30 = vpack.c.bf16 %v810_v38, %v808_v12  ;;  %v7445_v29 = vor.u32 %v7971_v5, %v7444_v3  ;;  %v4322_v2 = vld [vmem:[%s11444_s8 + $0x38] sm:$0xf]  ;;  %v2898_v38 = vld [vmem:[%s11442_s6 + $0x8] sm:$0xf]  ;;  %v7976_v3 = vld [vmem:[%s11439_s3 + $0x34] sm:$0xf] }
 0x14b   :  { %1099 = vmatpush.bf16.msrb.mxu2 %v880_v17  ;;  %1277 = vmatpush.bf16.msrb.mxu0 %v881_v18  ;;  %v428_v23 = vpop.f32.mrf.mxu0  ;;  %v873_v13 = vpack.c.bf16 %v811_v21, %v809_v42  ;;  %v681_v52 = vmul.f32 0.010009766, %v617_v63  ;;  %v842_v47 = vmax.f32 %v618_v9, %v682_v36  ;;  %v4339_v21 = vld [vmem:[%s11444_s8 + $0x7c] sm:$0xf]  ;;  %v7974_v9 = vld [vmem:[%s11439_s3 + $0x24] sm:$0xf] }
 0x14c   :  { %v517_v27 = vpop.f32.mrf.mxu1  ;;  %v7977_v12 = vld [vmem:[%s11439_s3 + $0x34] sm:$0xf0]  ;;  %v7470_v5 = vld [vmem:[%s11439_s3 + $0x38] sm:$0xf0]  ;;  %v4316_v36 = vld [vmem:[%s11444_s8 + $0x20] sm:$0xf] }
 0x14d   :  { %v8731_v46 = vpack.c.bf16 %v517_v27, %v428_v23  ;;  %v680_v23 = vmul.f32 0.010009766, %v616_v60  ;;  %v841_v15 = vmax.f32 %v617_v63, %v681_v52  ;;  %v8848_v63 = vpop.permute.xlu1 %1788  ;;  %v4332_v52 = vld [vmem:[%s11444_s8 + $0x60] sm:$0xf] }
 0x14e   :  { %3137 = vperm.xlu0 %8109, %v2919_v10   ;;  %3029 = vperm.xlu2 %8111, %v2907_v26   ;;  %v7460_v10 = vld [vmem:[%s11439_s3 + $0x20] sm:$0xf]  ;;  %v7975_v26 = vld [vmem:[%s11439_s3 + $0x24] sm:$0xf0]  ;;  %11464 = vst [vmem:[#allocation13_spill] sm:$0xff] %v8848_v63 }
 0x14f   :  { %1100 = vmatpush.bf16.msrb.mxu2 %v878_v4  ;;  %1278 = vmatpush.bf16.msrb.mxu0 %v879_v20  ;;  %v620_v50 = vunpack.c.l.bf16 %v8731_v46  ;;  %v621_v24 = vunpack.c.h.bf16 %v8731_v46  ;;  %v843_v4 = vmax.f32 %v619_v16, %v683_v22  ;;  %v2916_v20 = vld [vmem:[%s11442_s6 + $0x50] sm:$0xf]  ;;  %v840_v48 = vmax.f32 %v616_v60, %v680_v23  ;;  %v7446_v46 = vld [vmem:[%s11439_s3 + $0x8] sm:$0xf0]  ;;  %v7476_v23 = vld [vmem:[%s11439_s3 + $0x40] sm:$0xf] }
 0x150   :  { %2966 = vperm.xlu1 %8110, %v2900_v59   ;;  %v7449_v8 = vor.u32 %v7970_v45, %v7446_v46  ;;  %v7462_v16 = vld [vmem:[%s11439_s3 + $0x28] sm:$0xf0]  ;;  %v4336_v60 = vld [vmem:[%s11444_s8 + $0x70] sm:$0xf]  ;;  %v7981_v45 = vld [vmem:[%s11439_s3 + $0x54] sm:$0xf0] }
 0x151   :  { %v684_v11 = vmul.f32 0.010009766, %v620_v50  ;;  %v685_v58 = vmul.f32 0.010009766, %v621_v24  ;;  %v888_v14 = vpack.c.bf16 %v842_v47, %v840_v48  ;;  %v889_v57 = vpack.c.bf16 %v843_v4, %v841_v15  ;;  %v2915_v59 = vld [vmem:[%s11442_s6 + $0x4c] sm:$0xf]  ;;  %v4330_v48 = vld [vmem:[%s11444_s8 + $0x58] sm:$0xf] }
 0x152   :  { %v7484_v15 = vld [vmem:[%s11439_s3 + $0x50] sm:$0xf] }
 0x153   :  { %1101 = vmatpush.bf16.msrb.mxu2 %v876_v54  ;;  %1279 = vmatpush.bf16.msrb.mxu0 %v877_v49  ;;  %v430_v25 = vpop.f32.mrf.mxu0  ;;  %v844_v51 = vmax.f32 %v620_v50, %v684_v11  ;;  %v845_v33 = vmax.f32 %v621_v24, %v685_v58  ;;  %v7453_v54 = vor.u32 %v7973_v53, %v7452_v43  ;;  %v2896_v49 = vld [vmem:[%s11442_s6] sm:$0xf]  ;;  %v7454_v50 = vld [vmem:[%s11439_s3 + $0x18] sm:$0xf0]  ;;  %v2913_v24 = vld [vmem:[%s11442_s6 + $0x44] sm:$0xf] }
 0x154   :  { %v519_v0 = vpop.f32.mrf.mxu1  ;;  %v7457_v28 = vor.u32 %v7972_v56, %v7454_v50  ;;  %v7468_v11 = vld [vmem:[%s11439_s3 + $0x30] sm:$0xf]  ;;  %v4318_v58 = vld [vmem:[%s11444_s8 + $0x28] sm:$0xf]  ;;  %v7486_v43 = vld [vmem:[%s11439_s3 + $0x58] sm:$0xf0] }
 0x155   :  { %v571_v61 = vpack.c.bf16 %v519_v0, %v430_v25  ;;  %v2901_v25 = vld [vmem:[%s11442_s6 + $0x14] sm:$0xf]  ;;  %v7461_v0 = vor.u32 %v7975_v26, %v7460_v10  ;;  %v7469_v42 = vor.u32 %v7977_v12, %v7468_v11  ;;  %v8876_v22 = vpop.permute.xlu1 %1797  ;;  %v4317_v56 = vld [vmem:[%s11444_s8 + $0x24] sm:$0xf]  ;;  %v4310_v50 = vld [vmem:[%s11444_s8 + $0x8] sm:$0xf] }
 0x156   :  { %3110 = vperm.xlu0 %8109, %v2916_v20   ;;  %3002 = vperm.xlu2 %8111, %v2904_v1   ;;  %11465 = vst [vmem:[#allocation14_spill] sm:$0xff] %v8876_v22  ;;  %v4315_v20 = vld [vmem:[%s11444_s8 + $0x1c] sm:$0xf]  ;;  %v4337_v1 = vld [vmem:[%s11444_s8 + $0x74] sm:$0xf] }
 0x157   :  { %v622_v17 = vunpack.c.l.bf16 %v571_v61  ;;  %v623_v18 = vunpack.c.h.bf16 %v571_v61  ;;  %1102 = vmatpush.bf16.msrb.mxu2 %v874_v7  ;;  %1280 = vmatpush.bf16.msrb.mxu0 %v875_v44  ;;  %v4338_v7 = vld [vmem:[%s11444_s8 + $0x78] sm:$0xf]  ;;  %v7465_v61 = vor.u32 %v7974_v9, %v7462_v16  ;;  %v4321_v44 = vld [vmem:[%s11444_s8 + $0x34] sm:$0xf]  ;;  %v4326_v26 = vld [vmem:[%s11444_s8 + $0x48] sm:$0xf] }
 0x158   :  { %3119 = vperm.xlu1 %8110, %v2917_v55   ;;  %v8909_v55 = vpop.permute.xlu0 %1644  ;;  %v7494_v9 = vld [vmem:[%s11439_s3 + $0x68] sm:$0xf0]  ;;  %v7500_v12 = vld [vmem:[%s11439_s3 + $0x70] sm:$0xf] }
 0x159   :  { %v686_v41 = vmul.f32 0.010009766, %v622_v17  ;;  %v687_v35 = vmul.f32 0.010009766, %v623_v18 }
 0x15b   :  { %1103 = vmatpush.bf16.msrb.mxu2 %v872_v30  ;;  %1281 = vmatpush.bf16.msrb.mxu0 %v873_v13  ;;  %v846_v19 = vmax.f32 %v622_v17, %v686_v41  ;;  %v847_v34 = vmax.f32 %v623_v18, %v687_v35  ;;  %v2912_v17 = vld [vmem:[%s11442_s6 + $0x40] sm:$0xf]  ;;  %v4319_v18 = vld [vmem:[%s11444_s8 + $0x2c] sm:$0xf]  ;;  %v7473_v30 = vor.u32 %v7976_v3, %v7470_v5  ;;  %v8865_v13 = vpop.permute.xlu2 %1626  ;;  %v4323_v35 = vld [vmem:[%s11444_s8 + $0x3c] sm:$0xf] }
 0x15c   :  { %v4335_v41 = vld [vmem:[%s11444_s8 + $0x6c] sm:$0xf]  ;;  %v4328_v3 = vld [vmem:[%s11444_s8 + $0x50] sm:$0xf] }
 0x15d   :  { %v890_v27 = vpack.c.bf16 %v846_v19, %v844_v51  ;;  %v891_v37 = vpack.c.bf16 %v847_v34, %v845_v33  ;;  %v4320_v19 = vld [vmem:[%s11444_s8 + $0x30] sm:$0xf]  ;;  %v4333_v33 = vld [vmem:[%s11444_s8 + $0x64] sm:$0xf]  ;;  %v8901_v47 = vpop.permute.xlu1 %1779 }
 0x15e   :  { %1104 = vmatmul.bf16.vlgmr.msrb.gmra.mxu2 %v7445_v29  ;;  %1282 = vmatmul.bf16.vlgmr.msrb.gmra.mxu0 %v7445_v29  ;;  %v7979_v29 = vld [vmem:[%s11439_s3 + $0x44] sm:$0xf0]  ;;  %11466 = vst [vmem:[#allocation15_spill] sm:$0xff] %v8901_v47 }
 0x15f   :  { %1191 = vmatpush.bf16.msrb.mxu3 %v890_v27  ;;  %1369 = vmatpush.bf16.msrb.mxu1 %v891_v37  ;;  %v7477_v51 = vor.u32 %v7979_v29, %v7476_v23  ;;  %v7978_v27 = vld [vmem:[%s11439_s3 + $0x44] sm:$0xf]  ;;  %v7478_v37 = vld [vmem:[%s11439_s3 + $0x48] sm:$0xf0] }
 0x160   :  { %2957 = vperm.xlu0 %8109, %v2899_v62   ;;  %3155 = vperm.xlu2 %8111, %v2921_v39   ;;  %v7481_v4 = vor.u32 %v7978_v27, %v7478_v37  ;;  %v4334_v62 = vld [vmem:[%s11444_s8 + $0x68] sm:$0xf]  ;;  %v4313_v39 = vld [vmem:[%s11444_s8 + $0x14] sm:$0xf]  ;;  %v8939_v53 = vpop.permute.xlu0 %1653 }
 0x161   :  { %3092 = vperm.xlu1 %8110, %v2914_v40   ;;  %v7980_v40 = vld [vmem:[%s11439_s3 + $0x54] sm:$0xf]  ;;  %v7987_v27 = vld [vmem:[%s11439_s3 + $0x84] sm:$0xf0] }
 0x163   :  { %1192 = vmatpush.bf16.msrb.mxu3 %v888_v14  ;;  %1370 = vmatpush.bf16.msrb.mxu1 %v889_v57  ;;  %v8893_v34 = vpop.permute.xlu2 %1635  ;;  %v7485_v14 = vor.u32 %v7981_v45, %v7484_v15  ;;  %v5749_v15 = vld [vmem:[%s11446_s10 + $0x74] sm:$0xf]  ;;  %v4308_v45 = vld [vmem:[%s11444_s8] sm:$0xf] }
 0x165   :  { %v8922_v57 = vpop.permute.xlu1 %1752 }
 0x166   :  { %1193 = vmatmul.bf16.vlgmr.msrb.gmra.mxu3 %v7449_v8  ;;  %1371 = vmatmul.bf16.vlgmr.msrb.gmra.mxu1 %v7449_v8  ;;  %11467 = vst [vmem:[#allocation16_spill] sm:$0xff] %v8922_v57  ;;  %v4312_v8 = vld [vmem:[%s11444_s8 + $0x10] sm:$0xf] }
 0x168   :  { %2930 = vperm.xlu0 %8109, %v2896_v49   ;;  %3128 = vperm.xlu2 %8111, %v2918_v31  }
 0x169   :  { %2939 = vperm.xlu1 %8110, %v2897_v32   ;;  %v4329_v32 = vld [vmem:[%s11444_s8 + $0x54] sm:$0xf] }
 0x16b   :  { %v8920_v46 = vpop.permute.xlu2 %1608 }
 0x16d   :  { %v8943_v31 = vpop.permute.xlu1 %1599 }
 0x16e   :  { %1109 = vmatmul.bf16.gmra.mxu2 %v7453_v54  ;;  %1287 = vmatmul.bf16.gmra.mxu0 %v7453_v54  ;;  %v7489_v54 = vor.u32 %v7980_v40, %v7486_v43 }
 0x170   :  { %3083 = vperm.xlu0 %8109, %v2913_v24   ;;  %2975 = vperm.xlu2 %8111, %v2901_v25   ;;  %v7983_v24 = vld [vmem:[%s11439_s3 + $0x64] sm:$0xf0]  ;;  %v8960_v25 = vpop.permute.xlu0 %1770 }
 0x171   :  { %4468 = vperm.xlu1 %8110, %v4322_v2   ;;  %11469 = vst [vmem:[#allocation18_spill] sm:$0xff] %v8960_v25 }
 0x173   :  { %v8941_v49 = vpop.permute.xlu2 %1761 }
 0x174   :  { %11468 = vst [vmem:[#allocation17_spill] sm:$0xff] %v8941_v49 }
 0x176   :  { %1198 = vmatmul.bf16.gmra.mxu3 %v7457_v28  ;;  %1376 = vmatmul.bf16.gmra.mxu1 %v7457_v28  ;;  %v7492_v28 = vld [vmem:[%s11439_s3 + $0x60] sm:$0xf] }
 0x177   :  { %v7493_v2 = vor.u32 %v7983_v24, %v7492_v28 }
 0x178   :  { %4612 = vperm.xlu0 %8109, %v4338_v7   ;;  %2948 = vperm.xlu2 %8111, %v2898_v38   ;;  %v4327_v7 = vld [vmem:[%s11444_s8 + $0x4c] sm:$0xf]  ;;  %v8973_v38 = vpop.permute.xlu1 %1572 }
 0x179   :  { %4621 = vperm.xlu1 %8110, %v4339_v21   ;;  %v7982_v21 = vld [vmem:[%s11439_s3 + $0x64] sm:$0xf] }
 0x17a   :  { %v7497_v16 = vor.u32 %v7982_v21, %v7494_v9  ;;  %v7516_v9 = vld [vmem:[%s11439_s3 + $0x90] sm:$0xf] }
 0x17b   :  { %v8962_v10 = vpop.permute.xlu2 %1734 }
 0x17c   :  { %11470 = vst [vmem:[#allocation19_spill] sm:$0xff] %v8962_v10 }
 0x17e   :  { %1114 = vmatmul.bf16.gmra.mxu2 %v7461_v0  ;;  %1292 = vmatmul.bf16.gmra.mxu0 %v7461_v0  ;;  %v4314_v0 = vld [vmem:[%s11444_s8 + $0x18] sm:$0xf] }
 0x180   :  { %4459 = vperm.xlu0 %8109, %v4321_v44   ;;  %3101 = vperm.xlu2 %8111, %v2915_v59   ;;  %v4309_v44 = vld [vmem:[%s11444_s8 + $0x4] sm:$0xf]  ;;  %v4331_v59 = vld [vmem:[%s11444_s8 + $0x5c] sm:$0xf] }
 0x181   :  { %4594 = vperm.xlu1 %8110, %v4336_v60   ;;  %v4324_v60 = vld [vmem:[%s11444_s8 + $0x40] sm:$0xf] }
 0x183   :  { %v8992_v11 = vpop.permute.xlu2 %1581 }
 0x186   :  { %1203 = vmatmul.bf16.gmra.mxu3 %v7465_v61  ;;  %1381 = vmatmul.bf16.gmra.mxu1 %v7465_v61  ;;  %v8981_v61 = vpop.permute.xlu0 %1617 }
 0x188   :  { %4432 = vperm.xlu0 %8109, %v4318_v58   ;;  %3074 = vperm.xlu2 %8111, %v2912_v17   ;;  %v9000_v58 = vpop.permute.xlu1 %1725 }
 0x189   :  { %4441 = vperm.xlu1 %8110, %v4319_v18   ;;  %11471 = vst [vmem:[#allocation20_spill] sm:$0xff] %v9000_v58  ;;  %v5735_v18 = vld [vmem:[%s11446_s10 + $0x3c] sm:$0xf] }
 0x18e   :  { %1119 = vmatmul.bf16.gmra.mxu2 %v7469_v42  ;;  %1297 = vmatmul.bf16.gmra.mxu0 %v7469_v42  ;;  %v7985_v42 = vld [vmem:[%s11439_s3 + $0x74] sm:$0xf0]  ;;  %v9008_v5 = vpop.permute.xlu0 %1590 }
 0x18f   :  { %v7501_v17 = vor.u32 %v7985_v42, %v7500_v12 }
 0x190   :  { %4585 = vperm.xlu0 %8109, %v4335_v41   ;;  %4477 = vperm.xlu2 %8111, %v4323_v35   ;;  %v7984_v41 = vld [vmem:[%s11439_s3 + $0x74] sm:$0xf]  ;;  %v7502_v35 = vld [vmem:[%s11439_s3 + $0x78] sm:$0xf0]  ;;  %v9021_v29 = vpop.permute.xlu1 %1698 }
 0x191   :  { %4414 = vperm.xlu1 %8110, %v4316_v36   ;;  %v9019_v36 = vpop.permute.xlu2 %1554  ;;  %v7505_v23 = vor.u32 %v7984_v41, %v7502_v35 }
 0x196   :  { %1208 = vmatmul.bf16.gmra.mxu3 %v7473_v30  ;;  %1386 = vmatmul.bf16.gmra.mxu1 %v7473_v30  ;;  %v5734_v30 = vld [vmem:[%s11446_s10 + $0x38] sm:$0xf]  ;;  %v9038_v37 = vpop.permute.xlu0 %1743 }
 0x197   :  { %11472 = vst [vmem:[#allocation21_spill] sm:$0xff] %v9038_v37 }
 0x198   :  { %4558 = vperm.xlu0 %8109, %v4332_v52   ;;  %4450 = vperm.xlu2 %8111, %v4320_v19   ;;  %v4311_v52 = vld [vmem:[%s11444_s8 + $0xc] sm:$0xf]  ;;  %v5750_v19 = vld [vmem:[%s11446_s10 + $0x78] sm:$0xf] }
 0x199   :  { %4567 = vperm.xlu1 %8110, %v4333_v33   ;;  %v7508_v33 = vld [vmem:[%s11439_s3 + $0x80] sm:$0xf] }
 0x19e   :  { %1124 = vmatmul.bf16.gmra.mxu2 %v7477_v51  ;;  %1302 = vmatmul.bf16.gmra.mxu0 %v7477_v51  ;;  %v5733_v51 = vld [vmem:[%s11446_s10 + $0x34] sm:$0xf] }
 0x1a0   :  { %4405 = vperm.xlu0 %8109, %v4315_v20   ;;  %4603 = vperm.xlu2 %8111, %v4337_v1   ;;  %v9040_v20 = vpop.permute.xlu2 %1707 }
 0x1a1   :  { %4540 = vperm.xlu1 %8110, %v4330_v48   ;;  %v9042_v48 = vpop.permute.xlu1 %1545 }
 0x1a6   :  { %1213 = vmatmul.bf16.gmra.mxu3 %v7481_v4  ;;  %1391 = vmatmul.bf16.gmra.mxu1 %v7481_v4  ;;  %v7509_v4 = vor.u32 %v7987_v27, %v7508_v33  ;;  %v5728_v33 = vld [vmem:[%s11446_s10 + $0x20] sm:$0xf] }
 0x1a8   :  { %4378 = vperm.xlu0 %8109, %v4312_v8   ;;  %4576 = vperm.xlu2 %8111, %v4334_v62   ;;  %v7986_v8 = vld [vmem:[%s11439_s3 + $0x84] sm:$0xf]  ;;  %v7510_v62 = vld [vmem:[%s11439_s3 + $0x88] sm:$0xf0] }
 0x1a9   :  { %4387 = vperm.xlu1 %8110, %v4313_v39   ;;  %v8229_v39 = vmov 839922192   ;;  %v1519_v21 = vpop.permute.xlu1 %1518 }
 0x1aa   :  { %v1522_v40 = vunpack.c.l.s4 %v8229_v39 }
 0x1ac   :  { %v9061_v28 = vunpack.c.0.s8 %v1522_v40 }
 0x1ae   :  { %1129 = vmatmul.bf16.gmra.mxu2 %v7485_v14  ;;  %1307 = vmatmul.bf16.gmra.mxu0 %v7485_v14  ;;  %v5731_v14 = vld [vmem:[%s11446_s10 + $0x2c] sm:$0xf]  ;;  %v1632_v57 = vperm.slane %v8865_v13, %v9061_v28  ;;  %v1641_v58 = vperm.slane %v8893_v34, %v9061_v28  ;;  %v1614_v34 = vperm.slane %v8920_v46, %v9061_v28 }
 0x1b0   :  { %4531 = vperm.xlu0 %8109, %v4329_v32   ;;  %4423 = vperm.xlu2 %8111, %v4317_v56   ;;  %v7513_v32 = vor.u32 %v7986_v8, %v7510_v62 }
 0x1b1   :  { %4360 = vperm.xlu1 %8110, %v4310_v50  }
 0x1b6   :  { %1218 = vmatmul.bf16.gmra.mxu3 %v7489_v54  ;;  %1396 = vmatmul.bf16.gmra.mxu1 %v7489_v54  ;;  %v9059_v54 = vpop.permute.xlu0 %1716 }
 0x1b7   :  { %11473 = vst [vmem:[#allocation22_spill] sm:$0xff] %v9059_v54  ;;  %v1623_v54 = vperm.slane %v8981_v61, %v9061_v28 }
 0x1b8   :  { %4504 = vperm.xlu0 %8109, %v4326_v26   ;;  %4396 = vperm.xlu2 %8111, %v4314_v0   ;;  %v5730_v26 = vld [vmem:[%s11446_s10 + $0x28] sm:$0xf]  ;;  %v4325_v0 = vld [vmem:[%s11444_s8 + $0x44] sm:$0xf] }
 0x1b9   :  { %4513 = vperm.xlu1 %8110, %v4327_v7   ;;  %v5747_v7 = vld [vmem:[%s11446_s10 + $0x6c] sm:$0xf] }
 0x1be   :  { %1134 = vmatmul.bf16.gmra.mxu2 %v7493_v2  ;;  %1312 = vmatmul.bf16.gmra.mxu0 %v7493_v2  ;;  %v9063_v2 = vpop.permute.xlu2 %1680 }
 0x1c0   :  { %4351 = vperm.xlu0 %8109, %v4309_v44   ;;  %4549 = vperm.xlu2 %8111, %v4331_v59   ;;  %v1524_v44 = vperm.slane %v1519_v21, %v9061_v28 }
 0x1c1   :  { %4486 = vperm.xlu1 %8110, %v4324_v60  }
 0x1c6   :  { %1223 = vmatmul.bf16.gmra.mxu3 %v7497_v16  ;;  %1401 = vmatmul.bf16.gmra.mxu1 %v7497_v16  ;;  %v7989_v16 = vld [vmem:[%s11439_s3 + $0x94] sm:$0xf0]  ;;  %v1528_v27 = vpop.permute.xlu2 %1527 }
 0x1c7   :  { %v7517_v42 = vor.u32 %v7989_v16, %v7516_v9 }
 0x1c8   :  { %5889 = vperm.xlu0 %8109, %v5735_v18   ;;  %4522 = vperm.xlu2 %8111, %v4328_v3   ;;  %v9081_v3 = vpop.permute.xlu0 %1563 }
 0x1c9   :  { %5880 = vperm.xlu1 %8110, %v5734_v30   ;;  %v1868_v30 = vunpack.c.l.bf16 %v1524_v44  ;;  %v5744_v44 = vld [vmem:[%s11446_s10 + $0x60] sm:$0xf] }
 0x1ce   :  { %1139 = vmatmul.bf16.gmra.mxu2 %v7501_v17  ;;  %1317 = vmatmul.bf16.gmra.mxu0 %v7501_v17 }
 0x1d0   :  { %5871 = vperm.xlu0 %8109, %v5733_v51   ;;  %4369 = vperm.xlu2 %8111, %v4311_v52   ;;  %v5751_v51 = vld [vmem:[%s11446_s10 + $0x7c] sm:$0xf]  ;;  %v1537_v21 = vpop.permute.xlu0 %1536 }
 0x1d1   :  { %6024 = vperm.xlu1 %8110, %v5750_v19  }
 0x1d6   :  { %1228 = vmatmul.bf16.gmra.mxu3 %v7505_v23  ;;  %1406 = vmatmul.bf16.gmra.mxu1 %v7505_v23  ;;  %v5746_v23 = vld [vmem:[%s11446_s10 + $0x68] sm:$0xf] }
 0x1d8   :  { %6015 = vperm.xlu0 %8109, %v5749_v15   ;;  %4342 = vperm.xlu2 %8111, %v4308_v45   ;;  %v1533_v15 = vperm.slane %v1528_v27, %v9061_v28 }
 0x1d9   :  { %5853 = vperm.xlu1 %8110, %v5731_v14  }
 0x1db   :  { %v1283_v1 = vpop.f32.mrf.mxu0 }
 0x1de   :  { %1144 = vmatmul.bf16.gmra.mxu2 %v7509_v4  ;;  %1322 = vmatmul.bf16.gmra.mxu0 %v7509_v4  ;;  %v7988_v4 = vld [vmem:[%s11439_s3 + $0x94] sm:$0xf] }
 0x1e0   :  { %5844 = vperm.xlu0 %8109, %v5730_v26   ;;  %4495 = vperm.xlu2 %8111, %v4325_v0   ;;  %v5727_v0 = vld [vmem:[%s11446_s10 + $0x1c] sm:$0xf] }
 0x1e1   :  { %v1105_v43 = vpop.f32.mrf.mxu2  ;;  %5997 = vperm.xlu1 %8110, %v5747_v7   ;;  %v5732_v7 = vld [vmem:[%s11446_s10 + $0x30] sm:$0xf] }
 0x1e3   :  { %v1372_v56 = vpop.f32.mrf.mxu1  ;;  %v1285_v50 = vpop.f32.mrf.mxu0 }
 0x1e4   :  { %v1373_v24 = vadd.f32 %v1372_v56, %v1283_v1  ;;  %v7518_v1 = vld [vmem:[%s11439_s3 + $0x98] sm:$0xf0] }
 0x1e5   :  { %v7521_v40 = vor.u32 %v7988_v4, %v7518_v1 }
 0x1e6   :  { %1233 = vmatmul.bf16.gmra.mxu3 %v7513_v32  ;;  %1411 = vmatmul.bf16.gmra.mxu1 %v7513_v32 }
 0x1e8   :  { %5988 = vperm.xlu0 %8109, %v5746_v23   ;;  %6033 = vperm.xlu2 %8111, %v5751_v51  }
 0x1e9   :  { %v1107_v59 = vpop.f32.mrf.mxu2  ;;  %v1194_v60 = vpop.f32.mrf.mxu3  ;;  %5826 = vperm.xlu1 %8110, %v5728_v33  }
 0x1ea   :  { %v1195_v12 = vadd.f32 %v1194_v60, %v1105_v43  ;;  %v7524_v60 = vld [vmem:[%s11439_s3 + $0xa0] sm:$0xf] }
 0x1eb   :  { %v1374_v17 = vpop.f32.mrf.mxu1  ;;  %v1288_v18 = vpop.f32.mrf.mxu0 }
 0x1ec   :  { %v1452_v41 = vpack.c.bf16 %v1373_v24, %v1195_v12  ;;  %v1375_v35 = vadd.f32 %v1374_v17, %v1285_v50  ;;  %v1869_v50 = vunpack.c.l.bf16 %v1533_v15  ;;  %v7991_v12 = vld [vmem:[%s11439_s3 + $0xa4] sm:$0xf0] }
 0x1ee   :  { %v1804_v52 = vunpack.c.l.bf16 %v1452_v41  ;;  %v1805_v19 = vunpack.c.h.bf16 %v1452_v41  ;;  %1149 = vmatmul.bf16.gmra.mxu2 %v7517_v42  ;;  %1327 = vmatmul.bf16.gmra.mxu0 %v7517_v42 }
 0x1f0   :  { %v1900_v45 = vadd.f32 %v1868_v30, %v1804_v52  ;;  %v1901_v14 = vadd.f32 %v1868_v30, %v1805_v19  ;;  %5817 = vperm.xlu0 %8109, %v5727_v0   ;;  %5862 = vperm.xlu2 %8111, %v5732_v7   ;;  %v7525_v52 = vor.u32 %v7991_v12, %v7524_v60  ;;  %v7526_v0 = vld [vmem:[%s11439_s3 + $0xa8] sm:$0xf0] }
 0x1f1   :  { %v1110_v8 = vpop.f32.mrf.mxu2  ;;  %v1196_v62 = vpop.f32.mrf.mxu3  ;;  %5970 = vperm.xlu1 %8110, %v5744_v44  }
 0x1f2   :  { %v1197_v39 = vadd.f32 %v1196_v62, %v1107_v59  ;;  %v1964_v43 = vpack.c.bf16 %v1901_v14, %v1900_v45  ;;  %v1542_v59 = vperm.slane %v1537_v21, %v9061_v28  ;;  %v5743_v62 = vld [vmem:[%s11446_s10 + $0x5c] sm:$0xf] }
 0x1f3   :  { %v1377_v32 = vpop.f32.mrf.mxu1  ;;  %v1290_v56 = vpop.f32.mrf.mxu0 }
 0x1f4   :  { %v1453_v24 = vpack.c.bf16 %v1375_v35, %v1197_v39  ;;  %v1378_v26 = vadd.f32 %v1377_v32, %v1288_v18  ;;  %v1996_v42 = vunpack.c.l.bf16 %v1964_v43  ;;  %v1997_v35 = vunpack.c.h.bf16 %v1964_v43  ;;  %v5748_v39 = vld [vmem:[%s11446_s10 + $0x70] sm:$0xf]  ;;  %v5725_v32 = vld [vmem:[%s11446_s10 + $0x14] sm:$0xf] }
 0x1f5   :  { %v1870_v19 = vunpack.c.l.bf16 %v1542_v59 }
 0x1f6   :  { %v1806_v9 = vunpack.c.l.bf16 %v1453_v24  ;;  %v1807_v16 = vunpack.c.h.bf16 %v1453_v24  ;;  %1238 = vmatmul.bf16.gmra.mxu3 %v7521_v40  ;;  %1416 = vmatmul.bf16.gmra.mxu1 %v7521_v40  ;;  %v2060_v4 = vmul.f32 0.010009766, %v1996_v42  ;;  %v2061_v40 = vmul.f32 0.010009766, %v1997_v35 }
 0x1f7   :  { %v1551_v24 = vperm.slane %v9042_v48, %v9061_v28 }
 0x1f8   :  { %v1902_v17 = vadd.f32 %v1869_v50, %v1806_v9  ;;  %v1903_v18 = vadd.f32 %v1869_v50, %v1807_v16  ;;  %v9132_v7 = vmax.f32 %v1996_v42, %v2060_v4  ;;  %5961 = vperm.xlu0 %8109, %v5743_v62   ;;  %6006 = vperm.xlu2 %8111, %v5748_v39  }
 0x1f9   :  { %v1112_v30 = vpop.f32.mrf.mxu2  ;;  %v1199_v41 = vpop.f32.mrf.mxu3  ;;  %5799 = vperm.xlu1 %8110, %v5725_v32   ;;  %v9136_v48 = vmax.f32 %v1997_v35, %v2061_v40  ;;  %v5724_v35 = vld [vmem:[%s11446_s10 + $0x10] sm:$0xf] }
 0x1fa   :  { %v1965_v23 = vpack.c.bf16 %v1903_v18, %v1902_v17  ;;  %v1200_v51 = vadd.f32 %v1199_v41, %v1110_v8 }
 0x1fb   :  { %v1379_v33 = vpop.f32.mrf.mxu1  ;;  %v1293_v27 = vpop.f32.mrf.mxu0  ;;  %11474 = vst [vmem:[#allocation23_spill] sm:$0xff] %v9136_v48 }
 0x1fc   :  { %v1454_v1 = vpack.c.bf16 %v1378_v26, %v1200_v51  ;;  %v1380_v15 = vadd.f32 %v1379_v33, %v1290_v56  ;;  %v1998_v45 = vunpack.c.l.bf16 %v1965_v23  ;;  %v1999_v14 = vunpack.c.h.bf16 %v1965_v23  ;;  %v7990_v26 = vld [vmem:[%s11439_s3 + $0xa4] sm:$0xf] }
 0x1fd   :  { %v7529_v17 = vor.u32 %v7990_v26, %v7526_v0 }
 0x1fe   :  { %v1808_v43 = vunpack.c.l.bf16 %v1454_v1  ;;  %v1809_v8 = vunpack.c.h.bf16 %v1454_v1  ;;  %1154 = vmatmul.bf16.gmra.mxu2 %v7525_v52  ;;  %1332 = vmatmul.bf16.gmra.mxu0 %v7525_v52  ;;  %v2062_v56 = vmul.f32 0.010009766, %v1998_v45  ;;  %v2063_v50 = vmul.f32 0.010009766, %v1999_v14 }
 0x1ff   :  { %v1871_v52 = vunpack.c.l.bf16 %v1551_v24 }
 0x200   :  { %v1904_v21 = vadd.f32 %v1870_v19, %v1808_v43  ;;  %v1905_v9 = vadd.f32 %v1870_v19, %v1809_v8  ;;  %v9134_v16 = vmax.f32 %v1998_v45, %v2062_v56  ;;  %v9138_v60 = vmax.f32 %v1999_v14, %v2063_v50  ;;  %v5741_v45 = vld [vmem:[%s11446_s10 + $0x54] sm:$0xf]  ;;  %v7993_v14 = vld [vmem:[%s11439_s3 + $0xb4] sm:$0xf0]  ;;  %5790 = vperm.xlu0 %8109, %v5724_v35  }
 0x201   :  { %v1115_v44 = vpop.f32.mrf.mxu2  ;;  %v1201_v59 = vpop.f32.mrf.mxu3  ;;  %5943 = vperm.xlu1 %8110, %v5741_v45  }
 0x202   :  { %11475 = vst [vmem:[#allocation24_spill] sm:$0xff] %v9138_v60  ;;  %v1202_v12 = vadd.f32 %v1201_v59, %v1112_v30  ;;  %v1966_v42 = vpack.c.bf16 %v1905_v9, %v1904_v21  ;;  %v5729_v30 = vld [vmem:[%s11446_s10 + $0x24] sm:$0xf] }
 0x203   :  { %v1382_v41 = vpop.f32.mrf.mxu1  ;;  %v1295_v23 = vpop.f32.mrf.mxu0  ;;  %5835 = vperm.xlu2 %8111, %v5729_v30   ;;  %v1569_v30 = vperm.slane %v9081_v3, %v9061_v28 }
 0x204   :  { %v1455_v19 = vpack.c.bf16 %v1380_v15, %v1202_v12  ;;  %v1383_v33 = vadd.f32 %v1382_v41, %v1293_v27  ;;  %v1560_v15 = vperm.slane %v9019_v36, %v9061_v28  ;;  %v7532_v27 = vld [vmem:[%s11439_s3 + $0xb0] sm:$0xf]  ;;  %v2000_v62 = vunpack.c.l.bf16 %v1966_v42 }
 0x205   :  { %v2001_v32 = vunpack.c.h.bf16 %v1966_v42  ;;  %v7533_v36 = vor.u32 %v7993_v14, %v7532_v27  ;;  %v5740_v41 = vld [vmem:[%s11446_s10 + $0x50] sm:$0xf] }
 0x206   :  { %v1810_v4 = vunpack.c.l.bf16 %v1455_v19  ;;  %v1811_v1 = vunpack.c.h.bf16 %v1455_v19  ;;  %1243 = vmatmul.bf16.gmra.mxu3 %v7529_v17  ;;  %1421 = vmatmul.bf16.gmra.mxu1 %v7529_v17  ;;  %v1872_v24 = vunpack.c.l.bf16 %v1560_v15  ;;  %v2064_v21 = vmul.f32 0.010009766, %v2000_v62 }
 0x207   :  { %v2065_v42 = vmul.f32 0.010009766, %v2001_v32 }
 0x208   :  { %v1906_v39 = vadd.f32 %v1871_v52, %v1810_v4  ;;  %v1907_v40 = vadd.f32 %v1871_v52, %v1811_v1  ;;  %v5745_v52 = vld [vmem:[%s11446_s10 + $0x64] sm:$0xf]  ;;  %v7992_v4 = vld [vmem:[%s11439_s3 + $0xb4] sm:$0xf]  ;;  %v7534_v1 = vld [vmem:[%s11439_s3 + $0xb8] sm:$0xf0]  ;;  %v9178_v45 = vmax.f32 %v2000_v62, %v2064_v21  ;;  %5934 = vperm.xlu0 %8109, %v5740_v41  }
 0x209   :  { %v1117_v43 = vpop.f32.mrf.mxu2  ;;  %v1204_v8 = vpop.f32.mrf.mxu3  ;;  %v9182_v3 = vmax.f32 %v2001_v32, %v2065_v42  ;;  %v5721_v32 = vld [vmem:[%s11446_s10 + $0x4] sm:$0xf]  ;;  %v5738_v42 = vld [vmem:[%s11446_s10 + $0x48] sm:$0xf] }
 0x20a   :  { %v1967_v56 = vpack.c.bf16 %v1907_v40, %v1906_v39  ;;  %v1205_v50 = vadd.f32 %v1204_v8, %v1115_v44 }
 0x20b   :  { %v1384_v26 = vpop.f32.mrf.mxu1  ;;  %v1298_v0 = vpop.f32.mrf.mxu0  ;;  %5979 = vperm.xlu2 %8111, %v5745_v52  }
 0x20c   :  { %v1456_v9 = vpack.c.bf16 %v1383_v33, %v1205_v50  ;;  %v1385_v59 = vadd.f32 %v1384_v26, %v1295_v23  ;;  %v2002_v12 = vunpack.c.l.bf16 %v1967_v56  ;;  %v2003_v17 = vunpack.c.h.bf16 %v1967_v56  ;;  %v5722_v33 = vld [vmem:[%s11446_s10 + $0x8] sm:$0xf] }
 0x20d   :  { %5772 = vperm.xlu1 %8110, %v5722_v33   ;;  %v7537_v50 = vor.u32 %v7992_v4, %v7534_v1 }
 0x20e   :  { %v1812_v19 = vunpack.c.l.bf16 %v1456_v9  ;;  %v1813_v44 = vunpack.c.h.bf16 %v1456_v9  ;;  %1159 = vmatmul.bf16.gmra.mxu2 %v7533_v36  ;;  %1337 = vmatmul.bf16.gmra.mxu0 %v7533_v36  ;;  %v2066_v23 = vmul.f32 0.010009766, %v2002_v12  ;;  %v2067_v35 = vmul.f32 0.010009766, %v2003_v17 }
 0x20f   :  { %v1873_v9 = vunpack.c.l.bf16 %v1569_v30 }
 0x210   :  { %v1908_v15 = vadd.f32 %v1872_v24, %v1812_v19  ;;  %v1909_v27 = vadd.f32 %v1872_v24, %v1813_v44  ;;  %v9180_v14 = vmax.f32 %v2002_v12, %v2066_v23  ;;  %v9184_v8 = vmax.f32 %v2003_v17, %v2067_v35  ;;  %v7995_v19 = vld [vmem:[%s11439_s3 + $0xc4] sm:$0xf0]  ;;  %5763 = vperm.xlu0 %8109, %v5721_v32   ;;  %v5742_v32 = vld [vmem:[%s11446_s10 + $0x58] sm:$0xf] }
 0x211   :  { %v1120_v39 = vpop.f32.mrf.mxu2  ;;  %v1206_v40 = vpop.f32.mrf.mxu3 }
 0x212   :  { %v1207_v56 = vadd.f32 %v1206_v40, %v1117_v43  ;;  %v1968_v62 = vpack.c.bf16 %v1909_v27, %v1908_v15  ;;  %v5726_v43 = vld [vmem:[%s11446_s10 + $0x18] sm:$0xf] }
 0x213   :  { %v1387_v26 = vpop.f32.mrf.mxu1  ;;  %v1300_v21 = vpop.f32.mrf.mxu0  ;;  %5808 = vperm.xlu2 %8111, %v5726_v43  }
 0x214   :  { %v1457_v12 = vpack.c.bf16 %v1385_v59, %v1207_v56  ;;  %v1388_v41 = vadd.f32 %v1387_v26, %v1298_v0  ;;  %v1578_v59 = vperm.slane %v8973_v38, %v9061_v28  ;;  %v7540_v0 = vld [vmem:[%s11439_s3 + $0xc0] sm:$0xf]  ;;  %v2004_v44 = vunpack.c.l.bf16 %v1968_v62 }
 0x215   :  { %5916 = vperm.xlu1 %8110, %v5738_v42   ;;  %v2005_v4 = vunpack.c.h.bf16 %v1968_v62  ;;  %v7541_v38 = vor.u32 %v7995_v19, %v7540_v0  ;;  %v7994_v42 = vld [vmem:[%s11439_s3 + $0xc4] sm:$0xf] }
 0x216   :  { %v1814_v17 = vunpack.c.l.bf16 %v1457_v12  ;;  %v1815_v52 = vunpack.c.h.bf16 %v1457_v12  ;;  %1248 = vmatmul.bf16.gmra.mxu3 %v7537_v50  ;;  %1426 = vmatmul.bf16.gmra.mxu1 %v7537_v50  ;;  %v1874_v27 = vunpack.c.l.bf16 %v1578_v59  ;;  %v2068_v50 = vmul.f32 0.010009766, %v2004_v44  ;;  %v7542_v59 = vld [vmem:[%s11439_s3 + $0xc8] sm:$0xf0] }
 0x217   :  { %v2069_v62 = vmul.f32 0.010009766, %v2005_v4 }
 0x218   :  { %v1910_v33 = vadd.f32 %v1873_v9, %v1814_v17  ;;  %v1911_v23 = vadd.f32 %v1873_v9, %v1815_v52  ;;  %v5737_v9 = vld [vmem:[%s11446_s10 + $0x44] sm:$0xf]  ;;  %v1587_v52 = vperm.slane %v8992_v11, %v9061_v28  ;;  %v9224_v0 = vmax.f32 %v2004_v44, %v2068_v50 }
 0x219   :  { %v1122_v35 = vpop.f32.mrf.mxu2  ;;  %v1209_v30 = vpop.f32.mrf.mxu3  ;;  %5907 = vperm.xlu0 %8109, %v5737_v9   ;;  %v9228_v11 = vmax.f32 %v2005_v4, %v2069_v62  ;;  %v7548_v62 = vld [vmem:[%s11439_s3 + $0xd0] sm:$0xf] }
 0x21a   :  { %v1969_v1 = vpack.c.bf16 %v1911_v23, %v1910_v33  ;;  %v1210_v15 = vadd.f32 %v1209_v30, %v1120_v39 }
 0x21b   :  { %v1389_v40 = vpop.f32.mrf.mxu1  ;;  %v1303_v56 = vpop.f32.mrf.mxu0  ;;  %5952 = vperm.xlu2 %8111, %v5742_v32  }
 0x21c   :  { %v1458_v26 = vpack.c.bf16 %v1388_v41, %v1210_v15  ;;  %v1390_v12 = vadd.f32 %v1389_v40, %v1300_v21  ;;  %v2006_v51 = vunpack.c.l.bf16 %v1969_v1  ;;  %v2007_v18 = vunpack.c.h.bf16 %v1969_v1  ;;  %v5736_v41 = vld [vmem:[%s11446_s10 + $0x40] sm:$0xf] }
 0x21d   :  { %5898 = vperm.xlu1 %8110, %v5736_v41   ;;  %v7545_v40 = vor.u32 %v7994_v42, %v7542_v59 }
 0x21e   :  { %v1816_v43 = vunpack.c.l.bf16 %v1458_v26  ;;  %v1817_v39 = vunpack.c.h.bf16 %v1458_v26  ;;  %1164 = vmatmul.bf16.gmra.mxu2 %v7541_v38  ;;  %1342 = vmatmul.bf16.gmra.mxu0 %v7541_v38  ;;  %v2070_v21 = vmul.f32 0.010009766, %v2006_v51  ;;  %v2071_v17 = vmul.f32 0.010009766, %v2007_v18  ;;  %v8001_v26 = vld [vmem:[%s11439_s3 + $0xf4] sm:$0xf0] }
 0x220   :  { %v1912_v19 = vadd.f32 %v1874_v27, %v1816_v43  ;;  %v1913_v33 = vadd.f32 %v1874_v27, %v1817_v39  ;;  %v9226_v23 = vmax.f32 %v2006_v51, %v2070_v21  ;;  %v9230_v15 = vmax.f32 %v2007_v18, %v2071_v17  ;;  %v5723_v18 = vld [vmem:[%s11446_s10 + $0xc] sm:$0xf]  ;;  %v7997_v39 = vld [vmem:[%s11439_s3 + $0xd4] sm:$0xf0] }
 0x221   :  { %v1125_v30 = vpop.f32.mrf.mxu2  ;;  %v1211_v1 = vpop.f32.mrf.mxu3  ;;  %v1875_v27 = vunpack.c.l.bf16 %v1587_v52 }
 0x222   :  { %v1212_v38 = vadd.f32 %v1211_v1, %v1122_v35  ;;  %v1970_v44 = vpack.c.bf16 %v1913_v33, %v1912_v19  ;;  %v7549_v19 = vor.u32 %v7997_v39, %v7548_v62 }
 0x223   :  { %v1392_v50 = vpop.f32.mrf.mxu1  ;;  %v9234_v43 = vpop.f32.mrf.mxu0  ;;  %5781 = vperm.xlu2 %8111, %v5723_v18  }
 0x224   :  { %v1459_v9 = vpack.c.bf16 %v1390_v12, %v1212_v38  ;;  %v1393_v32 = vadd.f32 %v1392_v50, %v1303_v56  ;;  %v2008_v41 = vunpack.c.l.bf16 %v1970_v44  ;;  %v2009_v56 = vunpack.c.h.bf16 %v1970_v44  ;;  %v5739_v44 = vld [vmem:[%s11446_s10 + $0x4c] sm:$0xf] }
 0x226   :  { %v1818_v4 = vunpack.c.l.bf16 %v1459_v9  ;;  %v1819_v35 = vunpack.c.h.bf16 %v1459_v9  ;;  %1253 = vmatmul.bf16.gmra.mxu3 %v7545_v40  ;;  %1431 = vmatmul.bf16.gmra.mxu1 %v7545_v40  ;;  %v2072_v38 = vmul.f32 0.010009766, %v2008_v41  ;;  %v2073_v24 = vmul.f32 0.010009766, %v2009_v56 }
 0x228   :  { %v1914_v21 = vadd.f32 %v1875_v27, %v1818_v4  ;;  %v1915_v12 = vadd.f32 %v1875_v27, %v1819_v35  ;;  %v9264_v4 = vmax.f32 %v2008_v41, %v2072_v38  ;;  %v9268_v62 = vmax.f32 %v2009_v56, %v2073_v24  ;;  %v5720_v24 = vld [vmem:[%s11446_s10] sm:$0xf]  ;;  %v7999_v56 = vld [vmem:[%s11439_s3 + $0xe4] sm:$0xf0] }
 0x229   :  { %v9247_v17 = vpop.f32.mrf.mxu2  ;;  %v1214_v52 = vpop.f32.mrf.mxu3  ;;  %v7556_v41 = vld [vmem:[%s11439_s3 + $0xe0] sm:$0xf] }
 0x22a   :  { %v1971_v42 = vpack.c.bf16 %v1915_v12, %v1914_v21  ;;  %v1215_v59 = vadd.f32 %v1214_v52, %v1125_v30  ;;  %v7996_v30 = vld [vmem:[%s11439_s3 + $0xd4] sm:$0xf] }
 0x22b   :  { %v9249_v33 = vpop.f32.mrf.mxu1  ;;  %v9251_v1 = vpop.f32.mrf.mxu0  ;;  %5925 = vperm.xlu2 %8111, %v5739_v44  }
 0x22c   :  { %v9253_v40 = vpack.c.bf16 %v1393_v32, %v1215_v59  ;;  %v2010_v50 = vunpack.c.l.bf16 %v1971_v42  ;;  %v2011_v9 = vunpack.c.h.bf16 %v1971_v42  ;;  %v7550_v32 = vld [vmem:[%s11439_s3 + $0xd8] sm:$0xf0] }
 0x22d   :  { %v7553_v52 = vor.u32 %v7996_v30, %v7550_v32  ;;  %v6618_v30 = vld [vmem:[%s11448_s12] sm:$0xff] }
 0x22e   :  { %1169 = vmatmul.bf16.gmra.mxu2 %v7549_v19  ;;  %1347 = vmatmul.bf16.gmra.mxu0 %v7549_v19  ;;  %v2074_v27 = vmul.f32 0.010009766, %v2010_v50  ;;  %v2075_v18 = vmul.f32 0.010009766, %v2011_v9  ;;  %v7998_v32 = vld [vmem:[%s11439_s3 + $0xe4] sm:$0xf] }
 0x230   :  { %v9266_v35 = vmax.f32 %v2010_v50, %v2074_v27  ;;  %v9270_v39 = vmax.f32 %v2011_v9, %v2075_v18  ;;  %v7557_v9 = vor.u32 %v7999_v56, %v7556_v41 }
 0x231   :  { %v1130_v21 = vpop.f32.mrf.mxu2  ;;  %v9272_v12 = vpop.f32.mrf.mxu3 }
 0x233   :  { %v1397_v19 = vpop.f32.mrf.mxu1  ;;  %v9278_v44 = vpop.f32.mrf.mxu0  ;;  %5754 = vperm.xlu2 %8111, %v5720_v24  }
 0x236   :  { %1258 = vmatmul.bf16.gmra.mxu3 %v7553_v52  ;;  %1436 = vmatmul.bf16.gmra.mxu1 %v7553_v52  ;;  %v7558_v52 = vld [vmem:[%s11439_s3 + $0xe8] sm:$0xf0] }
 0x237   :  { %v7561_v41 = vor.u32 %v7998_v32, %v7558_v52  ;;  %v8000_v32 = vld [vmem:[%s11439_s3 + $0xf4] sm:$0xf]  ;;  %v7566_v52 = vld [vmem:[%s11439_s3 + $0xf8] sm:$0xf0] }
 0x238   :  { %v7569_v47 = vor.u32 %v8000_v32, %v7566_v52 }
 0x239   :  { %v1132_v38 = vpop.f32.mrf.mxu2  ;;  %v1219_v50 = vpop.f32.mrf.mxu3 }
 0x23a   :  { %v1220_v48 = vadd.f32 %v1219_v50, %v1130_v21 }
 0x23b   :  { %v1399_v27 = vpop.f32.mrf.mxu1  ;;  %v1313_v18 = vpop.f32.mrf.mxu0  ;;  %6621 = vperm.xlu2 %8111, %v6618_v30  }
 0x23e   :  { %1174 = vmatmul.bf16.gmra.mxu2 %v7557_v9  ;;  %1352 = vmatmul.bf16.gmra.mxu0 %v7557_v9  ;;  %v7564_v9 = vld [vmem:[%s11439_s3 + $0xf0] sm:$0xf] }
 0x23f   :  { %v7565_v6 = vor.u32 %v8001_v26, %v7564_v9  ;;  %v1650_v26 = vperm.slane %v8909_v55, %v9061_v28  ;;  %v1659_v9 = vperm.slane %v8939_v53, %v9061_v28  ;;  %v1398_v55 = vadd.f32 %v1397_v19, %v9251_v1 }
 0x240   :  { %v1596_v1 = vperm.slane %v9008_v5, %v9061_v28  ;;  %v1879_v19 = vunpack.c.l.bf16 %v1623_v54 }
 0x241   :  { %v1135_v24 = vpop.f32.mrf.mxu2  ;;  %v1221_v36 = vpop.f32.mrf.mxu3  ;;  %v9321_v60 = vunpack.c.l.bf16 %v1659_v9 }
 0x242   :  { %v1222_v53 = vadd.f32 %v1221_v36, %v1132_v38  ;;  %v1605_v36 = vperm.slane %v8943_v31, %v9061_v28  ;;  %v1462_v38 = vpack.c.bf16 %v1398_v55, %v1220_v48 }
 0x243   :  { %v1402_v56 = vpop.f32.mrf.mxu1  ;;  %v1315_v51 = vpop.f32.mrf.mxu0 }
 0x244   :  { %v1403_v37 = vadd.f32 %v1402_v56, %v1313_v18  ;;  %v1824_v9 = vunpack.c.l.bf16 %v1462_v38 }
 0x246   :  { %1263 = vmatmul.bf16.gmra.mxu3 %v7561_v41  ;;  %1441 = vmatmul.bf16.gmra.mxu1 %v7561_v41 }
 0x249   :  { %v1137_v59 = vpop.f32.mrf.mxu2  ;;  %v1224_v42 = vpop.f32.mrf.mxu3 }
 0x24a   :  { %v1225_v10 = vadd.f32 %v1224_v42, %v1135_v24  ;;  %v1880_v42 = vunpack.c.l.bf16 %v1632_v57  ;;  %v1881_v24 = vunpack.c.l.bf16 %v1641_v58  ;;  %v1217_v57 = vadd.f32 %v9272_v12, %v9247_v17 }
 0x24b   :  { %v1404_v22 = vpop.f32.mrf.mxu1  ;;  %v1318_v30 = vpop.f32.mrf.mxu0  ;;  %v1395_v58 = vadd.f32 %v9249_v33, %v9234_v43 }
 0x24c   :  { %v1405_v32 = vadd.f32 %v1404_v22, %v1315_v51  ;;  %v1400_v22 = vadd.f32 %v1399_v27, %v9278_v44 }
 0x24d   :  { %v1461_v54 = vpack.c.bf16 %v1395_v58, %v1217_v57 }
 0x24e   :  { %1179 = vmatmul.bf16.gmra.mxu2 %v7565_v6  ;;  %1357 = vmatmul.bf16.gmra.mxu0 %v7565_v6  ;;  %v1463_v50 = vpack.c.bf16 %v1400_v22, %v1222_v53  ;;  %v1820_v22 = vunpack.c.l.bf16 %v9253_v40 }
 0x250   :  { %v1827_v17 = vunpack.c.h.bf16 %v1463_v50 }
 0x251   :  { %v1140_v41 = vpop.f32.mrf.mxu2  ;;  %v1226_v63 = vpop.f32.mrf.mxu3 }
 0x252   :  { %v1227_v6 = vadd.f32 %v1226_v63, %v1137_v59 }
 0x253   :  { %v1407_v25 = vpop.f32.mrf.mxu1  ;;  %v1320_v49 = vpop.f32.mrf.mxu0 }
 0x254   :  { %v1408_v52 = vadd.f32 %v1407_v25, %v1318_v30  ;;  %v1465_v13 = vpack.c.bf16 %v1405_v32, %v1227_v6  ;;  %v1464_v25 = vpack.c.bf16 %v1403_v37, %v1225_v10  ;;  %v1878_v37 = vunpack.c.l.bf16 %v1614_v34 }
 0x255   :  { %v1877_v30 = vunpack.c.l.bf16 %v1605_v36  ;;  %v1826_v6 = vunpack.c.l.bf16 %v1463_v50  ;;  %v1923_v50 = vadd.f32 %v1879_v19, %v1827_v17 }
 0x256   :  { %1268 = vmatmul.bf16.gmra.mxu3 %v7569_v47  ;;  %1446 = vmatmul.bf16.gmra.mxu1 %v7569_v47  ;;  %v1882_v47 = vunpack.c.l.bf16 %v1650_v26  ;;  %v1830_v46 = vunpack.c.l.bf16 %v1465_v13  ;;  %v1831_v56 = vunpack.c.h.bf16 %v1465_v13  ;;  %v1828_v27 = vunpack.c.l.bf16 %v1464_v25 }
 0x257   :  { %v1829_v31 = vunpack.c.h.bf16 %v1464_v25  ;;  %v1922_v57 = vadd.f32 %v1879_v19, %v1826_v6 }
 0x258   :  { %v1926_v32 = vadd.f32 %v1881_v24, %v1830_v46  ;;  %v1924_v13 = vadd.f32 %v1880_v42, %v1828_v27 }
 0x259   :  { %v1142_v63 = vpop.f32.mrf.mxu2  ;;  %v1229_v59 = vpop.f32.mrf.mxu3 }
 0x25a   :  { %v1230_v18 = vadd.f32 %v1229_v59, %v1140_v41  ;;  %v1876_v41 = vunpack.c.l.bf16 %v1596_v1  ;;  %v1825_v59 = vunpack.c.h.bf16 %v1462_v38  ;;  %v1822_v1 = vunpack.c.l.bf16 %v1461_v54 }
 0x25b   :  { %v1409_v51 = vpop.f32.mrf.mxu1  ;;  %v1323_v61 = vpop.f32.mrf.mxu0 }
 0x25c   :  { %v1466_v21 = vpack.c.bf16 %v1408_v52, %v1230_v18  ;;  %v1927_v52 = vadd.f32 %v1881_v24, %v1831_v56  ;;  %v1410_v55 = vadd.f32 %v1409_v51, %v1320_v49  ;;  %v1925_v18 = vadd.f32 %v1880_v42, %v1829_v31 }
 0x25d   :  { %v1920_v51 = vadd.f32 %v1878_v37, %v1824_v9  ;;  %v1921_v38 = vadd.f32 %v1878_v37, %v1825_v59  ;;  %v1916_v56 = vadd.f32 %v1876_v41, %v1820_v22  ;;  %v1918_v27 = vadd.f32 %v1877_v30, %v1822_v1 }
 0x25e   :  { %v1832_v44 = vunpack.c.l.bf16 %v1466_v21  ;;  %v1833_v10 = vunpack.c.h.bf16 %v1466_v21  ;;  %v1823_v21 = vunpack.c.h.bf16 %v1461_v54  ;;  %v1977_v24 = vpack.c.bf16 %v1927_v52, %v1926_v32 }
 0x25f   :  { %v1976_v42 = vpack.c.bf16 %v1925_v18, %v1924_v13  ;;  %v1975_v31 = vpack.c.bf16 %v1923_v50, %v1922_v57  ;;  %v1974_v37 = vpack.c.bf16 %v1921_v38, %v1920_v51 }
 0x260   :  { %v1928_v5 = vadd.f32 %v1882_v47, %v1832_v44  ;;  %v1929_v26 = vadd.f32 %v1882_v47, %v1833_v10  ;;  %v1821_v47 = vunpack.c.h.bf16 %v9253_v40  ;;  %v2022_v6 = vunpack.c.l.bf16 %v1977_v24 }
 0x261   :  { %v1145_v48 = vpop.f32.mrf.mxu2  ;;  %v1231_v12 = vpop.f32.mrf.mxu3  ;;  %v2023_v9 = vunpack.c.h.bf16 %v1977_v24  ;;  %v2020_v52 = vunpack.c.l.bf16 %v1976_v42  ;;  %v2018_v18 = vunpack.c.l.bf16 %v1975_v31  ;;  %v2017_v57 = vunpack.c.h.bf16 %v1974_v37 }
 0x262   :  { %v1232_v53 = vadd.f32 %v1231_v12, %v1142_v63  ;;  %v1978_v43 = vpack.c.bf16 %v1929_v26, %v1928_v5  ;;  %v1917_v40 = vadd.f32 %v1876_v41, %v1821_v47  ;;  %v2086_v22 = vmul.f32 0.010009766, %v2022_v6 }
 0x263   :  { %v1412_v33 = vpop.f32.mrf.mxu1  ;;  %v9334_v34 = vpop.f32.mrf.mxu0  ;;  %v2087_v47 = vmul.f32 0.010009766, %v2023_v9  ;;  %v2082_v38 = vmul.f32 0.010009766, %v2018_v18 }
 0x264   :  { %v1467_v25 = vpack.c.bf16 %v1410_v55, %v1232_v53  ;;  %v1413_v36 = vadd.f32 %v1412_v33, %v1323_v61  ;;  %v2024_v46 = vunpack.c.l.bf16 %v1978_v43  ;;  %v2025_v44 = vunpack.c.h.bf16 %v1978_v43 }
 0x265   :  { %v1919_v61 = vadd.f32 %v1877_v30, %v1823_v21  ;;  %v2021_v55 = vunpack.c.h.bf16 %v1976_v42  ;;  %v9346_v59 = vpack.c.bf16 %v1917_v40, %v1916_v56  ;;  %v2019_v43 = vunpack.c.h.bf16 %v1975_v31 }
 0x266   :  { %v1834_v49 = vunpack.c.l.bf16 %v1467_v25  ;;  %v1835_v63 = vunpack.c.h.bf16 %v1467_v25  ;;  %v2088_v32 = vmul.f32 0.010009766, %v2024_v46  ;;  %v2089_v30 = vmul.f32 0.010009766, %v2025_v44 }
 0x267   :  { %v1973_v13 = vpack.c.bf16 %v1919_v61, %v1918_v27  ;;  %v2084_v25 = vmul.f32 0.010009766, %v2020_v52  ;;  %v2085_v1 = vmul.f32 0.010009766, %v2021_v55  ;;  %v2016_v21 = vunpack.c.l.bf16 %v1974_v37 }
 0x268   :  { %v1930_v10 = vadd.f32 %v9321_v60, %v1834_v49  ;;  %v1931_v58 = vadd.f32 %v9321_v60, %v1835_v63  ;;  %v2248_v50 = vmax.f32 %v2024_v46, %v2088_v32  ;;  %v2083_v42 = vmul.f32 0.010009766, %v2019_v43 }
 0x269   :  { %v9340_v5 = vpop.f32.mrf.mxu2  ;;  %v1234_v19 = vpop.f32.mrf.mxu3  ;;  %v2014_v56 = vunpack.c.l.bf16 %v1973_v13  ;;  %v2246_v27 = vmax.f32 %v2022_v6, %v2086_v22  ;;  %v2247_v61 = vmax.f32 %v2023_v9, %v2087_v47  ;;  %v2012_v46 = vunpack.c.l.bf16 %v9346_v59 }
 0x26a   :  { %v1979_v26 = vpack.c.bf16 %v1931_v58, %v1930_v10  ;;  %v1235_v54 = vadd.f32 %v1234_v19, %v1145_v48  ;;  %v2015_v10 = vunpack.c.h.bf16 %v1973_v13  ;;  %v2244_v37 = vmax.f32 %v2020_v52, %v2084_v25 }
 0x26b   :  { %v9342_v17 = vpop.f32.mrf.mxu1  ;;  %v1328_v12 = vpop.f32.mrf.mxu0  ;;  %v2245_v32 = vmax.f32 %v2021_v55, %v2085_v1  ;;  %v2242_v6 = vmax.f32 %v2018_v18, %v2082_v38  ;;  %v2243_v9 = vmax.f32 %v2019_v43, %v2083_v42 }
 0x26c   :  { %v9344_v53 = vpack.c.bf16 %v1413_v36, %v1235_v54  ;;  %v2026_v60 = vunpack.c.l.bf16 %v1979_v26  ;;  %v2027_v41 = vunpack.c.h.bf16 %v1979_v26  ;;  %v2249_v36 = vmax.f32 %v2025_v44, %v2089_v30 }
 0x26d   :  { %v2080_v26 = vmul.f32 0.010009766, %v2016_v21  ;;  %v2013_v44 = vunpack.c.h.bf16 %v9346_v59  ;;  %v2079_v30 = vmul.f32 0.010009766, %v2015_v10  ;;  %v2296_v13 = vpack.c.bf16 %v2246_v27, %v2244_v37 }
 0x26e   :  { %v2090_v48 = vmul.f32 0.010009766, %v2026_v60  ;;  %v2091_v33 = vmul.f32 0.010009766, %v2027_v41  ;;  %v2076_v59 = vmul.f32 0.010009766, %v2012_v46  ;;  %v1704_v37 = vperm.slane %v9021_v29, %v9061_v28 }
 0x26f   :  { %v2240_v22 = vmax.f32 %v2016_v21, %v2080_v26  ;;  %v11481_v29 = vpack.c.bf16 %v9184_v8, %v9182_v3 }
 0x270   :  { %v2250_v24 = vmax.f32 %v2026_v60, %v2090_v48  ;;  %v2251_v49 = vmax.f32 %v2027_v41, %v2091_v33  ;;  %v2081_v60 = vmul.f32 0.010009766, %v2017_v57  ;;  %v2078_v41 = vmul.f32 0.010009766, %v2014_v56 }
 0x271   :  { %v1150_v63 = vpop.f32.mrf.mxu2  ;;  %v9348_v51 = vpop.f32.mrf.mxu3  ;;  %v2297_v48 = vpack.c.bf16 %v2247_v61, %v2245_v32  ;;  %v1686_v33 = vperm.slane %v9063_v2, %v9061_v28  ;;  %v2294_v1 = vpack.c.bf16 %v2242_v6, %v2240_v22  ;;  %v2236_v2 = vmax.f32 %v2012_v46, %v2076_v59  ;;  %v11484_v22 = vld [vmem:[#allocation23_spill] sm:$0xff] }
 0x272   :  { %v2298_v58 = vpack.c.bf16 %v2250_v24, %v2248_v50  ;;  %v2299_v40 = vpack.c.bf16 %v2251_v49, %v2249_v36  ;;  %v2241_v47 = vmax.f32 %v2017_v57, %v2081_v60  ;;  %v2238_v55 = vmax.f32 %v2014_v56, %v2078_v41 }
 0x273   :  { %v1417_v31 = vpop.f32.mrf.mxu1  ;;  %v9350_v19 = vpop.f32.mrf.mxu0  ;;  %v2239_v36 = vmax.f32 %v2015_v10, %v2079_v30  ;;  %v1886_v43 = vunpack.c.l.bf16 %v1686_v33  ;;  %v11476_v46 = vpack.c.bf16 %v9266_v35, %v9264_v4  ;;  %v11478_v32 = vpack.c.bf16 %v9226_v23, %v9224_v0  ;;  %v11483_v33 = vld [vmem:[#allocation24_spill] sm:$0xff] }
 0x274   :  { %v1418_v54 = vadd.f32 %v1417_v31, %v1328_v12  ;;  %2508 = vmatpush.bf16.msra.mxu2 %v2298_v58  ;;  %2686 = vmatpush.bf16.msra.mxu0 %v2299_v40  ;;  %v2077_v12 = vmul.f32 0.010009766, %v2013_v44  ;;  %v2295_v24 = vpack.c.bf16 %v2243_v9, %v2241_v47  ;;  %v2292_v58 = vpack.c.bf16 %v2238_v55, %v2236_v2 }
 0x275   :  { %v11479_v60 = vpack.c.bf16 %v9230_v15, %v9228_v11  ;;  %v1713_v11 = vperm.slane %v9040_v20, %v9061_v28  ;;  %v11482_v9 = vpack.c.bf16 %v9134_v16, %v9132_v7  ;;  %v11485_v47 = vpack.c.bf16 %v11483_v33, %v11484_v22  ;;  %v11486_v7 = vld [vmem:[#allocation22_spill] sm:$0xff] }
 0x276   :  { %v2237_v21 = vmax.f32 %v2013_v44, %v2077_v12  ;;  %v11477_v44 = vpack.c.bf16 %v9270_v39, %v9268_v62  ;;  %v11480_v62 = vpack.c.bf16 %v9180_v14, %v9178_v45  ;;  %v1722_v16 = vperm.slane %v11486_v7, %v9061_v28 }
 0x277   :  { %v1889_v55 = vunpack.c.l.bf16 %v1713_v11 }
 0x278   :  { %2509 = vmatpush.bf16.msra.mxu2 %v2296_v13  ;;  %2687 = vmatpush.bf16.msra.mxu0 %v2297_v48  ;;  %v2293_v40 = vpack.c.bf16 %v2239_v36, %v2237_v21  ;;  %v1888_v48 = vunpack.c.l.bf16 %v1704_v37 }
 0x279   :  { %v9356_v50 = vpop.f32.mrf.mxu2  ;;  %v1239_v52 = vpop.f32.mrf.mxu3 }
 0x27a   :  { %v1240_v25 = vadd.f32 %v1239_v52, %v1150_v63 }
 0x27b   :  { %v9358_v49 = vpop.f32.mrf.mxu1  ;;  %v1333_v18 = vpop.f32.mrf.mxu0 }
 0x27c   :  { %v1470_v38 = vpack.c.bf16 %v1418_v54, %v1240_v25  ;;  %2510 = vmatpush.bf16.msra.mxu2 %v2294_v1  ;;  %2688 = vmatpush.bf16.msra.mxu0 %v2295_v24 }
 0x27e   :  { %v1840_v57 = vunpack.c.l.bf16 %v1470_v38  ;;  %v1841_v42 = vunpack.c.h.bf16 %v1470_v38 }
 0x280   :  { %v1936_v27 = vadd.f32 %v1886_v43, %v1840_v57  ;;  %v1937_v61 = vadd.f32 %v1886_v43, %v1841_v42  ;;  %2511 = vmatpush.bf16.msra.mxu2 %v2292_v58  ;;  %2689 = vmatpush.bf16.msra.mxu0 %v2293_v40 }
 0x281   :  { %v1155_v63 = vpop.f32.mrf.mxu2  ;;  %v9360_v56 = vpop.f32.mrf.mxu3 }
 0x282   :  { %v9362_v10 = vpack.c.bf16 %v1937_v61, %v1936_v27 }
 0x283   :  { %v1422_v31 = vpop.f32.mrf.mxu1  ;;  %v1335_v26 = vpop.f32.mrf.mxu0 }
 0x284   :  { %v1423_v54 = vadd.f32 %v1422_v31, %v1333_v18  ;;  %2512 = vmatpush.bf16.msra.mxu2 %v11476_v46  ;;  %2690 = vmatpush.bf16.msra.mxu0 %v11477_v44 }
 0x288   :  { %2513 = vmatpush.bf16.msra.mxu2 %v11478_v32  ;;  %2691 = vmatpush.bf16.msra.mxu0 %v11479_v60  ;;  %v11487_v60 = vld [vmem:[#allocation20_spill] sm:$0xff] }
 0x289   :  { %v1157_v41 = vpop.f32.mrf.mxu2  ;;  %v1244_v30 = vpop.f32.mrf.mxu3 }
 0x28a   :  { %v1245_v13 = vadd.f32 %v1244_v30, %v1155_v63  ;;  %v1890_v63 = vunpack.c.l.bf16 %v1722_v16 }
 0x28b   :  { %v1424_v4 = vpop.f32.mrf.mxu1  ;;  %v1338_v35 = vpop.f32.mrf.mxu0 }
 0x28c   :  { %v1472_v6 = vpack.c.bf16 %v1423_v54, %v1245_v13  ;;  %2514 = vmatpush.bf16.msra.mxu2 %v11480_v62  ;;  %2692 = vmatpush.bf16.msra.mxu0 %v11481_v29  ;;  %v1425_v3 = vadd.f32 %v1424_v4, %v1335_v26 }
 0x28e   :  { %v1844_v0 = vunpack.c.l.bf16 %v1472_v6  ;;  %v1845_v23 = vunpack.c.h.bf16 %v1472_v6 }
 0x290   :  { %v1940_v15 = vadd.f32 %v1888_v48, %v1844_v0  ;;  %v1941_v39 = vadd.f32 %v1888_v48, %v1845_v23  ;;  %2515 = vmatpush.bf16.msra.mxu2 %v11482_v9  ;;  %2693 = vmatpush.bf16.msra.mxu0 %v11485_v47 }
 0x291   :  { %v1160_v45 = vpop.f32.mrf.mxu2  ;;  %v1246_v14 = vpop.f32.mrf.mxu3 }
 0x292   :  { %v1984_v59 = vpack.c.bf16 %v1941_v39, %v1940_v15  ;;  %v1247_v8 = vadd.f32 %v1246_v14, %v1157_v41  ;;  %v1731_v41 = vperm.slane %v11487_v60, %v9061_v28 }
 0x293   :  { %v1427_v12 = vpop.f32.mrf.mxu1  ;;  %v1340_v52 = vpop.f32.mrf.mxu0 }
 0x294   :  { %v1473_v25 = vpack.c.bf16 %v1425_v3, %v1247_v8  ;;  %v1428_v20 = vadd.f32 %v1427_v12, %v1338_v35  ;;  %v2036_v36 = vunpack.c.l.bf16 %v1984_v59  ;;  %v2037_v18 = vunpack.c.h.bf16 %v1984_v59  ;;  %v11488_v12 = vld [vmem:[#allocation19_spill] sm:$0xff] }
 0x295   :  { %v1891_v33 = vunpack.c.l.bf16 %v1731_v41 }
 0x296   :  { %v1846_v1 = vunpack.c.l.bf16 %v1473_v25  ;;  %v1847_v24 = vunpack.c.h.bf16 %v1473_v25  ;;  %v2100_v27 = vmul.f32 0.010009766, %v2036_v36  ;;  %v2101_v61 = vmul.f32 0.010009766, %v2037_v18 }
 0x298   :  { %v1942_v43 = vadd.f32 %v1889_v55, %v1846_v1  ;;  %v1943_v38 = vadd.f32 %v1889_v55, %v1847_v24  ;;  %v9396_v30 = vmax.f32 %v2036_v36, %v2100_v27  ;;  %v9398_v13 = vmax.f32 %v2037_v18, %v2101_v61 }
 0x299   :  { %v1162_v2 = vpop.f32.mrf.mxu2  ;;  %v1249_v21 = vpop.f32.mrf.mxu3 }
 0x29a   :  { %v1985_v57 = vpack.c.bf16 %v1943_v38, %v1942_v43  ;;  %v1250_v42 = vadd.f32 %v1249_v21, %v1160_v45 }
 0x29b   :  { %v1429_v58 = vpop.f32.mrf.mxu1  ;;  %v1343_v40 = vpop.f32.mrf.mxu0 }
 0x29c   :  { %v1474_v31 = vpack.c.bf16 %v1428_v20, %v1250_v42  ;;  %v2038_v26 = vunpack.c.l.bf16 %v1985_v57  ;;  %v2039_v54 = vunpack.c.h.bf16 %v1985_v57  ;;  %v1430_v62 = vadd.f32 %v1429_v58, %v1340_v52 }
 0x29d   :  { %v1740_v52 = vperm.slane %v11488_v12, %v9061_v28 }
 0x29e   :  { %v1848_v46 = vunpack.c.l.bf16 %v1474_v31  ;;  %v1849_v44 = vunpack.c.h.bf16 %v1474_v31  ;;  %v2102_v37 = vmul.f32 0.010009766, %v2038_v26  ;;  %v2103_v32 = vmul.f32 0.010009766, %v2039_v54 }
 0x29f   :  { %v1892_v43 = vunpack.c.l.bf16 %v1740_v52 }
 0x2a0   :  { %v1944_v4 = vadd.f32 %v1890_v63, %v1848_v46  ;;  %v1945_v35 = vadd.f32 %v1890_v63, %v1849_v44  ;;  %v9400_v48 = vmax.f32 %v2038_v26, %v2102_v37  ;;  %v9402_v6 = vmax.f32 %v2039_v54, %v2103_v32  ;;  %v11489_v44 = vld [vmem:[#allocation21_spill] sm:$0xff] }
 0x2a1   :  { %v1165_v29 = vpop.f32.mrf.mxu2  ;;  %v1251_v0 = vpop.f32.mrf.mxu3  ;;  %v1749_v37 = vperm.slane %v11489_v44, %v9061_v28  ;;  %v11491_v44 = vld [vmem:[#allocation17_spill] sm:$0xff] }
 0x2a2   :  { %v1986_v23 = vpack.c.bf16 %v1945_v35, %v1944_v4  ;;  %v1252_v11 = vadd.f32 %v1251_v0, %v1162_v2  ;;  %v2304_v15 = vpack.c.bf16 %v9400_v48, %v9396_v30  ;;  %v2305_v39 = vpack.c.bf16 %v9402_v6, %v9398_v13  ;;  %v8002_v30 = vld [vmem:[%s11441_s5 + $0x4] sm:$0xf]  ;;  %v7574_v13 = vld [vmem:[%s11441_s5 + $0x8] sm:$0xf0] }
 0x2a3   :  { %v1432_v9 = vpop.f32.mrf.mxu1  ;;  %v1345_v45 = vpop.f32.mrf.mxu0 }
 0x2a4   :  { %v1475_v22 = vpack.c.bf16 %v1430_v62, %v1252_v11  ;;  %v1433_v47 = vadd.f32 %v1432_v9, %v1343_v40  ;;  %v2040_v3 = vunpack.c.l.bf16 %v1986_v23  ;;  %v2041_v8 = vunpack.c.h.bf16 %v1986_v23 }
 0x2a5   :  { %v1893_v11 = vunpack.c.l.bf16 %v1749_v37  ;;  %v1767_v37 = vperm.slane %v11491_v44, %v9061_v28 }
 0x2a6   :  { %v1850_v14 = vunpack.c.l.bf16 %v1475_v22  ;;  %v1851_v59 = vunpack.c.h.bf16 %v1475_v22  ;;  %v2104_v7 = vmul.f32 0.010009766, %v2040_v3  ;;  %v2105_v16 = vmul.f32 0.010009766, %v2041_v8 }
 0x2a8   :  { %v1946_v55 = vadd.f32 %v1891_v33, %v1850_v14  ;;  %v1947_v25 = vadd.f32 %v1891_v33, %v1851_v59  ;;  %v9410_v61 = vmax.f32 %v2040_v3, %v2104_v7  ;;  %v9412_v63 = vmax.f32 %v2041_v8, %v2105_v16  ;;  %v11490_v8 = vld [vmem:[#allocation16_spill] sm:$0xff] }
 0x2a9   :  { %v1167_v20 = vpop.f32.mrf.mxu2  ;;  %v1254_v1 = vpop.f32.mrf.mxu3  ;;  %v1758_v12 = vperm.slane %v11490_v8, %v9061_v28 }
 0x2aa   :  { %v1987_v24 = vpack.c.bf16 %v1947_v25, %v1946_v55  ;;  %v1255_v36 = vadd.f32 %v1254_v1, %v1165_v29 }
 0x2ab   :  { %v1434_v18 = vpop.f32.mrf.mxu1  ;;  %v1348_v58 = vpop.f32.mrf.mxu0 }
 0x2ac   :  { %v1476_v38 = vpack.c.bf16 %v1433_v47, %v1255_v36  ;;  %v2042_v2 = vunpack.c.l.bf16 %v1987_v24  ;;  %v2043_v21 = vunpack.c.h.bf16 %v1987_v24  ;;  %v1435_v32 = vadd.f32 %v1434_v18, %v1345_v45 }
 0x2ae   :  { %v1852_v57 = vunpack.c.l.bf16 %v1476_v38  ;;  %v1853_v42 = vunpack.c.h.bf16 %v1476_v38  ;;  %v2106_v40 = vmul.f32 0.010009766, %v2042_v2  ;;  %v2107_v27 = vmul.f32 0.010009766, %v2043_v21 }
 0x2b0   :  { %v1948_v31 = vadd.f32 %v1892_v43, %v1852_v57  ;;  %v1949_v26 = vadd.f32 %v1892_v43, %v1853_v42  ;;  %v9414_v54 = vmax.f32 %v2042_v2, %v2106_v40  ;;  %v9416_v46 = vmax.f32 %v2043_v21, %v2107_v27 }
 0x2b1   :  { %v1170_v60 = vpop.f32.mrf.mxu2  ;;  %v1256_v41 = vpop.f32.mrf.mxu3  ;;  %v1894_v43 = vunpack.c.l.bf16 %v1758_v12 }
 0x2b2   :  { %v1988_v4 = vpack.c.bf16 %v1949_v26, %v1948_v31  ;;  %v1257_v35 = vadd.f32 %v1256_v41, %v1167_v20  ;;  %v2306_v62 = vpack.c.bf16 %v9414_v54, %v9410_v61  ;;  %v2307_v29 = vpack.c.bf16 %v9416_v46, %v9412_v63 }
 0x2b3   :  { %v1437_v0 = vpop.f32.mrf.mxu1  ;;  %v1350_v3 = vpop.f32.mrf.mxu0 }
 0x2b4   :  { %v1477_v23 = vpack.c.bf16 %v1435_v32, %v1257_v35  ;;  %v2044_v22 = vunpack.c.l.bf16 %v1988_v4  ;;  %v2045_v47 = vunpack.c.h.bf16 %v1988_v4  ;;  %v1438_v45 = vadd.f32 %v1437_v0, %v1348_v58 }
 0x2b6   :  { %v1854_v9 = vunpack.c.l.bf16 %v1477_v23  ;;  %v1855_v33 = vunpack.c.h.bf16 %v1477_v23  ;;  %v2108_v24 = vmul.f32 0.010009766, %v2044_v22  ;;  %v2109_v36 = vmul.f32 0.010009766, %v2045_v47 }
 0x2b8   :  { %v1950_v14 = vadd.f32 %v1893_v11, %v1854_v9  ;;  %v1951_v59 = vadd.f32 %v1893_v11, %v1855_v33  ;;  %v9426_v42 = vmax.f32 %v2044_v22, %v2108_v24  ;;  %v9428_v58 = vmax.f32 %v2045_v47, %v2109_v36 }
 0x2b9   :  { %v1172_v52 = vpop.f32.mrf.mxu2  ;;  %v1259_v55 = vpop.f32.mrf.mxu3  ;;  %v1895_v22 = vunpack.c.l.bf16 %v1767_v37 }
 0x2ba   :  { %v1989_v25 = vpack.c.bf16 %v1951_v59, %v1950_v14  ;;  %v1260_v20 = vadd.f32 %v1259_v55, %v1170_v60 }
 0x2bb   :  { %v1439_v1 = vpop.f32.mrf.mxu1  ;;  %v1353_v4 = vpop.f32.mrf.mxu0 }
 0x2bc   :  { %v1478_v18 = vpack.c.bf16 %v1438_v45, %v1260_v20  ;;  %v2046_v7 = vunpack.c.l.bf16 %v1989_v25  ;;  %v2047_v16 = vunpack.c.h.bf16 %v1989_v25  ;;  %v1440_v60 = vadd.f32 %v1439_v1, %v1350_v3 }
 0x2be   :  { %v1856_v38 = vunpack.c.l.bf16 %v1478_v18  ;;  %v1857_v2 = vunpack.c.h.bf16 %v1478_v18  ;;  %v2110_v21 = vmul.f32 0.010009766, %v2046_v7  ;;  %v2111_v57 = vmul.f32 0.010009766, %v2047_v16 }
 0x2c0   :  { %v1952_v40 = vadd.f32 %v1894_v43, %v1856_v38  ;;  %v1953_v27 = vadd.f32 %v1894_v43, %v1857_v2  ;;  %v9430_v31 = vmax.f32 %v2046_v7, %v2110_v21  ;;  %v9432_v26 = vmax.f32 %v2047_v16, %v2111_v57 }
 0x2c1   :  { %v1261_v32 = vpop.f32.mrf.mxu3  ;;  %v1175_v11 = vpop.f32.mrf.mxu2 }
 0x2c2   :  { %v1262_v41 = vadd.f32 %v1261_v32, %v1172_v52  ;;  %v2308_v35 = vpack.c.bf16 %v9430_v31, %v9426_v42  ;;  %v2309_v0 = vpack.c.bf16 %v9432_v26, %v9428_v58  ;;  %v1990_v23 = vpack.c.bf16 %v1953_v27, %v1952_v40  ;;  %v11492_v52 = vld [vmem:[#allocation18_spill] sm:$0xff] }
 0x2c3   :  { %v1442_v9 = vpop.f32.mrf.mxu1  ;;  %v1776_v55 = vperm.slane %v11492_v52, %v9061_v28  ;;  %v1355_v16 = vpop.f32.mrf.mxu0 }
 0x2c4   :  { %v1479_v33 = vpack.c.bf16 %v1440_v60, %v1262_v41  ;;  %v2048_v59 = vunpack.c.l.bf16 %v1990_v23  ;;  %v2049_v45 = vunpack.c.h.bf16 %v1990_v23  ;;  %v1443_v3 = vadd.f32 %v1442_v9, %v1353_v4 }
 0x2c5   :  { %v1896_v2 = vunpack.c.l.bf16 %v1776_v55 }
 0x2c6   :  { %v1858_v47 = vunpack.c.l.bf16 %v1479_v33  ;;  %v1859_v14 = vunpack.c.h.bf16 %v1479_v33  ;;  %v2112_v36 = vmul.f32 0.010009766, %v2048_v59  ;;  %v2113_v18 = vmul.f32 0.010009766, %v2049_v45 }
 0x2c8   :  { %v1954_v8 = vadd.f32 %v1895_v22, %v1858_v47  ;;  %v1955_v12 = vadd.f32 %v1895_v22, %v1859_v14  ;;  %v9442_v37 = vmax.f32 %v2048_v59, %v2112_v36  ;;  %v9444_v32 = vmax.f32 %v2049_v45, %v2113_v18 }
 0x2c9   :  { %v1264_v25 = vpop.f32.mrf.mxu3  ;;  %v1177_v21 = vpop.f32.mrf.mxu2 }
 0x2ca   :  { %v1991_v20 = vpack.c.bf16 %v1955_v12, %v1954_v8  ;;  %v1265_v1 = vadd.f32 %v1264_v25, %v1175_v11  ;;  %v11493_v11 = vld [vmem:[#allocation15_spill] sm:$0xff] }
 0x2cb   :  { %v1444_v24 = vpop.f32.mrf.mxu1  ;;  %v1785_v9 = vperm.slane %v11493_v11, %v9061_v28  ;;  %v1358_v25 = vpop.f32.mrf.mxu0 }
 0x2cc   :  { %v1480_v7 = vpack.c.bf16 %v1443_v3, %v1265_v1  ;;  %v2050_v43 = vunpack.c.l.bf16 %v1991_v20  ;;  %v2051_v38 = vunpack.c.h.bf16 %v1991_v20  ;;  %v1445_v22 = vadd.f32 %v1444_v24, %v1355_v16  ;;  %v11494_v16 = vld [vmem:[#allocation13_spill] sm:$0xff] }
 0x2cd   :  { %v1897_v3 = vunpack.c.l.bf16 %v1785_v9 }
 0x2ce   :  { %v1860_v57 = vunpack.c.l.bf16 %v1480_v7  ;;  %v1861_v40 = vunpack.c.h.bf16 %v1480_v7  ;;  %v2114_v27 = vmul.f32 0.010009766, %v2050_v43  ;;  %v2115_v44 = vmul.f32 0.010009766, %v2051_v38 }
 0x2d0   :  { %v1956_v60 = vadd.f32 %v1896_v2, %v1860_v57  ;;  %v1957_v41 = vadd.f32 %v1896_v2, %v1861_v40  ;;  %v9446_v4 = vmax.f32 %v2050_v43, %v2114_v27  ;;  %v9448_v23 = vmax.f32 %v2051_v38, %v2115_v44 }
 0x2d1   :  { %v1266_v33 = vpop.f32.mrf.mxu3  ;;  %v1180_v20 = vpop.f32.mrf.mxu2  ;;  %v1794_v43 = vperm.slane %v11494_v16, %v9061_v28 }
 0x2d2   :  { %v1267_v47 = vadd.f32 %v1266_v33, %v1177_v21  ;;  %v2310_v14 = vpack.c.bf16 %v9446_v4, %v9442_v37  ;;  %v2311_v59 = vpack.c.bf16 %v9448_v23, %v9444_v32  ;;  %v1992_v45 = vpack.c.bf16 %v1957_v41, %v1956_v60 }
 0x2d3   :  { %v1447_v12 = vpop.f32.mrf.mxu1  ;;  %v1898_v41 = vunpack.c.l.bf16 %v1794_v43  ;;  %v2033_v37 = vunpack.c.h.bf16 %v9362_v10 }
 0x2d4   :  { %v1481_v8 = vpack.c.bf16 %v1445_v22, %v1267_v47  ;;  %v2052_v1 = vunpack.c.l.bf16 %v1992_v45  ;;  %v2053_v36 = vunpack.c.h.bf16 %v1992_v45  ;;  %v1448_v24 = vadd.f32 %v1447_v12, %v1358_v25 }
 0x2d5   :  { %v2097_v31 = vmul.f32 0.010009766, %v2033_v37 }
 0x2d6   :  { %v1862_v52 = vunpack.c.l.bf16 %v1481_v8  ;;  %v1863_v55 = vunpack.c.h.bf16 %v1481_v8  ;;  %v2116_v57 = vmul.f32 0.010009766, %v2052_v1  ;;  %v2117_v40 = vmul.f32 0.010009766, %v2053_v36 }
 0x2d7   :  { %v2257_v46 = vmax.f32 %v2033_v37, %v2097_v31 }
 0x2d8   :  { %v1958_v18 = vadd.f32 %v1897_v3, %v1862_v52  ;;  %v1959_v7 = vadd.f32 %v1897_v3, %v1863_v55  ;;  %v9458_v45 = vmax.f32 %v2052_v1, %v2116_v57  ;;  %v9460_v8 = vmax.f32 %v2053_v36, %v2117_v40  ;;  %v1360_v52 = vpop.f32.mrf.mxu0 }
 0x2d9   :  { %v1269_v38 = vpop.f32.mrf.mxu3 }
 0x2da   :  { %v1993_v2 = vpack.c.bf16 %v1959_v7, %v1958_v18  ;;  %v1270_v21 = vadd.f32 %v1269_v38, %v1180_v20  ;;  %v11495_v20 = vld [vmem:[#allocation14_spill] sm:$0xff]  ;;  %v1182_v7 = vpop.f32.mrf.mxu2 }
 0x2db   :  { %v1449_v47 = vpop.f32.mrf.mxu1  ;;  %v1803_v18 = vperm.slane %v11495_v20, %v9061_v28  ;;  %v1237_v20 = vadd.f32 %v9348_v51, %v9340_v5 }
 0x2dc   :  { %v1482_v27 = vpack.c.bf16 %v1448_v24, %v1270_v21  ;;  %v2054_v44 = vunpack.c.l.bf16 %v1993_v2  ;;  %v2055_v60 = vunpack.c.h.bf16 %v1993_v2  ;;  %v1450_v16 = vadd.f32 %v1449_v47, %v1360_v52 }
 0x2dd   :  { %v1899_v21 = vunpack.c.l.bf16 %v1803_v18  ;;  %v1242_v47 = vadd.f32 %v9360_v56, %v9356_v50  ;;  %v1415_v50 = vadd.f32 %v9342_v17, %v9334_v34  ;;  %v1672_v56 = vpop.permute.xlu1 %1671  ;;  %v7580_v34 = vld [vmem:[%s11441_s5 + $0x10] sm:$0xf]  ;;  %v8005_v17 = vld [vmem:[%s11441_s5 + $0x14] sm:$0xf0] }
 0x2de   :  { %v1864_v11 = vunpack.c.l.bf16 %v1482_v27  ;;  %v1865_v9 = vunpack.c.h.bf16 %v1482_v27  ;;  %v2118_v33 = vmul.f32 0.010009766, %v2054_v44  ;;  %v2119_v22 = vmul.f32 0.010009766, %v2055_v60 }
 0x2e0   :  { %v1960_v12 = vadd.f32 %v1898_v41, %v1864_v11  ;;  %v1961_v3 = vadd.f32 %v1898_v41, %v1865_v9  ;;  %v9462_v55 = vmax.f32 %v2054_v44, %v2118_v33  ;;  %v9464_v25 = vmax.f32 %v2055_v60, %v2119_v22  ;;  %v7572_v11 = vld [vmem:[%s11441_s5] sm:$0xf]  ;;  %v8003_v9 = vld [vmem:[%s11441_s5 + $0x4] sm:$0xf0]  ;;  %v1690_v33 = vpop.permute.xlu0 %1689 }
 0x2e1   :  { %v1271_v24 = vpop.f32.mrf.mxu3  ;;  %v7573_v22 = vor.u32 %v8003_v9, %v7572_v11 }
 0x2e2   :  { %v1272_v43 = vadd.f32 %v1271_v24, %v1182_v7  ;;  %v2312_v1 = vpack.c.bf16 %v9462_v55, %v9458_v45  ;;  %v2313_v36 = vpack.c.bf16 %v9464_v25, %v9460_v8  ;;  %v1994_v38 = vpack.c.bf16 %v1961_v3, %v1960_v12 }
 0x2e3   :  { %v1420_v8 = vadd.f32 %v9358_v49, %v9350_v19  ;;  %2516 = vmatmul.bf16.vlgmr.msra.gmra.mxu2 %v7573_v22  ;;  %2694 = vmatmul.bf16.vlgmr.msra.gmra.mxu0 %v7573_v22  ;;  %v1695_v25 = vperm.slane %v1690_v33, %v9061_v28  ;;  %v7581_v22 = vor.u32 %v8005_v17, %v7580_v34  ;;  %v7612_v17 = vld [vmem:[%s11441_s5 + $0x50] sm:$0xf] }
 0x2e4   :  { %v1483_v2 = vpack.c.bf16 %v1450_v16, %v1272_v43  ;;  %v2056_v27 = vunpack.c.l.bf16 %v1994_v38  ;;  %v2057_v44 = vunpack.c.h.bf16 %v1994_v38 }
 0x2e5   :  { %v1471_v18 = vpack.c.bf16 %v1420_v8, %v1242_v47  ;;  %v1887_v38 = vunpack.c.l.bf16 %v1695_v25  ;;  %v1837_v8 = vunpack.c.h.bf16 %v9344_v53 }
 0x2e6   :  { %v1866_v57 = vunpack.c.l.bf16 %v1483_v2  ;;  %v1867_v40 = vunpack.c.h.bf16 %v1483_v2  ;;  %v2120_v3 = vmul.f32 0.010009766, %v2056_v27  ;;  %v2121_v55 = vmul.f32 0.010009766, %v2057_v44 }
 0x2e7   :  { %v1677_v2 = vperm.slane %v1672_v56, %v9061_v28 }
 0x2e8   :  { %v1962_v60 = vadd.f32 %v1899_v21, %v1866_v57  ;;  %v1963_v41 = vadd.f32 %v1899_v21, %v1867_v40  ;;  %v2280_v16 = vmax.f32 %v2056_v27, %v2120_v3  ;;  %v2281_v49 = vmax.f32 %v2057_v44, %v2121_v55  ;;  %v1663_v5 = vpop.permute.xlu0 %1662 }
 0x2e9   :  { %v1469_v21 = vpack.c.bf16 %v1415_v50, %v1237_v20  ;;  %v1842_v57 = vunpack.c.l.bf16 %v1471_v18  ;;  %v1843_v40 = vunpack.c.h.bf16 %v1471_v18  ;;  %v1668_v51 = vperm.slane %v1663_v5, %v9061_v28  ;;  %v8006_v5 = vld [vmem:[%s11441_s5 + $0x24] sm:$0xf] }
 0x2ea   :  { %v1995_v45 = vpack.c.bf16 %v1963_v41, %v1962_v60  ;;  %v1885_v27 = vunpack.c.l.bf16 %v1677_v2  ;;  %v8004_v2 = vld [vmem:[%s11441_s5 + $0x14] sm:$0xf] }
 0x2eb   :  { %v1838_v44 = vunpack.c.l.bf16 %v1469_v21  ;;  %v1839_v11 = vunpack.c.h.bf16 %v1469_v21  ;;  %v1938_v9 = vadd.f32 %v1887_v38, %v1842_v57  ;;  %v1939_v33 = vadd.f32 %v1887_v38, %v1843_v40  ;;  %v7582_v21 = vld [vmem:[%s11441_s5 + $0x18] sm:$0xf0]  ;;  %v7604_v40 = vld [vmem:[%s11441_s5 + $0x40] sm:$0xf] }
 0x2ec   :  { %v2058_v12 = vunpack.c.l.bf16 %v1995_v45  ;;  %v2059_v52 = vunpack.c.h.bf16 %v1995_v45  ;;  %v1884_v47 = vunpack.c.l.bf16 %v1668_v51  ;;  %v1836_v45 = vunpack.c.l.bf16 %v9344_v53  ;;  %v7590_v51 = vld [vmem:[%s11441_s5 + $0x28] sm:$0xf0] }
 0x2ed   :  { %v1935_v3 = vadd.f32 %v1885_v27, %v1839_v11  ;;  %v7585_v57 = vor.u32 %v8004_v2, %v7582_v21  ;;  %v7593_v34 = vor.u32 %v8006_v5, %v7590_v51  ;;  %v8023_v5 = vld [vmem:[%s11441_s5 + $0xa4] sm:$0xf0] }
 0x2ee   :  { %v2122_v7 = vmul.f32 0.010009766, %v2058_v12  ;;  %v2123_v24 = vmul.f32 0.010009766, %v2059_v52  ;;  %v1932_v55 = vadd.f32 %v1884_v47, %v1836_v45  ;;  %v1933_v25 = vadd.f32 %v1884_v47, %v1837_v8  ;;  %v9573_v47 = vpop.permute.xlu1 %3200  ;;  %v7620_v45 = vld [vmem:[%s11441_s5 + $0x60] sm:$0xf]  ;;  %v8015_v8 = vld [vmem:[%s11441_s5 + $0x64] sm:$0xf0] }
 0x2ef   :  { %11496 = vst [vmem:[#allocation24_spill] sm:$0xff] %v9573_v47 }
 0x2f0   :  { %v2282_v19 = vmax.f32 %v2058_v12, %v2122_v7  ;;  %v2283_v43 = vmax.f32 %v2059_v52, %v2123_v24  ;;  %v1934_v12 = vadd.f32 %v1885_v27, %v1838_v44  ;;  %v1983_v52 = vpack.c.bf16 %v1939_v33, %v1938_v9  ;;  %v8013_v27 = vld [vmem:[%s11441_s5 + $0x54] sm:$0xf0]  ;;  %v9565_v11 = vpop.permute.xlu0 %3065  ;;  %v8008_v9 = vld [vmem:[%s11441_s5 + $0x34] sm:$0xf]  ;;  %v7598_v33 = vld [vmem:[%s11441_s5 + $0x38] sm:$0xf0] }
 0x2f1   :  { %v7613_v44 = vor.u32 %v8013_v27, %v7612_v17  ;;  %v8018_v27 = vld [vmem:[%s11441_s5 + $0x84] sm:$0xf] }
 0x2f2   :  { %v2314_v60 = vpack.c.bf16 %v2282_v19, %v2280_v16  ;;  %v2315_v41 = vpack.c.bf16 %v2283_v43, %v2281_v49  ;;  %v1981_v20 = vpack.c.bf16 %v1935_v3, %v1934_v12  ;;  %v2034_v18 = vunpack.c.l.bf16 %v1983_v52  ;;  %v8009_v43 = vld [vmem:[%s11441_s5 + $0x34] sm:$0xf0] }
 0x2f3   :  { %2521 = vmatmul.bf16.gmra.mxu2 %v7581_v22  ;;  %2699 = vmatmul.bf16.gmra.mxu0 %v7581_v22  ;;  %v2035_v53 = vunpack.c.h.bf16 %v1983_v52  ;;  %v7601_v22 = vor.u32 %v8008_v9, %v7598_v33  ;;  %v7621_v3 = vor.u32 %v8015_v8, %v7620_v45  ;;  %v8010_v52 = vld [vmem:[%s11441_s5 + $0x44] sm:$0xf] }
 0x2f4   :  { %2597 = vmatpush.bf16.msra.mxu3 %v2314_v60  ;;  %2775 = vmatpush.bf16.msra.mxu1 %v2315_v41  ;;  %v2098_v4 = vmul.f32 0.010009766, %v2034_v18  ;;  %v2030_v32 = vunpack.c.l.bf16 %v1981_v20  ;;  %v2031_v23 = vunpack.c.h.bf16 %v1981_v20  ;;  %v8011_v60 = vld [vmem:[%s11441_s5 + $0x44] sm:$0xf0] }
 0x2f5   :  { %v7605_v41 = vor.u32 %v8011_v60, %v7604_v40 }
 0x2f6   :  { %v2094_v61 = vmul.f32 0.010009766, %v2030_v32  ;;  %v2095_v54 = vmul.f32 0.010009766, %v2031_v23 }
 0x2f8   :  { %2598 = vmatpush.bf16.msra.mxu3 %v2312_v1  ;;  %2776 = vmatpush.bf16.msra.mxu1 %v2313_v36  ;;  %v1980_v1 = vpack.c.bf16 %v1933_v25, %v1932_v55  ;;  %v2032_v36 = vunpack.c.l.bf16 %v9362_v10  ;;  %v7588_v10 = vld [vmem:[%s11441_s5 + $0x20] sm:$0xf]  ;;  %v2254_v56 = vmax.f32 %v2030_v32, %v2094_v61  ;;  %v2255_v16 = vmax.f32 %v2031_v23, %v2095_v54  ;;  %v9581_v12 = vpop.permute.xlu0 %3038  ;;  %v7606_v55 = vld [vmem:[%s11441_s5 + $0x48] sm:$0xf0]  ;;  %v9589_v25 = vpop.permute.xlu1 %3047  ;;  %v8012_v32 = vld [vmem:[%s11441_s5 + $0x54] sm:$0xf] }
 0x2f9   :  { %v7609_v20 = vor.u32 %v8010_v52, %v7606_v55  ;;  %v7614_v23 = vld [vmem:[%s11441_s5 + $0x58] sm:$0xf0]  ;;  %v8014_v54 = vld [vmem:[%s11441_s5 + $0x64] sm:$0xf] }
 0x2fa   :  { %v2096_v42 = vmul.f32 0.010009766, %v2032_v36  ;;  %v2028_v58 = vunpack.c.l.bf16 %v1980_v1  ;;  %v2029_v26 = vunpack.c.h.bf16 %v1980_v1  ;;  %v7628_v1 = vld [vmem:[%s11441_s5 + $0x70] sm:$0xf]  ;;  %v7617_v31 = vor.u32 %v8012_v32, %v7614_v23 }
 0x2fc   :  { %2599 = vmatpush.bf16.msra.mxu3 %v2310_v14  ;;  %2777 = vmatpush.bf16.msra.mxu1 %v2311_v59  ;;  %v2099_v14 = vmul.f32 0.010009766, %v2035_v53  ;;  %v2256_v63 = vmax.f32 %v2032_v36, %v2096_v42  ;;  %v2093_v7 = vmul.f32 0.010009766, %v2029_v26  ;;  %v8017_v36 = vld [vmem:[%s11441_s5 + $0x74] sm:$0xf0] }
 0x2fd   :  { %v7629_v37 = vor.u32 %v8017_v36, %v7628_v1 }
 0x2fe   :  { %v2259_v59 = vmax.f32 %v2035_v53, %v2099_v14  ;;  %v2253_v49 = vmax.f32 %v2029_v26, %v2093_v7  ;;  %v9593_v53 = vpop.permute.xlu2 %3056 }
 0x300   :  { %2600 = vmatpush.bf16.msra.mxu3 %v2308_v35  ;;  %2778 = vmatpush.bf16.msra.mxu1 %v2309_v0  ;;  %v8007_v35 = vld [vmem:[%s11441_s5 + $0x24] sm:$0xf0]  ;;  %v2258_v0 = vmax.f32 %v2034_v18, %v2098_v4  ;;  %v2303_v50 = vpack.c.bf16 %v2259_v59, %v2257_v46  ;;  %v2301_v6 = vpack.c.bf16 %v2255_v16, %v2253_v49  ;;  %v9591_v18 = vpop.permute.xlu0 %3191  ;;  %v9601_v4 = vpop.permute.xlu1 %3020  ;;  %v7644_v49 = vld [vmem:[%s11441_s5 + $0x90] sm:$0xf] }
 0x301   :  { %11497 = vst [vmem:[#allocation23_spill] sm:$0xff] %v9591_v18 }
 0x302   :  { %v2302_v24 = vpack.c.bf16 %v2258_v0, %v2256_v63 }
 0x304   :  { %2601 = vmatpush.bf16.msra.mxu3 %v2306_v62  ;;  %2779 = vmatpush.bf16.msra.mxu1 %v2307_v29  ;;  %v7589_v62 = vor.u32 %v8007_v35, %v7588_v10  ;;  %v2092_v29 = vmul.f32 0.010009766, %v2028_v58  ;;  %v7636_v10 = vld [vmem:[%s11441_s5 + $0x80] sm:$0xf]  ;;  %v8019_v35 = vld [vmem:[%s11441_s5 + $0x84] sm:$0xf0] }
 0x305   :  { %v7637_v0 = vor.u32 %v8019_v35, %v7636_v10  ;;  %v7660_v35 = vld [vmem:[%s11441_s5 + $0xb0] sm:$0xf] }
 0x306   :  { %2526 = vmatmul.bf16.gmra.mxu2 %v7589_v62  ;;  %2704 = vmatmul.bf16.gmra.mxu0 %v7589_v62  ;;  %v2252_v19 = vmax.f32 %v2028_v58, %v2092_v29  ;;  %v9611_v42 = vpop.permute.xlu2 %3209  ;;  %v7622_v62 = vld [vmem:[%s11441_s5 + $0x68] sm:$0xf0] }
 0x307   :  { %11499 = vst [vmem:[#allocation20_spill] sm:$0xff] %v9611_v42  ;;  %v7625_v7 = vor.u32 %v8014_v54, %v7622_v62 }
 0x308   :  { %2602 = vmatpush.bf16.msra.mxu3 %v2304_v15  ;;  %2780 = vmatpush.bf16.msra.mxu1 %v2305_v39  ;;  %v2300_v48 = vpack.c.bf16 %v2254_v56, %v2252_v19  ;;  %v7577_v15 = vor.u32 %v8002_v30, %v7574_v13  ;;  %v7596_v39 = vld [vmem:[%s11441_s5 + $0x30] sm:$0xf]  ;;  %v9603_v14 = vpop.permute.xlu0 %3164  ;;  %v9613_v58 = vpop.permute.xlu1 %3173  ;;  %v8021_v30 = vld [vmem:[%s11441_s5 + $0x94] sm:$0xf0] }
 0x309   :  { %v7597_v38 = vor.u32 %v8009_v43, %v7596_v39  ;;  %11498 = vst [vmem:[#allocation22_spill] sm:$0xff] %v9603_v14  ;;  %v7645_v13 = vor.u32 %v8021_v30, %v7644_v49  ;;  %v8020_v49 = vld [vmem:[%s11441_s5 + $0x94] sm:$0xf] }
 0x30a   :  { %11500 = vst [vmem:[#allocation19_spill] sm:$0xff] %v9613_v58  ;;  %v7694_v58 = vld [vmem:[%s11441_s5 + $0xf8] sm:$0xf0] }
 0x30c   :  { %2603 = vmatpush.bf16.msra.mxu3 %v2302_v24  ;;  %2781 = vmatpush.bf16.msra.mxu1 %v2303_v50 }
 0x30e   :  { %v9623_v59 = vpop.permute.xlu2 %3182 }
 0x30f   :  { %11501 = vst [vmem:[#allocation21_spill] sm:$0xff] %v9623_v59  ;;  %v8032_v59 = vld [vmem:[%s11441_s5 + $0xf4] sm:$0xf] }
 0x310   :  { %2604 = vmatpush.bf16.msra.mxu3 %v2300_v48  ;;  %2782 = vmatpush.bf16.msra.mxu1 %v2301_v6  ;;  %v9615_v26 = vpop.permute.xlu0 %3011  ;;  %v9625_v61 = vpop.permute.xlu1 %3146  ;;  %v8016_v6 = vld [vmem:[%s11441_s5 + $0x74] sm:$0xf] }
 0x311   :  { %11502 = vst [vmem:[#allocation16_spill] sm:$0xff] %v9625_v61  ;;  %v3071_v61 = vperm.slane %v9565_v11, %v9061_v28  ;;  %v3026_v11 = vperm.slane %v9601_v4, %v9061_v28 }
 0x313   :  { %2605 = vmatmul.bf16.vlgmr.msra.gmra.mxu3 %v7577_v15  ;;  %2783 = vmatmul.bf16.vlgmr.msra.gmra.mxu1 %v7577_v15  ;;  %v7630_v15 = vld [vmem:[%s11441_s5 + $0x78] sm:$0xf0] }
 0x314   :  { %v7633_v39 = vor.u32 %v8016_v6, %v7630_v15 }
 0x316   :  { %2531 = vmatmul.bf16.gmra.mxu2 %v7597_v38  ;;  %2709 = vmatmul.bf16.gmra.mxu0 %v7597_v38  ;;  %v9635_v24 = vpop.permute.xlu2 %3029 }
 0x318   :  { %v9633_v46 = vpop.permute.xlu0 %2984  ;;  %v9637_v50 = vpop.permute.xlu1 %2993 }
 0x31e   :  { %v9649_v48 = vpop.permute.xlu2 %3002 }
 0x320   :  { %v9641_v19 = vpop.permute.xlu0 %3137  ;;  %v9659_v2 = vpop.permute.xlu1 %2966 }
 0x321   :  { %11503 = vst [vmem:[#allocation17_spill] sm:$0xff] %v9641_v19 }
 0x323   :  { %2610 = vmatmul.bf16.gmra.mxu3 %v7585_v57  ;;  %2788 = vmatmul.bf16.gmra.mxu1 %v7585_v57 }
 0x326   :  { %2536 = vmatmul.bf16.gmra.mxu2 %v7605_v41  ;;  %2714 = vmatmul.bf16.gmra.mxu0 %v7605_v41  ;;  %v9663_v57 = vpop.permute.xlu2 %3155  ;;  %v7652_v41 = vld [vmem:[%s11441_s5 + $0xa0] sm:$0xf] }
 0x327   :  { %11504 = vst [vmem:[#allocation18_spill] sm:$0xff] %v9663_v57  ;;  %v7697_v57 = vor.u32 %v8032_v59, %v7694_v58  ;;  %v3044_v58 = vperm.slane %v9581_v12, %v9061_v28  ;;  %v3053_v59 = vperm.slane %v9589_v25, %v9061_v28  ;;  %v3035_v25 = vperm.slane %v9635_v24, %v9061_v28 }
 0x328   :  { %v9661_v21 = vpop.permute.xlu0 %3110  ;;  %v9675_v51 = vpop.permute.xlu1 %3119 }
 0x329   :  { %11505 = vst [vmem:[#allocation15_spill] sm:$0xff] %v9675_v51  ;;  %v3292_v4 = vunpack.c.l.bf16 %v3044_v58 }
 0x32e   :  { %v9689_v8 = vpop.permute.xlu2 %3128 }
 0x32f   :  { %11506 = vst [vmem:[#allocation13_spill] sm:$0xff] %v9689_v8  ;;  %v3062_v8 = vperm.slane %v9593_v53, %v9061_v28 }
 0x330   :  { %v9677_v17 = vpop.permute.xlu0 %2957  ;;  %v9691_v52 = vpop.permute.xlu1 %3092 }
 0x331   :  { %v3294_v12 = vunpack.c.l.bf16 %v3062_v8 }
 0x333   :  { %2615 = vmatmul.bf16.gmra.mxu3 %v7593_v34  ;;  %2793 = vmatmul.bf16.gmra.mxu1 %v7593_v34  ;;  %v7653_v34 = vor.u32 %v8023_v5, %v7652_v41 }
 0x336   :  { %2541 = vmatmul.bf16.gmra.mxu2 %v7613_v44  ;;  %2719 = vmatmul.bf16.gmra.mxu0 %v7613_v44  ;;  %v7638_v44 = vld [vmem:[%s11441_s5 + $0x88] sm:$0xf0]  ;;  %v9704_v62 = vpop.permute.xlu2 %2975 }
 0x337   :  { %v7641_v9 = vor.u32 %v8018_v27, %v7638_v44 }
 0x338   :  { %v2931_v55 = vpop.permute.xlu0 %2930  ;;  %v2940_v6 = vpop.permute.xlu1 %2939 }
 0x339   :  { %v2936_v1 = vperm.slane %v2931_v55, %v9061_v28 }
 0x343   :  { %2620 = vmatmul.bf16.gmra.mxu3 %v7601_v22  ;;  %2798 = vmatmul.bf16.gmra.mxu1 %v7601_v22 }
 0x346   :  { %2546 = vmatmul.bf16.gmra.mxu2 %v7621_v3  ;;  %2724 = vmatmul.bf16.gmra.mxu0 %v7621_v3 }
 0x353   :  { %2625 = vmatmul.bf16.gmra.mxu3 %v7609_v20  ;;  %2803 = vmatmul.bf16.gmra.mxu1 %v7609_v20 }
 0x356   :  { %2551 = vmatmul.bf16.gmra.mxu2 %v7629_v37  ;;  %2729 = vmatmul.bf16.gmra.mxu0 %v7629_v37 }
 0x360   :  { %v2695_v63 = vpop.f32.mrf.mxu0 }
 0x363   :  { %2630 = vmatmul.bf16.gmra.mxu3 %v7617_v31  ;;  %2808 = vmatmul.bf16.gmra.mxu1 %v7617_v31 }
 0x366   :  { %2556 = vmatmul.bf16.gmra.mxu2 %v7637_v0  ;;  %2734 = vmatmul.bf16.gmra.mxu0 %v7637_v0  ;;  %v2517_v29 = vpop.f32.mrf.mxu2  ;;  %v8025_v0 = vld [vmem:[%s11441_s5 + $0xb4] sm:$0xf0] }
 0x367   :  { %v7661_v54 = vor.u32 %v8025_v0, %v7660_v35 }
 0x368   :  { %v2697_v16 = vpop.f32.mrf.mxu0 }
 0x36e   :  { %v9639_v56 = vpop.f32.mrf.mxu2 }
 0x370   :  { %v2700_v38 = vpop.f32.mrf.mxu0 }
 0x373   :  { %2635 = vmatmul.bf16.gmra.mxu3 %v7625_v7  ;;  %2813 = vmatmul.bf16.gmra.mxu1 %v7625_v7 }
 0x376   :  { %2561 = vmatmul.bf16.gmra.mxu2 %v7645_v13  ;;  %2739 = vmatmul.bf16.gmra.mxu0 %v7645_v13  ;;  %v9657_v43 = vpop.f32.mrf.mxu2 }
 0x378   :  { %v9667_v60 = vpop.f32.mrf.mxu0 }
 0x37e   :  { %v9665_v40 = vpop.f32.mrf.mxu2 }
 0x383   :  { %2640 = vmatmul.bf16.gmra.mxu3 %v7633_v39  ;;  %2818 = vmatmul.bf16.gmra.mxu1 %v7633_v39  ;;  %v9687_v22 = vpop.f32.mrf.mxu0  ;;  %v2945_v39 = vperm.slane %v2940_v6, %v9061_v28  ;;  %v7668_v6 = vld [vmem:[%s11441_s5 + $0xc0] sm:$0xf] }
 0x385   :  { %v3281_v55 = vunpack.c.l.bf16 %v2945_v39 }
 0x386   :  { %2566 = vmatmul.bf16.gmra.mxu2 %v7653_v34  ;;  %2744 = vmatmul.bf16.gmra.mxu0 %v7653_v34 }
 0x389   :  { %v9685_v33 = vpop.f32.mrf.mxu2 }
 0x38b   :  { %v9696_v32 = vpop.f32.mrf.mxu0 }
 0x390   :  { %v2784_v45 = vpop.f32.mrf.mxu1 }
 0x391   :  { %v2785_v3 = vadd.f32 %v2784_v45, %v2695_v63  ;;  %v9694_v37 = vpop.f32.mrf.mxu2  ;;  %v3280_v63 = vunpack.c.l.bf16 %v2936_v1 }
 0x393   :  { %2645 = vmatmul.bf16.gmra.mxu3 %v7641_v9  ;;  %2823 = vmatmul.bf16.gmra.mxu1 %v7641_v9  ;;  %v9716_v27 = vpop.f32.mrf.mxu0 }
 0x396   :  { %v2606_v20 = vpop.f32.mrf.mxu3  ;;  %2571 = vmatmul.bf16.gmra.mxu2 %v7661_v54  ;;  %2749 = vmatmul.bf16.gmra.mxu0 %v7661_v54 }
 0x397   :  { %v2607_v36 = vadd.f32 %v2606_v20, %v2517_v29 }
 0x398   :  { %v2786_v23 = vpop.f32.mrf.mxu1 }
 0x399   :  { %v2864_v31 = vpack.c.bf16 %v2785_v3, %v2607_v36  ;;  %v2787_v10 = vadd.f32 %v2786_v23, %v2697_v16  ;;  %v7646_v16 = vld [vmem:[%s11441_s5 + $0x98] sm:$0xf0]  ;;  %v9714_v34 = vpop.f32.mrf.mxu2 }
 0x39a   :  { %v7649_v5 = vor.u32 %v8020_v49, %v7646_v16 }
 0x39b   :  { %v3216_v29 = vunpack.c.l.bf16 %v2864_v31  ;;  %v3217_v7 = vunpack.c.h.bf16 %v2864_v31  ;;  %v2949_v31 = vpop.permute.xlu2 %2948 }
 0x39d   :  { %v3312_v30 = vadd.f32 %v3280_v63, %v3216_v29  ;;  %v3313_v13 = vadd.f32 %v3280_v63, %v3217_v7 }
 0x39e   :  { %v2608_v15 = vpop.f32.mrf.mxu3 }
 0x39f   :  { %v2609_v41 = vadd.f32 %v2608_v15, %v9639_v56  ;;  %v3376_v44 = vpack.c.bf16 %v3313_v13, %v3312_v30  ;;  %v2954_v56 = vperm.slane %v2949_v31, %v9061_v28  ;;  %v8027_v15 = vld [vmem:[%s11441_s5 + $0xc4] sm:$0xf0] }
 0x3a0   :  { %v2789_v9 = vpop.f32.mrf.mxu1 }
 0x3a1   :  { %v2865_v45 = vpack.c.bf16 %v2787_v10, %v2609_v41  ;;  %v2790_v3 = vadd.f32 %v2789_v9, %v2700_v38  ;;  %v3408_v36 = vunpack.c.l.bf16 %v3376_v44  ;;  %v3409_v23 = vunpack.c.h.bf16 %v3376_v44  ;;  %v9720_v7 = vpop.f32.mrf.mxu2  ;;  %v9722_v10 = vpop.f32.mrf.mxu0 }
 0x3a2   :  { %v3282_v41 = vunpack.c.l.bf16 %v2954_v56 }
 0x3a3   :  { %v3218_v20 = vunpack.c.l.bf16 %v2865_v45  ;;  %v3219_v1 = vunpack.c.h.bf16 %v2865_v45  ;;  %2650 = vmatmul.bf16.gmra.mxu3 %v7649_v5  ;;  %2828 = vmatmul.bf16.gmra.mxu1 %v7649_v5  ;;  %v3472_v49 = vmul.f32 0.010009766, %v3408_v36  ;;  %v3473_v16 = vmul.f32 0.010009766, %v3409_v23 }
 0x3a4   :  { %v7669_v5 = vor.u32 %v8027_v15, %v7668_v6 }
 0x3a5   :  { %v3314_v35 = vadd.f32 %v3281_v55, %v3218_v20  ;;  %v3315_v0 = vadd.f32 %v3281_v55, %v3219_v1  ;;  %v9737_v20 = vmax.f32 %v3408_v36, %v3472_v49  ;;  %v9739_v1 = vmax.f32 %v3409_v23, %v3473_v16 }
 0x3a6   :  { %v2611_v54 = vpop.f32.mrf.mxu3  ;;  %2576 = vmatmul.bf16.gmra.mxu2 %v7669_v5  ;;  %2754 = vmatmul.bf16.gmra.mxu0 %v7669_v5 }
 0x3a7   :  { %v3377_v63 = vpack.c.bf16 %v3315_v0, %v3314_v35  ;;  %v2612_v29 = vadd.f32 %v2611_v54, %v9657_v43  ;;  %11507 = vst [vmem:[#allocation14_spill] sm:$0xff] %v9739_v1  ;;  %v2963_v54 = vperm.slane %v9677_v17, %v9061_v28 }
 0x3a8   :  { %v2791_v38 = vpop.f32.mrf.mxu1 }
 0x3a9   :  { %v2866_v30 = vpack.c.bf16 %v2790_v3, %v2612_v29  ;;  %v2792_v13 = vadd.f32 %v2791_v38, %v9667_v60  ;;  %v3410_v39 = vunpack.c.l.bf16 %v3377_v63  ;;  %v3411_v43 = vunpack.c.h.bf16 %v3377_v63  ;;  %v8022_v60 = vld [vmem:[%s11441_s5 + $0xa4] sm:$0xf]  ;;  %v7654_v3 = vld [vmem:[%s11441_s5 + $0xa8] sm:$0xf0]  ;;  %v9750_v6 = vpop.f32.mrf.mxu0 }
 0x3aa   :  { %v7657_v38 = vor.u32 %v8022_v60, %v7654_v3  ;;  %v3283_v17 = vunpack.c.l.bf16 %v2963_v54 }
 0x3ab   :  { %v3220_v44 = vunpack.c.l.bf16 %v2866_v30  ;;  %v3221_v9 = vunpack.c.h.bf16 %v2866_v30  ;;  %v3474_v45 = vmul.f32 0.010009766, %v3410_v39  ;;  %v3475_v55 = vmul.f32 0.010009766, %v3411_v43  ;;  %v9748_v30 = vpop.f32.mrf.mxu2 }
 0x3ad   :  { %v3316_v31 = vadd.f32 %v3282_v41, %v3220_v44  ;;  %v3317_v35 = vadd.f32 %v3282_v41, %v3221_v9  ;;  %v9741_v0 = vmax.f32 %v3410_v39, %v3474_v45  ;;  %v9743_v56 = vmax.f32 %v3411_v43, %v3475_v55 }
 0x3ae   :  { %v2613_v63 = vpop.f32.mrf.mxu3  ;;  %v2972_v45 = vperm.slane %v9659_v2, %v9061_v28  ;;  %v8029_v2 = vld [vmem:[%s11441_s5 + $0xd4] sm:$0xf0] }
 0x3af   :  { %v2614_v29 = vadd.f32 %v2613_v63, %v9665_v40  ;;  %v3378_v49 = vpack.c.bf16 %v3317_v35, %v3316_v31 }
 0x3b0   :  { %v2794_v16 = vpop.f32.mrf.mxu1 }
 0x3b1   :  { %v2867_v15 = vpack.c.bf16 %v2792_v13, %v2614_v29  ;;  %v2795_v39 = vadd.f32 %v2794_v16, %v9687_v22  ;;  %v3412_v40 = vunpack.c.l.bf16 %v3378_v49  ;;  %v3413_v5 = vunpack.c.h.bf16 %v3378_v49  ;;  %v9762_v13 = vpop.f32.mrf.mxu0 }
 0x3b2   :  { %v3284_v16 = vunpack.c.l.bf16 %v2972_v45 }
 0x3b3   :  { %v3222_v43 = vunpack.c.l.bf16 %v2867_v15  ;;  %v3223_v41 = vunpack.c.h.bf16 %v2867_v15  ;;  %2655 = vmatmul.bf16.gmra.mxu3 %v7657_v38  ;;  %2833 = vmatmul.bf16.gmra.mxu1 %v7657_v38  ;;  %v9760_v31 = vpop.f32.mrf.mxu2  ;;  %v3476_v35 = vmul.f32 0.010009766, %v3412_v40  ;;  %v3477_v54 = vmul.f32 0.010009766, %v3413_v5  ;;  %v7676_v38 = vld [vmem:[%s11441_s5 + $0xd0] sm:$0xf] }
 0x3b4   :  { %v7677_v15 = vor.u32 %v8029_v2, %v7676_v38 }
 0x3b5   :  { %v3318_v44 = vadd.f32 %v3283_v17, %v3222_v43  ;;  %v3319_v9 = vadd.f32 %v3283_v17, %v3223_v41 }
 0x3b6   :  { %v2616_v55 = vpop.f32.mrf.mxu3  ;;  %2581 = vmatmul.bf16.gmra.mxu2 %v7677_v15  ;;  %2759 = vmatmul.bf16.gmra.mxu0 %v7677_v15 }
 0x3b7   :  { %v3379_v60 = vpack.c.bf16 %v3319_v9, %v3318_v44  ;;  %v2617_v3 = vadd.f32 %v2616_v55, %v9685_v33  ;;  %v9777_v9 = vmax.f32 %v3412_v40, %v3476_v35  ;;  %v9779_v55 = vmax.f32 %v3413_v5, %v3477_v54 }
 0x3b8   :  { %v2796_v22 = vpop.f32.mrf.mxu1 }
 0x3b9   :  { %v2868_v63 = vpack.c.bf16 %v2795_v39, %v2617_v3  ;;  %v2797_v29 = vadd.f32 %v2796_v22, %v9696_v32  ;;  %v3414_v49 = vunpack.c.l.bf16 %v3379_v60  ;;  %v3415_v33 = vunpack.c.h.bf16 %v3379_v60  ;;  %v8024_v32 = vld [vmem:[%s11441_s5 + $0xb4] sm:$0xf]  ;;  %v7662_v39 = vld [vmem:[%s11441_s5 + $0xb8] sm:$0xf0]  ;;  %v9790_v15 = vpop.f32.mrf.mxu0 }
 0x3ba   :  { %v7665_v23 = vor.u32 %v8024_v32, %v7662_v39  ;;  %v2990_v32 = vperm.slane %v9633_v46, %v9061_v28  ;;  %v8031_v46 = vld [vmem:[%s11441_s5 + $0xe4] sm:$0xf0] }
 0x3bb   :  { %v3224_v17 = vunpack.c.l.bf16 %v2868_v63  ;;  %v3225_v43 = vunpack.c.h.bf16 %v2868_v63  ;;  %v3478_v41 = vmul.f32 0.010009766, %v3414_v49  ;;  %v3479_v44 = vmul.f32 0.010009766, %v3415_v33  ;;  %v9788_v36 = vpop.f32.mrf.mxu2 }
 0x3bc   :  { %v2981_v63 = vperm.slane %v9704_v62, %v9061_v28 }
 0x3bd   :  { %v3320_v45 = vadd.f32 %v3284_v16, %v3224_v17  ;;  %v3321_v60 = vadd.f32 %v3284_v16, %v3225_v43  ;;  %v9781_v3 = vmax.f32 %v3414_v49, %v3478_v41  ;;  %v9783_v22 = vmax.f32 %v3415_v33, %v3479_v44 }
 0x3be   :  { %v2618_v38 = vpop.f32.mrf.mxu3  ;;  %v3285_v62 = vunpack.c.l.bf16 %v2981_v63 }
 0x3bf   :  { %v2619_v2 = vadd.f32 %v2618_v38, %v9694_v37  ;;  %v3380_v35 = vpack.c.bf16 %v3321_v60, %v3320_v45 }
 0x3c0   :  { %v2799_v54 = vpop.f32.mrf.mxu1 }
 0x3c1   :  { %v2869_v49 = vpack.c.bf16 %v2797_v29, %v2619_v2  ;;  %v2800_v33 = vadd.f32 %v2799_v54, %v9716_v27  ;;  %v3416_v37 = vunpack.c.l.bf16 %v3380_v35  ;;  %v3417_v43 = vunpack.c.h.bf16 %v3380_v35  ;;  %v9802_v29 = vpop.f32.mrf.mxu0  ;;  %v7684_v35 = vld [vmem:[%s11441_s5 + $0xe0] sm:$0xf] }
 0x3c3   :  { %v3226_v16 = vunpack.c.l.bf16 %v2869_v49  ;;  %v3227_v17 = vunpack.c.h.bf16 %v2869_v49  ;;  %2660 = vmatmul.bf16.gmra.mxu3 %v7665_v23  ;;  %2838 = vmatmul.bf16.gmra.mxu1 %v7665_v23  ;;  %v9800_v60 = vpop.f32.mrf.mxu2  ;;  %v3480_v63 = vmul.f32 0.010009766, %v3416_v37  ;;  %v3481_v2 = vmul.f32 0.010009766, %v3417_v43 }
 0x3c5   :  { %v3322_v41 = vadd.f32 %v3285_v62, %v3226_v16  ;;  %v3323_v44 = vadd.f32 %v3285_v62, %v3227_v17  ;;  %v3286_v62 = vunpack.c.l.bf16 %v2990_v32  ;;  %v7685_v16 = vor.u32 %v8031_v46, %v7684_v35 }
 0x3c6   :  { %v2621_v39 = vpop.f32.mrf.mxu3  ;;  %v2999_v46 = vperm.slane %v9637_v50, %v9061_v28 }
 0x3c7   :  { %v3381_v38 = vpack.c.bf16 %v3323_v44, %v3322_v41  ;;  %v2622_v45 = vadd.f32 %v2621_v39, %v9714_v34  ;;  %2586 = vmatmul.bf16.gmra.mxu2 %v7685_v16  ;;  %2764 = vmatmul.bf16.gmra.mxu0 %v7685_v16 }
 0x3c8   :  { %v2801_v27 = vpop.f32.mrf.mxu1  ;;  %v3287_v50 = vunpack.c.l.bf16 %v2999_v46 }
 0x3c9   :  { %v2870_v54 = vpack.c.bf16 %v2800_v33, %v2622_v45  ;;  %v2802_v23 = vadd.f32 %v2801_v27, %v9722_v10  ;;  %v3418_v49 = vunpack.c.l.bf16 %v3381_v38  ;;  %v3419_v34 = vunpack.c.h.bf16 %v3381_v38  ;;  %v8026_v10 = vld [vmem:[%s11441_s5 + $0xc4] sm:$0xf]  ;;  %v7670_v33 = vld [vmem:[%s11441_s5 + $0xc8] sm:$0xf0] }
 0x3ca   :  { %v9817_v45 = vmax.f32 %v3416_v37, %v3480_v63  ;;  %v9819_v27 = vmax.f32 %v3417_v43, %v3481_v2  ;;  %v7673_v42 = vor.u32 %v8026_v10, %v7670_v33 }
 0x3cb   :  { %v3228_v17 = vunpack.c.l.bf16 %v2870_v54  ;;  %v3229_v41 = vunpack.c.h.bf16 %v2870_v54  ;;  %v3482_v44 = vmul.f32 0.010009766, %v3418_v49  ;;  %v3483_v39 = vmul.f32 0.010009766, %v3419_v34  ;;  %v9828_v47 = vpop.f32.mrf.mxu2 }
 0x3cd   :  { %v3324_v32 = vadd.f32 %v3286_v62, %v3228_v17  ;;  %v3325_v38 = vadd.f32 %v3286_v62, %v3229_v41  ;;  %v9821_v35 = vmax.f32 %v3418_v49, %v3482_v44  ;;  %v9823_v54 = vmax.f32 %v3419_v34, %v3483_v39  ;;  %v9834_v49 = vpop.f32.mrf.mxu0 }
 0x3ce   :  { %v2623_v5 = vpop.f32.mrf.mxu3 }
 0x3cf   :  { %v2624_v40 = vadd.f32 %v2623_v5, %v9720_v7  ;;  %v3382_v63 = vpack.c.bf16 %v3325_v38, %v3324_v32 }
 0x3d0   :  { %v2804_v2 = vpop.f32.mrf.mxu1 }
 0x3d1   :  { %v2871_v34 = vpack.c.bf16 %v2802_v23, %v2624_v40  ;;  %v2805_v62 = vadd.f32 %v2804_v2, %v9750_v6  ;;  %v3420_v7 = vunpack.c.l.bf16 %v3382_v63  ;;  %v3421_v44 = vunpack.c.h.bf16 %v3382_v63  ;;  %v7692_v6 = vld [vmem:[%s11441_s5 + $0xf0] sm:$0xf] }
 0x3d3   :  { %v3230_v16 = vunpack.c.l.bf16 %v2871_v34  ;;  %v3231_v17 = vunpack.c.h.bf16 %v2871_v34  ;;  %2665 = vmatmul.bf16.gmra.mxu3 %v7673_v42  ;;  %2843 = vmatmul.bf16.gmra.mxu1 %v7673_v42  ;;  %v3484_v38 = vmul.f32 0.010009766, %v3420_v7  ;;  %v2549_v40 = vpop.f32.mrf.mxu2  ;;  %v8033_v42 = vld [vmem:[%s11441_s5 + $0xf4] sm:$0xf0]  ;;  %v3485_v63 = vmul.f32 0.010009766, %v3421_v44 }
 0x3d4   :  { %v7693_v34 = vor.u32 %v8033_v42, %v7692_v6 }
 0x3d5   :  { %v3326_v5 = vadd.f32 %v3287_v50, %v3230_v16  ;;  %v3327_v41 = vadd.f32 %v3287_v50, %v3231_v17  ;;  %v2727_v2 = vpop.f32.mrf.mxu0  ;;  %v7678_v16 = vld [vmem:[%s11441_s5 + $0xd8] sm:$0xf0]  ;;  %v9854_v17 = vmax.f32 %v3420_v7, %v3484_v38 }
 0x3d6   :  { %v2626_v39 = vpop.f32.mrf.mxu3 }
 0x3d7   :  { %v3383_v10 = vpack.c.bf16 %v3327_v41, %v3326_v5  ;;  %v2627_v33 = vadd.f32 %v2626_v39, %v9748_v30  ;;  %2591 = vmatmul.bf16.gmra.mxu2 %v7693_v34  ;;  %2769 = vmatmul.bf16.gmra.mxu0 %v7693_v34  ;;  %v9858_v41 = vmax.f32 %v3421_v44, %v3485_v63  ;;  %v8030_v44 = vld [vmem:[%s11441_s5 + $0xe4] sm:$0xf] }
 0x3d8   :  { %v9838_v32 = vpop.f32.mrf.mxu1 }
 0x3d9   :  { %v9840_v43 = vpack.c.bf16 %v2805_v62, %v2627_v33  ;;  %v3422_v23 = vunpack.c.l.bf16 %v3383_v10  ;;  %v3423_v46 = vunpack.c.h.bf16 %v3383_v10  ;;  %v8028_v62 = vld [vmem:[%s11441_s5 + $0xd4] sm:$0xf] }
 0x3da   :  { %v7681_v33 = vor.u32 %v8028_v62, %v7678_v16 }
 0x3db   :  { %v3486_v30 = vmul.f32 0.010009766, %v3422_v23  ;;  %v3487_v50 = vmul.f32 0.010009766, %v3423_v46  ;;  %v2552_v34 = vpop.f32.mrf.mxu2 }
 0x3dd   :  { %v9856_v5 = vmax.f32 %v3422_v23, %v3486_v30  ;;  %v9860_v39 = vmax.f32 %v3423_v46, %v3487_v50  ;;  %v2730_v7 = vpop.f32.mrf.mxu0  ;;  %v7686_v46 = vld [vmem:[%s11441_s5 + $0xe8] sm:$0xf0] }
 0x3de   :  { %v2628_v10 = vpop.f32.mrf.mxu3  ;;  %v7689_v62 = vor.u32 %v8030_v44, %v7686_v46 }
 0x3e0   :  { %v2809_v37 = vpop.f32.mrf.mxu1 }
 0x3e3   :  { %2670 = vmatmul.bf16.gmra.mxu3 %v7681_v33  ;;  %2848 = vmatmul.bf16.gmra.mxu1 %v7681_v33  ;;  %v9872_v63 = vpop.f32.mrf.mxu2 }
 0x3e5   :  { %v9874_v50 = vpop.f32.mrf.mxu0 }
 0x3e6   :  { %v2631_v38 = vpop.f32.mrf.mxu3 }
 0x3e8   :  { %v2811_v23 = vpop.f32.mrf.mxu1 }
 0x3eb   :  { %v9876_v42 = vpop.f32.mrf.mxu2 }
 0x3ed   :  { %v9878_v18 = vpop.f32.mrf.mxu0 }
 0x3ee   :  { %v2633_v30 = vpop.f32.mrf.mxu3 }
 0x3ef   :  { %v2634_v53 = vadd.f32 %v2633_v30, %v9800_v60  ;;  %v3290_v60 = vunpack.c.l.bf16 %v3026_v11 }
 0x3f0   :  { %v2814_v16 = vpop.f32.mrf.mxu1 }
 0x3f1   :  { %v2815_v51 = vadd.f32 %v2814_v16, %v9834_v49 }
 0x3f3   :  { %2675 = vmatmul.bf16.gmra.mxu3 %v7689_v62  ;;  %2853 = vmatmul.bf16.gmra.mxu1 %v7689_v62  ;;  %v9886_v46 = vpop.f32.mrf.mxu2 }
 0x3f4   :  { %11508 = vst [vmem:[#allocation25_spill] sm:$0xff] %v9886_v46 }
 0x3f5   :  { %v9888_v62 = vpop.f32.mrf.mxu0 }
 0x3f6   :  { %v2636_v33 = vpop.f32.mrf.mxu3  ;;  %11509 = vst [vmem:[#allocation26_spill] sm:$0xff] %v9888_v62 }
 0x3f7   :  { %v2637_v1 = vadd.f32 %v2636_v33, %v9828_v47  ;;  %v3293_v33 = vunpack.c.l.bf16 %v3053_v59 }
 0x3f8   :  { %v2816_v6 = vpop.f32.mrf.mxu1 }
 0x3f9   :  { %v2817_v62 = vadd.f32 %v2816_v6, %v2727_v2  ;;  %v2812_v2 = vadd.f32 %v2811_v23, %v9802_v29  ;;  %v2876_v6 = vpack.c.bf16 %v2815_v51, %v2637_v1  ;;  %v3291_v29 = vunpack.c.l.bf16 %v3035_v25 }
 0x3fa   :  { %v2807_v51 = vadd.f32 %v9838_v32, %v9762_v13 }
 0x3fb   :  { %v9913_v24 = vpop.f32.mrf.mxu2  ;;  %v3240_v1 = vunpack.c.l.bf16 %v2876_v6  ;;  %v3241_v23 = vunpack.c.h.bf16 %v2876_v6 }
 0x3fe   :  { %v2638_v14 = vpop.f32.mrf.mxu3 }
 0x3ff   :  { %v2639_v19 = vadd.f32 %v2638_v14, %v2549_v40  ;;  %v2810_v14 = vadd.f32 %v2809_v37, %v9790_v15  ;;  %v9905_v40 = vunpack.c.l.bf16 %v3071_v61  ;;  %v2629_v61 = vadd.f32 %v2628_v10, %v9760_v31 }
 0x400   :  { %v2819_v44 = vpop.f32.mrf.mxu1  ;;  %v3008_v31 = vperm.slane %v9649_v48, %v9061_v28  ;;  %v3232_v48 = vunpack.c.l.bf16 %v9840_v43 }
 0x401   :  { %v2820_v46 = vadd.f32 %v2819_v44, %v2730_v7  ;;  %v2877_v47 = vpack.c.bf16 %v2817_v62, %v2639_v19  ;;  %v2875_v19 = vpack.c.bf16 %v2812_v2, %v2634_v53  ;;  %v9917_v44 = vpop.f32.mrf.mxu0  ;;  %v2873_v62 = vpack.c.bf16 %v2807_v51, %v2629_v61 }
 0x403   :  { %2680 = vmatmul.bf16.gmra.mxu3 %v7697_v57  ;;  %2858 = vmatmul.bf16.gmra.mxu1 %v7697_v57  ;;  %v2632_v57 = vadd.f32 %v2631_v38, %v9788_v36  ;;  %v3017_v36 = vperm.slane %v9615_v26, %v9061_v28  ;;  %v3243_v8 = vunpack.c.h.bf16 %v2877_v47  ;;  %v3238_v59 = vunpack.c.l.bf16 %v2875_v19 }
 0x404   :  { %v3239_v11 = vunpack.c.h.bf16 %v2875_v19  ;;  %v3235_v61 = vunpack.c.h.bf16 %v2873_v62 }
 0x405   :  { %v2874_v37 = vpack.c.bf16 %v2810_v14, %v2632_v57  ;;  %v3289_v26 = vunpack.c.l.bf16 %v3017_v36  ;;  %v3339_v53 = vadd.f32 %v3293_v33, %v3243_v8  ;;  %v3334_v19 = vadd.f32 %v3291_v29, %v3238_v59 }
 0x406   :  { %v2641_v49 = vpop.f32.mrf.mxu3 }
 0x407   :  { %v2642_v16 = vadd.f32 %v2641_v49, %v2552_v34  ;;  %v3242_v34 = vunpack.c.l.bf16 %v2877_v47  ;;  %v3236_v58 = vunpack.c.l.bf16 %v2874_v37  ;;  %v3237_v32 = vunpack.c.h.bf16 %v2874_v37 }
 0x408   :  { %v2821_v7 = vpop.f32.mrf.mxu1  ;;  %v3336_v47 = vadd.f32 %v3292_v4, %v3240_v1 }
 0x409   :  { %v2878_v15 = vpack.c.bf16 %v2820_v46, %v2642_v16  ;;  %v3338_v57 = vadd.f32 %v3293_v33, %v3242_v34  ;;  %v2822_v49 = vadd.f32 %v2821_v7, %v9874_v50  ;;  %v3337_v16 = vadd.f32 %v3292_v4, %v3241_v23  ;;  %v9928_v23 = vpop.f32.mrf.mxu2 }
 0x40a   :  { %v3335_v33 = vadd.f32 %v3291_v29, %v3239_v11  ;;  %v3288_v34 = vunpack.c.l.bf16 %v3008_v31  ;;  %v3332_v37 = vadd.f32 %v3290_v60, %v3236_v58  ;;  %v3333_v8 = vadd.f32 %v3290_v60, %v3237_v32 }
 0x40b   :  { %v3244_v38 = vunpack.c.l.bf16 %v2878_v15  ;;  %v3245_v30 = vunpack.c.h.bf16 %v2878_v15  ;;  %v3234_v15 = vunpack.c.l.bf16 %v2873_v62  ;;  %v3389_v50 = vpack.c.bf16 %v3339_v53, %v3338_v57  ;;  %v9930_v62 = vpop.f32.mrf.mxu0 }
 0x40c   :  { %v3388_v4 = vpack.c.bf16 %v3337_v16, %v3336_v47  ;;  %v3387_v29 = vpack.c.bf16 %v3335_v33, %v3334_v19 }
 0x40d   :  { %v3340_v10 = vadd.f32 %v3294_v12, %v3244_v38  ;;  %v3341_v46 = vadd.f32 %v3294_v12, %v3245_v30  ;;  %v3233_v12 = vunpack.c.h.bf16 %v9840_v43  ;;  %v3328_v30 = vadd.f32 %v3288_v34, %v3232_v48 }
 0x40e   :  { %v2643_v14 = vpop.f32.mrf.mxu3  ;;  %v3434_v58 = vunpack.c.l.bf16 %v3389_v50  ;;  %v3435_v11 = vunpack.c.h.bf16 %v3389_v50  ;;  %v3431_v48 = vunpack.c.h.bf16 %v3387_v29 }
 0x40f   :  { %v2644_v13 = vadd.f32 %v2643_v14, %v9872_v63  ;;  %v3390_v25 = vpack.c.bf16 %v3341_v46, %v3340_v10  ;;  %v3330_v10 = vadd.f32 %v3289_v26, %v3234_v15  ;;  %v3331_v46 = vadd.f32 %v3289_v26, %v3235_v61 }
 0x410   :  { %v2824_v2 = vpop.f32.mrf.mxu1  ;;  %v3386_v14 = vpack.c.bf16 %v3333_v8, %v3332_v37  ;;  %v3499_v15 = vmul.f32 0.010009766, %v3435_v11 }
 0x411   :  { %v2879_v6 = vpack.c.bf16 %v2822_v49, %v2644_v13  ;;  %v2825_v36 = vadd.f32 %v2824_v2, %v9878_v18  ;;  %v3436_v38 = vunpack.c.l.bf16 %v3390_v25  ;;  %v3437_v51 = vunpack.c.h.bf16 %v3390_v25 }
 0x412   :  { %v3329_v18 = vadd.f32 %v3288_v34, %v3233_v12  ;;  %v3432_v49 = vunpack.c.l.bf16 %v3388_v4  ;;  %v3385_v25 = vpack.c.bf16 %v3331_v46, %v3330_v10  ;;  %v3430_v2 = vunpack.c.l.bf16 %v3387_v29  ;;  %v2567_v29 = vpop.f32.mrf.mxu2 }
 0x413   :  { %v3246_v7 = vunpack.c.l.bf16 %v2879_v6  ;;  %v3247_v63 = vunpack.c.h.bf16 %v2879_v6  ;;  %v3500_v53 = vmul.f32 0.010009766, %v3436_v38  ;;  %v3501_v26 = vmul.f32 0.010009766, %v3437_v51 }
 0x414   :  { %v3384_v16 = vpack.c.bf16 %v3329_v18, %v3328_v30  ;;  %v3496_v61 = vmul.f32 0.010009766, %v3432_v49  ;;  %v3428_v33 = vunpack.c.l.bf16 %v3386_v14  ;;  %v3429_v34 = vunpack.c.h.bf16 %v3386_v14  ;;  %v2745_v14 = vpop.f32.mrf.mxu0 }
 0x415   :  { %v3342_v1 = vadd.f32 %v9905_v40, %v3246_v7  ;;  %v3343_v43 = vadd.f32 %v9905_v40, %v3247_v63  ;;  %v3433_v40 = vunpack.c.h.bf16 %v3388_v4  ;;  %v3660_v50 = vmax.f32 %v3436_v38, %v3500_v53 }
 0x416   :  { %v2646_v31 = vpop.f32.mrf.mxu3  ;;  %v3661_v63 = vmax.f32 %v3437_v51, %v3501_v26  ;;  %v3494_v8 = vmul.f32 0.010009766, %v3430_v2  ;;  %v3495_v4 = vmul.f32 0.010009766, %v3431_v48  ;;  %v3426_v30 = vunpack.c.l.bf16 %v3385_v25 }
 0x417   :  { %v3391_v59 = vpack.c.bf16 %v3343_v43, %v3342_v1  ;;  %v2647_v60 = vadd.f32 %v2646_v31, %v9876_v42  ;;  %v3498_v42 = vmul.f32 0.010009766, %v3434_v58  ;;  %v3497_v19 = vmul.f32 0.010009766, %v3433_v40 }
 0x418   :  { %v9933_v57 = vpop.f32.mrf.mxu1  ;;  %v3427_v1 = vunpack.c.h.bf16 %v3385_v25  ;;  %v3659_v46 = vmax.f32 %v3435_v11, %v3499_v15  ;;  %v3656_v51 = vmax.f32 %v3432_v49, %v3496_v61 }
 0x419   :  { %v9935_v13 = vpack.c.bf16 %v2825_v36, %v2647_v60  ;;  %v3438_v32 = vunpack.c.l.bf16 %v3391_v59  ;;  %v3439_v47 = vunpack.c.h.bf16 %v3391_v59  ;;  %v3658_v10 = vmax.f32 %v3434_v58, %v3498_v42 }
 0x41a   :  { %v3492_v59 = vmul.f32 0.010009766, %v3428_v33  ;;  %v3424_v60 = vunpack.c.l.bf16 %v3384_v16  ;;  %v3657_v53 = vmax.f32 %v3433_v40, %v3497_v19  ;;  %v3491_v26 = vmul.f32 0.010009766, %v3427_v1 }
 0x41b   :  { %11510 = vst [vmem:[#allocation27_spill] sm:$0xff] %v9935_v13  ;;  %v3502_v12 = vmul.f32 0.010009766, %v3438_v32  ;;  %v3503_v6 = vmul.f32 0.010009766, %v3439_v47  ;;  %v3425_v13 = vunpack.c.h.bf16 %v3384_v16  ;;  %v3708_v25 = vpack.c.bf16 %v3658_v10, %v3656_v51 }
 0x41c   :  { %v3655_v58 = vmax.f32 %v3431_v48, %v3495_v4  ;;  %v3652_v11 = vmax.f32 %v3428_v33, %v3492_v59  ;;  %v3488_v15 = vmul.f32 0.010009766, %v3424_v60  ;;  %v3651_v19 = vmax.f32 %v3427_v1, %v3491_v26 }
 0x41d   :  { %v3662_v7 = vmax.f32 %v3438_v32, %v3502_v12  ;;  %v3663_v36 = vmax.f32 %v3439_v47, %v3503_v6  ;;  %v3493_v32 = vmul.f32 0.010009766, %v3429_v34  ;;  %v3490_v47 = vmul.f32 0.010009766, %v3426_v30 }
 0x41e   :  { %v9937_v37 = vpop.f32.mrf.mxu3  ;;  %v3709_v12 = vpack.c.bf16 %v3659_v46, %v3657_v53  ;;  %v3654_v6 = vmax.f32 %v3430_v2, %v3494_v8  ;;  %v3489_v16 = vmul.f32 0.010009766, %v3425_v13  ;;  %v3648_v48 = vmax.f32 %v3424_v60, %v3488_v15  ;;  %v2747_v8 = vpop.f32.mrf.mxu0 }
 0x41f   :  { %v3710_v43 = vpack.c.bf16 %v3662_v7, %v3660_v50  ;;  %v3711_v18 = vpack.c.bf16 %v3663_v36, %v3661_v63  ;;  %v3653_v42 = vmax.f32 %v3429_v34, %v3493_v32  ;;  %v3650_v7 = vmax.f32 %v3426_v30, %v3490_v47  ;;  %v2569_v34 = vpop.f32.mrf.mxu2 }
 0x420   :  { %v2829_v31 = vpop.f32.mrf.mxu1  ;;  %v3706_v40 = vpack.c.bf16 %v3654_v6, %v3652_v11  ;;  %v3649_v33 = vmax.f32 %v3425_v13, %v3489_v16  ;;  %v11511_v13 = vpack.c.bf16 %v9856_v5, %v9854_v17  ;;  %v11512_v59 = vpack.c.bf16 %v9860_v39, %v9858_v41  ;;  %v11520_v6 = vld [vmem:[#allocation15_spill] sm:$0xff] }
 0x421   :  { %v2830_v38 = vadd.f32 %v2829_v31, %v9917_v44  ;;  %3920 = vmatpush.bf16.msrb.mxu2 %v3710_v43  ;;  %4098 = vmatpush.bf16.msrb.mxu0 %v3711_v18  ;;  %v3098_v44 = vperm.slane %v9691_v52, %v9061_v28  ;;  %v3707_v61 = vpack.c.bf16 %v3655_v58, %v3653_v42 }
 0x422   :  { %v3704_v52 = vpack.c.bf16 %v3650_v7, %v3648_v48  ;;  %v3705_v18 = vpack.c.bf16 %v3651_v19, %v3649_v33  ;;  %v11513_v51 = vpack.c.bf16 %v9821_v35, %v9817_v45  ;;  %v11514_v53 = vpack.c.bf16 %v9823_v54, %v9819_v27 }
 0x423   :  { %v3298_v36 = vunpack.c.l.bf16 %v3098_v44  ;;  %v11515_v41 = vpack.c.bf16 %v9781_v3, %v9777_v9  ;;  %v11516_v39 = vpack.c.bf16 %v9783_v22, %v9779_v55  ;;  %v3125_v55 = vperm.slane %v11520_v6, %v9061_v28 }
 0x425   :  { %3921 = vmatpush.bf16.msrb.mxu2 %v3708_v25  ;;  %4099 = vmatpush.bf16.msrb.mxu0 %v3709_v12  ;;  %v11517_v25 = vpack.c.bf16 %v9741_v0, %v9737_v20  ;;  %v3301_v44 = vunpack.c.l.bf16 %v3125_v55 }
 0x426   :  { %v2651_v50 = vpop.f32.mrf.mxu3 }
 0x427   :  { %v2652_v49 = vadd.f32 %v2651_v50, %v9913_v24  ;;  %v2572_v60 = vpop.f32.mrf.mxu2 }
 0x428   :  { %v9943_v63 = vpop.f32.mrf.mxu1 }
 0x429   :  { %v2882_v2 = vpack.c.bf16 %v2830_v38, %v2652_v49  ;;  %3922 = vmatpush.bf16.msrb.mxu2 %v3706_v40  ;;  %4100 = vmatpush.bf16.msrb.mxu0 %v3707_v61  ;;  %v2750_v38 = vpop.f32.mrf.mxu0  ;;  %v11521_v40 = vld [vmem:[#allocation13_spill] sm:$0xff] }
 0x42a   :  { %v3134_v61 = vperm.slane %v11521_v40, %v9061_v28 }
 0x42b   :  { %v3252_v4 = vunpack.c.l.bf16 %v2882_v2  ;;  %v3253_v43 = vunpack.c.h.bf16 %v2882_v2 }
 0x42d   :  { %v3348_v30 = vadd.f32 %v3298_v36, %v3252_v4  ;;  %v3349_v10 = vadd.f32 %v3298_v36, %v3253_v43  ;;  %3923 = vmatpush.bf16.msrb.mxu2 %v3704_v52  ;;  %4101 = vmatpush.bf16.msrb.mxu0 %v3705_v18 }
 0x42e   :  { %v9945_v24 = vpop.f32.mrf.mxu3 }
 0x42f   :  { %v9947_v1 = vpack.c.bf16 %v3349_v10, %v3348_v30  ;;  %v2574_v12 = vpop.f32.mrf.mxu2  ;;  %v3302_v30 = vunpack.c.l.bf16 %v3134_v61 }
 0x430   :  { %v2834_v46 = vpop.f32.mrf.mxu1 }
 0x431   :  { %v2835_v31 = vadd.f32 %v2834_v46, %v2745_v14  ;;  %3924 = vmatpush.bf16.msrb.mxu2 %v11511_v13  ;;  %4102 = vmatpush.bf16.msrb.mxu0 %v11512_v59  ;;  %v3116_v14 = vperm.slane %v9661_v21, %v9061_v28  ;;  %v11518_v21 = vld [vmem:[#allocation14_spill] sm:$0xff]  ;;  %v2752_v3 = vpop.f32.mrf.mxu0 }
 0x433   :  { %v3300_v45 = vunpack.c.l.bf16 %v3116_v14  ;;  %v11522_v14 = vld [vmem:[#allocation17_spill] sm:$0xff] }
 0x435   :  { %3925 = vmatpush.bf16.msrb.mxu2 %v11513_v51  ;;  %4103 = vmatpush.bf16.msrb.mxu0 %v11514_v53 }
 0x436   :  { %v2656_v32 = vpop.f32.mrf.mxu3 }
 0x437   :  { %v2657_v17 = vadd.f32 %v2656_v32, %v2567_v29  ;;  %v11519_v29 = vpack.c.bf16 %v9743_v56, %v11518_v21  ;;  %v2577_v33 = vpop.f32.mrf.mxu2 }
 0x438   :  { %v2836_v5 = vpop.f32.mrf.mxu1 }
 0x439   :  { %v2884_v47 = vpack.c.bf16 %v2835_v31, %v2657_v17  ;;  %3926 = vmatpush.bf16.msrb.mxu2 %v11515_v41  ;;  %4104 = vmatpush.bf16.msrb.mxu0 %v11516_v39  ;;  %v2837_v58 = vadd.f32 %v2836_v5, %v2747_v8  ;;  %v2755_v8 = vpop.f32.mrf.mxu0  ;;  %v3143_v17 = vperm.slane %v11522_v14, %v9061_v28 }
 0x43b   :  { %v3256_v35 = vunpack.c.l.bf16 %v2884_v47  ;;  %v3257_v26 = vunpack.c.h.bf16 %v2884_v47 }
 0x43d   :  { %v3352_v27 = vadd.f32 %v3300_v45, %v3256_v35  ;;  %v3353_v54 = vadd.f32 %v3300_v45, %v3257_v26  ;;  %3927 = vmatpush.bf16.msrb.mxu2 %v11517_v25  ;;  %4105 = vmatpush.bf16.msrb.mxu0 %v11519_v29  ;;  %v3303_v29 = vunpack.c.l.bf16 %v3143_v17 }
 0x43e   :  { %v2658_v9 = vpop.f32.mrf.mxu3 }
 0x43f   :  { %v3396_v22 = vpack.c.bf16 %v3353_v54, %v3352_v27  ;;  %v2659_v11 = vadd.f32 %v2658_v9, %v2569_v34  ;;  %v2579_v25 = vpop.f32.mrf.mxu2 }
 0x440   :  { %v2839_v42 = vpop.f32.mrf.mxu1 }
 0x441   :  { %v2885_v15 = vpack.c.bf16 %v2837_v58, %v2659_v11  ;;  %v2840_v16 = vadd.f32 %v2839_v42, %v2750_v38  ;;  %v3448_v0 = vunpack.c.l.bf16 %v3396_v22  ;;  %v3449_v7 = vunpack.c.h.bf16 %v3396_v22  ;;  %v2757_v21 = vpop.f32.mrf.mxu0 }
 0x443   :  { %v3258_v50 = vunpack.c.l.bf16 %v2885_v15  ;;  %v3259_v20 = vunpack.c.h.bf16 %v2885_v15  ;;  %v3512_v34 = vmul.f32 0.010009766, %v3448_v0  ;;  %v3513_v4 = vmul.f32 0.010009766, %v3449_v7 }
 0x445   :  { %v3354_v49 = vadd.f32 %v3301_v44, %v3258_v50  ;;  %v3355_v56 = vadd.f32 %v3301_v44, %v3259_v20  ;;  %v9979_v59 = vmax.f32 %v3448_v0, %v3512_v34  ;;  %v9981_v38 = vmax.f32 %v3449_v7, %v3513_v4 }
 0x446   :  { %v2661_v19 = vpop.f32.mrf.mxu3 }
 0x447   :  { %v3397_v2 = vpack.c.bf16 %v3355_v56, %v3354_v49  ;;  %v2662_v48 = vadd.f32 %v2661_v19, %v2572_v60  ;;  %v2582_v19 = vpop.f32.mrf.mxu2 }
 0x448   :  { %v2841_v36 = vpop.f32.mrf.mxu1 }
 0x449   :  { %v2886_v43 = vpack.c.bf16 %v2840_v16, %v2662_v48  ;;  %v3450_v52 = vunpack.c.l.bf16 %v3397_v2  ;;  %v3451_v18 = vunpack.c.h.bf16 %v3397_v2  ;;  %v2842_v5 = vadd.f32 %v2841_v36, %v2752_v3  ;;  %v2760_v36 = vpop.f32.mrf.mxu0 }
 0x44b   :  { %v3260_v10 = vunpack.c.l.bf16 %v2886_v43  ;;  %v3261_v46 = vunpack.c.h.bf16 %v2886_v43  ;;  %v3514_v31 = vmul.f32 0.010009766, %v3450_v52  ;;  %v3515_v13 = vmul.f32 0.010009766, %v3451_v18 }
 0x44d   :  { %v3356_v51 = vadd.f32 %v3302_v30, %v3260_v10  ;;  %v3357_v53 = vadd.f32 %v3302_v30, %v3261_v46  ;;  %v9983_v60 = vmax.f32 %v3450_v52, %v3514_v31  ;;  %v9985_v32 = vmax.f32 %v3451_v18, %v3515_v13  ;;  %v11524_v18 = vld [vmem:[#allocation18_spill] sm:$0xff] }
 0x44e   :  { %v2663_v47 = vpop.f32.mrf.mxu3  ;;  %v3161_v30 = vperm.slane %v11524_v18, %v9061_v28 }
 0x44f   :  { %v3398_v41 = vpack.c.bf16 %v3357_v53, %v3356_v51  ;;  %v2664_v39 = vadd.f32 %v2663_v47, %v2574_v12  ;;  %v3716_v45 = vpack.c.bf16 %v9983_v60, %v9979_v59  ;;  %v3717_v35 = vpack.c.bf16 %v9985_v32, %v9981_v38  ;;  %v11523_v12 = vld [vmem:[#allocation16_spill] sm:$0xff]  ;;  %v8034_v59 = vld [vmem:[#allocation3 + $0x4] sm:$0xf]  ;;  %v7702_v60 = vld [vmem:[#allocation3 + $0x8] sm:$0xf0] }
 0x450   :  { %v2844_v26 = vpop.f32.mrf.mxu1  ;;  %v3152_v11 = vperm.slane %v11523_v12, %v9061_v28  ;;  %v7705_v38 = vor.u32 %v8034_v59, %v7702_v60  ;;  %v7724_v32 = vld [vmem:[#allocation3 + $0x30] sm:$0xf]  ;;  %v8053_v59 = vld [vmem:[#allocation3 + $0x94] sm:$0xf0] }
 0x451   :  { %v2887_v27 = vpack.c.bf16 %v2842_v5, %v2664_v39  ;;  %v2845_v54 = vadd.f32 %v2844_v26, %v2755_v8  ;;  %v3452_v55 = vunpack.c.l.bf16 %v3398_v41  ;;  %v3453_v22 = vunpack.c.h.bf16 %v3398_v41 }
 0x452   :  { %v3304_v56 = vunpack.c.l.bf16 %v3152_v11  ;;  %v3305_v5 = vunpack.c.l.bf16 %v3161_v30 }
 0x453   :  { %v3262_v9 = vunpack.c.l.bf16 %v2887_v27  ;;  %v3263_v6 = vunpack.c.h.bf16 %v2887_v27  ;;  %v3516_v50 = vmul.f32 0.010009766, %v3452_v55  ;;  %v3517_v20 = vmul.f32 0.010009766, %v3453_v22 }
 0x455   :  { %v3358_v3 = vadd.f32 %v3303_v29, %v3262_v9  ;;  %v3359_v58 = vadd.f32 %v3303_v29, %v3263_v6  ;;  %v9995_v8 = vmax.f32 %v3452_v55, %v3516_v50  ;;  %v9997_v34 = vmax.f32 %v3453_v22, %v3517_v20  ;;  %v11525_v9 = vld [vmem:[#allocation22_spill] sm:$0xff]  ;;  %v2762_v55 = vpop.f32.mrf.mxu0 }
 0x456   :  { %v2666_v42 = vpop.f32.mrf.mxu3 }
 0x457   :  { %v3399_v15 = vpack.c.bf16 %v3359_v58, %v3358_v3  ;;  %v2667_v16 = vadd.f32 %v2666_v42, %v2577_v33 }
 0x458   :  { %v2846_v44 = vpop.f32.mrf.mxu1 }
 0x459   :  { %v2888_v0 = vpack.c.bf16 %v2845_v54, %v2667_v16  ;;  %v3454_v7 = vunpack.c.l.bf16 %v3399_v15  ;;  %v3455_v49 = vunpack.c.h.bf16 %v3399_v15  ;;  %v2847_v10 = vadd.f32 %v2846_v44, %v2757_v21  ;;  %v2584_v21 = vpop.f32.mrf.mxu2 }
 0x45b   :  { %v3264_v40 = vunpack.c.l.bf16 %v2888_v0  ;;  %v3265_v61 = vunpack.c.h.bf16 %v2888_v0  ;;  %v3518_v2 = vmul.f32 0.010009766, %v3454_v7  ;;  %v3519_v48 = vmul.f32 0.010009766, %v3455_v49 }
 0x45d   :  { %v3360_v4 = vadd.f32 %v3304_v56, %v3264_v40  ;;  %v3361_v43 = vadd.f32 %v3304_v56, %v3265_v61  ;;  %v9999_v33 = vmax.f32 %v3454_v7, %v3518_v2  ;;  %v10001_v52 = vmax.f32 %v3455_v49, %v3519_v48  ;;  %v11526_v48 = vld [vmem:[#allocation19_spill] sm:$0xff] }
 0x45e   :  { %v2668_v46 = vpop.f32.mrf.mxu3 }
 0x45f   :  { %v3400_v31 = vpack.c.bf16 %v3361_v43, %v3360_v4  ;;  %v2669_v13 = vadd.f32 %v2668_v46, %v2579_v25  ;;  %v3718_v51 = vpack.c.bf16 %v9999_v33, %v9995_v8  ;;  %v3719_v53 = vpack.c.bf16 %v10001_v52, %v9997_v34 }
 0x460   :  { %v2849_v14 = vpop.f32.mrf.mxu1  ;;  %v3170_v25 = vperm.slane %v11525_v9, %v9061_v28 }
 0x461   :  { %v2889_v17 = vpack.c.bf16 %v2847_v10, %v2669_v13  ;;  %v3456_v39 = vunpack.c.l.bf16 %v3400_v31  ;;  %v3457_v26 = vunpack.c.h.bf16 %v3400_v31  ;;  %v2850_v29 = vadd.f32 %v2849_v14, %v2760_v36  ;;  %v2587_v18 = vpop.f32.mrf.mxu2  ;;  %v2765_v13 = vpop.f32.mrf.mxu0 }
 0x462   :  { %v3306_v44 = vunpack.c.l.bf16 %v3170_v25  ;;  %v3179_v36 = vperm.slane %v11526_v48, %v9061_v28 }
 0x463   :  { %v3266_v47 = vunpack.c.l.bf16 %v2889_v17  ;;  %v3267_v41 = vunpack.c.h.bf16 %v2889_v17  ;;  %v3520_v12 = vmul.f32 0.010009766, %v3456_v39  ;;  %v3521_v11 = vmul.f32 0.010009766, %v3457_v26 }
 0x465   :  { %v3362_v27 = vadd.f32 %v3305_v5, %v3266_v47  ;;  %v3363_v54 = vadd.f32 %v3305_v5, %v3267_v41  ;;  %v10011_v49 = vmax.f32 %v3456_v39, %v3520_v12  ;;  %v10013_v56 = vmax.f32 %v3457_v26, %v3521_v11 }
 0x466   :  { %v2671_v6 = vpop.f32.mrf.mxu3  ;;  %v3307_v5 = vunpack.c.l.bf16 %v3179_v36 }
 0x467   :  { %v3401_v22 = vpack.c.bf16 %v3363_v54, %v3362_v27  ;;  %v2672_v3 = vadd.f32 %v2671_v6, %v2582_v19 }
 0x468   :  { %v2851_v58 = vpop.f32.mrf.mxu1 }
 0x469   :  { %v2890_v42 = vpack.c.bf16 %v2850_v29, %v2672_v3  ;;  %v3458_v15 = vunpack.c.l.bf16 %v3401_v22  ;;  %v3459_v16 = vunpack.c.h.bf16 %v3401_v22  ;;  %v2852_v43 = vadd.f32 %v2851_v58, %v2762_v55  ;;  %v2589_v12 = vpop.f32.mrf.mxu2 }
 0x46b   :  { %v3268_v50 = vunpack.c.l.bf16 %v2890_v42  ;;  %v3269_v20 = vunpack.c.h.bf16 %v2890_v42  ;;  %v3522_v0 = vmul.f32 0.010009766, %v3458_v15  ;;  %v3523_v7 = vmul.f32 0.010009766, %v3459_v16 }
 0x46d   :  { %v3364_v40 = vadd.f32 %v3306_v44, %v3268_v50  ;;  %v3365_v61 = vadd.f32 %v3306_v44, %v3269_v20  ;;  %v10015_v2 = vmax.f32 %v3458_v15, %v3522_v0  ;;  %v10017_v19 = vmax.f32 %v3459_v16, %v3523_v7  ;;  %v2767_v44 = vpop.f32.mrf.mxu0 }
 0x46e   :  { %v2673_v4 = vpop.f32.mrf.mxu3 }
 0x46f   :  { %v2674_v30 = vadd.f32 %v2673_v4, %v2584_v21  ;;  %v3720_v10 = vpack.c.bf16 %v10015_v2, %v10011_v49  ;;  %v3721_v46 = vpack.c.bf16 %v10017_v19, %v10013_v56  ;;  %v3402_v31 = vpack.c.bf16 %v3365_v61, %v3364_v40  ;;  %v11527_v21 = vld [vmem:[#allocation21_spill] sm:$0xff] }
 0x470   :  { %v2854_v14 = vpop.f32.mrf.mxu1  ;;  %v3188_v9 = vperm.slane %v11527_v21, %v9061_v28 }
 0x471   :  { %v2891_v17 = vpack.c.bf16 %v2852_v43, %v2674_v30  ;;  %v3460_v39 = vunpack.c.l.bf16 %v3402_v31  ;;  %v3461_v26 = vunpack.c.h.bf16 %v3402_v31  ;;  %v2855_v29 = vadd.f32 %v2854_v14, %v2765_v13 }
 0x472   :  { %v3308_v16 = vunpack.c.l.bf16 %v3188_v9 }
 0x473   :  { %v3270_v47 = vunpack.c.l.bf16 %v2891_v17  ;;  %v3271_v41 = vunpack.c.h.bf16 %v2891_v17  ;;  %v3524_v3 = vmul.f32 0.010009766, %v3460_v39  ;;  %v3525_v58 = vmul.f32 0.010009766, %v3461_v26 }
 0x475   :  { %v3366_v27 = vadd.f32 %v3307_v5, %v3270_v47  ;;  %v3367_v54 = vadd.f32 %v3307_v5, %v3271_v41  ;;  %v10027_v40 = vmax.f32 %v3460_v39, %v3524_v3  ;;  %v10029_v61 = vmax.f32 %v3461_v26, %v3525_v58  ;;  %v2770_v21 = vpop.f32.mrf.mxu0  ;;  %v11529_v3 = vld [vmem:[#allocation24_spill] sm:$0xff] }
 0x476   :  { %v2676_v25 = vpop.f32.mrf.mxu3  ;;  %v3206_v58 = vperm.slane %v11529_v3, %v9061_v28 }
 0x477   :  { %v3403_v6 = vpack.c.bf16 %v3367_v54, %v3366_v27  ;;  %v2677_v55 = vadd.f32 %v2676_v25, %v2587_v18  ;;  %v11528_v18 = vld [vmem:[#allocation23_spill] sm:$0xff]  ;;  %v2592_v27 = vpop.f32.mrf.mxu2 }
 0x478   :  { %v2856_v22 = vpop.f32.mrf.mxu1  ;;  %v3197_v30 = vperm.slane %v11528_v18, %v9061_v28 }
 0x479   :  { %v2892_v11 = vpack.c.bf16 %v2855_v29, %v2677_v55  ;;  %v3462_v42 = vunpack.c.l.bf16 %v3403_v6  ;;  %v3463_v15 = vunpack.c.h.bf16 %v3403_v6  ;;  %v2857_v13 = vadd.f32 %v2856_v22, %v2767_v44 }
 0x47a   :  { %v3309_v26 = vunpack.c.l.bf16 %v3197_v30 }
 0x47b   :  { %v3272_v50 = vunpack.c.l.bf16 %v2892_v11  ;;  %v3273_v20 = vunpack.c.h.bf16 %v2892_v11  ;;  %v3526_v0 = vmul.f32 0.010009766, %v3462_v42  ;;  %v3527_v7 = vmul.f32 0.010009766, %v3463_v15 }
 0x47d   :  { %v3368_v48 = vadd.f32 %v3308_v16, %v3272_v50  ;;  %v3369_v36 = vadd.f32 %v3308_v16, %v3273_v20  ;;  %v10031_v4 = vmax.f32 %v3462_v42, %v3526_v0  ;;  %v10033_v43 = vmax.f32 %v3463_v15, %v3527_v7 }
 0x47e   :  { %v2678_v31 = vpop.f32.mrf.mxu3  ;;  %v3310_v0 = vunpack.c.l.bf16 %v3206_v58 }
 0x47f   :  { %v2679_v14 = vadd.f32 %v2678_v31, %v2589_v12  ;;  %v3722_v17 = vpack.c.bf16 %v10031_v4, %v10027_v40  ;;  %v3723_v5 = vpack.c.bf16 %v10033_v43, %v10029_v61  ;;  %v3404_v47 = vpack.c.bf16 %v3369_v36, %v3368_v48 }
 0x480   :  { %v2859_v39 = vpop.f32.mrf.mxu1  ;;  %v3445_v40 = vunpack.c.h.bf16 %v9947_v1 }
 0x481   :  { %v2893_v41 = vpack.c.bf16 %v2857_v13, %v2679_v14  ;;  %v3464_v9 = vunpack.c.l.bf16 %v3404_v47  ;;  %v3465_v25 = vunpack.c.h.bf16 %v3404_v47  ;;  %v2860_v22 = vadd.f32 %v2859_v39, %v2770_v21  ;;  %v2594_v14 = vpop.f32.mrf.mxu2 }
 0x482   :  { %v3509_v2 = vmul.f32 0.010009766, %v3445_v40 }
 0x483   :  { %v3274_v54 = vunpack.c.l.bf16 %v2893_v41  ;;  %v3275_v29 = vunpack.c.h.bf16 %v2893_v41  ;;  %v3528_v15 = vmul.f32 0.010009766, %v3464_v9  ;;  %v3529_v16 = vmul.f32 0.010009766, %v3465_v25 }
 0x484   :  { %v3669_v34 = vmax.f32 %v3445_v40, %v3509_v2 }
 0x485   :  { %v3370_v6 = vadd.f32 %v3309_v26, %v3274_v54  ;;  %v3371_v55 = vadd.f32 %v3309_v26, %v3275_v29  ;;  %v10043_v31 = vmax.f32 %v3464_v9, %v3528_v15  ;;  %v10045_v13 = vmax.f32 %v3465_v25, %v3529_v16  ;;  %v2772_v29 = vpop.f32.mrf.mxu0 }
 0x486   :  { %v2681_v12 = vpop.f32.mrf.mxu3 }
 0x487   :  { %v3405_v11 = vpack.c.bf16 %v3371_v55, %v3370_v6  ;;  %v2682_v42 = vadd.f32 %v2681_v12, %v2592_v27  ;;  %v11530_v27 = vld [vmem:[#allocation20_spill] sm:$0xff] }
 0x488   :  { %v2861_v30 = vpop.f32.mrf.mxu1  ;;  %v3215_v54 = vperm.slane %v11530_v27, %v9061_v28 }
 0x489   :  { %v2894_v44 = vpack.c.bf16 %v2860_v22, %v2682_v42  ;;  %v3466_v50 = vunpack.c.l.bf16 %v3405_v11  ;;  %v3467_v20 = vunpack.c.h.bf16 %v3405_v11  ;;  %v2862_v6 = vadd.f32 %v2861_v30, %v2772_v29  ;;  %v11532_v29 = vld [vmem:[#allocation26_spill] sm:$0xff] }
 0x48a   :  { %v3311_v58 = vunpack.c.l.bf16 %v3215_v54 }
 0x48b   :  { %v3276_v7 = vunpack.c.l.bf16 %v2894_v44  ;;  %v3277_v48 = vunpack.c.h.bf16 %v2894_v44  ;;  %v3530_v36 = vmul.f32 0.010009766, %v3466_v50  ;;  %v3531_v18 = vmul.f32 0.010009766, %v3467_v20 }
 0x48d   :  { %v3372_v47 = vadd.f32 %v3310_v0, %v3276_v7  ;;  %v3373_v41 = vadd.f32 %v3310_v0, %v3277_v48  ;;  %v10047_v39 = vmax.f32 %v3466_v50, %v3530_v36  ;;  %v10049_v26 = vmax.f32 %v3467_v20, %v3531_v18  ;;  %v7700_v50 = vld [vmem:[#allocation3] sm:$0xf]  ;;  %v8035_v20 = vld [vmem:[#allocation3 + $0x4] sm:$0xf0]  ;;  %v3102_v7 = vpop.permute.xlu2 %3101 }
 0x48e   :  { %v2683_v21 = vpop.f32.mrf.mxu3  ;;  %v7701_v0 = vor.u32 %v8035_v20, %v7700_v50  ;;  %v2654_v48 = vadd.f32 %v9945_v24, %v9928_v23  ;;  %v2832_v18 = vadd.f32 %v9943_v63, %v9930_v62  ;;  %v3107_v54 = vperm.slane %v3102_v7, %v9061_v28  ;;  %v8037_v50 = vld [vmem:[#allocation3 + $0x14] sm:$0xf0] }
 0x48f   :  { %v2684_v55 = vadd.f32 %v2683_v21, %v2594_v14  ;;  %v3724_v9 = vpack.c.bf16 %v10047_v39, %v10043_v31  ;;  %v3725_v25 = vpack.c.bf16 %v10049_v26, %v10045_v13  ;;  %v3406_v22 = vpack.c.bf16 %v3373_v41, %v3372_v47  ;;  %v11531_v47 = vld [vmem:[#allocation25_spill] sm:$0xff] }
 0x490   :  { %3928 = vmatmul.bf16.vlgmr.msrb.gmra.mxu2 %v7701_v0  ;;  %4106 = vmatmul.bf16.vlgmr.msrb.gmra.mxu0 %v7701_v0  ;;  %v2649_v41 = vadd.f32 %v9937_v37, %v11531_v47  ;;  %v2883_v39 = vpack.c.bf16 %v2832_v18, %v2654_v48  ;;  %v2827_v23 = vadd.f32 %v9933_v57, %v11532_v29 }
 0x491   :  { %v2895_v3 = vpack.c.bf16 %v2862_v6, %v2684_v55  ;;  %v3468_v42 = vunpack.c.l.bf16 %v3406_v22  ;;  %v3469_v15 = vunpack.c.h.bf16 %v3406_v22 }
 0x492   :  { %v2881_v6 = vpack.c.bf16 %v2827_v23, %v2649_v41  ;;  %v3254_v55 = vunpack.c.l.bf16 %v2883_v39  ;;  %v3255_v22 = vunpack.c.h.bf16 %v2883_v39 }
 0x493   :  { %v3278_v12 = vunpack.c.l.bf16 %v2895_v3  ;;  %v3279_v11 = vunpack.c.h.bf16 %v2895_v3  ;;  %v3532_v31 = vmul.f32 0.010009766, %v3468_v42  ;;  %v3533_v14 = vmul.f32 0.010009766, %v3469_v15 }
 0x494   :  { %v3251_v20 = vunpack.c.h.bf16 %v2881_v6 }
 0x495   :  { %v3374_v16 = vadd.f32 %v3311_v58, %v3278_v12  ;;  %v3375_v44 = vadd.f32 %v3311_v58, %v3279_v11  ;;  %v3692_v24 = vmax.f32 %v3468_v42, %v3532_v31  ;;  %v3693_v62 = vmax.f32 %v3469_v15, %v3533_v14  ;;  %v3084_v12 = vpop.permute.xlu0 %3083 }
 0x496   :  { %v3299_v11 = vunpack.c.l.bf16 %v3107_v54  ;;  %v3089_v37 = vperm.slane %v3084_v12, %v9061_v28  ;;  %v3250_v42 = vunpack.c.l.bf16 %v2881_v6  ;;  %v3444_v54 = vunpack.c.l.bf16 %v9947_v1 }
 0x497   :  { %v3407_v36 = vpack.c.bf16 %v3375_v44, %v3374_v16  ;;  %v3075_v16 = vpop.permute.xlu2 %3074  ;;  %v7708_v44 = vld [vmem:[#allocation3 + $0x10] sm:$0xf] }
 0x498   :  { %v3080_v57 = vperm.slane %v3075_v16, %v9061_v28  ;;  %v3350_v15 = vadd.f32 %v3299_v11, %v3254_v55  ;;  %v3351_v0 = vadd.f32 %v3299_v11, %v3255_v22  ;;  %v7709_v7 = vor.u32 %v8037_v50, %v7708_v44  ;;  %v7732_v11 = vld [vmem:[#allocation3 + $0x40] sm:$0xf]  ;;  %v8038_v44 = vld [vmem:[#allocation3 + $0x24] sm:$0xf]  ;;  %v7718_v50 = vld [vmem:[#allocation3 + $0x28] sm:$0xf0] }
 0x499   :  { %v3470_v30 = vunpack.c.l.bf16 %v3407_v36  ;;  %v3471_v13 = vunpack.c.h.bf16 %v3407_v36  ;;  %v3297_v48 = vunpack.c.l.bf16 %v3089_v37  ;;  %v11533_v36 = vld [vmem:[#allocation27_spill] sm:$0xff]  ;;  %v3508_v49 = vmul.f32 0.010009766, %v3444_v54 }
 0x49a   :  { %v3248_v18 = vunpack.c.l.bf16 %v11533_v36  ;;  %v3296_v31 = vunpack.c.l.bf16 %v3080_v57  ;;  %v3395_v47 = vpack.c.bf16 %v3351_v0, %v3350_v15  ;;  %v8043_v37 = vld [vmem:[#allocation3 + $0x44] sm:$0xf0]  ;;  %v7721_v57 = vor.u32 %v8038_v44, %v7718_v50 }
 0x49b   :  { %v3534_v26 = vmul.f32 0.010009766, %v3470_v30  ;;  %v3535_v27 = vmul.f32 0.010009766, %v3471_v13  ;;  %v3347_v14 = vadd.f32 %v3297_v48, %v3251_v20  ;;  %v3668_v8 = vmax.f32 %v3444_v54, %v3508_v49  ;;  %v8045_v20 = vld [vmem:[#allocation3 + $0x54] sm:$0xf0]  ;;  %v8055_v44 = vld [vmem:[#allocation3 + $0xa4] sm:$0xf0] }
 0x49c   :  { %v3344_v41 = vadd.f32 %v3296_v31, %v3248_v18  ;;  %v7733_v16 = vor.u32 %v8043_v37, %v7732_v11  ;;  %v8049_v54 = vld [vmem:[#allocation3 + $0x74] sm:$0xf0] }
 0x49d   :  { %v3694_v21 = vmax.f32 %v3470_v30, %v3534_v26  ;;  %v3695_v63 = vmax.f32 %v3471_v13, %v3535_v27  ;;  %v3249_v30 = vunpack.c.h.bf16 %v11533_v36  ;;  %v3346_v13 = vadd.f32 %v3297_v48, %v3250_v42  ;;  %v7740_v42 = vld [vmem:[#allocation3 + $0x50] sm:$0xf]  ;;  %v7726_v48 = vld [vmem:[#allocation3 + $0x38] sm:$0xf0]  ;;  %v10098_v18 = vpop.permute.xlu0 %4612 }
 0x49e   :  { %v3446_v27 = vunpack.c.l.bf16 %v3395_v47  ;;  %v7741_v15 = vor.u32 %v8045_v20, %v7740_v42  ;;  %11534 = vst [vmem:[#allocation14_spill] sm:$0xff] %v10098_v18  ;;  %v8050_v20 = vld [vmem:[#allocation3 + $0x84] sm:$0xf] }
 0x49f   :  { %v3726_v3 = vpack.c.bf16 %v3694_v21, %v3692_v24  ;;  %v3727_v58 = vpack.c.bf16 %v3695_v63, %v3693_v62  ;;  %v3345_v39 = vadd.f32 %v3296_v31, %v3249_v30  ;;  %v3393_v26 = vpack.c.bf16 %v3347_v14, %v3346_v13  ;;  %v10096_v0 = vpop.permute.xlu2 %4477  ;;  %v7748_v30 = vld [vmem:[#allocation3 + $0x60] sm:$0xf]  ;;  %v8047_v31 = vld [vmem:[#allocation3 + $0x64] sm:$0xf0] }
 0x4a0   :  { %3933 = vmatmul.bf16.gmra.mxu2 %v7709_v7  ;;  %4111 = vmatmul.bf16.gmra.mxu0 %v7709_v7  ;;  %v3510_v4 = vmul.f32 0.010009766, %v3446_v27  ;;  %v8040_v7 = vld [vmem:[#allocation3 + $0x34] sm:$0xf]  ;;  %v7749_v14 = vor.u32 %v8047_v31, %v7748_v30 }
 0x4a1   :  { %4009 = vmatpush.bf16.msrb.mxu3 %v3726_v3  ;;  %4187 = vmatpush.bf16.msrb.mxu1 %v3727_v58  ;;  %v3442_v61 = vunpack.c.l.bf16 %v3393_v26  ;;  %v3443_v43 = vunpack.c.h.bf16 %v3393_v26  ;;  %v8036_v3 = vld [vmem:[#allocation3 + $0x14] sm:$0xf]  ;;  %v7710_v58 = vld [vmem:[#allocation3 + $0x18] sm:$0xf0]  ;;  %v7729_v36 = vor.u32 %v8040_v7, %v7726_v48 }
 0x4a2   :  { %v7713_v12 = vor.u32 %v8036_v3, %v7710_v58 }
 0x4a3   :  { %v3506_v29 = vmul.f32 0.010009766, %v3442_v61  ;;  %v3507_v23 = vmul.f32 0.010009766, %v3443_v43 }
 0x4a5   :  { %4010 = vmatpush.bf16.msrb.mxu3 %v3724_v9  ;;  %4188 = vmatpush.bf16.msrb.mxu1 %v3725_v25  ;;  %v3447_v9 = vunpack.c.h.bf16 %v3395_v47  ;;  %v3392_v25 = vpack.c.bf16 %v3345_v39, %v3344_v41  ;;  %v3666_v21 = vmax.f32 %v3442_v61, %v3506_v29  ;;  %v3667_v62 = vmax.f32 %v3443_v43, %v3507_v23  ;;  %v8042_v47 = vld [vmem:[#allocation3 + $0x44] sm:$0xf]  ;;  %v7734_v41 = vld [vmem:[#allocation3 + $0x48] sm:$0xf0]  ;;  %v10102_v39 = vpop.permute.xlu0 %4459  ;;  %v8044_v61 = vld [vmem:[#allocation3 + $0x54] sm:$0xf] }
 0x4a6   :  { %v7737_v26 = vor.u32 %v8042_v47, %v7734_v41  ;;  %v7742_v43 = vld [vmem:[#allocation3 + $0x58] sm:$0xf0]  ;;  %v8046_v23 = vld [vmem:[#allocation3 + $0x64] sm:$0xf] }
 0x4a7   :  { %v3440_v56 = vunpack.c.l.bf16 %v3392_v25  ;;  %v3441_v19 = vunpack.c.h.bf16 %v3392_v25  ;;  %v10100_v13 = vpop.permute.xlu2 %4450  ;;  %v7756_v25 = vld [vmem:[#allocation3 + $0x70] sm:$0xf]  ;;  %v7745_v2 = vor.u32 %v8044_v61, %v7742_v43 }
 0x4a8   :  { %v7757_v40 = vor.u32 %v8049_v54, %v7756_v25 }
 0x4a9   :  { %4011 = vmatpush.bf16.msrb.mxu3 %v3722_v17  ;;  %4189 = vmatpush.bf16.msrb.mxu1 %v3723_v5  ;;  %v3511_v17 = vmul.f32 0.010009766, %v3447_v9  ;;  %v3670_v5 = vmax.f32 %v3446_v27, %v3510_v4  ;;  %v3504_v33 = vmul.f32 0.010009766, %v3440_v56  ;;  %v3505_v52 = vmul.f32 0.010009766, %v3441_v19 }
 0x4ab   :  { %v3671_v1 = vmax.f32 %v3447_v9, %v3511_v17  ;;  %v3664_v63 = vmax.f32 %v3440_v56, %v3504_v33  ;;  %v3665_v6 = vmax.f32 %v3441_v19, %v3505_v52  ;;  %v10106_v9 = vpop.permute.xlu1 %4468 }
 0x4ad   :  { %4012 = vmatpush.bf16.msrb.mxu3 %v3720_v10  ;;  %4190 = vmatpush.bf16.msrb.mxu1 %v3721_v46  ;;  %v7716_v10 = vld [vmem:[#allocation3 + $0x20] sm:$0xf]  ;;  %v8039_v46 = vld [vmem:[#allocation3 + $0x24] sm:$0xf0]  ;;  %v3713_v55 = vpack.c.bf16 %v3667_v62, %v3665_v6  ;;  %v10108_v4 = vpop.permute.xlu0 %4432  ;;  %v7772_v6 = vld [vmem:[#allocation3 + $0x90] sm:$0xf] }
 0x4ae   :  { %v7717_v24 = vor.u32 %v8039_v46, %v7716_v10  ;;  %v7764_v10 = vld [vmem:[#allocation3 + $0x80] sm:$0xf]  ;;  %v8051_v46 = vld [vmem:[#allocation3 + $0x84] sm:$0xf0]  ;;  %v7773_v60 = vor.u32 %v8053_v59, %v7772_v6  ;;  %v8052_v59 = vld [vmem:[#allocation3 + $0x94] sm:$0xf] }
 0x4af   :  { %v10104_v27 = vpop.permute.xlu2 %4603 }
 0x4b0   :  { %3938 = vmatmul.bf16.gmra.mxu2 %v7717_v24  ;;  %4116 = vmatmul.bf16.gmra.mxu0 %v7717_v24  ;;  %11535 = vst [vmem:[#allocation15_spill] sm:$0xff] %v10104_v27  ;;  %v7750_v24 = vld [vmem:[#allocation3 + $0x68] sm:$0xf0] }
 0x4b1   :  { %4013 = vmatpush.bf16.msrb.mxu3 %v3718_v51  ;;  %4191 = vmatpush.bf16.msrb.mxu1 %v3719_v53  ;;  %v3714_v51 = vpack.c.bf16 %v3670_v5, %v3668_v8  ;;  %v3715_v53 = vpack.c.bf16 %v3671_v1, %v3669_v34  ;;  %v7765_v5 = vor.u32 %v8051_v46, %v7764_v10  ;;  %v7788_v46 = vld [vmem:[#allocation3 + $0xb0] sm:$0xf] }
 0x4b2   :  { %v7753_v52 = vor.u32 %v8046_v23, %v7750_v24 }
 0x4b3   :  { %v10112_v49 = vpop.permute.xlu1 %4621 }
 0x4b4   :  { %11537 = vst [vmem:[#allocation17_spill] sm:$0xff] %v10112_v49 }
 0x4b5   :  { %4014 = vmatpush.bf16.msrb.mxu3 %v3716_v45  ;;  %4192 = vmatpush.bf16.msrb.mxu1 %v3717_v35  ;;  %v3712_v45 = vpack.c.bf16 %v3666_v21, %v3664_v63  ;;  %v8041_v35 = vld [vmem:[#allocation3 + $0x34] sm:$0xf0]  ;;  %v10114_v56 = vpop.permute.xlu0 %4585 }
 0x4b6   :  { %v7725_v22 = vor.u32 %v8041_v35, %v7724_v32  ;;  %11538 = vst [vmem:[#allocation16_spill] sm:$0xff] %v10114_v56  ;;  %v7822_v56 = vld [vmem:[#allocation3 + $0xf8] sm:$0xf0] }
 0x4b7   :  { %v10110_v17 = vpop.permute.xlu2 %4576 }
 0x4b8   :  { %11536 = vst [vmem:[#allocation13_spill] sm:$0xff] %v10110_v17 }
 0x4b9   :  { %4015 = vmatpush.bf16.msrb.mxu3 %v3714_v51  ;;  %4193 = vmatpush.bf16.msrb.mxu1 %v3715_v53 }
 0x4bb   :  { %v10118_v1 = vpop.permute.xlu1 %4594 }
 0x4bc   :  { %11539 = vst [vmem:[#allocation18_spill] sm:$0xff] %v10118_v1  ;;  %v8064_v1 = vld [vmem:[#allocation3 + $0xf4] sm:$0xf] }
 0x4bd   :  { %4016 = vmatpush.bf16.msrb.mxu3 %v3712_v45  ;;  %4194 = vmatpush.bf16.msrb.mxu1 %v3713_v55  ;;  %v10120_v29 = vpop.permute.xlu0 %4558  ;;  %v8048_v55 = vld [vmem:[#allocation3 + $0x74] sm:$0xf] }
 0x4be   :  { %11540 = vst [vmem:[#allocation22_spill] sm:$0xff] %v10120_v29 }
 0x4bf   :  { %v10116_v19 = vpop.permute.xlu2 %4423 }
 0x4c0   :  { %4017 = vmatmul.bf16.vlgmr.msrb.gmra.mxu3 %v7705_v38  ;;  %4195 = vmatmul.bf16.vlgmr.msrb.gmra.mxu1 %v7705_v38  ;;  %v7758_v38 = vld [vmem:[#allocation3 + $0x78] sm:$0xf0] }
 0x4c1   :  { %3943 = vmatmul.bf16.gmra.mxu2 %v7725_v22  ;;  %4121 = vmatmul.bf16.gmra.mxu0 %v7725_v22  ;;  %v7761_v32 = vor.u32 %v8048_v55, %v7758_v38 }
 0x4c3   :  { %v10124_v51 = vpop.permute.xlu1 %4441 }
 0x4c5   :  { %v10126_v53 = vpop.permute.xlu0 %4405 }
 0x4c7   :  { %v10122_v34 = vpop.permute.xlu2 %4396 }
 0x4cb   :  { %v10132_v45 = vpop.permute.xlu1 %4414 }
 0x4cd   :  { %v10136_v3 = vpop.permute.xlu0 %4378 }
 0x4cf   :  { %v10130_v63 = vpop.permute.xlu2 %4549 }
 0x4d0   :  { %4022 = vmatmul.bf16.gmra.mxu3 %v7713_v12  ;;  %4200 = vmatmul.bf16.gmra.mxu1 %v7713_v12  ;;  %11541 = vst [vmem:[#allocation19_spill] sm:$0xff] %v10130_v63 }
 0x4d1   :  { %3948 = vmatmul.bf16.gmra.mxu2 %v7733_v16  ;;  %4126 = vmatmul.bf16.gmra.mxu0 %v7733_v16  ;;  %v7780_v16 = vld [vmem:[#allocation3 + $0xa0] sm:$0xf] }
 0x4d3   :  { %v10140_v12 = vpop.permute.xlu1 %4567 }
 0x4d4   :  { %11542 = vst [vmem:[#allocation21_spill] sm:$0xff] %v10140_v12  ;;  %v7825_v12 = vor.u32 %v8064_v1, %v7822_v56  ;;  %v4465_v56 = vperm.slane %v10102_v39, %v9061_v28  ;;  %v4456_v1 = vperm.slane %v10100_v13, %v9061_v28  ;;  %v4447_v39 = vperm.slane %v10124_v51, %v9061_v28 }
 0x4d5   :  { %v10146_v50 = vpop.permute.xlu0 %4531 }
 0x4d6   :  { %11543 = vst [vmem:[#allocation23_spill] sm:$0xff] %v10146_v50 }
 0x4d7   :  { %v10138_v58 = vpop.permute.xlu2 %4522 }
 0x4db   :  { %v10154_v31 = vpop.permute.xlu1 %4540 }
 0x4dc   :  { %11544 = vst [vmem:[#allocation24_spill] sm:$0xff] %v10154_v31 }
 0x4dd   :  { %v10156_v47 = vpop.permute.xlu0 %4504 }
 0x4df   :  { %v10148_v42 = vpop.permute.xlu2 %4369 }
 0x4e0   :  { %4027 = vmatmul.bf16.gmra.mxu3 %v7721_v57  ;;  %4205 = vmatmul.bf16.gmra.mxu1 %v7721_v57  ;;  %v7781_v57 = vor.u32 %v8055_v44, %v7780_v16 }
 0x4e1   :  { %3953 = vmatmul.bf16.gmra.mxu2 %v7741_v15  ;;  %4131 = vmatmul.bf16.gmra.mxu0 %v7741_v15  ;;  %v7766_v15 = vld [vmem:[#allocation3 + $0x88] sm:$0xf0] }
 0x4e2   :  { %v7769_v7 = vor.u32 %v8050_v20, %v7766_v15 }
 0x4e3   :  { %v10163_v24 = vpop.permute.xlu1 %4387 }
 0x4e5   :  { %v4352_v38 = vpop.permute.xlu0 %4351 }
 0x4e6   :  { %v4357_v16 = vperm.slane %v4352_v38, %v9061_v28  ;;  %v7796_v38 = vld [vmem:[#allocation3 + $0xc0] sm:$0xf] }
 0x4e7   :  { %v4343_v41 = vpop.permute.xlu2 %4342 }
 0x4e8   :  { %v4348_v25 = vperm.slane %v4343_v41, %v9061_v28  ;;  %v4693_v41 = vunpack.c.l.bf16 %v4357_v16 }
 0x4f0   :  { %4032 = vmatmul.bf16.gmra.mxu3 %v7729_v36  ;;  %4210 = vmatmul.bf16.gmra.mxu1 %v7729_v36 }
 0x4f1   :  { %3958 = vmatmul.bf16.gmra.mxu2 %v7749_v14  ;;  %4136 = vmatmul.bf16.gmra.mxu0 %v7749_v14 }
 0x500   :  { %4037 = vmatmul.bf16.gmra.mxu3 %v7737_v26  ;;  %4215 = vmatmul.bf16.gmra.mxu1 %v7737_v26 }
 0x501   :  { %3963 = vmatmul.bf16.gmra.mxu2 %v7757_v40  ;;  %4141 = vmatmul.bf16.gmra.mxu0 %v7757_v40 }
 0x50d   :  { %v4107_v8 = vpop.f32.mrf.mxu0 }
 0x510   :  { %4042 = vmatmul.bf16.gmra.mxu3 %v7745_v2  ;;  %4220 = vmatmul.bf16.gmra.mxu1 %v7745_v2 }
 0x511   :  { %3968 = vmatmul.bf16.gmra.mxu2 %v7765_v5  ;;  %4146 = vmatmul.bf16.gmra.mxu0 %v7765_v5  ;;  %v8057_v5 = vld [vmem:[#allocation3 + $0xb4] sm:$0xf0] }
 0x512   :  { %v7789_v23 = vor.u32 %v8057_v5, %v7788_v46 }
 0x513   :  { %v3929_v33 = vpop.f32.mrf.mxu2 }
 0x515   :  { %v4109_v62 = vpop.f32.mrf.mxu0 }
 0x51b   :  { %v10128_v21 = vpop.f32.mrf.mxu2 }
 0x51d   :  { %v4112_v22 = vpop.f32.mrf.mxu0 }
 0x520   :  { %4047 = vmatmul.bf16.gmra.mxu3 %v7753_v52  ;;  %4225 = vmatmul.bf16.gmra.mxu1 %v7753_v52 }
 0x521   :  { %3973 = vmatmul.bf16.gmra.mxu2 %v7773_v60  ;;  %4151 = vmatmul.bf16.gmra.mxu0 %v7773_v60  ;;  %v7774_v60 = vld [vmem:[#allocation3 + $0x98] sm:$0xf0] }
 0x522   :  { %v7777_v44 = vor.u32 %v8052_v59, %v7774_v60 }
 0x523   :  { %v10134_v35 = vpop.f32.mrf.mxu2 }
 0x525   :  { %v10144_v37 = vpop.f32.mrf.mxu0 }
 0x52b   :  { %v10142_v11 = vpop.f32.mrf.mxu2 }
 0x52d   :  { %v10152_v36 = vpop.f32.mrf.mxu0 }
 0x530   :  { %4052 = vmatmul.bf16.gmra.mxu3 %v7761_v32  ;;  %4230 = vmatmul.bf16.gmra.mxu1 %v7761_v32 }
 0x531   :  { %3978 = vmatmul.bf16.gmra.mxu2 %v7781_v57  ;;  %4156 = vmatmul.bf16.gmra.mxu0 %v7781_v57 }
 0x533   :  { %v10150_v48 = vpop.f32.mrf.mxu2 }
 0x535   :  { %v10161_v61 = vpop.f32.mrf.mxu0 }
 0x53b   :  { %v10159_v40 = vpop.f32.mrf.mxu2 }
 0x53d   :  { %v4196_v30 = vpop.f32.mrf.mxu1 }
 0x53e   :  { %v4197_v14 = vadd.f32 %v4196_v30, %v4107_v8  ;;  %v4692_v8 = vunpack.c.l.bf16 %v4348_v25  ;;  %v10169_v20 = vpop.f32.mrf.mxu0 }
 0x540   :  { %4057 = vmatmul.bf16.gmra.mxu3 %v7769_v7  ;;  %4235 = vmatmul.bf16.gmra.mxu1 %v7769_v7 }
 0x541   :  { %3983 = vmatmul.bf16.gmra.mxu2 %v7789_v23  ;;  %4161 = vmatmul.bf16.gmra.mxu0 %v7789_v23 }
 0x543   :  { %v4018_v26 = vpop.f32.mrf.mxu3 }
 0x544   :  { %v4019_v54 = vadd.f32 %v4018_v26, %v3929_v33  ;;  %v10167_v57 = vpop.f32.mrf.mxu2 }
 0x545   :  { %v4198_v43 = vpop.f32.mrf.mxu1 }
 0x546   :  { %v4276_v2 = vpack.c.bf16 %v4197_v14, %v4019_v54  ;;  %v4199_v10 = vadd.f32 %v4198_v43, %v4109_v62 }
 0x548   :  { %v4628_v52 = vunpack.c.l.bf16 %v4276_v2  ;;  %v4629_v6 = vunpack.c.h.bf16 %v4276_v2  ;;  %v4361_v2 = vpop.permute.xlu1 %4360 }
 0x54a   :  { %v4724_v33 = vadd.f32 %v4692_v8, %v4628_v52  ;;  %v4725_v55 = vadd.f32 %v4692_v8, %v4629_v6 }
 0x54b   :  { %v4020_v32 = vpop.f32.mrf.mxu3 }
 0x54c   :  { %v4021_v62 = vadd.f32 %v4020_v32, %v10128_v21  ;;  %v4788_v15 = vpack.c.bf16 %v4725_v55, %v4724_v33  ;;  %v4366_v21 = vperm.slane %v4361_v2, %v9061_v28  ;;  %v10173_v6 = vpop.f32.mrf.mxu2  ;;  %v8059_v32 = vld [vmem:[#allocation3 + $0xc4] sm:$0xf0] }
 0x54d   :  { %v4201_v7 = vpop.f32.mrf.mxu1 }
 0x54e   :  { %v4277_v30 = vpack.c.bf16 %v4199_v10, %v4021_v62  ;;  %v4202_v14 = vadd.f32 %v4201_v7, %v4112_v22  ;;  %v4820_v54 = vunpack.c.l.bf16 %v4788_v15  ;;  %v4821_v43 = vunpack.c.h.bf16 %v4788_v15  ;;  %v10175_v10 = vpop.f32.mrf.mxu0 }
 0x54f   :  { %v7797_v15 = vor.u32 %v8059_v32, %v7796_v38 }
 0x550   :  { %v4630_v26 = vunpack.c.l.bf16 %v4277_v30  ;;  %v4631_v25 = vunpack.c.h.bf16 %v4277_v30  ;;  %4062 = vmatmul.bf16.gmra.mxu3 %v7777_v44  ;;  %4240 = vmatmul.bf16.gmra.mxu1 %v7777_v44  ;;  %v4884_v59 = vmul.f32 0.010009766, %v4820_v54  ;;  %v4885_v60 = vmul.f32 0.010009766, %v4821_v43 }
 0x551   :  { %v4694_v44 = vunpack.c.l.bf16 %v4366_v21  ;;  %3988 = vmatmul.bf16.gmra.mxu2 %v7797_v15  ;;  %4166 = vmatmul.bf16.gmra.mxu0 %v7797_v15  ;;  %v4375_v21 = vperm.slane %v10148_v42, %v9061_v28 }
 0x552   :  { %v4726_v46 = vadd.f32 %v4693_v41, %v4630_v26  ;;  %v4727_v5 = vadd.f32 %v4693_v41, %v4631_v25  ;;  %v8054_v26 = vld [vmem:[#allocation3 + $0xa4] sm:$0xf]  ;;  %v7782_v25 = vld [vmem:[#allocation3 + $0xa8] sm:$0xf0]  ;;  %v10178_v2 = vmax.f32 %v4820_v54, %v4884_v59 }
 0x553   :  { %v4023_v23 = vpop.f32.mrf.mxu3  ;;  %v4695_v42 = vunpack.c.l.bf16 %v4375_v21 }
 0x554   :  { %v4789_v8 = vpack.c.bf16 %v4727_v5, %v4726_v46  ;;  %v4024_v52 = vadd.f32 %v4023_v23, %v10134_v35  ;;  %v10180_v46 = vmax.f32 %v4821_v43, %v4885_v60 }
 0x555   :  { %v4203_v22 = vpop.f32.mrf.mxu1 }
 0x556   :  { %v4278_v33 = vpack.c.bf16 %v4202_v14, %v4024_v52  ;;  %v4204_v55 = vadd.f32 %v4203_v22, %v10144_v37  ;;  %v4822_v16 = vunpack.c.l.bf16 %v4789_v8  ;;  %v4823_v62 = vunpack.c.h.bf16 %v4789_v8  ;;  %11545 = vst [vmem:[#allocation20_spill] sm:$0xff] %v10180_v46  ;;  %v10191_v38 = vpop.f32.mrf.mxu0 }
 0x557   :  { %v7785_v22 = vor.u32 %v8054_v26, %v7782_v25 }
 0x558   :  { %v4632_v7 = vunpack.c.l.bf16 %v4278_v33  ;;  %v4633_v30 = vunpack.c.h.bf16 %v4278_v33  ;;  %v4886_v41 = vmul.f32 0.010009766, %v4822_v16  ;;  %v4887_v35 = vmul.f32 0.010009766, %v4823_v62  ;;  %v10189_v33 = vpop.f32.mrf.mxu2 }
 0x55a   :  { %v4728_v14 = vadd.f32 %v4694_v44, %v4632_v7  ;;  %v4729_v37 = vadd.f32 %v4694_v44, %v4633_v30  ;;  %v10182_v5 = vmax.f32 %v4822_v16, %v4886_v41  ;;  %v10184_v23 = vmax.f32 %v4823_v62, %v4887_v35 }
 0x55b   :  { %v4025_v8 = vpop.f32.mrf.mxu3  ;;  %v4384_v41 = vperm.slane %v10136_v3, %v9061_v28 }
 0x55c   :  { %v4026_v52 = vadd.f32 %v4025_v8, %v10142_v11  ;;  %v4790_v59 = vpack.c.bf16 %v4729_v37, %v4728_v14 }
 0x55d   :  { %v4206_v60 = vpop.f32.mrf.mxu1 }
 0x55e   :  { %v4279_v32 = vpack.c.bf16 %v4204_v55, %v4026_v52  ;;  %v4207_v16 = vadd.f32 %v4206_v60, %v10152_v36  ;;  %v4824_v11 = vunpack.c.l.bf16 %v4790_v59  ;;  %v4825_v15 = vunpack.c.h.bf16 %v4790_v59  ;;  %v10203_v55 = vpop.f32.mrf.mxu0  ;;  %v8061_v59 = vld [vmem:[#allocation3 + $0xd4] sm:$0xf0] }
 0x560   :  { %v4634_v62 = vunpack.c.l.bf16 %v4279_v32  ;;  %v4635_v44 = vunpack.c.h.bf16 %v4279_v32  ;;  %4067 = vmatmul.bf16.gmra.mxu3 %v7785_v22  ;;  %4245 = vmatmul.bf16.gmra.mxu1 %v7785_v22  ;;  %v10201_v14 = vpop.f32.mrf.mxu2  ;;  %v4888_v37 = vmul.f32 0.010009766, %v4824_v11  ;;  %v4889_v21 = vmul.f32 0.010009766, %v4825_v15  ;;  %v7804_v22 = vld [vmem:[#allocation3 + $0xd0] sm:$0xf] }
 0x561   :  { %v7805_v3 = vor.u32 %v8061_v59, %v7804_v22 }
 0x562   :  { %v4730_v7 = vadd.f32 %v4695_v42, %v4634_v62  ;;  %v4731_v30 = vadd.f32 %v4695_v42, %v4635_v44  ;;  %v4696_v42 = vunpack.c.l.bf16 %v4384_v41  ;;  %v10206_v43 = vmax.f32 %v4824_v11, %v4888_v37  ;;  %v7798_v11 = vld [vmem:[#allocation3 + $0xc8] sm:$0xf0] }
 0x563   :  { %v4028_v35 = vpop.f32.mrf.mxu3  ;;  %3993 = vmatmul.bf16.gmra.mxu2 %v7805_v3  ;;  %4171 = vmatmul.bf16.gmra.mxu0 %v7805_v3  ;;  %v10208_v54 = vmax.f32 %v4825_v15, %v4889_v21  ;;  %v4393_v41 = vperm.slane %v10163_v24, %v9061_v28 }
 0x564   :  { %v4791_v26 = vpack.c.bf16 %v4731_v30, %v4730_v7  ;;  %v4029_v25 = vadd.f32 %v4028_v35, %v10150_v48  ;;  %v8056_v30 = vld [vmem:[#allocation3 + $0xb4] sm:$0xf]  ;;  %v7790_v35 = vld [vmem:[#allocation3 + $0xb8] sm:$0xf0] }
 0x565   :  { %v4208_v36 = vpop.f32.mrf.mxu1  ;;  %v7793_v22 = vor.u32 %v8056_v30, %v7790_v35  ;;  %v4697_v24 = vunpack.c.l.bf16 %v4393_v41  ;;  %v4402_v30 = vperm.slane %v10122_v34, %v9061_v28 }
 0x566   :  { %v4280_v8 = vpack.c.bf16 %v4207_v16, %v4029_v25  ;;  %v4209_v52 = vadd.f32 %v4208_v36, %v10161_v61  ;;  %v4826_v60 = vunpack.c.l.bf16 %v4791_v26  ;;  %v4827_v32 = vunpack.c.h.bf16 %v4791_v26  ;;  %v10219_v3 = vpop.f32.mrf.mxu0 }
 0x568   :  { %v4636_v62 = vunpack.c.l.bf16 %v4280_v8  ;;  %v4637_v44 = vunpack.c.h.bf16 %v4280_v8  ;;  %v4890_v7 = vmul.f32 0.010009766, %v4826_v60  ;;  %v4891_v48 = vmul.f32 0.010009766, %v4827_v32  ;;  %v10217_v59 = vpop.f32.mrf.mxu2 }
 0x56a   :  { %v4732_v16 = vadd.f32 %v4696_v42, %v4636_v62  ;;  %v4733_v61 = vadd.f32 %v4696_v42, %v4637_v44  ;;  %v10210_v25 = vmax.f32 %v4826_v60, %v4890_v7  ;;  %v10212_v36 = vmax.f32 %v4827_v32, %v4891_v48 }
 0x56b   :  { %v4030_v26 = vpop.f32.mrf.mxu3 }
 0x56c   :  { %v4031_v8 = vadd.f32 %v4030_v26, %v10159_v40  ;;  %v4792_v37 = vpack.c.bf16 %v4733_v61, %v4732_v16 }
 0x56d   :  { %v4211_v21 = vpop.f32.mrf.mxu1 }
 0x56e   :  { %v4281_v60 = vpack.c.bf16 %v4209_v52, %v4031_v8  ;;  %v4212_v32 = vadd.f32 %v4211_v21, %v10169_v20  ;;  %v4828_v40 = vunpack.c.l.bf16 %v4792_v37  ;;  %v4829_v44 = vunpack.c.h.bf16 %v4792_v37  ;;  %v10231_v52 = vpop.f32.mrf.mxu0  ;;  %v7812_v37 = vld [vmem:[#allocation3 + $0xe0] sm:$0xf] }
 0x570   :  { %v4638_v42 = vunpack.c.l.bf16 %v4281_v60  ;;  %v4639_v62 = vunpack.c.h.bf16 %v4281_v60  ;;  %4072 = vmatmul.bf16.gmra.mxu3 %v7793_v22  ;;  %4250 = vmatmul.bf16.gmra.mxu1 %v7793_v22  ;;  %v10229_v61 = vpop.f32.mrf.mxu2  ;;  %v4892_v41 = vmul.f32 0.010009766, %v4828_v40  ;;  %v4893_v8 = vmul.f32 0.010009766, %v4829_v44  ;;  %v8063_v60 = vld [vmem:[#allocation3 + $0xe4] sm:$0xf0] }
 0x571   :  { %v7813_v34 = vor.u32 %v8063_v60, %v7812_v37 }
 0x572   :  { %v4734_v7 = vadd.f32 %v4697_v24, %v4638_v42  ;;  %v4735_v48 = vadd.f32 %v4697_v24, %v4639_v62  ;;  %v4698_v62 = vunpack.c.l.bf16 %v4402_v30  ;;  %v10234_v49 = vmax.f32 %v4828_v40, %v4892_v41 }
 0x573   :  { %v4033_v35 = vpop.f32.mrf.mxu3  ;;  %3998 = vmatmul.bf16.gmra.mxu2 %v7813_v34  ;;  %4176 = vmatmul.bf16.gmra.mxu0 %v7813_v34  ;;  %v10236_v18 = vmax.f32 %v4829_v44, %v4893_v8  ;;  %v4411_v30 = vperm.slane %v10126_v53, %v9061_v28 }
 0x574   :  { %v4793_v26 = vpack.c.bf16 %v4735_v48, %v4734_v7  ;;  %v4034_v16 = vadd.f32 %v4033_v35, %v10167_v57  ;;  %v8058_v35 = vld [vmem:[#allocation3 + $0xc4] sm:$0xf] }
 0x575   :  { %v4213_v20 = vpop.f32.mrf.mxu1  ;;  %v7801_v37 = vor.u32 %v8058_v35, %v7798_v11  ;;  %v4699_v53 = vunpack.c.l.bf16 %v4411_v30  ;;  %v8065_v30 = vld [vmem:[#allocation3 + $0xf4] sm:$0xf0] }
 0x576   :  { %v4282_v21 = vpack.c.bf16 %v4212_v32, %v4034_v16  ;;  %v4214_v22 = vadd.f32 %v4213_v20, %v10175_v10  ;;  %v4830_v24 = vunpack.c.l.bf16 %v4793_v26  ;;  %v4831_v42 = vunpack.c.h.bf16 %v4793_v26  ;;  %v10251_v8 = vpop.f32.mrf.mxu0 }
 0x578   :  { %v4640_v15 = vunpack.c.l.bf16 %v4282_v21  ;;  %v4641_v7 = vunpack.c.h.bf16 %v4282_v21  ;;  %v4894_v48 = vmul.f32 0.010009766, %v4830_v24  ;;  %v4895_v57 = vmul.f32 0.010009766, %v4831_v42  ;;  %v10245_v60 = vpop.f32.mrf.mxu2 }
 0x57a   :  { %v4736_v32 = vadd.f32 %v4698_v62, %v4640_v15  ;;  %v4737_v10 = vadd.f32 %v4698_v62, %v4641_v7  ;;  %v10238_v16 = vmax.f32 %v4830_v24, %v4894_v48  ;;  %v10240_v20 = vmax.f32 %v4831_v42, %v4895_v57 }
 0x57b   :  { %v4035_v26 = vpop.f32.mrf.mxu3 }
 0x57c   :  { %v4036_v21 = vadd.f32 %v4035_v26, %v10173_v6  ;;  %v4794_v44 = vpack.c.bf16 %v4737_v10, %v4736_v32 }
 0x57d   :  { %v4216_v41 = vpop.f32.mrf.mxu1 }
 0x57e   :  { %v4283_v24 = vpack.c.bf16 %v4214_v22, %v4036_v21  ;;  %v4217_v42 = vadd.f32 %v4216_v41, %v10191_v38  ;;  %v4832_v6 = vunpack.c.l.bf16 %v4794_v44  ;;  %v4833_v48 = vunpack.c.h.bf16 %v4794_v44  ;;  %v7820_v38 = vld [vmem:[#allocation3 + $0xf0] sm:$0xf]  ;;  %v8060_v44 = vld [vmem:[#allocation3 + $0xd4] sm:$0xf] }
 0x57f   :  { %v7821_v40 = vor.u32 %v8065_v30, %v7820_v38 }
 0x580   :  { %v4642_v62 = vunpack.c.l.bf16 %v4283_v24  ;;  %v4643_v34 = vunpack.c.h.bf16 %v4283_v24  ;;  %4077 = vmatmul.bf16.gmra.mxu3 %v7801_v37  ;;  %4255 = vmatmul.bf16.gmra.mxu1 %v7801_v37  ;;  %v4896_v10 = vmul.f32 0.010009766, %v4832_v6  ;;  %v3961_v22 = vpop.f32.mrf.mxu2  ;;  %v4897_v24 = vmul.f32 0.010009766, %v4833_v48  ;;  %v4139_v37 = vpop.f32.mrf.mxu0 }
 0x582   :  { %v4738_v11 = vadd.f32 %v4699_v53, %v4642_v62  ;;  %v4739_v7 = vadd.f32 %v4699_v53, %v4643_v34  ;;  %v7806_v34 = vld [vmem:[#allocation3 + $0xd8] sm:$0xf0] }
 0x583   :  { %v4038_v57 = vpop.f32.mrf.mxu3  ;;  %4003 = vmatmul.bf16.gmra.mxu2 %v7821_v40  ;;  %4181 = vmatmul.bf16.gmra.mxu0 %v7821_v40 }
 0x584   :  { %v4795_v35 = vpack.c.bf16 %v4739_v7, %v4738_v11  ;;  %v4039_v26 = vadd.f32 %v4038_v57, %v10189_v33  ;;  %v10259_v33 = vmax.f32 %v4832_v6, %v4896_v10 }
 0x585   :  { %v10255_v32 = vpop.f32.mrf.mxu1 }
 0x586   :  { %v10257_v15 = vpack.c.bf16 %v4217_v42, %v4039_v26  ;;  %v4834_v21 = vunpack.c.l.bf16 %v4795_v35  ;;  %v4835_v41 = vunpack.c.h.bf16 %v4795_v35  ;;  %v10263_v42 = vmax.f32 %v4833_v48, %v4897_v24  ;;  %v7814_v48 = vld [vmem:[#allocation3 + $0xe8] sm:$0xf0] }
 0x587   :  { %v7809_v26 = vor.u32 %v8060_v44, %v7806_v34 }
 0x588   :  { %v4898_v62 = vmul.f32 0.010009766, %v4834_v21  ;;  %v4899_v53 = vmul.f32 0.010009766, %v4835_v41  ;;  %v3964_v40 = vpop.f32.mrf.mxu2  ;;  %v4142_v6 = vpop.f32.mrf.mxu0 }
 0x58a   :  { %v10261_v11 = vmax.f32 %v4834_v21, %v4898_v62  ;;  %v10265_v7 = vmax.f32 %v4835_v41, %v4899_v53  ;;  %v8062_v62 = vld [vmem:[#allocation3 + $0xe4] sm:$0xf] }
 0x58b   :  { %v4040_v57 = vpop.f32.mrf.mxu3  ;;  %v7817_v44 = vor.u32 %v8062_v62, %v7814_v48  ;;  %v4474_v62 = vperm.slane %v10106_v9, %v9061_v28  ;;  %v4438_v9 = vperm.slane %v10108_v4, %v9061_v28  ;;  %v4704_v4 = vunpack.c.l.bf16 %v4456_v1 }
 0x58d   :  { %v4221_v30 = vpop.f32.mrf.mxu1 }
 0x590   :  { %4082 = vmatmul.bf16.gmra.mxu3 %v7809_v26  ;;  %4260 = vmatmul.bf16.gmra.mxu1 %v7809_v26  ;;  %v10271_v24 = vpop.f32.mrf.mxu2  ;;  %v10273_v53 = vpop.f32.mrf.mxu0 }
 0x593   :  { %v4043_v10 = vpop.f32.mrf.mxu3 }
 0x595   :  { %v4223_v21 = vpop.f32.mrf.mxu1 }
 0x596   :  { %v4224_v13 = vadd.f32 %v4223_v21, %v10231_v52  ;;  %v4703_v52 = vunpack.c.l.bf16 %v4447_v39 }
 0x598   :  { %v10275_v38 = vpop.f32.mrf.mxu2  ;;  %v10277_v26 = vpop.f32.mrf.mxu0 }
 0x59b   :  { %v4045_v41 = vpop.f32.mrf.mxu3 }
 0x59d   :  { %v4226_v34 = vpop.f32.mrf.mxu1 }
 0x59e   :  { %v4227_v50 = vadd.f32 %v4226_v34, %v10251_v8 }
 0x5a0   :  { %4087 = vmatmul.bf16.gmra.mxu3 %v7817_v44  ;;  %4265 = vmatmul.bf16.gmra.mxu1 %v7817_v44  ;;  %v10279_v63 = vpop.f32.mrf.mxu2  ;;  %v10281_v31 = vpop.f32.mrf.mxu0  ;;  %v4483_v44 = vperm.slane %v10096_v0, %v9061_v28  ;;  %v4046_v0 = vadd.f32 %v4045_v41, %v10229_v61  ;;  %v4041_v61 = vadd.f32 %v4040_v57, %v10201_v14 }
 0x5a1   :  { %11546 = vst [vmem:[#allocation25_spill] sm:$0xff] %v10279_v63 }
 0x5a2   :  { %11547 = vst [vmem:[#allocation26_spill] sm:$0xff] %v10281_v31  ;;  %v4707_v34 = vunpack.c.l.bf16 %v4483_v44 }
 0x5a3   :  { %v4048_v35 = vpop.f32.mrf.mxu3 }
 0x5a4   :  { %v4049_v46 = vadd.f32 %v4048_v35, %v10245_v60 }
 0x5a5   :  { %v4228_v27 = vpop.f32.mrf.mxu1 }
 0x5a6   :  { %v4229_v31 = vadd.f32 %v4228_v27, %v4139_v37  ;;  %v4288_v27 = vpack.c.bf16 %v4227_v50, %v4049_v46  ;;  %v4705_v37 = vunpack.c.l.bf16 %v4465_v56  ;;  %v4219_v50 = vadd.f32 %v10255_v32, %v10203_v55 }
 0x5a8   :  { %v10304_v51 = vpop.f32.mrf.mxu2  ;;  %v4652_v46 = vunpack.c.l.bf16 %v4288_v27  ;;  %v4653_v21 = vunpack.c.h.bf16 %v4288_v27  ;;  %v4285_v44 = vpack.c.bf16 %v4219_v50, %v4041_v61 }
 0x5aa   :  { %v4647_v61 = vunpack.c.h.bf16 %v4285_v44 }
 0x5ab   :  { %v4050_v17 = vpop.f32.mrf.mxu3 }
 0x5ac   :  { %v4051_v48 = vadd.f32 %v4050_v17, %v3961_v22  ;;  %v4222_v17 = vadd.f32 %v4221_v30, %v10219_v3  ;;  %v4706_v22 = vunpack.c.l.bf16 %v4474_v62  ;;  %v4420_v3 = vperm.slane %v10132_v45, %v9061_v28 }
 0x5ad   :  { %v4231_v29 = vpop.f32.mrf.mxu1  ;;  %v4702_v30 = vunpack.c.l.bf16 %v4438_v9  ;;  %v4429_v45 = vperm.slane %v10116_v19, %v9061_v28  ;;  %v4644_v19 = vunpack.c.l.bf16 %v10257_v15 }
 0x5ae   :  { %v4232_v63 = vadd.f32 %v4231_v29, %v4142_v6  ;;  %v4289_v60 = vpack.c.bf16 %v4229_v31, %v4051_v48  ;;  %v4287_v31 = vpack.c.bf16 %v4224_v13, %v4046_v0  ;;  %v10308_v48 = vpop.f32.mrf.mxu0 }
 0x5b0   :  { %4092 = vmatmul.bf16.gmra.mxu3 %v7825_v12  ;;  %4270 = vmatmul.bf16.gmra.mxu1 %v7825_v12  ;;  %v4044_v12 = vadd.f32 %v4043_v10, %v10217_v59  ;;  %v4655_v10 = vunpack.c.h.bf16 %v4289_v60  ;;  %v4650_v1 = vunpack.c.l.bf16 %v4287_v31  ;;  %v4651_v9 = vunpack.c.h.bf16 %v4287_v31 }
 0x5b2   :  { %v4286_v6 = vpack.c.bf16 %v4222_v17, %v4044_v12  ;;  %v4751_v0 = vadd.f32 %v4705_v37, %v4655_v10  ;;  %v4746_v31 = vadd.f32 %v4703_v52, %v4650_v1 }
 0x5b3   :  { %v4053_v8 = vpop.f32.mrf.mxu3 }
 0x5b4   :  { %v4054_v35 = vadd.f32 %v4053_v8, %v3964_v40  ;;  %v4654_v40 = vunpack.c.l.bf16 %v4289_v60  ;;  %v4648_v56 = vunpack.c.l.bf16 %v4286_v6  ;;  %v4649_v32 = vunpack.c.h.bf16 %v4286_v6 }
 0x5b5   :  { %v4233_v29 = vpop.f32.mrf.mxu1  ;;  %v4748_v60 = vadd.f32 %v4704_v4, %v4652_v46 }
 0x5b6   :  { %v4290_v59 = vpack.c.bf16 %v4232_v63, %v4054_v35  ;;  %v4700_v63 = vunpack.c.l.bf16 %v4420_v3  ;;  %v4750_v12 = vadd.f32 %v4705_v37, %v4654_v40  ;;  %v4234_v8 = vadd.f32 %v4233_v29, %v10273_v53 }
 0x5b7   :  { %v4749_v35 = vadd.f32 %v4704_v4, %v4653_v21  ;;  %v4747_v37 = vadd.f32 %v4703_v52, %v4651_v9  ;;  %v4701_v40 = vunpack.c.l.bf16 %v4429_v45  ;;  %v4744_v6 = vadd.f32 %v4702_v30, %v4648_v56  ;;  %v10319_v52 = vpop.f32.mrf.mxu0 }
 0x5b8   :  { %v4656_v41 = vunpack.c.l.bf16 %v4290_v59  ;;  %v4657_v62 = vunpack.c.h.bf16 %v4290_v59  ;;  %v4646_v59 = vunpack.c.l.bf16 %v4285_v44  ;;  %v4801_v53 = vpack.c.bf16 %v4751_v0, %v4750_v12 }
 0x5b9   :  { %v4745_v10 = vadd.f32 %v4702_v30, %v4649_v32  ;;  %v4800_v4 = vpack.c.bf16 %v4749_v35, %v4748_v60  ;;  %v4799_v44 = vpack.c.bf16 %v4747_v37, %v4746_v31 }
 0x5ba   :  { %v4752_v14 = vadd.f32 %v4706_v22, %v4656_v41  ;;  %v4753_v57 = vadd.f32 %v4706_v22, %v4657_v62  ;;  %v4645_v22 = vunpack.c.h.bf16 %v10257_v15  ;;  %v4740_v62 = vadd.f32 %v4700_v63, %v4644_v19  ;;  %v10317_v15 = vpop.f32.mrf.mxu2 }
 0x5bb   :  { %v4055_v17 = vpop.f32.mrf.mxu3  ;;  %v4846_v56 = vunpack.c.l.bf16 %v4801_v53  ;;  %v4847_v30 = vunpack.c.h.bf16 %v4801_v53  ;;  %v4843_v19 = vunpack.c.h.bf16 %v4799_v44 }
 0x5bc   :  { %v4056_v55 = vadd.f32 %v4055_v17, %v10271_v24  ;;  %v4802_v39 = vpack.c.bf16 %v4753_v57, %v4752_v14  ;;  %v4741_v14 = vadd.f32 %v4700_v63, %v4645_v22  ;;  %v4743_v57 = vadd.f32 %v4701_v40, %v4647_v61 }
 0x5bd   :  { %v4236_v13 = vpop.f32.mrf.mxu1  ;;  %v4798_v17 = vpack.c.bf16 %v4745_v10, %v4744_v6 }
 0x5be   :  { %v4291_v27 = vpack.c.bf16 %v4234_v8, %v4056_v55  ;;  %v4237_v3 = vadd.f32 %v4236_v13, %v10277_v26  ;;  %v4848_v41 = vunpack.c.l.bf16 %v4802_v39  ;;  %v4849_v50 = vunpack.c.h.bf16 %v4802_v39 }
 0x5bf   :  { %v4742_v26 = vadd.f32 %v4701_v40, %v4646_v59  ;;  %v4844_v8 = vunpack.c.l.bf16 %v4800_v4  ;;  %v4796_v35 = vpack.c.bf16 %v4741_v14, %v4740_v62  ;;  %v4842_v13 = vunpack.c.l.bf16 %v4799_v44 }
 0x5c0   :  { %v4658_v29 = vunpack.c.l.bf16 %v4291_v27  ;;  %v4659_v24 = vunpack.c.h.bf16 %v4291_v27  ;;  %v4912_v0 = vmul.f32 0.010009766, %v4848_v41  ;;  %v4913_v60 = vmul.f32 0.010009766, %v4849_v50 }
 0x5c1   :  { %v4797_v39 = vpack.c.bf16 %v4743_v57, %v4742_v26  ;;  %v4911_v59 = vmul.f32 0.010009766, %v4847_v30  ;;  %v4908_v61 = vmul.f32 0.010009766, %v4844_v8  ;;  %v4840_v37 = vunpack.c.l.bf16 %v4798_v17 }
 0x5c2   :  { %v4754_v46 = vadd.f32 %v4707_v34, %v4658_v29  ;;  %v4755_v21 = vadd.f32 %v4707_v34, %v4659_v24  ;;  %v4845_v34 = vunpack.c.h.bf16 %v4800_v4  ;;  %v4841_v40 = vunpack.c.h.bf16 %v4798_v17  ;;  %v3979_v44 = vpop.f32.mrf.mxu2  ;;  %v4157_v17 = vpop.f32.mrf.mxu0 }
 0x5c3   :  { %v4058_v1 = vpop.f32.mrf.mxu3  ;;  %v5072_v53 = vmax.f32 %v4848_v41, %v4912_v0  ;;  %v5073_v24 = vmax.f32 %v4849_v50, %v4913_v60  ;;  %v4906_v10 = vmul.f32 0.010009766, %v4842_v13  ;;  %v4907_v4 = vmul.f32 0.010009766, %v4843_v19 }
 0x5c4   :  { %v4803_v45 = vpack.c.bf16 %v4755_v21, %v4754_v46  ;;  %v4059_v9 = vadd.f32 %v4058_v1, %v10275_v38  ;;  %v4910_v38 = vmul.f32 0.010009766, %v4846_v56  ;;  %v4909_v31 = vmul.f32 0.010009766, %v4845_v34 }
 0x5c5   :  { %v10322_v12 = vpop.f32.mrf.mxu1  ;;  %v4838_v62 = vunpack.c.l.bf16 %v4797_v39  ;;  %v4839_v46 = vunpack.c.h.bf16 %v4797_v39  ;;  %v5071_v57 = vmax.f32 %v4847_v30, %v4911_v59  ;;  %v5068_v50 = vmax.f32 %v4844_v8, %v4908_v61 }
 0x5c6   :  { %v10324_v55 = vpack.c.bf16 %v4237_v3, %v4059_v9  ;;  %v4850_v63 = vunpack.c.l.bf16 %v4803_v45  ;;  %v4851_v32 = vunpack.c.h.bf16 %v4803_v45  ;;  %v5070_v26 = vmax.f32 %v4846_v56, %v4910_v38 }
 0x5c7   :  { %v4904_v45 = vmul.f32 0.010009766, %v4840_v37  ;;  %v4836_v9 = vunpack.c.l.bf16 %v4796_v35  ;;  %v5069_v0 = vmax.f32 %v4845_v34, %v4909_v31  ;;  %v4903_v60 = vmul.f32 0.010009766, %v4839_v46 }
 0x5c8   :  { %11548 = vst [vmem:[#allocation27_spill] sm:$0xff] %v10324_v55  ;;  %v4914_v22 = vmul.f32 0.010009766, %v4850_v63  ;;  %v4915_v27 = vmul.f32 0.010009766, %v4851_v32  ;;  %v4837_v55 = vunpack.c.h.bf16 %v4796_v35  ;;  %v5120_v39 = vpack.c.bf16 %v5070_v26, %v5068_v50 }
 0x5c9   :  { %v5067_v56 = vmax.f32 %v4843_v19, %v4907_v4  ;;  %v5064_v30 = vmax.f32 %v4840_v37, %v4904_v45  ;;  %v4900_v59 = vmul.f32 0.010009766, %v4836_v9  ;;  %v5063_v31 = vmax.f32 %v4839_v46, %v4903_v60 }
 0x5ca   :  { %v5074_v29 = vmax.f32 %v4850_v63, %v4914_v22  ;;  %v5075_v3 = vmax.f32 %v4851_v32, %v4915_v27  ;;  %v4905_v63 = vmul.f32 0.010009766, %v4841_v40  ;;  %v4902_v32 = vmul.f32 0.010009766, %v4838_v62 }
 0x5cb   :  { %v10326_v6 = vpop.f32.mrf.mxu3  ;;  %v5121_v22 = vpack.c.bf16 %v5071_v57, %v5069_v0  ;;  %v5066_v27 = vmax.f32 %v4842_v13, %v4906_v10  ;;  %v4901_v35 = vmul.f32 0.010009766, %v4837_v55  ;;  %v5060_v19 = vmax.f32 %v4836_v9, %v4900_v59  ;;  %v4159_v10 = vpop.f32.mrf.mxu0 }
 0x5cc   :  { %v5122_v21 = vpack.c.bf16 %v5074_v29, %v5072_v53  ;;  %v5123_v14 = vpack.c.bf16 %v5075_v3, %v5073_v24  ;;  %v5065_v38 = vmax.f32 %v4841_v40, %v4905_v63  ;;  %v5062_v29 = vmax.f32 %v4838_v62, %v4902_v32  ;;  %v3981_v40 = vpop.f32.mrf.mxu2 }
 0x5cd   :  { %v4241_v1 = vpop.f32.mrf.mxu1  ;;  %v5118_v34 = vpack.c.bf16 %v5066_v27, %v5064_v30  ;;  %v5061_v37 = vmax.f32 %v4837_v55, %v4901_v35  ;;  %v11549_v55 = vpack.c.bf16 %v10261_v11, %v10259_v33  ;;  %v11550_v45 = vpack.c.bf16 %v10265_v7, %v10263_v42  ;;  %v11558_v27 = vld [vmem:[#allocation23_spill] sm:$0xff] }
 0x5ce   :  { %v4242_v41 = vadd.f32 %v4241_v1, %v10308_v48  ;;  %5332 = vmatpush.bf16.msra.mxu2 %v5122_v21  ;;  %5510 = vmatpush.bf16.msra.mxu0 %v5123_v14  ;;  %v4510_v48 = vperm.slane %v10156_v47, %v9061_v28  ;;  %v5119_v61 = vpack.c.bf16 %v5067_v56, %v5065_v38 }
 0x5cf   :  { %v5116_v47 = vpack.c.bf16 %v5062_v29, %v5060_v19  ;;  %v5117_v14 = vpack.c.bf16 %v5063_v31, %v5061_v37  ;;  %v11551_v50 = vpack.c.bf16 %v10238_v16, %v10234_v49  ;;  %v11552_v0 = vpack.c.bf16 %v10240_v20, %v10236_v18 }
 0x5d0   :  { %v4710_v3 = vunpack.c.l.bf16 %v4510_v48  ;;  %v11553_v42 = vpack.c.bf16 %v10210_v25, %v10206_v43  ;;  %v11554_v7 = vpack.c.bf16 %v10212_v36, %v10208_v54  ;;  %v4537_v54 = vperm.slane %v11558_v27, %v9061_v28 }
 0x5d2   :  { %5333 = vmatpush.bf16.msra.mxu2 %v5120_v39  ;;  %5511 = vmatpush.bf16.msra.mxu0 %v5121_v22  ;;  %v11555_v39 = vpack.c.bf16 %v10182_v5, %v10178_v2  ;;  %v4713_v48 = vunpack.c.l.bf16 %v4537_v54 }
 0x5d3   :  { %v4063_v53 = vpop.f32.mrf.mxu3 }
 0x5d4   :  { %v4064_v8 = vadd.f32 %v4063_v53, %v10304_v51  ;;  %v3984_v9 = vpop.f32.mrf.mxu2 }
 0x5d5   :  { %v10332_v24 = vpop.f32.mrf.mxu1 }
 0x5d6   :  { %v4294_v13 = vpack.c.bf16 %v4242_v41, %v4064_v8  ;;  %5334 = vmatpush.bf16.msra.mxu2 %v5118_v34  ;;  %5512 = vmatpush.bf16.msra.mxu0 %v5119_v61  ;;  %v4162_v41 = vpop.f32.mrf.mxu0  ;;  %v11559_v34 = vld [vmem:[#allocation24_spill] sm:$0xff] }
 0x5d7   :  { %v4546_v61 = vperm.slane %v11559_v34, %v9061_v28 }
 0x5d8   :  { %v4664_v4 = vunpack.c.l.bf16 %v4294_v13  ;;  %v4665_v21 = vunpack.c.h.bf16 %v4294_v13 }
 0x5da   :  { %v4760_v62 = vadd.f32 %v4710_v3, %v4664_v4  ;;  %v4761_v26 = vadd.f32 %v4710_v3, %v4665_v21  ;;  %5335 = vmatpush.bf16.msra.mxu2 %v5116_v47  ;;  %5513 = vmatpush.bf16.msra.mxu0 %v5117_v14 }
 0x5db   :  { %v10334_v51 = vpop.f32.mrf.mxu3 }
 0x5dc   :  { %v10336_v46 = vpack.c.bf16 %v4761_v26, %v4760_v62  ;;  %v3986_v22 = vpop.f32.mrf.mxu2  ;;  %v4714_v62 = vunpack.c.l.bf16 %v4546_v61 }
 0x5dd   :  { %v4246_v57 = vpop.f32.mrf.mxu1 }
 0x5de   :  { %v4247_v1 = vadd.f32 %v4246_v57, %v4157_v17  ;;  %5336 = vmatpush.bf16.msra.mxu2 %v11549_v55  ;;  %5514 = vmatpush.bf16.msra.mxu0 %v11550_v45  ;;  %v4528_v17 = vperm.slane %v10138_v58, %v9061_v28  ;;  %v11556_v58 = vld [vmem:[#allocation20_spill] sm:$0xff]  ;;  %v4164_v25 = vpop.f32.mrf.mxu0 }
 0x5e0   :  { %v4712_v49 = vunpack.c.l.bf16 %v4528_v17  ;;  %v11560_v17 = vld [vmem:[#allocation19_spill] sm:$0xff] }
 0x5e2   :  { %5337 = vmatpush.bf16.msra.mxu2 %v11551_v50  ;;  %5515 = vmatpush.bf16.msra.mxu0 %v11552_v0 }
 0x5e3   :  { %v4068_v63 = vpop.f32.mrf.mxu3 }
 0x5e4   :  { %v4069_v33 = vadd.f32 %v4068_v63, %v3979_v44  ;;  %v11557_v44 = vpack.c.bf16 %v10184_v23, %v11556_v58  ;;  %v3989_v37 = vpop.f32.mrf.mxu2 }
 0x5e5   :  { %v4248_v11 = vpop.f32.mrf.mxu1 }
 0x5e6   :  { %v4296_v32 = vpack.c.bf16 %v4247_v1, %v4069_v33  ;;  %5338 = vmatpush.bf16.msra.mxu2 %v11553_v42  ;;  %5516 = vmatpush.bf16.msra.mxu0 %v11554_v7  ;;  %v4249_v56 = vadd.f32 %v4248_v11, %v4159_v10  ;;  %v4167_v10 = vpop.f32.mrf.mxu0  ;;  %v4555_v33 = vperm.slane %v11560_v17, %v9061_v28 }
 0x5e8   :  { %v4668_v16 = vunpack.c.l.bf16 %v4296_v32  ;;  %v4669_v60 = vunpack.c.h.bf16 %v4296_v32 }
 0x5ea   :  { %v4764_v18 = vadd.f32 %v4712_v49, %v4668_v16  ;;  %v4765_v20 = vadd.f32 %v4712_v49, %v4669_v60  ;;  %5339 = vmatpush.bf16.msra.mxu2 %v11555_v39  ;;  %5517 = vmatpush.bf16.msra.mxu0 %v11557_v44  ;;  %v4715_v44 = vunpack.c.l.bf16 %v4555_v33 }
 0x5eb   :  { %v4070_v43 = vpop.f32.mrf.mxu3 }
 0x5ec   :  { %v4808_v36 = vpack.c.bf16 %v4765_v20, %v4764_v18  ;;  %v4071_v30 = vadd.f32 %v4070_v43, %v3981_v40  ;;  %v3991_v39 = vpop.f32.mrf.mxu2 }
 0x5ed   :  { %v4251_v38 = vpop.f32.mrf.mxu1 }
 0x5ee   :  { %v4297_v59 = vpack.c.bf16 %v4249_v56, %v4071_v30  ;;  %v4252_v35 = vadd.f32 %v4251_v38, %v4162_v41  ;;  %v4860_v5 = vunpack.c.l.bf16 %v4808_v36  ;;  %v4861_v29 = vunpack.c.h.bf16 %v4808_v36  ;;  %v4169_v58 = vpop.f32.mrf.mxu0 }
 0x5f0   :  { %v4670_v53 = vunpack.c.l.bf16 %v4297_v59  ;;  %v4671_v2 = vunpack.c.h.bf16 %v4297_v59  ;;  %v4924_v40 = vmul.f32 0.010009766, %v4860_v5  ;;  %v4925_v4 = vmul.f32 0.010009766, %v4861_v29 }
 0x5f2   :  { %v4766_v8 = vadd.f32 %v4713_v48, %v4670_v53  ;;  %v4767_v23 = vadd.f32 %v4713_v48, %v4671_v2  ;;  %v10368_v45 = vmax.f32 %v4860_v5, %v4924_v40  ;;  %v10370_v41 = vmax.f32 %v4861_v29, %v4925_v4 }
 0x5f3   :  { %v4073_v31 = vpop.f32.mrf.mxu3 }
 0x5f4   :  { %v4809_v13 = vpack.c.bf16 %v4767_v23, %v4766_v8  ;;  %v4074_v19 = vadd.f32 %v4073_v31, %v3984_v9  ;;  %v3994_v31 = vpop.f32.mrf.mxu2 }
 0x5f5   :  { %v4253_v3 = vpop.f32.mrf.mxu1 }
 0x5f6   :  { %v4298_v21 = vpack.c.bf16 %v4252_v35, %v4074_v19  ;;  %v4862_v47 = vunpack.c.l.bf16 %v4809_v13  ;;  %v4863_v14 = vunpack.c.h.bf16 %v4809_v13  ;;  %v4254_v11 = vadd.f32 %v4253_v3, %v4164_v25  ;;  %v4172_v3 = vpop.f32.mrf.mxu0 }
 0x5f8   :  { %v4672_v26 = vunpack.c.l.bf16 %v4298_v21  ;;  %v4673_v57 = vunpack.c.h.bf16 %v4298_v21  ;;  %v4926_v1 = vmul.f32 0.010009766, %v4862_v47  ;;  %v4927_v55 = vmul.f32 0.010009766, %v4863_v14 }
 0x5fa   :  { %v4768_v50 = vadd.f32 %v4714_v62, %v4672_v26  ;;  %v4769_v0 = vadd.f32 %v4714_v62, %v4673_v57  ;;  %v10372_v9 = vmax.f32 %v4862_v47, %v4926_v1  ;;  %v10374_v63 = vmax.f32 %v4863_v14, %v4927_v55  ;;  %v11562_v14 = vld [vmem:[#allocation21_spill] sm:$0xff] }
 0x5fb   :  { %v4075_v32 = vpop.f32.mrf.mxu3  ;;  %v4573_v62 = vperm.slane %v11562_v14, %v9061_v28 }
 0x5fc   :  { %v4810_v42 = vpack.c.bf16 %v4769_v0, %v4768_v50  ;;  %v4076_v7 = vadd.f32 %v4075_v32, %v3986_v22  ;;  %v5128_v49 = vpack.c.bf16 %v10372_v9, %v10368_v45  ;;  %v5129_v16 = vpack.c.bf16 %v10374_v63, %v10370_v41  ;;  %v11561_v22 = vld [vmem:[#allocation22_spill] sm:$0xff]  ;;  %v7830_v9 = vld [vmem:[#allocation6 + $0x8] sm:$0xf0]  ;;  %v7852_v63 = vld [vmem:[#allocation6 + $0x30] sm:$0xf] }
 0x5fd   :  { %v4256_v60 = vpop.f32.mrf.mxu1  ;;  %v4564_v30 = vperm.slane %v11561_v22, %v9061_v28  ;;  %v8066_v45 = vld [vmem:[#allocation6 + $0x4] sm:$0xf] }
 0x5fe   :  { %v4299_v18 = vpack.c.bf16 %v4254_v11, %v4076_v7  ;;  %v4257_v20 = vadd.f32 %v4256_v60, %v4167_v10  ;;  %v4864_v54 = vunpack.c.l.bf16 %v4810_v42  ;;  %v4865_v36 = vunpack.c.h.bf16 %v4810_v42 }
 0x5ff   :  { %v4716_v23 = vunpack.c.l.bf16 %v4564_v30  ;;  %v4717_v11 = vunpack.c.l.bf16 %v4573_v62  ;;  %v7833_v41 = vor.u32 %v8066_v45, %v7830_v9 }
 0x600   :  { %v4674_v43 = vunpack.c.l.bf16 %v4299_v18  ;;  %v4675_v27 = vunpack.c.h.bf16 %v4299_v18  ;;  %v4928_v53 = vmul.f32 0.010009766, %v4864_v54  ;;  %v4929_v2 = vmul.f32 0.010009766, %v4865_v36 }
 0x602   :  { %v4770_v25 = vadd.f32 %v4715_v44, %v4674_v43  ;;  %v4771_v56 = vadd.f32 %v4715_v44, %v4675_v27  ;;  %v10384_v10 = vmax.f32 %v4864_v54, %v4928_v53  ;;  %v10386_v40 = vmax.f32 %v4865_v36, %v4929_v2  ;;  %v11563_v43 = vld [vmem:[#allocation13_spill] sm:$0xff]  ;;  %v4174_v54 = vpop.f32.mrf.mxu0 }
 0x603   :  { %v4078_v38 = vpop.f32.mrf.mxu3 }
 0x604   :  { %v4811_v59 = vpack.c.bf16 %v4771_v56, %v4770_v25  ;;  %v4079_v35 = vadd.f32 %v4078_v38, %v3989_v37 }
 0x605   :  { %v4258_v48 = vpop.f32.mrf.mxu1 }
 0x606   :  { %v4300_v5 = vpack.c.bf16 %v4257_v20, %v4079_v35  ;;  %v4866_v29 = vunpack.c.l.bf16 %v4811_v59  ;;  %v4867_v8 = vunpack.c.h.bf16 %v4811_v59  ;;  %v4259_v26 = vadd.f32 %v4258_v48, %v4169_v58  ;;  %v3996_v58 = vpop.f32.mrf.mxu2 }
 0x608   :  { %v4676_v34 = vunpack.c.l.bf16 %v4300_v5  ;;  %v4677_v61 = vunpack.c.h.bf16 %v4300_v5  ;;  %v4930_v13 = vmul.f32 0.010009766, %v4866_v29  ;;  %v4931_v19 = vmul.f32 0.010009766, %v4867_v8 }
 0x60a   :  { %v4772_v4 = vadd.f32 %v4716_v23, %v4676_v34  ;;  %v4773_v21 = vadd.f32 %v4716_v23, %v4677_v61  ;;  %v10388_v37 = vmax.f32 %v4866_v29, %v4930_v13  ;;  %v10390_v47 = vmax.f32 %v4867_v8, %v4931_v19  ;;  %v11564_v19 = vld [vmem:[#allocation16_spill] sm:$0xff] }
 0x60b   :  { %v4080_v57 = vpop.f32.mrf.mxu3 }
 0x60c   :  { %v4812_v1 = vpack.c.bf16 %v4773_v21, %v4772_v4  ;;  %v4081_v55 = vadd.f32 %v4080_v57, %v3991_v39  ;;  %v5130_v50 = vpack.c.bf16 %v10388_v37, %v10384_v10  ;;  %v5131_v0 = vpack.c.bf16 %v10390_v47, %v10386_v40 }
 0x60d   :  { %v4261_v17 = vpop.f32.mrf.mxu1  ;;  %v4582_v39 = vperm.slane %v11563_v43, %v9061_v28 }
 0x60e   :  { %v4301_v33 = vpack.c.bf16 %v4259_v26, %v4081_v55  ;;  %v4868_v7 = vunpack.c.l.bf16 %v4812_v1  ;;  %v4869_v60 = vunpack.c.h.bf16 %v4812_v1  ;;  %v4262_v44 = vadd.f32 %v4261_v17, %v4172_v3  ;;  %v3999_v14 = vpop.f32.mrf.mxu2  ;;  %v4177_v55 = vpop.f32.mrf.mxu0 }
 0x60f   :  { %v4718_v48 = vunpack.c.l.bf16 %v4582_v39  ;;  %v4591_v3 = vperm.slane %v11564_v19, %v9061_v28 }
 0x610   :  { %v4678_v32 = vunpack.c.l.bf16 %v4301_v33  ;;  %v4679_v42 = vunpack.c.h.bf16 %v4301_v33  ;;  %v4932_v22 = vmul.f32 0.010009766, %v4868_v7  ;;  %v4933_v30 = vmul.f32 0.010009766, %v4869_v60 }
 0x612   :  { %v4774_v18 = vadd.f32 %v4717_v11, %v4678_v32  ;;  %v4775_v20 = vadd.f32 %v4717_v11, %v4679_v42  ;;  %v10400_v8 = vmax.f32 %v4868_v7, %v4932_v22  ;;  %v10402_v23 = vmax.f32 %v4869_v60, %v4933_v30 }
 0x613   :  { %v4083_v27 = vpop.f32.mrf.mxu3  ;;  %v4719_v11 = vunpack.c.l.bf16 %v4591_v3 }
 0x614   :  { %v4813_v36 = vpack.c.bf16 %v4775_v20, %v4774_v18  ;;  %v4084_v25 = vadd.f32 %v4083_v27, %v3994_v31 }
 0x615   :  { %v4263_v56 = vpop.f32.mrf.mxu1 }
 0x616   :  { %v4302_v38 = vpack.c.bf16 %v4262_v44, %v4084_v25  ;;  %v4870_v59 = vunpack.c.l.bf16 %v4813_v36  ;;  %v4871_v35 = vunpack.c.h.bf16 %v4813_v36  ;;  %v4264_v21 = vadd.f32 %v4263_v56, %v4174_v54  ;;  %v4001_v22 = vpop.f32.mrf.mxu2 }
 0x618   :  { %v4680_v53 = vunpack.c.l.bf16 %v4302_v38  ;;  %v4681_v2 = vunpack.c.h.bf16 %v4302_v38  ;;  %v4934_v5 = vmul.f32 0.010009766, %v4870_v59  ;;  %v4935_v29 = vmul.f32 0.010009766, %v4871_v35 }
 0x61a   :  { %v4776_v34 = vadd.f32 %v4718_v48, %v4680_v53  ;;  %v4777_v61 = vadd.f32 %v4718_v48, %v4681_v2  ;;  %v10404_v13 = vmax.f32 %v4870_v59, %v4934_v5  ;;  %v10406_v31 = vmax.f32 %v4871_v35, %v4935_v29  ;;  %v4179_v48 = vpop.f32.mrf.mxu0 }
 0x61b   :  { %v4085_v4 = vpop.f32.mrf.mxu3 }
 0x61c   :  { %v4086_v62 = vadd.f32 %v4085_v4, %v3996_v58  ;;  %v5132_v26 = vpack.c.bf16 %v10404_v13, %v10400_v8  ;;  %v5133_v57 = vpack.c.bf16 %v10406_v31, %v10402_v23  ;;  %v4814_v1 = vpack.c.bf16 %v4777_v61, %v4776_v34  ;;  %v11565_v58 = vld [vmem:[#allocation18_spill] sm:$0xff] }
 0x61d   :  { %v4266_v17 = vpop.f32.mrf.mxu1  ;;  %v4600_v43 = vperm.slane %v11565_v58, %v9061_v28 }
 0x61e   :  { %v4303_v33 = vpack.c.bf16 %v4264_v21, %v4086_v62  ;;  %v4872_v7 = vunpack.c.l.bf16 %v4814_v1  ;;  %v4873_v60 = vunpack.c.h.bf16 %v4814_v1  ;;  %v4267_v44 = vadd.f32 %v4266_v17, %v4177_v55 }
 0x61f   :  { %v4720_v35 = vunpack.c.l.bf16 %v4600_v43 }
 0x620   :  { %v4682_v32 = vunpack.c.l.bf16 %v4303_v33  ;;  %v4683_v42 = vunpack.c.h.bf16 %v4303_v33  ;;  %v4936_v25 = vmul.f32 0.010009766, %v4872_v7  ;;  %v4937_v56 = vmul.f32 0.010009766, %v4873_v60 }
 0x622   :  { %v4778_v18 = vadd.f32 %v4719_v11, %v4682_v32  ;;  %v4779_v20 = vadd.f32 %v4719_v11, %v4683_v42  ;;  %v10416_v34 = vmax.f32 %v4872_v7, %v4936_v25  ;;  %v10418_v61 = vmax.f32 %v4873_v60, %v4937_v56  ;;  %v4182_v58 = vpop.f32.mrf.mxu0  ;;  %v11567_v25 = vld [vmem:[#allocation14_spill] sm:$0xff] }
 0x623   :  { %v4088_v39 = vpop.f32.mrf.mxu3  ;;  %v4618_v56 = vperm.slane %v11567_v25, %v9061_v28 }
 0x624   :  { %v4815_v27 = vpack.c.bf16 %v4779_v20, %v4778_v18  ;;  %v4089_v54 = vadd.f32 %v4088_v39, %v3999_v14  ;;  %v11566_v14 = vld [vmem:[#allocation15_spill] sm:$0xff]  ;;  %v4004_v18 = vpop.f32.mrf.mxu2 }
 0x625   :  { %v4268_v36 = vpop.f32.mrf.mxu1  ;;  %v4609_v62 = vperm.slane %v11566_v14, %v9061_v28 }
 0x626   :  { %v4304_v30 = vpack.c.bf16 %v4267_v44, %v4089_v54  ;;  %v4874_v38 = vunpack.c.l.bf16 %v4815_v27  ;;  %v4875_v59 = vunpack.c.h.bf16 %v4815_v27  ;;  %v4269_v55 = vadd.f32 %v4268_v36, %v4179_v48 }
 0x627   :  { %v4721_v60 = vunpack.c.l.bf16 %v4609_v62 }
 0x628   :  { %v4684_v53 = vunpack.c.l.bf16 %v4304_v30  ;;  %v4685_v2 = vunpack.c.h.bf16 %v4304_v30  ;;  %v4938_v5 = vmul.f32 0.010009766, %v4874_v38  ;;  %v4939_v29 = vmul.f32 0.010009766, %v4875_v59 }
 0x62a   :  { %v4780_v19 = vadd.f32 %v4720_v35, %v4684_v53  ;;  %v4781_v3 = vadd.f32 %v4720_v35, %v4685_v2  ;;  %v10420_v4 = vmax.f32 %v4874_v38, %v4938_v5  ;;  %v10422_v21 = vmax.f32 %v4875_v59, %v4939_v29 }
 0x62b   :  { %v4090_v1 = vpop.f32.mrf.mxu3  ;;  %v4722_v5 = vunpack.c.l.bf16 %v4618_v56 }
 0x62c   :  { %v4091_v17 = vadd.f32 %v4090_v1, %v4001_v22  ;;  %v5134_v33 = vpack.c.bf16 %v10420_v4, %v10416_v34  ;;  %v5135_v11 = vpack.c.bf16 %v10422_v21, %v10418_v61  ;;  %v4816_v32 = vpack.c.bf16 %v4781_v3, %v4780_v19 }
 0x62d   :  { %v4271_v7 = vpop.f32.mrf.mxu1  ;;  %v4857_v34 = vunpack.c.h.bf16 %v10336_v46 }
 0x62e   :  { %v4305_v42 = vpack.c.bf16 %v4269_v55, %v4091_v17  ;;  %v4876_v43 = vunpack.c.l.bf16 %v4816_v32  ;;  %v4877_v39 = vunpack.c.h.bf16 %v4816_v32  ;;  %v4272_v36 = vadd.f32 %v4271_v7, %v4182_v58  ;;  %v4006_v17 = vpop.f32.mrf.mxu2 }
 0x62f   :  { %v4921_v13 = vmul.f32 0.010009766, %v4857_v34 }
 0x630   :  { %v4686_v20 = vunpack.c.l.bf16 %v4305_v42  ;;  %v4687_v44 = vunpack.c.h.bf16 %v4305_v42  ;;  %v4940_v59 = vmul.f32 0.010009766, %v4876_v43  ;;  %v4941_v35 = vmul.f32 0.010009766, %v4877_v39 }
 0x631   :  { %v5081_v40 = vmax.f32 %v4857_v34, %v4921_v13 }
 0x632   :  { %v4782_v27 = vadd.f32 %v4721_v60, %v4686_v20  ;;  %v4783_v54 = vadd.f32 %v4721_v60, %v4687_v44  ;;  %v10432_v1 = vmax.f32 %v4876_v43, %v4940_v59  ;;  %v10434_v55 = vmax.f32 %v4877_v39, %v4941_v35  ;;  %v4184_v44 = vpop.f32.mrf.mxu0 }
 0x633   :  { %v4093_v22 = vpop.f32.mrf.mxu3 }
 0x634   :  { %v4817_v30 = vpack.c.bf16 %v4783_v54, %v4782_v27  ;;  %v4094_v38 = vadd.f32 %v4093_v22, %v4004_v18  ;;  %v11568_v18 = vld [vmem:[#allocation17_spill] sm:$0xff] }
 0x635   :  { %v4273_v62 = vpop.f32.mrf.mxu1  ;;  %v4627_v20 = vperm.slane %v11568_v18, %v9061_v28 }
 0x636   :  { %v4306_v48 = vpack.c.bf16 %v4272_v36, %v4094_v38  ;;  %v4878_v53 = vunpack.c.l.bf16 %v4817_v30  ;;  %v4879_v2 = vunpack.c.h.bf16 %v4817_v30  ;;  %v4274_v27 = vadd.f32 %v4273_v62, %v4184_v44  ;;  %v11570_v44 = vld [vmem:[#allocation26_spill] sm:$0xff] }
 0x637   :  { %v4723_v56 = vunpack.c.l.bf16 %v4627_v20 }
 0x638   :  { %v4688_v29 = vunpack.c.l.bf16 %v4306_v48  ;;  %v4689_v19 = vunpack.c.h.bf16 %v4306_v48  ;;  %v4942_v3 = vmul.f32 0.010009766, %v4878_v53  ;;  %v4943_v14 = vmul.f32 0.010009766, %v4879_v2 }
 0x63a   :  { %v4784_v32 = vadd.f32 %v4722_v5, %v4688_v29  ;;  %v4785_v42 = vadd.f32 %v4722_v5, %v4689_v19  ;;  %v10436_v7 = vmax.f32 %v4878_v53, %v4942_v3  ;;  %v10438_v60 = vmax.f32 %v4879_v2, %v4943_v14  ;;  %v7828_v53 = vld [vmem:[#allocation6] sm:$0xf]  ;;  %v8067_v2 = vld [vmem:[#allocation6 + $0x4] sm:$0xf0]  ;;  %v4514_v29 = vpop.permute.xlu1 %4513 }
 0x63b   :  { %v4095_v58 = vpop.f32.mrf.mxu3  ;;  %v7829_v5 = vor.u32 %v8067_v2, %v7828_v53  ;;  %v4066_v19 = vadd.f32 %v10334_v51, %v10317_v15  ;;  %v4244_v14 = vadd.f32 %v10332_v24, %v10319_v52  ;;  %v4519_v20 = vperm.slane %v4514_v29, %v9061_v28  ;;  %v8069_v53 = vld [vmem:[#allocation6 + $0x14] sm:$0xf0] }
 0x63c   :  { %v4096_v54 = vadd.f32 %v4095_v58, %v4006_v17  ;;  %v5136_v43 = vpack.c.bf16 %v10436_v7, %v10432_v1  ;;  %v5137_v39 = vpack.c.bf16 %v10438_v60, %v10434_v55  ;;  %v4818_v36 = vpack.c.bf16 %v4785_v42, %v4784_v32  ;;  %v11569_v32 = vld [vmem:[#allocation25_spill] sm:$0xff] }
 0x63d   :  { %5340 = vmatmul.bf16.vlgmr.msra.gmra.mxu2 %v7829_v5  ;;  %5518 = vmatmul.bf16.vlgmr.msra.gmra.mxu0 %v7829_v5  ;;  %v4061_v42 = vadd.f32 %v10326_v6, %v11569_v32  ;;  %v4295_v7 = vpack.c.bf16 %v4244_v14, %v4066_v19  ;;  %v4239_v15 = vadd.f32 %v10322_v12, %v11570_v44 }
 0x63e   :  { %v4307_v25 = vpack.c.bf16 %v4274_v27, %v4096_v54  ;;  %v4880_v38 = vunpack.c.l.bf16 %v4818_v36  ;;  %v4881_v59 = vunpack.c.h.bf16 %v4818_v36 }
 0x63f   :  { %v4293_v27 = vpack.c.bf16 %v4239_v15, %v4061_v42  ;;  %v4666_v54 = vunpack.c.l.bf16 %v4295_v7  ;;  %v4667_v36 = vunpack.c.h.bf16 %v4295_v7 }
 0x640   :  { %v4690_v22 = vunpack.c.l.bf16 %v4307_v25  ;;  %v4691_v30 = vunpack.c.h.bf16 %v4307_v25  ;;  %v4944_v1 = vmul.f32 0.010009766, %v4880_v38  ;;  %v4945_v17 = vmul.f32 0.010009766, %v4881_v59 }
 0x641   :  { %v4663_v2 = vunpack.c.h.bf16 %v4293_v27 }
 0x642   :  { %v4786_v35 = vadd.f32 %v4723_v56, %v4690_v22  ;;  %v4787_v48 = vadd.f32 %v4723_v56, %v4691_v30  ;;  %v5104_v51 = vmax.f32 %v4880_v38, %v4944_v1  ;;  %v5105_v52 = vmax.f32 %v4881_v59, %v4945_v17  ;;  %v4496_v22 = vpop.permute.xlu2 %4495  ;;  %v4487_v6 = vpop.permute.xlu1 %4486 }
 0x643   :  { %v4711_v30 = vunpack.c.l.bf16 %v4519_v20  ;;  %v4492_v12 = vperm.slane %v4487_v6, %v9061_v28  ;;  %v4662_v38 = vunpack.c.l.bf16 %v4293_v27  ;;  %v4856_v20 = vunpack.c.l.bf16 %v10336_v46  ;;  %v8075_v6 = vld [vmem:[#allocation6 + $0x44] sm:$0xf0] }
 0x644   :  { %v4819_v3 = vpack.c.bf16 %v4787_v48, %v4786_v35  ;;  %v4501_v35 = vperm.slane %v4496_v22, %v9061_v28  ;;  %v7836_v48 = vld [vmem:[#allocation6 + $0x10] sm:$0xf] }
 0x645   :  { %v4762_v59 = vadd.f32 %v4711_v30, %v4666_v54  ;;  %v4763_v5 = vadd.f32 %v4711_v30, %v4667_v36  ;;  %v7837_v29 = vor.u32 %v8069_v53, %v7836_v48  ;;  %v4708_v1 = vunpack.c.l.bf16 %v4492_v12  ;;  %v7860_v30 = vld [vmem:[#allocation6 + $0x40] sm:$0xf]  ;;  %v8070_v48 = vld [vmem:[#allocation6 + $0x24] sm:$0xf]  ;;  %v7846_v53 = vld [vmem:[#allocation6 + $0x28] sm:$0xf0] }
 0x646   :  { %v4882_v62 = vunpack.c.l.bf16 %v4819_v3  ;;  %v4883_v55 = vunpack.c.h.bf16 %v4819_v3  ;;  %v4709_v19 = vunpack.c.l.bf16 %v4501_v35  ;;  %v11571_v3 = vld [vmem:[#allocation27_spill] sm:$0xff]  ;;  %v4920_v8 = vmul.f32 0.010009766, %v4856_v20 }
 0x647   :  { %v4660_v14 = vunpack.c.l.bf16 %v11571_v3  ;;  %v4807_v32 = vpack.c.bf16 %v4763_v5, %v4762_v59  ;;  %v7861_v35 = vor.u32 %v8075_v6, %v7860_v30  ;;  %v7849_v12 = vor.u32 %v8070_v48, %v7846_v53  ;;  %v8072_v5 = vld [vmem:[#allocation6 + $0x34] sm:$0xf] }
 0x648   :  { %v4946_v60 = vmul.f32 0.010009766, %v4882_v62  ;;  %v4947_v18 = vmul.f32 0.010009766, %v4883_v55  ;;  %v4759_v17 = vadd.f32 %v4709_v19, %v4663_v2  ;;  %v5080_v10 = vmax.f32 %v4856_v20, %v4920_v8  ;;  %v8077_v2 = vld [vmem:[#allocation6 + $0x54] sm:$0xf0]  ;;  %v8083_v20 = vld [vmem:[#allocation6 + $0x84] sm:$0xf0] }
 0x649   :  { %v4756_v42 = vadd.f32 %v4708_v1, %v4660_v14  ;;  %v8079_v14 = vld [vmem:[#allocation6 + $0x64] sm:$0xf0]  ;;  %v8084_v6 = vld [vmem:[#allocation6 + $0x94] sm:$0xf] }
 0x64a   :  { %v5106_v58 = vmax.f32 %v4882_v62, %v4946_v60  ;;  %v5107_v24 = vmax.f32 %v4883_v55, %v4947_v18  ;;  %v4661_v62 = vunpack.c.h.bf16 %v11571_v3  ;;  %v4758_v55 = vadd.f32 %v4709_v19, %v4662_v38  ;;  %v7868_v38 = vld [vmem:[#allocation6 + $0x50] sm:$0xf]  ;;  %v7876_v3 = vld [vmem:[#allocation6 + $0x60] sm:$0xf] }
 0x64b   :  { %v4858_v18 = vunpack.c.l.bf16 %v4807_v32  ;;  %v7869_v59 = vor.u32 %v8077_v2, %v7868_v38 }
 0x64c   :  { %v5138_v25 = vpack.c.bf16 %v5106_v58, %v5104_v51  ;;  %v5139_v56 = vpack.c.bf16 %v5107_v24, %v5105_v52  ;;  %v4757_v7 = vadd.f32 %v4708_v1, %v4661_v62  ;;  %v4805_v60 = vpack.c.bf16 %v4759_v17, %v4758_v55  ;;  %v8074_v1 = vld [vmem:[#allocation6 + $0x44] sm:$0xf]  ;;  %v7862_v55 = vld [vmem:[#allocation6 + $0x48] sm:$0xf0] }
 0x64d   :  { %5345 = vmatmul.bf16.gmra.mxu2 %v7837_v29  ;;  %5523 = vmatmul.bf16.gmra.mxu0 %v7837_v29  ;;  %v4922_v4 = vmul.f32 0.010009766, %v4858_v18  ;;  %v7854_v29 = vld [vmem:[#allocation6 + $0x38] sm:$0xf0]  ;;  %v7877_v62 = vor.u32 %v8079_v14, %v7876_v3  ;;  %v7865_v17 = vor.u32 %v8074_v1, %v7862_v55 }
 0x64e   :  { %5421 = vmatpush.bf16.msra.mxu3 %v5138_v25  ;;  %5599 = vmatpush.bf16.msra.mxu1 %v5139_v56  ;;  %v4854_v61 = vunpack.c.l.bf16 %v4805_v60  ;;  %v4855_v21 = vunpack.c.h.bf16 %v4805_v60  ;;  %v8068_v25 = vld [vmem:[#allocation6 + $0x14] sm:$0xf]  ;;  %v7838_v56 = vld [vmem:[#allocation6 + $0x18] sm:$0xf0]  ;;  %v7857_v19 = vor.u32 %v8072_v5, %v7854_v29 }
 0x64f   :  { %v7841_v22 = vor.u32 %v8068_v25, %v7838_v56  ;;  %v8076_v60 = vld [vmem:[#allocation6 + $0x54] sm:$0xf]  ;;  %v7916_v56 = vld [vmem:[#allocation6 + $0xb0] sm:$0xf] }
 0x650   :  { %v4918_v44 = vmul.f32 0.010009766, %v4854_v61  ;;  %v4919_v15 = vmul.f32 0.010009766, %v4855_v21 }
 0x652   :  { %5422 = vmatpush.bf16.msra.mxu3 %v5136_v43  ;;  %5600 = vmatpush.bf16.msra.mxu1 %v5137_v39  ;;  %v4859_v43 = vunpack.c.h.bf16 %v4807_v32  ;;  %v4804_v39 = vpack.c.bf16 %v4757_v7, %v4756_v42  ;;  %v5078_v58 = vmax.f32 %v4854_v61, %v4918_v44  ;;  %v5079_v52 = vmax.f32 %v4855_v21, %v4919_v15  ;;  %v7884_v32 = vld [vmem:[#allocation6 + $0x70] sm:$0xf]  ;;  %v8081_v42 = vld [vmem:[#allocation6 + $0x74] sm:$0xf0] }
 0x653   :  { %v7885_v7 = vor.u32 %v8081_v42, %v7884_v32  ;;  %v7924_v32 = vld [vmem:[#allocation6 + $0xc0] sm:$0xf]  ;;  %v8091_v42 = vld [vmem:[#allocation6 + $0xc4] sm:$0xf0] }
 0x654   :  { %v4852_v23 = vunpack.c.l.bf16 %v4804_v39  ;;  %v4853_v31 = vunpack.c.h.bf16 %v4804_v39  ;;  %v7892_v39 = vld [vmem:[#allocation6 + $0x80] sm:$0xf] }
 0x655   :  { %v7893_v34 = vor.u32 %v8083_v20, %v7892_v39  ;;  %v7910_v39 = vld [vmem:[#allocation6 + $0xa8] sm:$0xf0] }
 0x656   :  { %5423 = vmatpush.bf16.msra.mxu3 %v5134_v33  ;;  %5601 = vmatpush.bf16.msra.mxu1 %v5135_v11  ;;  %v4923_v33 = vmul.f32 0.010009766, %v4859_v43  ;;  %v5082_v11 = vmax.f32 %v4858_v18, %v4922_v4  ;;  %v4916_v37 = vmul.f32 0.010009766, %v4852_v23  ;;  %v4917_v47 = vmul.f32 0.010009766, %v4853_v31  ;;  %v7870_v18 = vld [vmem:[#allocation6 + $0x58] sm:$0xf0] }
 0x657   :  { %v8078_v4 = vld [vmem:[#allocation6 + $0x64] sm:$0xf] }
 0x658   :  { %v5083_v46 = vmax.f32 %v4859_v43, %v4923_v33  ;;  %v5076_v24 = vmax.f32 %v4852_v23, %v4916_v37  ;;  %v5077_v27 = vmax.f32 %v4853_v31, %v4917_v47  ;;  %v7873_v43 = vor.u32 %v8076_v60, %v7870_v18  ;;  %v7878_v33 = vld [vmem:[#allocation6 + $0x68] sm:$0xf0]  ;;  %v7900_v31 = vld [vmem:[#allocation6 + $0x90] sm:$0xf]  ;;  %v7908_v37 = vld [vmem:[#allocation6 + $0xa0] sm:$0xf]  ;;  %v10497_v60 = vpop.permute.xlu0 %5889  ;;  %v10499_v18 = vpop.permute.xlu2 %6033 }
 0x659   :  { %v7881_v8 = vor.u32 %v8078_v4, %v7878_v33  ;;  %v8087_v47 = vld [vmem:[#allocation6 + $0xa4] sm:$0xf0]  ;;  %11574 = vst [vmem:[#allocation24_spill] sm:$0xff] %v10499_v18 }
 0x65a   :  { %5424 = vmatpush.bf16.msra.mxu3 %v5132_v26  ;;  %5602 = vmatpush.bf16.msra.mxu1 %v5133_v57  ;;  %v7844_v26 = vld [vmem:[#allocation6 + $0x20] sm:$0xf]  ;;  %v8071_v57 = vld [vmem:[#allocation6 + $0x24] sm:$0xf0]  ;;  %v5125_v54 = vpack.c.bf16 %v5079_v52, %v5077_v27 }
 0x65b   :  { %v7845_v51 = vor.u32 %v8071_v57, %v7844_v26  ;;  %v8085_v26 = vld [vmem:[#allocation6 + $0x94] sm:$0xf0] }
 0x65c   :  { %v7901_v57 = vor.u32 %v8085_v26, %v7900_v31 }
 0x65d   :  { %5350 = vmatmul.bf16.gmra.mxu2 %v7845_v51  ;;  %5528 = vmatmul.bf16.gmra.mxu0 %v7845_v51 }
 0x65e   :  { %5425 = vmatpush.bf16.msra.mxu3 %v5130_v50  ;;  %5603 = vmatpush.bf16.msra.mxu1 %v5131_v0  ;;  %v5126_v50 = vpack.c.bf16 %v5082_v11, %v5080_v10  ;;  %v5127_v0 = vpack.c.bf16 %v5083_v46, %v5081_v40  ;;  %v8080_v11 = vld [vmem:[#allocation6 + $0x74] sm:$0xf]  ;;  %v7886_v46 = vld [vmem:[#allocation6 + $0x78] sm:$0xf0] }
 0x65f   :  { %v7889_v15 = vor.u32 %v8080_v11, %v7886_v46 }
 0x660   :  { %v10507_v31 = vpop.permute.xlu0 %5871  ;;  %v10509_v26 = vpop.permute.xlu2 %5862 }
 0x662   :  { %5426 = vmatpush.bf16.msra.mxu3 %v5128_v49  ;;  %5604 = vmatpush.bf16.msra.mxu1 %v5129_v16  ;;  %v5124_v49 = vpack.c.bf16 %v5078_v58, %v5076_v24  ;;  %v8073_v16 = vld [vmem:[#allocation6 + $0x34] sm:$0xf0]  ;;  %v7894_v58 = vld [vmem:[#allocation6 + $0x88] sm:$0xf0] }
 0x663   :  { %v7853_v36 = vor.u32 %v8073_v16, %v7852_v63 }
 0x666   :  { %5427 = vmatpush.bf16.msra.mxu3 %v5126_v50  ;;  %5605 = vmatpush.bf16.msra.mxu1 %v5127_v0  ;;  %v7909_v50 = vor.u32 %v8087_v47, %v7908_v37  ;;  %v8082_v0 = vld [vmem:[#allocation6 + $0x84] sm:$0xf]  ;;  %v8093_v37 = vld [vmem:[#allocation6 + $0xd4] sm:$0xf0] }
 0x667   :  { %v7897_v24 = vor.u32 %v8082_v0, %v7894_v58  ;;  %v7918_v0 = vld [vmem:[#allocation6 + $0xb8] sm:$0xf0] }
 0x66a   :  { %5428 = vmatpush.bf16.msra.mxu3 %v5124_v49  ;;  %5606 = vmatpush.bf16.msra.mxu1 %v5125_v54 }
 0x66d   :  { %5429 = vmatmul.bf16.vlgmr.msra.gmra.mxu3 %v7833_v41  ;;  %5607 = vmatmul.bf16.vlgmr.msra.gmra.mxu1 %v7833_v41 }
 0x66e   :  { %5355 = vmatmul.bf16.gmra.mxu2 %v7853_v36  ;;  %5533 = vmatmul.bf16.gmra.mxu0 %v7853_v36 }
 0x67d   :  { %5434 = vmatmul.bf16.gmra.mxu3 %v7841_v22  ;;  %5612 = vmatmul.bf16.gmra.mxu1 %v7841_v22  ;;  %v8089_v22 = vld [vmem:[#allocation6 + $0xb4] sm:$0xf0] }
 0x67e   :  { %5360 = vmatmul.bf16.gmra.mxu2 %v7861_v35  ;;  %5538 = vmatmul.bf16.gmra.mxu0 %v7861_v35  ;;  %v7917_v30 = vor.u32 %v8089_v22, %v7916_v56  ;;  %v7902_v35 = vld [vmem:[#allocation6 + $0x98] sm:$0xf0] }
 0x67f   :  { %v7905_v38 = vor.u32 %v8084_v6, %v7902_v35 }
 0x68d   :  { %5439 = vmatmul.bf16.gmra.mxu3 %v7849_v12  ;;  %5617 = vmatmul.bf16.gmra.mxu1 %v7849_v12 }
 0x68e   :  { %5365 = vmatmul.bf16.gmra.mxu2 %v7869_v59  ;;  %5543 = vmatmul.bf16.gmra.mxu0 %v7869_v59 }
 0x69d   :  { %5444 = vmatmul.bf16.gmra.mxu3 %v7857_v19  ;;  %5622 = vmatmul.bf16.gmra.mxu1 %v7857_v19 }
 0x69e   :  { %5370 = vmatmul.bf16.gmra.mxu2 %v7877_v62  ;;  %5548 = vmatmul.bf16.gmra.mxu0 %v7877_v62 }
 0x6ad   :  { %5449 = vmatmul.bf16.gmra.mxu3 %v7865_v17  ;;  %5627 = vmatmul.bf16.gmra.mxu1 %v7865_v17 }
 0x6ae   :  { %5375 = vmatmul.bf16.gmra.mxu2 %v7885_v7  ;;  %5553 = vmatmul.bf16.gmra.mxu0 %v7885_v7  ;;  %v7925_v7 = vor.u32 %v8091_v42, %v7924_v32 }
 0x6ba   :  { %v5519_v61 = vpop.f32.mrf.mxu0 }
 0x6bd   :  { %5454 = vmatmul.bf16.gmra.mxu3 %v7873_v43  ;;  %5632 = vmatmul.bf16.gmra.mxu1 %v7873_v43  ;;  %v8086_v43 = vld [vmem:[#allocation6 + $0xa4] sm:$0xf] }
 0x6be   :  { %5380 = vmatmul.bf16.gmra.mxu2 %v7893_v34  ;;  %5558 = vmatmul.bf16.gmra.mxu0 %v7893_v34  ;;  %v7913_v33 = vor.u32 %v8086_v43, %v7910_v39 }
 0x6c0   :  { %v5341_v21 = vpop.f32.mrf.mxu2 }
 0x6c2   :  { %v5521_v23 = vpop.f32.mrf.mxu0 }
 0x6c8   :  { %v5343_v13 = vpop.f32.mrf.mxu2 }
 0x6ca   :  { %v5524_v51 = vpop.f32.mrf.mxu0 }
 0x6cd   :  { %5459 = vmatmul.bf16.gmra.mxu3 %v7881_v8  ;;  %5637 = vmatmul.bf16.gmra.mxu1 %v7881_v8 }
 0x6ce   :  { %5385 = vmatmul.bf16.gmra.mxu2 %v7901_v57  ;;  %5563 = vmatmul.bf16.gmra.mxu0 %v7901_v57 }
 0x6d0   :  { %v5346_v44 = vpop.f32.mrf.mxu2 }
 0x6d2   :  { %v5526_v40 = vpop.f32.mrf.mxu0 }
 0x6d8   :  { %v5348_v10 = vpop.f32.mrf.mxu2 }
 0x6da   :  { %v5529_v27 = vpop.f32.mrf.mxu0 }
 0x6dd   :  { %5464 = vmatmul.bf16.gmra.mxu3 %v7889_v15  ;;  %5642 = vmatmul.bf16.gmra.mxu1 %v7889_v15 }
 0x6de   :  { %5390 = vmatmul.bf16.gmra.mxu2 %v7909_v50  ;;  %5568 = vmatmul.bf16.gmra.mxu0 %v7909_v50  ;;  %v8088_v50 = vld [vmem:[#allocation6 + $0xb4] sm:$0xf] }
 0x6e0   :  { %v5351_v52 = vpop.f32.mrf.mxu2 }
 0x6e2   :  { %v5531_v63 = vpop.f32.mrf.mxu0 }
 0x6e8   :  { %v10485_v54 = vpop.f32.mrf.mxu2 }
 0x6ea   :  { %v5608_v45 = vpop.f32.mrf.mxu1 }
 0x6eb   :  { %v5609_v9 = vadd.f32 %v5608_v45, %v5519_v61  ;;  %v5534_v2 = vpop.f32.mrf.mxu0  ;;  %v10521_v45 = vpop.permute.xlu0 %6015 }
 0x6ec   :  { %11577 = vst [vmem:[#allocation21_spill] sm:$0xff] %v10521_v45 }
 0x6ed   :  { %5469 = vmatmul.bf16.gmra.mxu3 %v7897_v24  ;;  %5647 = vmatmul.bf16.gmra.mxu1 %v7897_v24 }
 0x6ee   :  { %5395 = vmatmul.bf16.gmra.mxu2 %v7917_v30  ;;  %5573 = vmatmul.bf16.gmra.mxu0 %v7917_v30 }
 0x6f0   :  { %v5430_v49 = vpop.f32.mrf.mxu3 }
 0x6f1   :  { %v5431_v41 = vadd.f32 %v5430_v49, %v5341_v21  ;;  %v10489_v53 = vpop.f32.mrf.mxu2 }
 0x6f2   :  { %v5610_v16 = vpop.f32.mrf.mxu1 }
 0x6f3   :  { %v10487_v36 = vpack.c.bf16 %v5609_v9, %v5431_v41  ;;  %v5611_v25 = vadd.f32 %v5610_v16, %v5521_v23  ;;  %v5536_v62 = vpop.f32.mrf.mxu0  ;;  %v10505_v23 = vpop.permute.xlu1 %5880  ;;  %v7921_v9 = vor.u32 %v8088_v50, %v7918_v0 }
 0x6f4   :  { %v10526_v41 = vpop.permute.xlu2 %6006 }
 0x6f5   :  { %11572 = vst [vmem:[#allocation20_spill] sm:$0xff] %v10487_v36 }
 0x6f6   :  { %11578 = vst [vmem:[#allocation13_spill] sm:$0xff] %v10526_v41  ;;  %v5877_v41 = vperm.slane %v10507_v31, %v9061_v28 }
 0x6f8   :  { %v5432_v48 = vpop.f32.mrf.mxu3 }
 0x6f9   :  { %v5433_v12 = vadd.f32 %v5432_v48, %v5343_v13  ;;  %v10493_v3 = vpop.f32.mrf.mxu2  ;;  %v10537_v48 = vpop.permute.xlu0 %5844 }
 0x6fa   :  { %v5613_v59 = vpop.f32.mrf.mxu1 }
 0x6fb   :  { %v10491_v5 = vpack.c.bf16 %v5611_v25, %v5433_v12  ;;  %v5614_v29 = vadd.f32 %v5613_v59, %v5524_v51  ;;  %v5539_v61 = vpop.f32.mrf.mxu0  ;;  %v10517_v58 = vpop.permute.xlu1 %6024  ;;  %v7940_v59 = vld [vmem:[#allocation6 + $0xe0] sm:$0xf] }
 0x6fc   :  { %11576 = vst [vmem:[#allocation22_spill] sm:$0xff] %v10517_v58  ;;  %v5868_v58 = vperm.slane %v10509_v26, %v9061_v28 }
 0x6fd   :  { %5474 = vmatmul.bf16.gmra.mxu3 %v7905_v38  ;;  %5652 = vmatmul.bf16.gmra.mxu1 %v7905_v38 }
 0x6fe   :  { %5400 = vmatmul.bf16.gmra.mxu2 %v7925_v7  ;;  %5578 = vmatmul.bf16.gmra.mxu0 %v7925_v7 }
 0x700   :  { %v5435_v19 = vpop.f32.mrf.mxu3 }
 0x701   :  { %v5436_v14 = vadd.f32 %v5435_v19, %v5346_v44  ;;  %v10501_v34 = vpop.f32.mrf.mxu2 }
 0x702   :  { %v5615_v1 = vpop.f32.mrf.mxu1 }
 0x703   :  { %v10495_v55 = vpack.c.bf16 %v5614_v29, %v5436_v14  ;;  %v5616_v17 = vadd.f32 %v5615_v1, %v5526_v40  ;;  %v10513_v44 = vpop.f32.mrf.mxu0  ;;  %v7932_v40 = vld [vmem:[#allocation6 + $0xd0] sm:$0xf]  ;;  %v10535_v35 = vpop.permute.xlu1 %5853  ;;  %v8095_v29 = vld [vmem:[#allocation6 + $0xe4] sm:$0xf0]  ;;  %v8090_v14 = vld [vmem:[#allocation6 + $0xc4] sm:$0xf] }
 0x704   :  { %v7933_v47 = vor.u32 %v8093_v37, %v7932_v40  ;;  %v7941_v19 = vor.u32 %v8095_v29, %v7940_v59  ;;  %v7926_v1 = vld [vmem:[#allocation6 + $0xc8] sm:$0xf0]  ;;  %v8092_v40 = vld [vmem:[#allocation6 + $0xd4] sm:$0xf]  ;;  %v7934_v37 = vld [vmem:[#allocation6 + $0xd8] sm:$0xf0]  ;;  %v5859_v18 = vperm.slane %v10535_v35, %v9061_v28 }
 0x705   :  { %11573 = vst [vmem:[#allocation23_spill] sm:$0xff] %v10495_v55  ;;  %v7929_v32 = vor.u32 %v8090_v14, %v7926_v1  ;;  %v8094_v59 = vld [vmem:[#allocation6 + $0xe4] sm:$0xf]  ;;  %v7942_v29 = vld [vmem:[#allocation6 + $0xe8] sm:$0xf0] }
 0x708   :  { %v5437_v20 = vpop.f32.mrf.mxu3 }
 0x709   :  { %v5438_v4 = vadd.f32 %v5437_v20, %v5348_v10  ;;  %v10511_v11 = vpop.f32.mrf.mxu2 }
 0x70a   :  { %v5618_v21 = vpop.f32.mrf.mxu1 }
 0x70b   :  { %v10503_v8 = vpack.c.bf16 %v5616_v17, %v5438_v4  ;;  %v5619_v13 = vadd.f32 %v5618_v21, %v5529_v27  ;;  %v10524_v49 = vpop.f32.mrf.mxu0  ;;  %v10552_v20 = vpop.permute.xlu1 %5997 }
 0x70c   :  { %11579 = vst [vmem:[#allocation16_spill] sm:$0xff] %v10552_v20  ;;  %v10554_v4 = vpop.permute.xlu0 %5988  ;;  %v8096_v20 = vld [vmem:[#allocation6 + $0xf4] sm:$0xf] }
 0x70d   :  { %5479 = vmatmul.bf16.gmra.mxu3 %v7913_v33  ;;  %5657 = vmatmul.bf16.gmra.mxu1 %v7913_v33  ;;  %11580 = vst [vmem:[#allocation18_spill] sm:$0xff] %v10554_v4 }
 0x70e   :  { %5405 = vmatmul.bf16.gmra.mxu2 %v7933_v47  ;;  %5583 = vmatmul.bf16.gmra.mxu0 %v7933_v47 }
 0x710   :  { %v5440_v57 = vpop.f32.mrf.mxu3 }
 0x711   :  { %v5441_v46 = vadd.f32 %v5440_v57, %v5351_v52  ;;  %v10519_v27 = vpop.f32.mrf.mxu2  ;;  %v7948_v57 = vld [vmem:[#allocation6 + $0xf0] sm:$0xf] }
 0x712   :  { %v5620_v15 = vpop.f32.mrf.mxu1 }
 0x713   :  { %v10515_v51 = vpack.c.bf16 %v5619_v13, %v5441_v46  ;;  %v5621_v10 = vadd.f32 %v5620_v15, %v5531_v63  ;;  %v10533_v6 = vpop.f32.mrf.mxu0  ;;  %v8097_v46 = vld [vmem:[#allocation6 + $0xf4] sm:$0xf0] }
 0x714   :  { %v10568_v47 = vpop.permute.xlu0 %5817 }
 0x715   :  { %11575 = vst [vmem:[#allocation19_spill] sm:$0xff] %v10515_v51  ;;  %v5823_v35 = vperm.slane %v10568_v47, %v9061_v28 }
 0x718   :  { %v5442_v24 = vpop.f32.mrf.mxu3 }
 0x719   :  { %v5443_v52 = vadd.f32 %v5442_v24, %v10485_v54  ;;  %v10530_v22 = vpop.f32.mrf.mxu2  ;;  %v7937_v24 = vor.u32 %v8092_v40, %v7934_v37 }
 0x71a   :  { %v5623_v63 = vpop.f32.mrf.mxu1 }
 0x71b   :  { %v10528_v16 = vpack.c.bf16 %v5621_v10, %v5443_v52  ;;  %v5624_v25 = vadd.f32 %v5623_v63, %v5534_v2  ;;  %v10541_v2 = vpop.permute.xlu2 %5835  ;;  %v10546_v43 = vpop.f32.mrf.mxu0 }
 0x71c   :  { %v10566_v10 = vpop.permute.xlu1 %5826 }
 0x71d   :  { %5484 = vmatmul.bf16.gmra.mxu3 %v7921_v9  ;;  %5662 = vmatmul.bf16.gmra.mxu1 %v7921_v9  ;;  %v5832_v26 = vperm.slane %v10566_v10, %v9061_v28 }
 0x71e   :  { %5410 = vmatmul.bf16.gmra.mxu2 %v7941_v19  ;;  %5588 = vmatmul.bf16.gmra.mxu0 %v7941_v19 }
 0x71f   :  { %v10647_v55 = vunpack.c.l.bf16 %v5832_v26 }
 0x720   :  { %v5445_v56 = vpop.f32.mrf.mxu3 }
 0x721   :  { %v5446_v30 = vadd.f32 %v5445_v56, %v10489_v53  ;;  %v10544_v42 = vpop.f32.mrf.mxu2 }
 0x722   :  { %v5625_v54 = vpop.f32.mrf.mxu1 }
 0x723   :  { %v10539_v12 = vpack.c.bf16 %v5624_v25, %v5446_v30  ;;  %v5626_v38 = vadd.f32 %v5625_v54, %v5536_v62  ;;  %v10556_v33 = vpop.permute.xlu2 %5979  ;;  %v10564_v15 = vpop.f32.mrf.mxu0 }
 0x724   :  { %11581 = vst [vmem:[#allocation15_spill] sm:$0xff] %v10556_v33  ;;  %v10578_v25 = vpop.permute.xlu1 %5970  ;;  %v10582_v30 = vpop.permute.xlu0 %5961 }
 0x725   :  { %11582 = vst [vmem:[#allocation14_spill] sm:$0xff] %v10578_v25  ;;  %v5850_v25 = vperm.slane %v10537_v48, %v9061_v28  ;;  %v10630_v48 = vunpack.c.l.bf16 %v5877_v41 }
 0x726   :  { %11583 = vst [vmem:[#allocation17_spill] sm:$0xff] %v10582_v30 }
 0x728   :  { %v5447_v53 = vpop.f32.mrf.mxu3 }
 0x729   :  { %v5448_v17 = vadd.f32 %v5447_v53, %v10493_v3  ;;  %v10562_v13 = vpop.f32.mrf.mxu2  ;;  %v7945_v53 = vor.u32 %v8094_v59, %v7942_v29  ;;  %v7950_v59 = vld [vmem:[#allocation6 + $0xf8] sm:$0xf0]  ;;  %v5895_v29 = vperm.slane %v10497_v60, %v9061_v28  ;;  %v5841_v60 = vperm.slane %v10541_v2, %v9061_v28 }
 0x72a   :  { %v5628_v7 = vpop.f32.mrf.mxu1  ;;  %v7953_v30 = vor.u32 %v8096_v20, %v7950_v59  ;;  %v10632_v20 = vunpack.c.l.bf16 %v5868_v58  ;;  %v10634_v2 = vunpack.c.l.bf16 %v5859_v18  ;;  %v10636_v59 = vunpack.c.l.bf16 %v5850_v25 }
 0x72b   :  { %v10548_v39 = vpack.c.bf16 %v5626_v38, %v5448_v17  ;;  %v10550_v62 = vadd.f32 %v5628_v7, %v5539_v61  ;;  %v7949_v61 = vor.u32 %v8097_v46, %v7948_v57  ;;  %v10570_v50 = vpop.permute.xlu2 %5808  ;;  %v5554_v63 = vpop.f32.mrf.mxu0 }
 0x72c   :  { %v5800_v17 = vpop.permute.xlu1 %5799  ;;  %v5791_v7 = vpop.permute.xlu0 %5790  ;;  %v5814_v10 = vperm.slane %v10570_v50, %v9061_v28 }
 0x72d   :  { %5489 = vmatmul.bf16.gmra.mxu3 %v7929_v32  ;;  %5667 = vmatmul.bf16.gmra.mxu1 %v7929_v32  ;;  %v5796_v47 = vperm.slane %v5791_v7, %v9061_v28 }
 0x72e   :  { %5415 = vmatmul.bf16.gmra.mxu2 %v7949_v61  ;;  %5593 = vmatmul.bf16.gmra.mxu0 %v7949_v61 }
 0x730   :  { %v10558_v21 = vpop.f32.mrf.mxu3 }
 0x731   :  { %v10576_v9 = vpop.f32.mrf.mxu2 }
 0x732   :  { %v10560_v3 = vpop.f32.mrf.mxu1 }
 0x733   :  { %v10584_v54 = vpop.permute.xlu2 %5952  ;;  %v10592_v1 = vpop.f32.mrf.mxu0 }
 0x734   :  { %11584 = vst [vmem:[#allocation25_spill] sm:$0xff] %v10584_v54  ;;  %v10600_v33 = vpop.permute.xlu0 %5934 }
 0x735   :  { %11586 = vst [vmem:[#allocation27_spill] sm:$0xff] %v10600_v33 }
 0x738   :  { %v10572_v0 = vpop.f32.mrf.mxu3 }
 0x739   :  { %v10588_v19 = vpop.f32.mrf.mxu2 }
 0x73a   :  { %v10574_v52 = vpop.f32.mrf.mxu1 }
 0x73b   :  { %v5782_v57 = vpop.permute.xlu2 %5781  ;;  %v10596_v37 = vpop.f32.mrf.mxu0 }
 0x73c   :  { %v5787_v41 = vperm.slane %v5782_v57, %v9061_v28  ;;  %v5764_v18 = vpop.permute.xlu0 %5763 }
 0x73d   :  { %5494 = vmatmul.bf16.gmra.mxu3 %v7937_v24  ;;  %5672 = vmatmul.bf16.gmra.mxu1 %v7937_v24  ;;  %v10598_v24 = vpop.permute.xlu1 %5943  ;;  %v5769_v7 = vperm.slane %v5764_v18, %v9061_v28 }
 0x73e   :  { %11585 = vst [vmem:[#allocation26_spill] sm:$0xff] %v10598_v24 }
 0x740   :  { %v10580_v56 = vpop.f32.mrf.mxu3 }
 0x741   :  { %v10594_v61 = vpop.f32.mrf.mxu2 }
 0x742   :  { %v10586_v38 = vpop.f32.mrf.mxu1 }
 0x743   :  { %v10602_v4 = vpop.permute.xlu2 %5925  ;;  %v10628_v33 = vpop.f32.mrf.mxu0 }
 0x744   :  { %11587 = vst [vmem:[#allocation28_spill] sm:$0xff] %v10602_v4 }
 0x745   :  { %v5773_v4 = vpop.permute.xlu1 %5772 }
 0x746   :  { %v5778_v58 = vperm.slane %v5773_v4, %v9061_v28 }
 0x748   :  { %v10590_v14 = vpop.f32.mrf.mxu3 }
 0x749   :  { %v10618_v24 = vpop.f32.mrf.mxu2 }
 0x74a   :  { %v5638_v32 = vpop.f32.mrf.mxu1  ;;  %11588 = vst [vmem:[#allocation29_spill] sm:$0xff] %v10618_v24 }
 0x74b   :  { %v5639_v50 = vadd.f32 %v5638_v32, %v10546_v43  ;;  %v5458_v43 = vadd.f32 %v10590_v14, %v10530_v22  ;;  %v10667_v32 = vunpack.c.l.bf16 %v5778_v58 }
 0x74d   :  { %5499 = vmatmul.bf16.gmra.mxu3 %v7945_v53  ;;  %5677 = vmatmul.bf16.gmra.mxu1 %v7945_v53  ;;  %v5886_v53 = vperm.slane %v10505_v23, %v9061_v28  ;;  %v10620_v23 = vunpack.c.l.bf16 %v5895_v29  ;;  %v10638_v29 = vunpack.c.l.bf16 %v5841_v60  ;;  %v5755_v60 = vpop.permute.xlu2 %5754 }
 0x74e   :  { %v5760_v57 = vperm.slane %v5755_v60, %v9061_v28 }
 0x74f   :  { %v10622_v31 = vunpack.c.l.bf16 %v5886_v53  ;;  %v5805_v53 = vperm.slane %v5800_v17, %v9061_v28 }
 0x750   :  { %v5460_v46 = vpop.f32.mrf.mxu3  ;;  %v10677_v22 = vunpack.c.l.bf16 %v5760_v57 }
 0x751   :  { %v5461_v17 = vadd.f32 %v5460_v46, %v10544_v42  ;;  %v10665_v42 = vunpack.c.l.bf16 %v5787_v41  ;;  %v5631_v41 = vadd.f32 %v10560_v3, %v10513_v44 }
 0x752   :  { %v5640_v40 = vpop.f32.mrf.mxu1 }
 0x753   :  { %v5641_v4 = vadd.f32 %v5640_v40, %v10564_v15  ;;  %v5634_v15 = vadd.f32 %v10574_v52, %v10524_v49  ;;  %v5636_v40 = vadd.f32 %v10586_v38, %v10533_v6  ;;  %v5453_v49 = vadd.f32 %v10572_v0, %v10511_v11  ;;  %v10685_v52 = vpop.f32.mrf.mxu0 }
 0x754   :  { %v6047_v6 = vunpack.c.h.bf16 %v10503_v8 }
 0x758   :  { %v5462_v45 = vpop.f32.mrf.mxu3 }
 0x759   :  { %v5463_v25 = vadd.f32 %v5462_v45, %v10562_v13  ;;  %v10657_v45 = vunpack.c.l.bf16 %v5814_v10  ;;  %v10659_v13 = vunpack.c.l.bf16 %v5805_v53  ;;  %v10679_v53 = vpop.f32.mrf.mxu2 }
 0x75a   :  { %v5643_v54 = vpop.f32.mrf.mxu1 }
 0x75b   :  { %v5644_v36 = vadd.f32 %v5643_v54, %v5554_v63  ;;  %v10661_v63 = vunpack.c.l.bf16 %v5796_v47  ;;  %v5701_v46 = vpack.c.bf16 %v5641_v4, %v5463_v25 }
 0x75d   :  { %5504 = vmatmul.bf16.gmra.mxu3 %v7953_v30  ;;  %5682 = vmatmul.bf16.gmra.mxu1 %v7953_v30  ;;  %v10649_v30 = vunpack.c.l.bf16 %v5823_v35  ;;  %v10675_v35 = vunpack.c.l.bf16 %v5769_v7  ;;  %v6066_v38 = vunpack.c.l.bf16 %v5701_v46  ;;  %v6067_v47 = vunpack.c.h.bf16 %v5701_v46 }
 0x75e   :  { %v6050_v7 = vunpack.c.l.bf16 %v10528_v16 }
 0x75f   :  { %v6162_v44 = vadd.f32 %v10630_v48, %v6066_v38  ;;  %v6163_v3 = vadd.f32 %v10630_v48, %v6067_v47 }
 0x760   :  { %v5465_v24 = vpop.f32.mrf.mxu3 }
 0x761   :  { %v5466_v51 = vadd.f32 %v5465_v24, %v10576_v9  ;;  %v5456_v9 = vadd.f32 %v10580_v56, %v10519_v27  ;;  %v5700_v24 = vpack.c.bf16 %v5639_v50, %v5461_v17  ;;  %v5699_v27 = vpack.c.bf16 %v5636_v40, %v5458_v43 }
 0x762   :  { %v5645_v54 = vpop.f32.mrf.mxu1  ;;  %v5451_v56 = vadd.f32 %v10558_v21, %v10501_v34  ;;  %v5697_v34 = vpack.c.bf16 %v5631_v41, %v5453_v49 }
 0x763   :  { %v5702_v26 = vpack.c.bf16 %v5644_v36, %v5466_v51  ;;  %v6042_v36 = vunpack.c.l.bf16 %v10491_v5  ;;  %v6046_v51 = vunpack.c.l.bf16 %v10503_v8  ;;  %v5698_v58 = vpack.c.bf16 %v5634_v15, %v5456_v9 }
 0x764   :  { %v6064_v18 = vunpack.c.l.bf16 %v5700_v24  ;;  %v6065_v25 = vunpack.c.h.bf16 %v5700_v24  ;;  %v5646_v0 = vadd.f32 %v5645_v54, %v10592_v1  ;;  %v6062_v21 = vunpack.c.l.bf16 %v5699_v27 }
 0x765   :  { %v6068_v14 = vunpack.c.l.bf16 %v5702_v26  ;;  %v6069_v10 = vunpack.c.h.bf16 %v5702_v26  ;;  %v6063_v57 = vunpack.c.h.bf16 %v5699_v27  ;;  %v5696_v26 = vpack.c.bf16 %v10550_v62, %v5451_v56  ;;  %v10712_v56 = vpop.f32.mrf.mxu2 }
 0x766   :  { %v6061_v15 = vunpack.c.h.bf16 %v5698_v58  ;;  %v6160_v1 = vadd.f32 %v10632_v20, %v6064_v18  ;;  %v6058_v24 = vunpack.c.l.bf16 %v5697_v34  ;;  %v10710_v27 = vpack.c.bf16 %v6163_v3, %v6162_v44  ;;  %v10716_v18 = vpop.f32.mrf.mxu0 }
 0x767   :  { %v6164_v50 = vadd.f32 %v10622_v31, %v6068_v14  ;;  %v6165_v11 = vadd.f32 %v10622_v31, %v6069_v10  ;;  %v6060_v31 = vunpack.c.l.bf16 %v5698_v58  ;;  %v6059_v14 = vunpack.c.h.bf16 %v5697_v34 }
 0x768   :  { %v5467_v60 = vpop.f32.mrf.mxu3  ;;  %v6158_v10 = vadd.f32 %v10634_v2, %v6062_v21  ;;  %v6159_v48 = vadd.f32 %v10634_v2, %v6063_v57  ;;  %v6057_v38 = vunpack.c.h.bf16 %v5696_v26  ;;  %v6157_v41 = vadd.f32 %v10636_v59, %v6061_v15 }
 0x769   :  { %v5468_v17 = vadd.f32 %v5467_v60, %v10588_v19  ;;  %v6161_v19 = vadd.f32 %v10632_v20, %v6065_v25  ;;  %v10703_v40 = vpack.c.bf16 %v6165_v11, %v6164_v50  ;;  %v6056_v20 = vunpack.c.l.bf16 %v5696_v26 }
 0x76a   :  { %v5648_v4 = vpop.f32.mrf.mxu1  ;;  %v6156_v47 = vadd.f32 %v10636_v59, %v6060_v31  ;;  %v6055_v50 = vunpack.c.h.bf16 %v10548_v39  ;;  %v6154_v11 = vadd.f32 %v10638_v29, %v6058_v24  ;;  %v10727_v34 = vpack.c.bf16 %v6159_v48, %v6158_v10 }
 0x76b   :  { %v5703_v43 = vpack.c.bf16 %v5646_v0, %v5468_v17  ;;  %v5649_v46 = vadd.f32 %v5648_v4, %v10596_v37  ;;  %v6054_v37 = vunpack.c.l.bf16 %v10548_v39  ;;  %v6260_v60 = vunpack.c.l.bf16 %v10703_v40 }
 0x76c   :  { %v6155_v0 = vadd.f32 %v10638_v29, %v6059_v14  ;;  %v6052_v4 = vunpack.c.l.bf16 %v10539_v12  ;;  %v6053_v44 = vunpack.c.h.bf16 %v10539_v12  ;;  %v6152_v39 = vadd.f32 %v10647_v55, %v6056_v20 }
 0x76d   :  { %v6070_v54 = vunpack.c.l.bf16 %v5703_v43  ;;  %v6071_v9 = vunpack.c.h.bf16 %v5703_v43  ;;  %v6153_v3 = vadd.f32 %v10647_v55, %v6057_v38  ;;  %v6324_v43 = vmul.f32 0.010009766, %v6260_v60 }
 0x76e   :  { %v6150_v31 = vadd.f32 %v10649_v30, %v6054_v37  ;;  %v6151_v15 = vadd.f32 %v10649_v30, %v6055_v50  ;;  %v6254_v55 = vunpack.c.l.bf16 %v10727_v34  ;;  %v6148_v14 = vadd.f32 %v10657_v45, %v6052_v4  ;;  %v11590_v37 = vld [vmem:[#allocation29_spill] sm:$0xff]  ;;  %v10762_v50 = vpop.f32.mrf.mxu0  ;;  %v11591_v4 = vld [vmem:[#allocation23_spill] sm:$0xff] }
 0x76f   :  { %v6166_v62 = vadd.f32 %v10620_v23, %v6070_v54  ;;  %v6167_v49 = vadd.f32 %v10620_v23, %v6071_v9  ;;  %v10722_v23 = vpack.c.bf16 %v6161_v19, %v6160_v1  ;;  %v10744_v1 = vpack.c.bf16 %v6155_v0, %v6154_v11  ;;  %v11589_v19 = vld [vmem:[#allocation19_spill] sm:$0xff] }
 0x770   :  { %v5470_v58 = vpop.f32.mrf.mxu3  ;;  %v6048_v12 = vunpack.c.l.bf16 %v11589_v19  ;;  %v6049_v24 = vunpack.c.h.bf16 %v11589_v19  ;;  %v6149_v10 = vadd.f32 %v10657_v45, %v6053_v44  ;;  %v6484_v30 = vmax.f32 %v6260_v60, %v6324_v43 }
 0x771   :  { %v10718_v2 = vpack.c.bf16 %v6167_v49, %v6166_v62  ;;  %v5471_v25 = vadd.f32 %v5470_v58, %v10594_v61  ;;  %v6258_v61 = vunpack.c.l.bf16 %v10710_v27  ;;  %v6256_v26 = vunpack.c.l.bf16 %v10722_v23 }
 0x772   :  { %v5650_v17 = vpop.f32.mrf.mxu1  ;;  %v10751_v62 = vpack.c.bf16 %v6153_v3, %v6152_v39  ;;  %v6250_v45 = vunpack.c.l.bf16 %v10744_v1  ;;  %v10764_v11 = vpack.c.bf16 %v6151_v15, %v6150_v31  ;;  %v6145_v44 = vadd.f32 %v10661_v63, %v6049_v24 }
 0x773   :  { %v10729_v59 = vpack.c.bf16 %v5649_v46, %v5471_v25  ;;  %v5651_v21 = vadd.f32 %v5650_v17, %v10628_v33  ;;  %v6262_v57 = vunpack.c.l.bf16 %v10718_v2  ;;  %v10739_v46 = vpack.c.bf16 %v6157_v41, %v6156_v47  ;;  %v10755_v47 = vpop.f32.mrf.mxu2 }
 0x774   :  { %v6051_v33 = vunpack.c.h.bf16 %v10528_v16  ;;  %v6322_v9 = vmul.f32 0.010009766, %v6258_v61  ;;  %v6320_v20 = vmul.f32 0.010009766, %v6256_v26  ;;  %v6146_v41 = vadd.f32 %v10659_v13, %v6050_v7 }
 0x775   :  { %v6326_v29 = vmul.f32 0.010009766, %v6262_v57  ;;  %v6252_v38 = vunpack.c.l.bf16 %v10739_v46  ;;  %v6044_v16 = vunpack.c.l.bf16 %v11591_v4  ;;  %v6045_v7 = vunpack.c.h.bf16 %v11591_v4  ;;  %v11593_v4 = vld [vmem:[#allocation28_spill] sm:$0xff] }
 0x776   :  { %v6147_v58 = vadd.f32 %v10659_v13, %v6051_v33  ;;  %v6482_v17 = vmax.f32 %v6258_v61, %v6322_v9  ;;  %v6144_v13 = vadd.f32 %v10661_v63, %v6048_v12  ;;  %v6480_v39 = vmax.f32 %v6256_v26, %v6320_v20  ;;  %v11592_v63 = vld [vmem:[#allocation20_spill] sm:$0xff] }
 0x777   :  { %v6486_v54 = vmax.f32 %v6262_v57, %v6326_v29  ;;  %v6318_v57 = vmul.f32 0.010009766, %v6254_v55  ;;  %v6316_v3 = vmul.f32 0.010009766, %v6252_v38  ;;  %v6248_v29 = vunpack.c.l.bf16 %v10751_v62 }
 0x778   :  { %v5472_v48 = vpop.f32.mrf.mxu3  ;;  %v6142_v61 = vadd.f32 %v10665_v42, %v6046_v51  ;;  %v6143_v43 = vadd.f32 %v10665_v42, %v6047_v6  ;;  %v10783_v33 = vpack.c.bf16 %v6147_v58, %v6146_v41  ;;  %v6040_v31 = vunpack.c.l.bf16 %v11592_v63  ;;  %v5571_v41 = vpop.f32.mrf.mxu0 }
 0x779   :  { %v5473_v49 = vadd.f32 %v5472_v48, %v11590_v37  ;;  %6624 = vmatpush.msrb.mxu2 %v6486_v54  ;;  %v6478_v26 = vmax.f32 %v6254_v55, %v6318_v57  ;;  %v6314_v15 = vmul.f32 0.010009766, %v6250_v45  ;;  %v6246_v19 = vunpack.c.l.bf16 %v10764_v11 }
 0x77a   :  { %v5653_v25 = vpop.f32.mrf.mxu1  ;;  %v6041_v12 = vunpack.c.h.bf16 %v11592_v63  ;;  %v6140_v54 = vadd.f32 %v10667_v32, %v6044_v16  ;;  %v6141_v9 = vadd.f32 %v10667_v32, %v6045_v7  ;;  %v10790_v24 = vpack.c.bf16 %v6145_v44, %v6144_v13 }
 0x77b   :  { %v10766_v0 = vpack.c.bf16 %v5651_v21, %v5473_v49  ;;  %v5654_v60 = vadd.f32 %v5653_v25, %v10685_v52  ;;  %6625 = vmatpush.msrb.mxu2 %v6484_v30  ;;  %v10774_v21 = vpack.c.bf16 %v6149_v10, %v6148_v14  ;;  %v6043_v52 = vunpack.c.h.bf16 %v10491_v5 }
 0x77c   :  { %v6476_v42 = vmax.f32 %v6252_v38, %v6316_v3  ;;  %v6312_v6 = vmul.f32 0.010009766, %v6248_v29  ;;  %v6138_v55 = vadd.f32 %v10675_v35, %v6042_v36  ;;  %v6242_v37 = vunpack.c.l.bf16 %v10783_v33  ;;  %v10804_v38 = vpop.f32.mrf.mxu2 }
 0x77d   :  { %6626 = vmatpush.msrb.mxu2 %v6482_v17  ;;  %v6244_v14 = vunpack.c.l.bf16 %v10774_v21  ;;  %v6139_v10 = vadd.f32 %v10675_v35, %v6043_v52  ;;  %v10799_v32 = vpack.c.bf16 %v6143_v43, %v6142_v61  ;;  %v6474_v30 = vmax.f32 %v6250_v45, %v6314_v15 }
 0x77e   :  { %v6310_v20 = vmul.f32 0.010009766, %v6246_v19  ;;  %v6136_v5 = vadd.f32 %v10677_v22, %v6040_v31  ;;  %v6137_v36 = vadd.f32 %v10677_v22, %v6041_v12  ;;  %v6472_v35 = vmax.f32 %v6248_v29, %v6312_v6 }
 0x77f   :  { %6627 = vmatpush.msrb.mxu2 %v6480_v39  ;;  %v6308_v58 = vmul.f32 0.010009766, %v6244_v14  ;;  %v6240_v25 = vunpack.c.l.bf16 %v10790_v24  ;;  %v10809_v17 = vpack.c.bf16 %v6141_v9, %v6140_v54  ;;  %v6306_v45 = vmul.f32 0.010009766, %v6242_v37 }
 0x780   :  { %v5475_v51 = vpop.f32.mrf.mxu3  ;;  %v6238_v57 = vunpack.c.l.bf16 %v10799_v32  ;;  %v5931_v16 = vperm.slane %v11593_v4, %v9061_v28  ;;  %v10816_v22 = vpack.c.bf16 %v6137_v36, %v6136_v5 }
 0x781   :  { %v5476_v8 = vadd.f32 %v5475_v51, %v10679_v53  ;;  %6628 = vmatpush.msrb.mxu2 %v6478_v26  ;;  %v6468_v44 = vmax.f32 %v6244_v14, %v6308_v58  ;;  %v6304_v39 = vmul.f32 0.010009766, %v6240_v25  ;;  %v6236_v3 = vunpack.c.l.bf16 %v10809_v17 }
 0x782   :  { %v5655_v48 = vpop.f32.mrf.mxu1  ;;  %v6466_v63 = vmax.f32 %v6242_v37, %v6306_v45  ;;  %v6302_v31 = vmul.f32 0.010009766, %v6238_v57  ;;  %v6123_v26 = vunpack.c.l.bf16 %v5931_v16  ;;  %v6232_v15 = vunpack.c.l.bf16 %v10816_v22 }
 0x783   :  { %v10801_v49 = vpack.c.bf16 %v5654_v60, %v5476_v8  ;;  %v5656_v53 = vadd.f32 %v5655_v48, %v10716_v18  ;;  %6629 = vmatpush.msrb.mxu2 %v6476_v42  ;;  %v10811_v60 = vpack.c.bf16 %v6139_v10, %v6138_v55  ;;  %v6470_v18 = vmax.f32 %v6246_v19, %v6310_v20  ;;  %v5574_v8 = vpop.f32.mrf.mxu0  ;;  %v11594_v55 = vld [vmem:[#allocation27_spill] sm:$0xff] }
 0x784   :  { %v6300_v54 = vmul.f32 0.010009766, %v6236_v3  ;;  %v10823_v9 = vpop.f32.mrf.mxu2  ;;  %v6462_v14 = vmax.f32 %v6238_v57, %v6302_v31  ;;  %v5940_v10 = vperm.slane %v11594_v55, %v9061_v28  ;;  %v6296_v37 = vmul.f32 0.010009766, %v6232_v15 }
 0x785   :  { %6630 = vmatpush.msrb.mxu2 %v6474_v30  ;;  %v6234_v52 = vunpack.c.l.bf16 %v10811_v60  ;;  %v6261_v20 = vunpack.c.h.bf16 %v10703_v40  ;;  %v6247_v55 = vunpack.c.h.bf16 %v10764_v11 }
 0x786   :  { %v6460_v30 = vmax.f32 %v6236_v3, %v6300_v54  ;;  %v6124_v45 = vunpack.c.l.bf16 %v5940_v10  ;;  %v6456_v57 = vmax.f32 %v6232_v15, %v6296_v37 }
 0x787   :  { %6631 = vmatpush.msrb.mxu2 %v6472_v35  ;;  %v6298_v51 = vmul.f32 0.010009766, %v6234_v52  ;;  %v6325_v40 = vmul.f32 0.010009766, %v6261_v20 }
 0x788   :  { %v5477_v7 = vpop.f32.mrf.mxu3 }
 0x789   :  { %v5478_v13 = vadd.f32 %v5477_v7, %v10712_v56  ;;  %6632 = vmatpush.msrb.mxu2 %v6470_v18  ;;  %v6464_v56 = vmax.f32 %v6240_v25, %v6304_v39  ;;  %v6458_v35 = vmax.f32 %v6234_v52, %v6298_v51  ;;  %v6257_v7 = vunpack.c.h.bf16 %v10722_v23 }
 0x78a   :  { %v5658_v29 = vpop.f32.mrf.mxu1 }
 0x78b   :  { %v5707_v61 = vpack.c.bf16 %v5656_v53, %v5478_v13  ;;  %v5659_v43 = vadd.f32 %v5658_v29, %v10762_v50  ;;  %6633 = vmatpush.msrb.mxu2 %v6468_v44  ;;  %v6263_v50 = vunpack.c.h.bf16 %v10718_v2  ;;  %v6259_v2 = vunpack.c.h.bf16 %v10710_v27  ;;  %v11595_v29 = vld [vmem:[#allocation26_spill] sm:$0xff] }
 0x78c   :  { %v6255_v13 = vunpack.c.h.bf16 %v10727_v34  ;;  %v10840_v3 = vpop.f32.mrf.mxu2  ;;  %v5949_v52 = vperm.slane %v11595_v29, %v9061_v28  ;;  %v6485_v34 = vmax.f32 %v6261_v20, %v6325_v40  ;;  %v6321_v31 = vmul.f32 0.010009766, %v6257_v7 }
 0x78d   :  { %v6078_v19 = vunpack.c.l.bf16 %v5707_v61  ;;  %v6079_v12 = vunpack.c.h.bf16 %v5707_v61  ;;  %6634 = vmatpush.msrb.mxu2 %v6466_v63  ;;  %v6327_v18 = vmul.f32 0.010009766, %v6263_v50  ;;  %v6323_v27 = vmul.f32 0.010009766, %v6259_v2 }
 0x78e   :  { %v6253_v63 = vunpack.c.h.bf16 %v10739_v46  ;;  %v6319_v51 = vmul.f32 0.010009766, %v6255_v13  ;;  %v6245_v20 = vunpack.c.h.bf16 %v10774_v21  ;;  %v6241_v21 = vunpack.c.h.bf16 %v10790_v24 }
 0x78f   :  { %v6174_v42 = vadd.f32 %v6123_v26, %v6078_v19  ;;  %v6175_v6 = vadd.f32 %v6123_v26, %v6079_v12  ;;  %6635 = vmatpush.msrb.mxu2 %v6464_v56  ;;  %v6487_v39 = vmax.f32 %v6263_v50, %v6327_v18  ;;  %v6251_v19 = vunpack.c.h.bf16 %v10744_v1 }
 0x790   :  { %v5480_v48 = vpop.f32.mrf.mxu3  ;;  %v6483_v54 = vmax.f32 %v6259_v2, %v6323_v27  ;;  %v6317_v50 = vmul.f32 0.010009766, %v6253_v63  ;;  %v6479_v37 = vmax.f32 %v6255_v13, %v6319_v51  ;;  %v6243_v2 = vunpack.c.h.bf16 %v10783_v33 }
 0x791   :  { %v5481_v53 = vadd.f32 %v5480_v48, %v10755_v47  ;;  %6636 = vmatpush.msrb.mxu2 %v6462_v14  ;;  %v10830_v5 = vpack.c.bf16 %v6175_v6, %v6174_v42  ;;  %v10836_v47 = vld [vmem:[%s11447_s11] sm:$0xff]  ;;  %v6125_v42 = vunpack.c.l.bf16 %v5949_v52  ;;  %v6249_v6 = vunpack.c.h.bf16 %v10751_v62 }
 0x792   :  { %v5660_v36 = vpop.f32.mrf.mxu1  ;;  %v6315_v1 = vmul.f32 0.010009766, %v6251_v19  ;;  %v6307_v33 = vmul.f32 0.010009766, %v6243_v2  ;;  %v11597_v52 = vld [vmem:[#allocation17_spill] sm:$0xff] }
 0x793   :  { %v5708_v58 = vpack.c.bf16 %v5659_v43, %v5481_v53  ;;  %v5661_v25 = vadd.f32 %v5660_v36, %v5571_v41  ;;  %6637 = vmatpush.msrb.mxu2 %v6460_v30  ;;  %v5576_v43 = vpop.f32.mrf.mxu0  ;;  %v6477_v36 = vmax.f32 %v6253_v63, %v6317_v50  ;;  %v6237_v63 = vunpack.c.h.bf16 %v10809_v17 }
 0x794   :  { %v6233_v17 = vunpack.c.h.bf16 %v10816_v22 }
 0x795   :  { %v6080_v4 = vunpack.c.l.bf16 %v5708_v58  ;;  %v6081_v16 = vunpack.c.h.bf16 %v5708_v58  ;;  %6638 = vmatpush.msrb.mxu2 %v6458_v35  ;;  %v6313_v35 = vmul.f32 0.010009766, %v6249_v6  ;;  %v5401_v58 = vpop.f32.mrf.mxu2 }
 0x797   :  { %v6176_v41 = vadd.f32 %v6124_v45, %v6080_v4  ;;  %v6177_v44 = vadd.f32 %v6124_v45, %v6081_v16  ;;  %6639 = vmatpush.msrb.mxu2 %v6456_v57  ;;  %v6475_v4 = vmax.f32 %v6251_v19, %v6315_v1  ;;  %v6311_v16 = vmul.f32 0.010009766, %v6247_v55 }
 0x798   :  { %v5482_v61 = vpop.f32.mrf.mxu3  ;;  %6640 = vmatmul.f32.vlgmr.msrb.gmra.mxu2 %v10836_v47  ;;  %v6473_v13 = vmax.f32 %v6249_v6, %v6313_v35 }
 0x799   :  { %v5483_v23 = vadd.f32 %v5482_v61, %v10804_v38  ;;  %6664 = vmatpush.msra.mxu2 %v6487_v39  ;;  %v10847_v26 = vpack.c.bf16 %v6177_v44, %v6176_v41  ;;  %v6481_v38 = vmax.f32 %v6257_v7, %v6321_v31  ;;  %v6309_v41 = vmul.f32 0.010009766, %v6245_v20 }
 0x79a   :  { %v5663_v15 = vpop.f32.mrf.mxu1  ;;  %v6239_v44 = vunpack.c.h.bf16 %v10799_v32  ;;  %v6471_v29 = vmax.f32 %v6247_v55, %v6311_v16  ;;  %v5967_v61 = vperm.slane %v11597_v52, %v9061_v28  ;;  %v6235_v32 = vunpack.c.h.bf16 %v10811_v60 }
 0x79b   :  { %v5709_v12 = vpack.c.bf16 %v5661_v25, %v5483_v23  ;;  %v5664_v56 = vadd.f32 %v5663_v15, %v5574_v8  ;;  %6665 = vmatpush.msra.mxu2 %v6485_v34  ;;  %v11596_v8 = vld [vmem:[#allocation25_spill] sm:$0xff]  ;;  %v5579_v18 = vpop.f32.mrf.mxu0  ;;  %v6469_v23 = vmax.f32 %v6245_v20, %v6309_v41  ;;  %v6305_v34 = vmul.f32 0.010009766, %v6241_v21 }
 0x79c   :  { %v5958_v53 = vperm.slane %v11596_v8, %v9061_v28  ;;  %v6303_v51 = vmul.f32 0.010009766, %v6239_v44 }
 0x79d   :  { %v6082_v14 = vunpack.c.l.bf16 %v5709_v12  ;;  %v6083_v46 = vunpack.c.h.bf16 %v5709_v12  ;;  %6666 = vmatpush.msra.mxu2 %v6483_v54  ;;  %v10868_v54 = vpop.f32.mrf.mxu2 }
 0x79e   :  { %v6126_v40 = vunpack.c.l.bf16 %v5958_v53  ;;  %v6463_v60 = vmax.f32 %v6239_v44, %v6303_v51 }
 0x79f   :  { %v6178_v10 = vadd.f32 %v6125_v42, %v6082_v14  ;;  %v6179_v48 = vadd.f32 %v6125_v42, %v6083_v46  ;;  %6667 = vmatpush.msra.mxu2 %v6481_v38  ;;  %v6127_v42 = vunpack.c.l.bf16 %v5967_v61  ;;  %v6465_v46 = vmax.f32 %v6241_v21, %v6305_v34 }
 0x7a0   :  { %v5485_v30 = vpop.f32.mrf.mxu3  ;;  %v6301_v38 = vmul.f32 0.010009766, %v6237_v63 }
 0x7a1   :  { %v5486_v62 = vadd.f32 %v5485_v30, %v10823_v9  ;;  %6668 = vmatpush.msra.mxu2 %v6479_v37  ;;  %v10856_v25 = vpack.c.bf16 %v6179_v48, %v6178_v10  ;;  %v6299_v10 = vmul.f32 0.010009766, %v6235_v32  ;;  %v11598_v48 = vld [vmem:[#allocation14_spill] sm:$0xff]  ;;  %v6297_v30 = vmul.f32 0.010009766, %v6233_v17 }
 0x7a2   :  { %v5665_v11 = vpop.f32.mrf.mxu1  ;;  %v5976_v37 = vperm.slane %v11598_v48, %v9061_v28  ;;  %v6461_v53 = vmax.f32 %v6237_v63, %v6301_v38  ;;  %v11601_v38 = vld [vmem:[#allocation21_spill] sm:$0xff] }
 0x7a3   :  { %v5710_v45 = vpack.c.bf16 %v5664_v56, %v5486_v62  ;;  %v5666_v57 = vadd.f32 %v5665_v11, %v5576_v43  ;;  %6669 = vmatpush.msra.mxu2 %v6477_v36  ;;  %v6467_v56 = vmax.f32 %v6243_v2, %v6307_v33  ;;  %v10870_v6 = vpop.f32.mrf.mxu0  ;;  %v6459_v36 = vmax.f32 %v6235_v32, %v6299_v10 }
 0x7a4   :  { %v6128_v35 = vunpack.c.l.bf16 %v5976_v37  ;;  %v6457_v2 = vmax.f32 %v6233_v17, %v6297_v30 }
 0x7a5   :  { %v6084_v7 = vunpack.c.l.bf16 %v5710_v45  ;;  %v6085_v9 = vunpack.c.h.bf16 %v5710_v45  ;;  %6670 = vmatpush.msra.mxu2 %v6475_v4  ;;  %v5406_v45 = vpop.f32.mrf.mxu2 }
 0x7a7   :  { %v6180_v39 = vadd.f32 %v6126_v40, %v6084_v7  ;;  %v6181_v27 = vadd.f32 %v6126_v40, %v6085_v9  ;;  %6671 = vmatpush.msra.mxu2 %v6473_v13 }
 0x7a8   :  { %v5487_v43 = vpop.f32.mrf.mxu3 }
 0x7a9   :  { %v5488_v24 = vadd.f32 %v5487_v43, %v10840_v3  ;;  %6672 = vmatpush.msra.mxu2 %v6471_v29  ;;  %v10865_v31 = vpack.c.bf16 %v6181_v27, %v6180_v39 }
 0x7aa   :  { %v5668_v15 = vpop.f32.mrf.mxu1 }
 0x7ab   :  { %v5711_v19 = vpack.c.bf16 %v5666_v57, %v5488_v24  ;;  %v5669_v12 = vadd.f32 %v5668_v15, %v5579_v18  ;;  %6673 = vmatpush.msra.mxu2 %v6469_v23  ;;  %v5584_v57 = vpop.f32.mrf.mxu0 }
 0x7ad   :  { %v6086_v3 = vunpack.c.l.bf16 %v5711_v19  ;;  %v6087_v14 = vunpack.c.h.bf16 %v5711_v19  ;;  %6674 = vmatpush.msra.mxu2 %v6467_v56  ;;  %v5408_v7 = vpop.f32.mrf.mxu2  ;;  %v11599_v56 = vld [vmem:[#allocation24_spill] sm:$0xff] }
 0x7ae   :  { %v6039_v51 = vperm.slane %v11599_v56, %v9061_v28 }
 0x7af   :  { %v6182_v50 = vadd.f32 %v6127_v42, %v6086_v3  ;;  %v6183_v55 = vadd.f32 %v6127_v42, %v6087_v14  ;;  %6675 = vmatpush.msra.mxu2 %v6465_v46  ;;  %v11600_v3 = vld [vmem:[#allocation22_spill] sm:$0xff] }
 0x7b0   :  { %v5490_v1 = vpop.f32.mrf.mxu3  ;;  %v6030_v14 = vperm.slane %v11600_v3, %v9061_v28  ;;  %v6135_v30 = vunpack.c.l.bf16 %v6039_v51 }
 0x7b1   :  { %v5491_v8 = vadd.f32 %v5490_v1, %v5401_v58  ;;  %6676 = vmatpush.msra.mxu2 %v6463_v60  ;;  %v10875_v20 = vpack.c.bf16 %v6183_v55, %v6182_v50  ;;  %v6021_v50 = vperm.slane %v11601_v38, %v9061_v28  ;;  %v11602_v55 = vld [vmem:[#allocation13_spill] sm:$0xff] }
 0x7b2   :  { %v10877_v22 = vpop.f32.mrf.mxu1  ;;  %v6012_v60 = vperm.slane %v11602_v55, %v9061_v28 }
 0x7b3   :  { %v5712_v62 = vpack.c.bf16 %v5669_v12, %v5491_v8  ;;  %6677 = vmatpush.msra.mxu2 %v6461_v53  ;;  %v5586_v13 = vpop.f32.mrf.mxu0 }
 0x7b5   :  { %v6088_v11 = vunpack.c.l.bf16 %v5712_v62  ;;  %v6089_v18 = vunpack.c.h.bf16 %v5712_v62  ;;  %6678 = vmatpush.msra.mxu2 %v6459_v36  ;;  %v5411_v39 = vpop.f32.mrf.mxu2 }
 0x7b7   :  { %v6184_v4 = vadd.f32 %v6128_v35, %v6088_v11  ;;  %v6185_v16 = vadd.f32 %v6128_v35, %v6089_v18  ;;  %6679 = vmatpush.msra.mxu2 %v6457_v2  ;;  %v6134_v35 = vunpack.c.l.bf16 %v6030_v14  ;;  %v11603_v11 = vld [vmem:[#allocation16_spill] sm:$0xff] }
 0x7b8   :  { %6680 = vmatmul.f32.vlgmr.msra.gmra.mxu2 %v10836_v47  ;;  %v5492_v58 = vpop.f32.mrf.mxu3  ;;  %v6003_v18 = vperm.slane %v11603_v11, %v9061_v28 }
 0x7b9   :  { %v10880_v40 = vpack.c.bf16 %v6185_v16, %v6184_v4  ;;  %v5493_v2 = vadd.f32 %v5492_v58, %v10868_v54  ;;  %v11604_v58 = vld [vmem:[#allocation18_spill] sm:$0xff] }
 0x7ba   :  { %v5673_v21 = vpop.f32.mrf.mxu1  ;;  %v6131_v54 = vunpack.c.l.bf16 %v6003_v18 }
 0x7bb   :  { %v5589_v27 = vpop.f32.mrf.mxu0  ;;  %v5674_v37 = vadd.f32 %v5673_v21, %v5584_v57 }
 0x7bd   :  { %v5413_v61 = vpop.f32.mrf.mxu2 }
 0x7c0   :  { %v5495_v9 = vpop.f32.mrf.mxu3 }
 0x7c1   :  { %v5496_v1 = vadd.f32 %v5495_v9, %v5406_v45  ;;  %v5671_v45 = vadd.f32 %v10877_v22, %v10870_v6  ;;  %v11605_v6 = vld [vmem:[#allocation15_spill] sm:$0xff] }
 0x7c2   :  { %v5675_v41 = vpop.f32.mrf.mxu1  ;;  %v5985_v22 = vperm.slane %v11605_v6, %v9061_v28  ;;  %v6074_v6 = vunpack.c.l.bf16 %v10766_v0 }
 0x7c3   :  { %v5591_v43 = vpop.f32.mrf.mxu0  ;;  %v5676_v8 = vadd.f32 %v5675_v41, %v5586_v13  ;;  %v5714_v57 = vpack.c.bf16 %v5674_v37, %v5496_v1 }
 0x7c4   :  { %v6129_v37 = vunpack.c.l.bf16 %v5985_v22  ;;  %v6075_v22 = vunpack.c.h.bf16 %v10766_v0 }
 0x7c5   :  { %v5416_v23 = vpop.f32.mrf.mxu2 }
 0x7c8   :  { %v5497_v44 = vpop.f32.mrf.mxu3 }
 0x7c9   :  { %v5498_v46 = vadd.f32 %v5497_v44, %v5408_v7  ;;  %v6133_v7 = vunpack.c.l.bf16 %v6021_v50  ;;  %v6132_v44 = vunpack.c.l.bf16 %v6012_v60 }
 0x7ca   :  { %v5678_v29 = vpop.f32.mrf.mxu1 }
 0x7cb   :  { %v5594_v47 = vpop.f32.mrf.mxu0  ;;  %v5679_v32 = vadd.f32 %v5678_v29, %v5589_v27  ;;  %v5715_v4 = vpack.c.bf16 %v5676_v8, %v5498_v46  ;;  %v5917_v8 = vpop.permute.xlu1 %5916 }
 0x7cd   :  { %v5418_v29 = vpop.f32.mrf.mxu2 }
 0x7d0   :  { %v5500_v33 = vpop.f32.mrf.mxu3 }
 0x7d1   :  { %v5501_v19 = vadd.f32 %v5500_v33, %v5411_v39 }
 0x7d2   :  { %v5680_v52 = vpop.f32.mrf.mxu1 }
 0x7d3   :  { %v5681_v42 = vadd.f32 %v5680_v52, %v5591_v43  ;;  %v5716_v53 = vpack.c.bf16 %v5679_v32, %v5501_v19  ;;  %v5596_v13 = vpop.f32.mrf.mxu0  ;;  %v6092_v19 = vunpack.c.l.bf16 %v5714_v57 }
 0x7d5   :  { %v6096_v21 = vunpack.c.l.bf16 %v5716_v53  ;;  %v6097_v9 = vunpack.c.h.bf16 %v5716_v53 }
 0x7d7   :  { %v6192_v56 = vadd.f32 %v6132_v44, %v6096_v21  ;;  %v6193_v51 = vadd.f32 %v6132_v44, %v6097_v9  ;;  %v5908_v21 = vpop.permute.xlu0 %5907 }
 0x7d8   :  { %v5502_v63 = vpop.f32.mrf.mxu3 }
 0x7d9   :  { %v5503_v34 = vadd.f32 %v5502_v63, %v5413_v61  ;;  %v5994_v63 = vperm.slane %v11604_v58, %v9061_v28  ;;  %v5913_v58 = vperm.slane %v5908_v21, %v9061_v28 }
 0x7da   :  { %v5683_v24 = vpop.f32.mrf.mxu1 }
 0x7db   :  { %v5684_v15 = vadd.f32 %v5683_v24, %v5594_v47  ;;  %v5717_v10 = vpack.c.bf16 %v5681_v42, %v5503_v34  ;;  %v5713_v24 = vpack.c.bf16 %v5671_v45, %v5493_v2  ;;  %v6095_v47 = vunpack.c.h.bf16 %v5715_v4 }
 0x7dc   :  { %v6130_v14 = vunpack.c.l.bf16 %v5994_v63  ;;  %v6076_v63 = vunpack.c.l.bf16 %v10801_v49 }
 0x7dd   :  { %v6098_v39 = vunpack.c.l.bf16 %v5717_v10  ;;  %v6099_v27 = vunpack.c.h.bf16 %v5717_v10  ;;  %v6090_v46 = vunpack.c.l.bf16 %v5713_v24  ;;  %v6091_v38 = vunpack.c.h.bf16 %v5713_v24 }
 0x7de   :  { %v6191_v55 = vadd.f32 %v6131_v54, %v6095_v47  ;;  %v6188_v1 = vadd.f32 %v6130_v14, %v6092_v19  ;;  %v6077_v24 = vunpack.c.h.bf16 %v10801_v49  ;;  %v6072_v49 = vunpack.c.l.bf16 %v10729_v59 }
 0x7df   :  { %v6194_v34 = vadd.f32 %v6133_v7, %v6098_v39  ;;  %v6186_v11 = vadd.f32 %v6129_v37, %v6090_v46  ;;  %v6187_v18 = vadd.f32 %v6129_v37, %v6091_v38  ;;  %v6274_v37 = vunpack.c.l.bf16 %v10856_v25 }
 0x7e0   :  { %v5505_v12 = vpop.f32.mrf.mxu3 }
 0x7e1   :  { %v5506_v17 = vadd.f32 %v5505_v12, %v5416_v23  ;;  %v6094_v23 = vunpack.c.l.bf16 %v5715_v4  ;;  %v6093_v12 = vunpack.c.h.bf16 %v5714_v57  ;;  %v10916_v57 = vpack.c.bf16 %v6187_v18, %v6186_v11 }
 0x7e2   :  { %v5685_v16 = vpop.f32.mrf.mxu1 }
 0x7e3   :  { %v5718_v48 = vpack.c.bf16 %v5684_v15, %v5506_v17  ;;  %v5686_v61 = vadd.f32 %v5685_v16, %v5596_v13  ;;  %v6195_v15 = vadd.f32 %v6133_v7, %v6099_v27  ;;  %v6190_v50 = vadd.f32 %v6131_v54, %v6094_v23 }
 0x7e4   :  { %v6189_v53 = vadd.f32 %v6130_v14, %v6093_v12  ;;  %v6282_v54 = vunpack.c.l.bf16 %v10916_v57 }
 0x7e5   :  { %v6100_v62 = vunpack.c.l.bf16 %v5718_v48  ;;  %v6101_v36 = vunpack.c.h.bf16 %v5718_v48  ;;  %v10901_v48 = vpack.c.bf16 %v6195_v15, %v6194_v34  ;;  %v10910_v16 = vpack.c.bf16 %v6191_v55, %v6190_v50 }
 0x7e6   :  { %v10913_v39 = vpack.c.bf16 %v6189_v53, %v6188_v1  ;;  %v6280_v34 = vunpack.c.l.bf16 %v10880_v40  ;;  %v6346_v12 = vmul.f32 0.010009766, %v6282_v54 }
 0x7e7   :  { %v6196_v33 = vadd.f32 %v6134_v35, %v6100_v62  ;;  %v6197_v52 = vadd.f32 %v6134_v35, %v6101_v36  ;;  %v10906_v35 = vpack.c.bf16 %v6193_v51, %v6192_v56  ;;  %v6290_v4 = vunpack.c.l.bf16 %v10901_v48 }
 0x7e8   :  { %v5507_v41 = vpop.f32.mrf.mxu3  ;;  %v6286_v45 = vunpack.c.l.bf16 %v10910_v16  ;;  %v6278_v56 = vunpack.c.l.bf16 %v10875_v20  ;;  %v6121_v51 = vunpack.c.l.bf16 %v5913_v58  ;;  %v6344_v38 = vmul.f32 0.010009766, %v6280_v34 }
 0x7e9   :  { %v5508_v43 = vadd.f32 %v5507_v41, %v5418_v29  ;;  %v10899_v3 = vpack.c.bf16 %v6197_v52, %v6196_v33  ;;  %v6288_v44 = vunpack.c.l.bf16 %v10906_v35  ;;  %v6354_v29 = vmul.f32 0.010009766, %v6290_v4  ;;  %v5899_v52 = vpop.permute.xlu1 %5898 }
 0x7ea   :  { %v6284_v41 = vunpack.c.l.bf16 %v10913_v39  ;;  %v5922_v33 = vperm.slane %v5917_v8, %v9061_v28  ;;  %v6170_v55 = vadd.f32 %v6121_v51, %v6074_v6  ;;  %v6171_v0 = vadd.f32 %v6121_v51, %v6075_v22 }
 0x7eb   :  { %v5719_v32 = vpack.c.bf16 %v5686_v61, %v5508_v43  ;;  %v6292_v36 = vunpack.c.l.bf16 %v10899_v3  ;;  %v6352_v13 = vmul.f32 0.010009766, %v6288_v44  ;;  %v6514_v61 = vmax.f32 %v6290_v4, %v6354_v29 }
 0x7ec   :  { %v6350_v43 = vmul.f32 0.010009766, %v6286_v45  ;;  %v6348_v47 = vmul.f32 0.010009766, %v6284_v41  ;;  %v6122_v15 = vunpack.c.l.bf16 %v5922_v33  ;;  %v6504_v53 = vmax.f32 %v6280_v34, %v6344_v38 }
 0x7ed   :  { %v6102_v42 = vunpack.c.l.bf16 %v5719_v32  ;;  %v6103_v17 = vunpack.c.h.bf16 %v5719_v32  ;;  %v6356_v7 = vmul.f32 0.010009766, %v6292_v36  ;;  %v6512_v23 = vmax.f32 %v6288_v44, %v6352_v13 }
 0x7ee   :  { %v5904_v32 = vperm.slane %v5899_v52, %v9061_v28  ;;  %v6510_v19 = vmax.f32 %v6286_v45, %v6350_v43  ;;  %v6173_v14 = vadd.f32 %v6122_v15, %v6077_v24  ;;  %v6508_v46 = vmax.f32 %v6284_v41, %v6348_v47 }
 0x7ef   :  { %v6198_v60 = vadd.f32 %v6135_v30, %v6102_v42  ;;  %v6199_v10 = vadd.f32 %v6135_v30, %v6103_v17  ;;  %v6516_v9 = vmax.f32 %v6292_v36, %v6356_v7  ;;  %v6073_v42 = vunpack.c.h.bf16 %v10729_v59 }
 0x7f0   :  { %v6172_v17 = vadd.f32 %v6122_v15, %v6076_v63  ;;  %v6276_v28 = vunpack.c.l.bf16 %v10865_v31  ;;  %v6120_v50 = vunpack.c.l.bf16 %v5904_v32  ;;  %v6272_v36 = vunpack.c.l.bf16 %v10847_v26  ;;  %v6553_v15 = vld [vmem:[%s11447_s11 + $0x8] sm:$0xff]  ;;  %s8230_s11 = smov [#allocation8]  }
 0x7f1   :  { %v10903_v62 = vpack.c.bf16 %v6199_v10, %v6198_v60  ;;  %v6506_v60 = vmax.f32 %v6282_v54, %v6346_v12  ;;  %v6342_v10 = vmul.f32 0.010009766, %v6278_v56  ;;  %v6270_v4 = vunpack.c.l.bf16 %v10830_v5  ;;  %s7328_s29 = sshll.u32 %s8230_s11, 4  ;;  %s7329_s29 = int_to_ptr.vmem [resolvable:$true] %s7328_s29 }
 0x7f2   :  { %v6168_v1 = vadd.f32 %v6120_v50, %v6072_v49  ;;  %v6169_v8 = vadd.f32 %v6120_v50, %v6073_v42  ;;  %v6340_v59 = vmul.f32 0.010009766, %v6276_v28  ;;  %v10934_v11 = vpack.c.bf16 %v6173_v14, %v6172_v17 }
 0x7f3   :  { %v6294_v2 = vunpack.c.l.bf16 %v10903_v62  ;;  %v6502_v18 = vmax.f32 %v6278_v56, %v6342_v10  ;;  %v6336_v44 = vmul.f32 0.010009766, %v6272_v36  ;;  %v6334_v21 = vmul.f32 0.010009766, %v6270_v4 }
 0x7f4   :  { %v6500_v7 = vmax.f32 %v6276_v28, %v6340_v59  ;;  %v10940_v29 = vpack.c.bf16 %v6169_v8, %v6168_v1  ;;  %v6295_v43 = vunpack.c.h.bf16 %v10903_v62  ;;  %v6293_v63 = vunpack.c.h.bf16 %v10899_v3 }
 0x7f5   :  { %v6358_v30 = vmul.f32 0.010009766, %v6294_v2  ;;  %v6496_v13 = vmax.f32 %v6272_v36, %v6336_v44  ;;  %v6494_v52 = vmax.f32 %v6270_v4, %v6334_v21  ;;  %v6291_v47 = vunpack.c.h.bf16 %v10901_v48 }
 0x7f6   :  { %v6264_v33 = vunpack.c.l.bf16 %v10940_v29  ;;  %v6357_v32 = vmul.f32 0.010009766, %v6293_v63  ;;  %v6289_v6 = vunpack.c.h.bf16 %v10906_v35  ;;  %v6285_v48 = vunpack.c.h.bf16 %v10913_v39 }
 0x7f7   :  { %v6518_v27 = vmax.f32 %v6294_v2, %v6358_v30  ;;  %v6338_v2 = vmul.f32 0.010009766, %v6274_v37  ;;  %v10937_v30 = vpack.c.bf16 %v6171_v0, %v6170_v55  ;;  %v6355_v22 = vmul.f32 0.010009766, %v6291_v47 }
 0x7f8   :  { %v6328_v58 = vmul.f32 0.010009766, %v6264_v33  ;;  %v6517_v3 = vmax.f32 %v6293_v63, %v6357_v32  ;;  %v6353_v12 = vmul.f32 0.010009766, %v6289_v6  ;;  %v6283_v49 = vunpack.c.h.bf16 %v10916_v57 }
 0x7f9   :  { %6644 = vmatpush.msrb.mxu3 %v6518_v27  ;;  %v6268_v27 = vunpack.c.l.bf16 %v10934_v11  ;;  %v6498_v45 = vmax.f32 %v6274_v37, %v6338_v2  ;;  %v6515_v56 = vmax.f32 %v6291_v47, %v6355_v22  ;;  %v6349_v17 = vmul.f32 0.010009766, %v6285_v48 }
 0x7fa   :  { %v6488_v34 = vmax.f32 %v6264_v33, %v6328_v58  ;;  %v6513_v42 = vmax.f32 %v6289_v6, %v6353_v12  ;;  %v6281_v35 = vunpack.c.h.bf16 %v10880_v40  ;;  %v6277_v39 = vunpack.c.h.bf16 %v10865_v31 }
 0x7fb   :  { %6645 = vmatpush.msrb.mxu3 %v6516_v9  ;;  %v6266_v9 = vunpack.c.l.bf16 %v10937_v30  ;;  %v6332_v41 = vmul.f32 0.010009766, %v6268_v27  ;;  %v6509_v38 = vmax.f32 %v6285_v48, %v6349_v17  ;;  %v6275_v57 = vunpack.c.h.bf16 %v10856_v25 }
 0x7fc   :  { %v6345_v28 = vmul.f32 0.010009766, %v6281_v35  ;;  %v6273_v40 = vunpack.c.h.bf16 %v10847_v26  ;;  %v6269_v31 = vunpack.c.h.bf16 %v10934_v11  ;;  %v6267_v25 = vunpack.c.h.bf16 %v10937_v30 }
 0x7fd   :  { %6646 = vmatpush.msrb.mxu3 %v6514_v61  ;;  %v6330_v61 = vmul.f32 0.010009766, %v6266_v9  ;;  %v6492_v54 = vmax.f32 %v6268_v27, %v6332_v41  ;;  %v6339_v37 = vmul.f32 0.010009766, %v6275_v57  ;;  %v6265_v26 = vunpack.c.h.bf16 %v10940_v29 }
 0x7fe   :  { %v6505_v0 = vmax.f32 %v6281_v35, %v6345_v28  ;;  %v6337_v8 = vmul.f32 0.010009766, %v6273_v40  ;;  %v6331_v4 = vmul.f32 0.010009766, %v6267_v25 }
 0x7ff   :  { %6647 = vmatpush.msrb.mxu3 %v6512_v23  ;;  %v6490_v24 = vmax.f32 %v6266_v9, %v6330_v61  ;;  %v6359_v23 = vmul.f32 0.010009766, %v6295_v43 }
 0x800   :  { %v6497_v36 = vmax.f32 %v6273_v40, %v6337_v8  ;;  %v6491_v44 = vmax.f32 %v6267_v25, %v6331_v4 }
 0x801   :  { %6648 = vmatpush.msrb.mxu3 %v6510_v19  ;;  %v6519_v62 = vmax.f32 %v6295_v43, %v6359_v23  ;;  %v6287_v19 = vunpack.c.h.bf16 %v10910_v16  ;;  %v6279_v16 = vunpack.c.h.bf16 %v10875_v20  ;;  %v6271_v20 = vunpack.c.h.bf16 %v10830_v5 }
 0x803   :  { %6649 = vmatpush.msrb.mxu3 %v6508_v46  ;;  %v6351_v51 = vmul.f32 0.010009766, %v6287_v19  ;;  %v6347_v46 = vmul.f32 0.010009766, %v6283_v49  ;;  %v6343_v55 = vmul.f32 0.010009766, %v6279_v16  ;;  %v6335_v59 = vmul.f32 0.010009766, %v6271_v20 }
 0x805   :  { %6650 = vmatpush.msrb.mxu3 %v6506_v60  ;;  %v6511_v14 = vmax.f32 %v6287_v19, %v6351_v51  ;;  %v6507_v50 = vmax.f32 %v6283_v49, %v6347_v46  ;;  %v6341_v60 = vmul.f32 0.010009766, %v6277_v39  ;;  %v6503_v10 = vmax.f32 %v6279_v16, %v6343_v55 }
 0x806   :  { %v6495_v2 = vmax.f32 %v6271_v20, %v6335_v59 }
 0x807   :  { %6651 = vmatpush.msrb.mxu3 %v6504_v53  ;;  %v6501_v1 = vmax.f32 %v6277_v39, %v6341_v60  ;;  %v6499_v53 = vmax.f32 %v6275_v57, %v6339_v37 }
 0x809   :  { %6652 = vmatpush.msrb.mxu3 %v6502_v18  ;;  %v6333_v18 = vmul.f32 0.010009766, %v6269_v31 }
 0x80b   :  { %6653 = vmatpush.msrb.mxu3 %v6500_v7  ;;  %v6493_v5 = vmax.f32 %v6269_v31, %v6333_v18  ;;  %v6329_v7 = vmul.f32 0.010009766, %v6265_v26 }
 0x80d   :  { %6654 = vmatpush.msrb.mxu3 %v6498_v45  ;;  %v6489_v11 = vmax.f32 %v6265_v26, %v6329_v7  ;;  %v6622_v45 = vpop.permute.xlu2 %6621 }
 0x80f   :  { %6655 = vmatpush.msrb.mxu3 %v6496_v13 }
 0x811   :  { %6656 = vmatpush.msrb.mxu3 %v6494_v52 }
 0x813   :  { %6657 = vmatpush.msrb.mxu3 %v6492_v54 }
 0x815   :  { %6658 = vmatpush.msrb.mxu3 %v6490_v24 }
 0x817   :  { %6659 = vmatpush.msrb.mxu3 %v6488_v34 }
 0x818   :  { %6660 = vmatmul.f32.vlgmr.msrb.gmra.mxu3 %v6553_v15 }
 0x819   :  { %6684 = vmatpush.msra.mxu3 %v6519_v62 }
 0x81b   :  { %6685 = vmatpush.msra.mxu3 %v6517_v3  ;;  %v6641_v27 = vpop.f32.mrf.mxu2 }
 0x81c   :  { %v6642_v30 = vadd.f32 %v6641_v27, %v6622_v45 }
 0x81d   :  { %6686 = vmatpush.msra.mxu3 %v6515_v56 }
 0x81f   :  { %6687 = vmatpush.msra.mxu3 %v6513_v42 }
 0x821   :  { %6688 = vmatpush.msra.mxu3 %v6511_v14 }
 0x823   :  { %6689 = vmatpush.msra.mxu3 %v6509_v38 }
 0x825   :  { %6690 = vmatpush.msra.mxu3 %v6507_v50 }
 0x827   :  { %6691 = vmatpush.msra.mxu3 %v6505_v0 }
 0x829   :  { %6692 = vmatpush.msra.mxu3 %v6503_v10 }
 0x82b   :  { %6693 = vmatpush.msra.mxu3 %v6501_v1 }
 0x82d   :  { %6694 = vmatpush.msra.mxu3 %v6499_v53 }
 0x82f   :  { %6695 = vmatpush.msra.mxu3 %v6497_v36 }
 0x831   :  { %6696 = vmatpush.msra.mxu3 %v6495_v2 }
 0x833   :  { %6697 = vmatpush.msra.mxu3 %v6493_v5 }
 0x835   :  { %6698 = vmatpush.msra.mxu3 %v6491_v44 }
 0x837   :  { %6699 = vmatpush.msra.mxu3 %v6489_v11 }
 0x838   :  { %6700 = vmatmul.f32.vlgmr.msra.gmra.mxu3 %v6553_v15 }
 0x83b   :  { %v6681_v56 = vpop.f32.mrf.mxu2 }
 0x83c   :  { %v6682_v42 = vadd.f32 %v6681_v56, %v6622_v45 }
 0x89b   :  { %v6661_v21 = vpop.f32.mrf.mxu3 }
 0x89c   :  { %v10963_v9 = vadd.f32 %v6661_v21, %v6642_v30 }
 0x89e   :  { %v7256_v29 = vmul.f32 1.442695, %v10963_v9  ;;  %v6704_v13 = vmul.f32 %v10963_v9, %v10963_v9  ;;  %vm7254_vm4 = vcmp.gt.f32.partialorder %v10963_v9, 20.0  ;;  %v6786_v16 = vrot.slane %v10963_v9, 5 }
 0x89f   :  { %v6766_v50 = vrot.slane %v10963_v9, 2  ;;  %v6780_v60 = vrot.slane %v10963_v9, 1  ;;  %v6760_v40 = vrot.slane %v10963_v9, 4 }
 0x8a0   :  { %8112 = vpow2.f32 %v7256_v29  ;;  %v6708_v41 = vrot.slane %v6704_v13, 1  ;;  %v6714_v52 = vrot.slane %v6704_v13, 2 }
 0x8a2   :  { %v6712_v33 = vadd.f32 %v6708_v41, %v6704_v13 }
 0x8a4   :  { %v6718_v61 = vadd.f32 %v6714_v52, %v6712_v33 }
 0x8a6   :  { %v8113_v43 = vpop.eup %8112  ;;  %v6720_v54 = vadd.f32 1e-12, %v6718_v61 }
 0x8a7   :  { %v7260_v58 = vadd.f32 1.0, %v8113_v43  ;;  %v7263_v63 = vmul.f32 -0.5, %v8113_v43  ;;  %v7266_v23 = vand.u32 2147483647, %v8113_v43 }
 0x8a8   :  { %8114 = vrsqrt.f32 %v6720_v54  ;;  %vm6728_vm6 = vweird.f32 %v6720_v54 }
 0x8a9   :  { %8116 = vlog2.f32 %v7260_v58  ;;  %v7264_v24 = vadd.f32 1.0, %v7263_v63  ;;  %vm7267_vm3 = vcmp.lt.f32.partialorder %v7266_v23, 0.0004427343 }
 0x8ab   :  { %v7265_v6 = vmul.f32 %v8113_v43, %v7264_v24 }
 0x8ae   :  { %v8115_v47 = vpop.eup %8114 }
 0x8af   :  { %v8117_v34 = vpop.eup %8116  ;;  %v6723_v15 = vmul.f32 %v8115_v47, %v6720_v54  ;;  %vm6729_vm5 = vweird.f32 %v8115_v47 }
 0x8b0   :  { %v7262_v32 = vmul.f32 0.6931472, %v8117_v34  ;;  %vm6730_vm7 = vmor %vm6728_vm6, %vm6729_vm5 }
 0x8b1   :  { %v6724_v62 = vmul.f32 %v8115_v47, %v6723_v15 }
 0x8b2   :  { %v7268_v22 = vsel %vm7267_vm3, %v7265_v6, %v7262_v32 }
 0x8b3   :  { %v7278_v19 = vsel %vm7254_vm4, %v10963_v9, %v7268_v22  ;;  %v6725_v3 = vmul.f32 0.5, %v6724_v62 }
 0x8b4   :  { %v7280_v12 = vadd.f32 0.0001, %v7278_v19 }
 0x8b5   :  { %v6726_v48 = vsub.f32 1.5, %v6725_v3 }
 0x8b6   :  { %7315 = vst [vmem:[#allocation1] sm:$0xff] %v7280_v12 }
 0x8b7   :  { %v6727_v51 = vmul.f32 %v8115_v47, %v6726_v48 }
 0x8b9   :  { %v6731_v49 = vsel %vm6730_vm7, %v8115_v47, %v6727_v51 }
 0x8ba   :  { %v10971_v17 = vmul.f32 %v6731_v49, %v10963_v9  ;;  %v6746_v35 = vrot.slane %v6731_v49, 7  ;;  %v6752_v14 = vrot.slane %v6731_v49, 6 }
 0x8bb   :  { %v6701_v46 = vpop.f32.mrf.mxu3 }
 0x8bc   :  { %v10974_v38 = vadd.f32 %v6701_v46, %v6682_v42  ;;  %v10977_v28 = vmul.f32 %v6752_v14, %v10963_v9  ;;  %v10980_v39 = vmul.f32 %v6746_v35, %v10963_v9  ;;  %v6790_v55 = vmul.f32 %v6786_v16, %v10971_v17 }
 0x8bd   :  { %v6800_v26 = vmul.f32 %v6760_v40, %v10971_v17 }
 0x8be   :  { %v7258_v57 = vmul.f32 1.442695, %v10974_v38  ;;  %v6705_v0 = vmul.f32 %v10974_v38, %v10974_v38  ;;  %v6770_v10 = vmul.f32 %v6766_v50, %v10977_v28  ;;  %v6784_v20 = vmul.f32 %v6780_v60, %v10977_v28 }
 0x8bf   :  { %v6764_v1 = vmul.f32 %v6760_v40, %v10980_v39  ;;  %v6794_v31 = vrot.slane %v6790_v55, 6  ;;  %v6802_v53 = vmul.f32 %v6766_v50, %v10980_v39  ;;  %vm7255_vm9 = vcmp.gt.f32.partialorder %v10974_v38, 20.0 }
 0x8c0   :  { %8118 = vpow2.f32 %v7258_v57  ;;  %v6709_v37 = vrot.slane %v6705_v0, 1  ;;  %v6774_v8 = vrot.slane %v6770_v10, 1  ;;  %v6715_v25 = vrot.slane %v6705_v0, 2 }
 0x8c1   :  { %v10995_v18 = vsub.f32 %v6784_v20, %v6794_v31  ;;  %v6806_v2 = vrot.slane %v6802_v53, 1  ;;  %v6787_v49 = vrot.slane %v10974_v38, 5  ;;  %v6767_v42 = vrot.slane %v10974_v38, 2 }
 0x8c2   :  { %v6713_v59 = vadd.f32 %v6709_v37, %v6705_v0  ;;  %v10993_v36 = vsub.f32 %v6764_v1, %v6774_v8  ;;  %v6781_v16 = vrot.slane %v10974_v38, 1  ;;  %v6761_v57 = vrot.slane %v10974_v38, 4 }
 0x8c3   :  { %v10998_v5 = vsub.f32 %v6800_v26, %v6806_v2  ;;  %v6814_v44 = vmul.f32 %v10995_v18, %v10995_v18 }
 0x8c4   :  { %v6719_v4 = vadd.f32 %v6715_v25, %v6713_v59  ;;  %v6812_v7 = vmul.f32 %v10993_v36, %v10993_v36 }
 0x8c5   :  { %v6818_v30 = vrot.slane %v6814_v44, 1  ;;  %v6824_v9 = vmul.f32 %v10998_v5, %v10998_v5 }
 0x8c6   :  { %v8119_v11 = vpop.eup %8118  ;;  %v6721_v27 = vadd.f32 1e-12, %v6719_v4 }
 0x8c7   :  { %v7269_v45 = vadd.f32 1.0, %v8119_v11  ;;  %v7272_v21 = vmul.f32 -0.5, %v8119_v11  ;;  %v6822_v29 = vadd.f32 %v6818_v30, %v6812_v7  ;;  %v6828_v13 = vrot.slane %v6824_v9, 7 }
 0x8c8   :  { %8120 = vrsqrt.f32 %v6721_v27  ;;  %v7275_v52 = vand.u32 2147483647, %v8119_v11  ;;  %vm6738_vm11 = vweird.f32 %v6721_v27 }
 0x8c9   :  { %8122 = vlog2.f32 %v7269_v45  ;;  %v7273_v41 = vadd.f32 1.0, %v7272_v21  ;;  %v6832_v33 = vadd.f32 %v6828_v13, %v6822_v29  ;;  %v6876_v29 = vrot.slane %v10980_v39, 1 }
 0x8ca   :  { %vm7276_vm8 = vcmp.lt.f32.partialorder %v7275_v52, 0.0004427343 }
 0x8cb   :  { %v6834_v43 = vadd.f32 1e-12, %v6832_v33  ;;  %v7274_v24 = vmul.f32 %v8119_v11, %v7273_v41  ;;  %v6912_v11 = vrot.slane %v10971_v17, 6 }
 0x8cd   :  { %8124 = vrsqrt.f32 %v6834_v43  ;;  %vm6842_vm14 = vweird.f32 %v6834_v43 }
 0x8ce   :  { %v8121_v61 = vpop.eup %8120 }
 0x8cf   :  { %v8123_v54 = vpop.eup %8122  ;;  %v6733_v58 = vmul.f32 %v8121_v61, %v6721_v27  ;;  %vm6739_vm10 = vweird.f32 %v8121_v61 }
 0x8d0   :  { %v7271_v63 = vmul.f32 0.6931472, %v8123_v54  ;;  %vm6740_vm12 = vmor %vm6738_vm11, %vm6739_vm10 }
 0x8d1   :  { %v6734_v23 = vmul.f32 %v8121_v61, %v6733_v58 }
 0x8d2   :  { %v7277_v47 = vsel %vm7276_vm8, %v7274_v24, %v7271_v63 }
 0x8d3   :  { %v7279_v34 = vsel %vm7255_vm9, %v10974_v38, %v7277_v47  ;;  %v6735_v15 = vmul.f32 0.5, %v6734_v23  ;;  %v8125_v62 = vpop.eup %8124  ;;  %v6934_v23 = vadd.f32 1.0, %v10971_v17 }
 0x8d4   :  { %v7281_v32 = vadd.f32 0.0001, %v7279_v34  ;;  %v6837_v19 = vmul.f32 %v8125_v62, %v6834_v43  ;;  %vm6843_vm13 = vweird.f32 %v8125_v62 }
 0x8d5   :  { %v6736_v6 = vsub.f32 1.5, %v6735_v15  ;;  %vm6844_vm15 = vmor %vm6842_vm14, %vm6843_vm13 }
 0x8d6   :  { %7316 = vst [vmem:[#allocation1 + $0x9] sm:$0xff] %v7281_v32  ;;  %v6838_v12 = vmul.f32 %v8125_v62, %v6837_v19 }
 0x8d7   :  { %v6737_v22 = vmul.f32 %v8121_v61, %v6736_v6 }
 0x8d8   :  { %v6839_v35 = vmul.f32 0.5, %v6838_v12 }
 0x8d9   :  { %v6741_v3 = vsel %vm6740_vm12, %v8121_v61, %v6737_v22 }
 0x8da   :  { %v11009_v48 = vmul.f32 %v6741_v3, %v10974_v38  ;;  %v6747_v56 = vrot.slane %v6741_v3, 7  ;;  %v6753_v51 = vrot.slane %v6741_v3, 6  ;;  %v6840_v55 = vsub.f32 1.5, %v6839_v35 }
 0x8dc   :  { %v11014_v14 = vmul.f32 %v6747_v56, %v10974_v38  ;;  %v11017_v46 = vmul.f32 %v6753_v51, %v10974_v38  ;;  %v6791_v50 = vmul.f32 %v6787_v49, %v11009_v48  ;;  %v6841_v37 = vmul.f32 %v8125_v62, %v6840_v55 }
 0x8dd   :  { %v6801_v31 = vmul.f32 %v6761_v57, %v11009_v48  ;;  %v11030_v38 = vrot.slane %v10977_v28, 1  ;;  %v7318_v41 = vld [vmem:[#allocation1 + $0x6] ss:$9 sm:$0xff] }
 0x8de   :  { %v6771_v0 = vmul.f32 %v6767_v42, %v11017_v46  ;;  %v6785_v60 = vmul.f32 %v6781_v16, %v11017_v46  ;;  %v6795_v40 = vrot.slane %v6791_v50, 6  ;;  %v6803_v10 = vmul.f32 %v6767_v42, %v11014_v14  ;;  %7321 = vst.msk [vmem:[#allocation8 + $0x4] ss:$8 sm:$0x3] %vm8310_vm0, %v7318_v41 }
 0x8df   :  { %v6765_v20 = vmul.f32 %v6761_v57, %v11014_v14  ;;  %v6845_v59 = vsel %vm6844_vm15, %v8125_v62, %v6841_v37  ;;  %v7088_v62 = vrot.slane %v10980_v39, 7  ;;  %v6913_v41 = vrot.slane %v11009_v48, 6 }
 0x8e0   :  { %v6775_v1 = vrot.slane %v6771_v0, 1  ;;  %v11026_v8 = vsub.f32 %v6785_v60, %v6795_v40  ;;  %v6807_v53 = vrot.slane %v6803_v10, 1  ;;  %v11037_v2 = vmul.f32 %v6845_v59, %v10993_v36 }
 0x8e1   :  { %v6860_v4 = vrot.slane %v6845_v59, 7  ;;  %v6866_v44 = vrot.slane %v6845_v59, 1 }
 0x8e2   :  { %v11032_v25 = vsub.f32 %v6765_v20, %v6775_v1  ;;  %v6815_v26 = vmul.f32 %v11026_v8, %v11026_v8  ;;  %v11039_v7 = vsub.f32 %v6801_v31, %v6807_v53  ;;  %v6898_v21 = vmul.f32 %v11030_v38, %v11037_v2 }
 0x8e3   :  { %v6864_v30 = vmul.f32 %v6860_v4, %v10995_v18  ;;  %v11050_v36 = vmul.f32 %v6866_v44, %v10998_v5  ;;  %v6908_v13 = vmul.f32 %v11037_v2, %v10980_v39 }
 0x8e4   :  { %v6813_v27 = vmul.f32 %v11032_v25, %v11032_v25  ;;  %v6819_v45 = vrot.slane %v6815_v26, 1  ;;  %v6825_v9 = vmul.f32 %v11039_v7, %v11039_v7  ;;  %v6902_v61 = vrot.slane %v6898_v21, 1 }
 0x8e5   :  { %v6872_v52 = vmul.f32 %v6864_v30, %v10977_v28  ;;  %v6916_v18 = vmul.f32 %v6912_v11, %v6864_v30  ;;  %v6880_v58 = vmul.f32 %v6876_v29, %v11050_v36  ;;  %v6890_v5 = vmul.f32 %v11050_v36, %v10971_v17 }
 0x8e6   :  { %v6823_v33 = vadd.f32 %v6819_v45, %v6813_v27  ;;  %v6829_v54 = vrot.slane %v6825_v9, 7  ;;  %v6950_v63 = vadd.f32 1.0, %v11050_v36  ;;  %vm7152_vm2 = vcmp.gt.f32.partialorder %v10971_v17, %v11050_v36 }
 0x8e7   :  { %v6920_v24 = vrot.slane %v6916_v18, 1  ;;  %v6884_v47 = vrot.slane %v6880_v58, 6  ;;  %v11065_v34 = vsub.f32 %v6890_v5, %v6902_v61  ;;  %v7050_v6 = vrot.slane %v6864_v30, 1 }
 0x8e8   :  { %v6833_v28 = vadd.f32 %v6829_v54, %v6823_v33  ;;  %v6952_v15 = vsub.f32 %v6950_v63, %v10971_v17  ;;  %v6935_v33 = vadd.f32 1.0, %v11009_v48  ;;  %v6877_v58 = vrot.slane %v11014_v14, 1 }
 0x8e9   :  { %v6924_v32 = vsub.f32 %v6908_v13, %v6920_v24  ;;  %v6888_v19 = vsub.f32 %v6872_v52, %v6884_v47  ;;  %v6926_v3 = vadd.f32 %v11065_v34, %v10971_v17  ;;  %v6936_v12 = vsub.f32 %v6934_v23, %v11065_v34 }
 0x8ea   :  { %v6835_v22 = vadd.f32 1e-12, %v6833_v28  ;;  %v6942_v56 = vadd.f32 1.0, %v11065_v34  ;;  %v6954_v51 = vsub.f32 %v6952_v15, %v11065_v34  ;;  %vm7150_vm3 = vcmp.gt.f32.partialorder %v10971_v17, %v11065_v34 }
 0x8eb   :  { %v11074_v49 = vsub.f32 %v6924_v32, %v7050_v6  ;;  %v7122_v42 = vrot.slane %v6924_v32, 7  ;;  %v11077_v35 = vadd.f32 %v6926_v3, %v11050_v36  ;;  %v6938_v16 = vsub.f32 %v6936_v12, %v11050_v36  ;;  %vm11105_vm4 = vmand %vm7150_vm3, %vm7152_vm2 }
 0x8ec   :  { %8126 = vrsqrt.f32 %v6835_v22  ;;  %v6944_v50 = vsub.f32 %v6942_v56, %v10971_v17  ;;  %v11081_v55 = vmax.f32 %v6954_v51, 1e-12  ;;  %v7070_v57 = vrot.slane %v6888_v19, 1 }
 0x8ed   :  { %v11083_v0 = vadd.f32 %v7088_v62, %v6888_v19  ;;  %v6930_v60 = vadd.f32 1.0, %v11077_v35  ;;  %v11086_v40 = vmax.f32 %v6938_v16, 1e-12  ;;  %v11088_v10 = vadd.f32 %v7122_v42, %v6864_v30 }
 0x8ee   :  { %v6946_v37 = vsub.f32 %v6944_v50, %v11050_v36  ;;  %8128 = vrsqrt.f32 %v11081_v55  ;;  %v11093_v20 = vsub.f32 %v10980_v39, %v7070_v57  ;;  %vm6852_vm6 = vweird.f32 %v6835_v22 }
 0x8ef   :  { %v11095_v1 = vmax.f32 %v6930_v60, 1e-12  ;;  %8130 = vrsqrt.f32 %v11086_v40  ;;  %v11130_v5 = vrot.slane %v11017_v46, 1  ;;  %v7089_v15 = vrot.slane %v11014_v14, 7 }
 0x8f0   :  { %v11100_v31 = vmax.f32 %v6946_v37, 1e-12  ;;  %vm7030_vm8 = vweird.f32 %v11081_v55  ;;  %vm6986_vm11 = vweird.f32 %v11086_v40 }
 0x8f1   :  { %8132 = vrsqrt.f32 %v11095_v1  ;;  %vm6964_vm9 = vweird.f32 %v11095_v1 }
 0x8f2   :  { %v8127_v59 = vpop.eup %8126  ;;  %8134 = vrsqrt.f32 %v11100_v31  ;;  %vm7008_vm3 = vweird.f32 %v11100_v31 }
 0x8f3   :  { %v6847_v39 = vmul.f32 %v8127_v59, %v6835_v22  ;;  %vm6853_vm5 = vweird.f32 %v8127_v59 }
 0x8f4   :  { %v11111_v26 = vpop.eup %8128  ;;  %vm6854_vm7 = vmor %vm6852_vm6, %vm6853_vm5 }
 0x8f5   :  { %v6848_v4 = vmul.f32 %v8127_v59, %v6847_v39  ;;  %v11113_v44 = vpop.eup %8130  ;;  %v7025_v11 = vmul.f32 %v11111_v26, %v11081_v55  ;;  %vm7031_vm14 = vweird.f32 %v11111_v26 }
 0x8f6   :  { %v6981_v17 = vmul.f32 %v11113_v44, %v11086_v40  ;;  %vm6987_vm12 = vweird.f32 %v11113_v44  ;;  %vm11185_vm5 = vmor %vm7030_vm8, %vm7031_vm14  ;;  %vm7156_vm8 = vcmp.gt.f32.partialorder %v11065_v34, %v11050_v36 }
 0x8f7   :  { %v6849_v27 = vmul.f32 0.5, %v6848_v4  ;;  %v8133_v45 = vpop.eup %8132  ;;  %v7026_v30 = vmul.f32 %v11111_v26, %v7025_v11  ;;  %vm11163_vm2 = vmor %vm6986_vm11, %vm6987_vm12 }
 0x8f8   :  { %v11120_v21 = vpop.eup %8134  ;;  %v6959_v29 = vmul.f32 %v8133_v45, %v11095_v1  ;;  %v6982_v13 = vmul.f32 %v11113_v44, %v6981_v17  ;;  %vm6965_vm10 = vweird.f32 %v8133_v45 }
 0x8f9   :  { %v6850_v9 = vsub.f32 1.5, %v6849_v27  ;;  %v7003_v52 = vmul.f32 %v11120_v21, %v11100_v31  ;;  %v7027_v24 = vmul.f32 0.5, %v7026_v30  ;;  %vm6966_vm13 = vmor %vm6964_vm9, %vm6965_vm10  ;;  %vm7009_vm15 = vweird.f32 %v11120_v21 }
 0x8fa   :  { %v6960_v18 = vmul.f32 %v8133_v45, %v6959_v29  ;;  %v6983_v54 = vmul.f32 0.5, %v6982_v13  ;;  %vm11196_vm6 = vmor %vm7008_vm3, %vm7009_vm15  ;;  %vm7148_vm10 = vcmp.gt.f32.partialorder %v11077_v35, 0.0 }
 0x8fb   :  { %v6851_v61 = vmul.f32 %v8127_v59, %v6850_v9  ;;  %v7004_v63 = vmul.f32 %v11120_v21, %v7003_v52  ;;  %v7028_v56 = vsub.f32 1.5, %v7027_v24 }
 0x8fc   :  { %v6961_v28 = vmul.f32 0.5, %v6960_v18  ;;  %v6984_v47 = vsub.f32 1.5, %v6983_v54 }
 0x8fd   :  { %v6855_v23 = vsel %vm6854_vm7, %v8127_v59, %v6851_v61  ;;  %v7005_v22 = vmul.f32 0.5, %v7004_v63  ;;  %v7029_v27 = vmul.f32 %v11111_v26, %v7028_v56 }
 0x8fe   :  { %v11135_v32 = vmul.f32 %v6855_v23, %v11032_v25  ;;  %v6861_v6 = vrot.slane %v6855_v23, 7  ;;  %v6867_v62 = vrot.slane %v6855_v23, 1  ;;  %v6962_v19 = vsub.f32 1.5, %v6961_v28 }
 0x8ff   :  { %v6985_v42 = vmul.f32 %v11113_v44, %v6984_v47  ;;  %v7006_v16 = vsub.f32 1.5, %v7005_v22  ;;  %v7033_v24 = vsel %vm11185_vm5, %v11111_v26, %v7029_v27 }
 0x900   :  { %v11141_v3 = vmul.f32 %v6861_v6, %v11026_v8  ;;  %v11144_v12 = vmul.f32 %v6867_v62, %v11039_v7  ;;  %v6899_v25 = vmul.f32 %v11130_v5, %v11135_v32  ;;  %v6963_v51 = vmul.f32 %v8133_v45, %v6962_v19 }
 0x901   :  { %v6909_v52 = vmul.f32 %v11135_v32, %v11014_v14 }
 0x902   :  { %v6881_v50 = vmul.f32 %v6877_v58, %v11144_v12  ;;  %v6891_v57 = vmul.f32 %v11144_v12, %v11009_v48  ;;  %v6903_v8 = vrot.slane %v6899_v25, 1  ;;  %v6917_v7 = vmul.f32 %v6913_v41, %v11141_v3 }
 0x903   :  { %v6951_v60 = vadd.f32 1.0, %v11144_v12  ;;  %v6967_v37 = vsel %vm6966_vm13, %v8133_v45, %v6963_v51  ;;  %v6873_v59 = vmul.f32 %v11141_v3, %v11017_v46  ;;  %v6989_v45 = vsel %vm11163_vm2, %v11113_v44, %v6985_v42 }
 0x904   :  { %v6885_v39 = vrot.slane %v6881_v50, 6  ;;  %v11159_v4 = vsub.f32 %v6891_v57, %v6903_v8  ;;  %v6978_v30 = vmul.f32 0.5, %v6967_v37  ;;  %v7007_v46 = vmul.f32 %v11120_v21, %v7006_v16 }
 0x905   :  { %v6953_v17 = vsub.f32 %v6951_v60, %v11009_v48  ;;  %v6921_v61 = vrot.slane %v6917_v7, 1  ;;  %v7000_v28 = vmul.f32 0.5, %v6989_v45  ;;  %v7064_v51 = vsub.f32 %v11037_v2, %v11030_v38 }
 0x906   :  { %v6889_v9 = vsub.f32 %v6873_v59, %v6885_v39  ;;  %v6927_v29 = vadd.f32 %v11159_v4, %v11009_v48  ;;  %v6937_v13 = vsub.f32 %v6935_v33, %v11159_v4  ;;  %v6943_v41 = vadd.f32 1.0, %v11159_v4 }
 0x907   :  { %v6955_v18 = vsub.f32 %v6953_v17, %v11159_v4  ;;  %v7011_v47 = vsel %vm11196_vm6, %v11120_v21, %v7007_v46  ;;  %v7058_v6 = vrot.slane %v6978_v30, 7  ;;  %v6925_v56 = vsub.f32 %v6909_v52, %v6921_v61 }
 0x908   :  { %v11190_v33 = vadd.f32 %v6927_v29, %v11144_v12  ;;  %v6939_v54 = vsub.f32 %v6937_v13, %v11144_v12  ;;  %v6945_v58 = vsub.f32 %v6943_v41, %v11009_v48  ;;  %v7071_v25 = vrot.slane %v6889_v9, 1 }
 0x909   :  { %v11203_v23 = vmax.f32 %v6955_v18, 1e-12  ;;  %v11214_v26 = vmul.f32 %v7058_v6, %v11074_v49  ;;  %v7022_v16 = vmul.f32 0.5, %v7011_v47  ;;  %v7044_v50 = vmul.f32 0.5, %v7033_v24 }
 0x90a   :  { %v6931_v62 = vadd.f32 1.0, %v11190_v33  ;;  %v11209_v22 = vmax.f32 %v6939_v54, 1e-12  ;;  %v6947_v19 = vsub.f32 %v6945_v58, %v11144_v12  ;;  %v11224_v57 = vsub.f32 %v11014_v14, %v7071_v25 }
 0x90b   :  { %8136 = vrsqrt.f32 %v11203_v23  ;;  %v11227_v8 = vmul.f32 %v11093_v20, %v7058_v6  ;;  %v7080_v7 = vrot.slane %v7000_v28, 7  ;;  %v7051_v60 = vrot.slane %v11141_v3, 1 }
 0x90c   :  { %v11218_v42 = vmax.f32 %v6931_v62, 1e-12  ;;  %v11220_v21 = vmax.f32 %v6947_v19, 1e-12  ;;  %8138 = vrsqrt.f32 %v11209_v22  ;;  %v11233_v37 = vadd.f32 %v7089_v15, %v6889_v9 }
 0x90d   :  { %v7100_v59 = vadd.f32 %v11030_v38, %v11037_v2  ;;  %v11239_v39 = vmul.f32 %v6978_v30, %v11095_v1  ;;  %v11242_v11 = vmul.f32 %v7080_v7, %v11074_v49  ;;  %v7094_v27 = vrot.slane %v7000_v28, 6 }
 0x90e   :  { %8140 = vrsqrt.f32 %v11218_v42  ;;  %v11244_v17 = vsub.f32 %v6925_v56, %v7051_v60  ;;  %v11248_v45 = vsub.f32 %v11135_v32, %v11130_v5  ;;  %v7106_v14 = vrot.slane %v7022_v16, 7 }
 0x90f   :  { %8142 = vrsqrt.f32 %v11220_v21  ;;  %v7112_v15 = vrot.slane %v7022_v16, 6  ;;  %v11252_v38 = vmul.f32 %v7064_v51, %v7058_v6  ;;  %v11255_v2 = vmul.f32 %v7094_v27, %v11083_v0 }
 0x910   :  { %v7132_v1 = vrot.slane %v7044_v50, 7  ;;  %v7140_v30 = vrot.slane %v7044_v50, 6  ;;  %vm7040_vm7 = vweird.f32 %v11203_v23  ;;  %v11261_v29 = vmul.f32 %v7000_v28, %v11086_v40 }
 0x911   :  { %v11250_v46 = vpop.eup %8136  ;;  %v11265_v13 = vadd.f32 %v11130_v5, %v11135_v32  ;;  %v7116_v41 = vmul.f32 %v7112_v15, %v11083_v0  ;;  %vm6996_vm9 = vweird.f32 %v11209_v22  ;;  %v11272_v61 = vmul.f32 %v7100_v59, %v7080_v7 }
 0x912   :  { %v8139_v49 = vpop.eup %8138  ;;  %v7035_v9 = vmul.f32 %v11250_v46, %v11203_v23  ;;  %v7123_v18 = vrot.slane %v6925_v56, 7  ;;  %v11275_v44 = vmul.f32 %v11088_v10, %v7112_v15  ;;  %v7110_v5 = vmul.f32 %v7106_v14, %v7064_v51 }
 0x913   :  { %v6991_v52 = vmul.f32 %v8139_v49, %v11209_v22  ;;  %v7136_v32 = vmul.f32 %v7132_v1, %v11093_v20  ;;  %v11280_v0 = vmul.f32 %v7140_v30, %v11088_v10  ;;  %vm6974_vm11 = vweird.f32 %v11218_v42 }
 0x914   :  { %v8141_v40 = vpop.eup %8140  ;;  %v7036_v54 = vmul.f32 %v11250_v46, %v7035_v9  ;;  %vm7041_vm12 = vweird.f32 %v11250_v46  ;;  %v11287_v28 = vmul.f32 %v7022_v16, %v11100_v31  ;;  %vm6997_vm13 = vweird.f32 %v8139_v49 }
 0x915   :  { %v8143_v58 = vpop.eup %8142  ;;  %v6969_v63 = vmul.f32 %v8141_v40, %v11218_v42  ;;  %v6992_v24 = vmul.f32 %v8139_v49, %v6991_v52  ;;  %vm7018_vm14 = vweird.f32 %v11220_v21  ;;  %v7138_v20 = vmul.f32 %v7132_v1, %v7100_v59  ;;  %vm7042_vm3 = vmor %vm7040_vm7, %vm7041_vm12 }
 0x916   :  { %v7013_v47 = vmul.f32 %v8143_v58, %v11220_v21  ;;  %v7037_v10 = vmul.f32 0.5, %v7036_v54  ;;  %vm6975_vm15 = vweird.f32 %v8141_v40  ;;  %v11292_v19 = vadd.f32 %v7123_v18, %v11141_v3  ;;  %vm6998_vm5 = vmor %vm6996_vm9, %vm6997_vm13 }
 0x917   :  { %v6970_v6 = vmul.f32 %v8141_v40, %v6969_v63  ;;  %v6993_v62 = vmul.f32 0.5, %v6992_v24  ;;  %v11295_v51 = vmul.f32 %v7044_v50, %v11081_v55  ;;  %v7160_v31 = vrot.slane %v7110_v5, 1  ;;  %vm6976_vm6 = vmor %vm6974_vm11, %vm6975_vm15 }
 0x918   :  { %v7014_v25 = vmul.f32 %v8143_v58, %v7013_v47  ;;  %v7038_v56 = vsub.f32 1.5, %v7037_v10  ;;  %v7166_v60 = vrot.slane %v7136_v32, 1  ;;  %v7174_v27 = vrot.slane %v11242_v11, 1 }
 0x919   :  { %v6971_v16 = vmul.f32 0.5, %v6970_v6  ;;  %v6994_v7 = vsub.f32 1.5, %v6993_v62  ;;  %v7184_v15 = vrot.slane %v7116_v41, 2  ;;  %v7190_v1 = vrot.slane %v7138_v20, 1 }
 0x91a   :  { %v7015_v14 = vmul.f32 0.5, %v7014_v25  ;;  %v7039_v59 = vmul.f32 %v11250_v46, %v7038_v56  ;;  %vm7019_vm2 = vweird.f32 %v8143_v58  ;;  %v7170_v55 = vsel %vm7156_vm8, %v7160_v31, %v7166_v60 }
 0x91b   :  { %v6972_v30 = vsub.f32 1.5, %v6971_v16  ;;  %v6995_v9 = vmul.f32 %v8139_v49, %v6994_v7  ;;  %v7178_v11 = vsel %vm11105_vm4, %v7174_v27, %v7170_v55  ;;  %v7194_v41 = vsel %vm7156_vm8, %v7184_v15, %v7190_v1  ;;  %vm7020_vm9 = vmor %vm7018_vm14, %vm7019_vm2 }
 0x91c   :  { %v7016_v3 = vsub.f32 1.5, %v7015_v14  ;;  %v7043_v50 = vsel %vm7042_vm3, %v11250_v46, %v7039_v59  ;;  %v11320_v5 = vsel %vm7148_vm10, %v11239_v39, %v7178_v11  ;;  %vm7151_vm7 = vcmp.gt.f32.partialorder %v11009_v48, %v11159_v4 }
 0x91d   :  { %v6973_v52 = vmul.f32 %v8141_v40, %v6972_v30  ;;  %v6999_v18 = vsel %vm6998_vm5, %v8139_v49, %v6995_v9  ;;  %v11315_v54 = vmul.f32 0.5, %v7043_v50  ;;  %v7196_v49 = vsel %vm11105_vm4, %v11261_v29, %v7194_v41 }
 0x91e   :  { %v7001_v46 = vmul.f32 0.5, %v6999_v18  ;;  %v7017_v32 = vmul.f32 %v8143_v58, %v7016_v3  ;;  %v7200_v63 = vrot.slane %v11214_v26, 1  ;;  %v7208_v10 = vrot.slane %v11280_v0, 2 }
 0x91f   :  { %v6977_v24 = vsel %vm6976_vm6, %v8141_v40, %v6973_v52  ;;  %v7133_v39 = vrot.slane %v11315_v54, 7  ;;  %v7141_v47 = vrot.slane %v11315_v54, 6  ;;  %vm7153_vm11 = vcmp.gt.f32.partialorder %v11009_v48, %v11144_v12 }
 0x920   :  { %v6979_v20 = vmul.f32 0.5, %v6977_v24  ;;  %v7021_v6 = vsel %vm7020_vm9, %v8143_v58, %v7017_v32  ;;  %v7081_v62 = vrot.slane %v7001_v46, 7  ;;  %v7087_v25 = vmul.f32 %v7001_v46, %v11209_v22  ;;  %vm11371_vm14 = vmand %vm7151_vm7, %vm7153_vm11 }
 0x921   :  { %vm7157_vm12 = vcmp.gt.f32.partialorder %v11159_v4, %v11144_v12  ;;  %v7023_v26 = vmul.f32 0.5, %v7021_v6  ;;  %v7095_v29 = vrot.slane %v7001_v46, 6  ;;  %v7137_v40 = vmul.f32 %v7133_v39, %v11224_v57 }
 0x922   :  { %v7139_v56 = vmul.f32 %v7133_v39, %v11265_v13  ;;  %v7047_v31 = vmul.f32 %v6979_v20, %v11218_v42  ;;  %v7059_v0 = vrot.slane %v6979_v20, 7  ;;  %v7085_v58 = vmul.f32 %v7081_v62, %v11244_v17 }
 0x923   :  { %v7103_v16 = vmul.f32 %v11265_v13, %v7081_v62  ;;  %vm7149_vm13 = vcmp.gt.f32.partialorder %v11190_v33, 0.0  ;;  %v7099_v22 = vmul.f32 %v7095_v29, %v11233_v37  ;;  %v7107_v7 = vrot.slane %v7023_v26, 7 }
 0x924   :  { %v7113_v60 = vrot.slane %v7023_v26, 6  ;;  %v7119_v27 = vmul.f32 %v7023_v26, %v11220_v21  ;;  %v7063_v14 = vmul.f32 %v7059_v0, %v11244_v17  ;;  %v7067_v59 = vmul.f32 %v11248_v45, %v7059_v0 }
 0x925   :  { %v7077_v15 = vmul.f32 %v11224_v57, %v7059_v0  ;;  %v7145_v42 = vmul.f32 %v7141_v47, %v11292_v19  ;;  %v7111_v1 = vmul.f32 %v7107_v7, %v11248_v45  ;;  %v7167_v9 = vrot.slane %v7137_v40, 1 }
 0x926   :  { %v7117_v13 = vmul.f32 %v7113_v60, %v11233_v37  ;;  %v7129_v30 = vmul.f32 %v11292_v19, %v7113_v60  ;;  %v7175_v55 = vrot.slane %v7085_v58, 1  ;;  %v7191_v3 = vrot.slane %v7139_v56, 1 }
 0x927   :  { %v7201_v50 = vrot.slane %v7063_v14, 1  ;;  %v7204_v21 = vsel %vm7148_vm10, %v7200_v63, %v7196_v49  ;;  %v7161_v17 = vrot.slane %v7111_v1, 1  ;;  %v7209_v41 = vrot.slane %v7145_v42, 2 }
 0x928   :  { %v7185_v11 = vrot.slane %v7117_v13, 2  ;;  %v7212_v57 = vsel %vm7156_vm8, %v11287_v28, %v7208_v10  ;;  %v7216_v45 = vrot.slane %v11255_v2, 2  ;;  %v7217_v37 = vrot.slane %v7099_v22, 2 }
 0x929   :  { %v7224_v19 = vrot.slane %v11252_v38, 1  ;;  %v7225_v52 = vrot.slane %v7067_v59, 1  ;;  %v7171_v28 = vsel %vm7157_vm12, %v7161_v17, %v7167_v9  ;;  %v7213_v38 = vsel %vm7157_vm12, %v7119_v27, %v7209_v41 }
 0x92a   :  { %v7195_v2 = vsel %vm7157_vm12, %v7185_v11, %v7191_v3  ;;  %v7232_v46 = vrot.slane %v11275_v44, 2  ;;  %v7179_v48 = vsel %vm11371_vm14, %v7175_v55, %v7171_v28  ;;  %v7220_v49 = vsel %vm11105_vm4, %v7216_v45, %v7212_v57 }
 0x92b   :  { %v7197_v32 = vsel %vm11371_vm14, %v7087_v25, %v7195_v2  ;;  %v7221_v63 = vsel %vm11371_vm14, %v7217_v37, %v7213_v38  ;;  %v7181_v24 = vsel %vm7149_vm13, %v7047_v31, %v7179_v48  ;;  %v7228_v44 = vsel %vm7148_vm10, %v7224_v19, %v7220_v49 }
 0x92c   :  { %v7205_v39 = vsel %vm7149_vm13, %v7201_v50, %v7197_v32  ;;  %v7229_v47 = vsel %vm7149_vm13, %v7225_v52, %v7221_v63  ;;  %v7147_v10 = vmul.f32 %v11315_v54, %v11203_v23  ;;  %v7233_v20 = vrot.slane %v7129_v30, 2 }
 0x92d   :  { %v7236_v6 = vsel %vm7156_vm8, %v7232_v46, %v11295_v51  ;;  %v7240_v62 = vrot.slane %v11272_v61, 1  ;;  %v7241_v25 = vrot.slane %v7103_v16, 1  ;;  %v7248_v26 = vrot.slane %v11227_v8, 1 }
 0x92e   :  { %v7284_v29 = vrot.slane %v7205_v39, 7  ;;  %v7291_v40 = vrot.slane %v7229_v47, 7  ;;  %v7237_v56 = vsel %vm7157_vm12, %v7233_v20, %v7147_v10  ;;  %v7249_v54 = vrot.slane %v7077_v15, 1 }
 0x92f   :  { %v7244_v23 = vsel %vm11105_vm4, %v7240_v62, %v7236_v6  ;;  %v7307_v31 = vrot.slane %v7181_v24, 7  ;;  %v7245_v36 = vsel %vm11371_vm14, %v7241_v25, %v7237_v56 }
 0x930   :  { %v7252_v34 = vsel %vm7148_vm10, %v7248_v26, %v7244_v23  ;;  %v7285_v61 = vsel %vm111_vm1, %v7204_v21, %v7284_v29  ;;  %v7292_v8 = vsel %vm111_vm1, %v7228_v44, %v7291_v40  ;;  %v7253_v53 = vsel %vm7149_vm13, %v7249_v54, %v7245_v36 }
 0x931   :  { %7287 = vst.msk [vmem:[#allocation8] ss:$8 sm:$0x3] %vm8310_vm0, %v7285_v61  ;;  %v7308_v35 = vsel %vm111_vm1, %v11320_v5, %v7307_v31  ;;  %v7299_v12 = vrot.slane %v7253_v53, 7 }
 0x932   :  { %7295 = vst.msk [vmem:[#allocation8 + $0x1] ss:$8 sm:$0x3] %vm8310_vm0, %v7292_v8 }
 0x933   :  { %7311 = vst.msk [vmem:[#allocation8 + $0x3] ss:$8 sm:$0x3] %vm8310_vm0, %v7308_v35  ;;  %v7300_v4 = vsel %vm111_vm1, %v7252_v34, %v7299_v12 }
 0x934   :  { %7303 = vst.msk [vmem:[#allocation8 + $0x2] ss:$8 sm:$0x3] %vm8310_vm0, %v7300_v4 }
 0x935   :  { %7333 = dma.vmem_to_hbm [thread:$0]  %s7329_s29, 256, %s7331_s14, [#allocation5]  }
 0x936   :  { %8220 = dma.done.wait [#allocation5], 256  }
 0x937   :  { %8221 = vsyncadd [#allocation5], 4294967040 }
 0x938   :  { %7338 = vsyncpa [#allocation4], 1 }
 0x939   :  { %7339 = vsyncpa [#allocation7], 1 }
 0x93a   :  { %7340 = vsyncpa [#allocation5], 1 }

</bundles_post_ra>
